<compile_context>
chip_gen: v7x
topology: tpu7x:2x2x1
jax: 0.10.0
libtpu: 0.0.40
codegen_flags: <defaults>
</compile_context>

<pallas_src>
import functools

import jax
import jax.numpy as jnp
from jax import lax
from jax.experimental import pallas as pl
from jax.experimental.pallas import tpu as pltpu

IN_FEATURES = 196608   # matches nn.Linear(196608, 10)
OUT_FEATURES = 10
TK = 98304             # K-tile per grid step: 196608 / 98304 = 2 steps (1 split)


def linear_kernel(x_ref, w_ref, b_ref, o_ref):
    """One K-tile of one split of y = x @ W^T (+ b on split 0).

    The output BlockSpec index is constant across the reduction axis, so the
    (B, N) f32 output block is resident and used directly as the accumulator.
    Bias is folded into split 0's accumulator init; other splits start at 0.
    """
    s = pl.program_id(0)   # TensorCore split axis ("parallel")
    k = pl.program_id(1)   # K-reduction step within the split ("arbitrary")

    @pl.when(k == 0)
    def _():
        bias = jnp.broadcast_to(b_ref[...], o_ref.shape)
        o_ref[...] = bias * (s == 0).astype(jnp.float32)

    # trans_b contraction: x (B, tk) . w (N, tk) over their last axes -> (B, N)
    o_ref[...] += lax.dot_general(
        x_ref[...],
        w_ref[...],
        dimension_numbers=(((1,), (1,)), ((), ())),
        preferred_element_type=jnp.float32,
    )


@functools.partial(jax.jit, static_argnames=("tk", "num_splits"))
def yuzhao_forward(x, w, b, *, tk=TK, num_splits=1):
    """x: (B, K) f32, w: (N, K) f32 (native PyTorch layout), b: (N,) -> (B, N) f32."""
    B, K = x.shape
    N = w.shape[0]
    assert K % (num_splits * tk) == 0, "K must divide num_splits * tk"

    k_steps = K // (num_splits * tk)   # reduction steps per split
    grid = (num_splits, k_steps)
    b2 = b.reshape(1, N)

    x_spec = pl.BlockSpec((B, tk), lambda s, k: (0, s * k_steps + k))
    w_spec = pl.BlockSpec((N, tk), lambda s, k: (0, s * k_steps + k))
    b_spec = pl.BlockSpec((1, N), lambda s, k: (0, 0))

    if num_splits == 1:
        out_shape = jax.ShapeDtypeStruct((B, N), jnp.float32)
        out_spec = pl.BlockSpec((B, N), lambda s, k: (0, 0))       # resident acc
    else:
        out_shape = jax.ShapeDtypeStruct((num_splits, B, N), jnp.float32)
        out_spec = pl.BlockSpec((None, B, N), lambda s, k: (s, 0, 0))  # per-split partial

    cost = pl.CostEstimate(
        flops=2 * B * K * N,
        bytes_accessed=(B * K + N * K + B * N) * 4,
        transcendentals=0,
    )

    y = pl.pallas_call(
        linear_kernel,
        out_shape=out_shape,
        grid_spec=pltpu.PrefetchScalarGridSpec(
            num_scalar_prefetch=0,
            grid=grid,
            in_specs=[x_spec, w_spec, b_spec],
            out_specs=out_spec,
        ),
        compiler_params=pltpu.CompilerParams(
            dimension_semantics=("parallel", "arbitrary"),
            # ~18 MiB double-buffered working set at TK=98304; raise above
            # v5e's 16 MiB default scoped VMEM, well under v7x's 64 MiB.
            vmem_limit_bytes=32 * 1024 * 1024,
        ),
        cost_estimate=cost,
    )(x, w, b2)

    if num_splits == 1:
        return y                      # bias already folded in-kernel
    return jnp.sum(y, axis=0)         # combine per-TensorCore partials (v7x)


def _default_num_splits():
    """2-way K-split only on 2-TensorCore chips (v7x); 1 elsewhere."""
    try:
        kind = (jax.devices()[0].device_kind or "").lower()
        if "v7" in kind or "7x" in kind:
            return 2
    except Exception:
        pass
    return 1


def init_params(key):
    """Deterministic init matching nn.Linear's default U(-1/sqrt(K), 1/sqrt(K))."""
    kw, kb = jax.random.split(key)
    bound = 1.0 / jnp.sqrt(jnp.float32(IN_FEATURES))
    w = jax.random.uniform(
        kw, (OUT_FEATURES, IN_FEATURES), jnp.float32, -bound, bound
    )
    b = jax.random.uniform(kb, (OUT_FEATURES,), jnp.float32, -bound, bound)
    return w, b


if __name__ == "__main__":
    key = jax.random.PRNGKey(0)
    kx, kp = jax.random.split(key)

    B = 2  # small batch; feature dim is fixed at 196608 by the module
    x = jax.random.normal(kx, (B, IN_FEATURES), jnp.float32)
    w, b = init_params(kp)

    num_splits = _default_num_splits()
    out = yuzhao_forward(x, w, b, num_splits=num_splits)
    out = jax.block_until_ready(out)

    # Cross-check against a plain JAX reference of the same Linear.
    ref = x @ w.T + b
    assert out.shape == (B, OUT_FEATURES)
    assert jnp.allclose(out, ref, rtol=1e-5, atol=1e-4), "mismatch vs reference"

    print("KERNEL_OK")
</pallas_src>

<mosaic_0001>
module attributes {stable_mosaic.version = 11 : i64} {
  func.func @linear_kernel(%arg0: i32, %arg1: i32, %arg2: memref<2x98304xf32, #tpu.memory_space<vmem>>, %arg3: memref<10x98304xf32, #tpu.memory_space<vmem>>, %arg4: memref<1x10xf32, #tpu.memory_space<vmem>>, %arg5: memref<2x10xf32, #tpu.memory_space<vmem>>) attributes {dimension_semantics = [#tpu.dimension_semantics<parallel>, #tpu.dimension_semantics<arbitrary>], iteration_bounds = array<i64: 1, 2>, scalar_prefetch = 0 : i64, scratch_operands = 0 : i64, tpu.core_type = #tpu.core_type<tc>, window_params = [{transform_indices = @transform_0, window_bounds = array<i64: 2, 98304>}, {transform_indices = @transform_1, window_bounds = array<i64: 10, 98304>}, {pipeline_mode = #tpu.pipeline_mode<synchronous>, transform_indices = @transform_2, window_bounds = array<i64: 1, 10>}, {pipeline_mode = #tpu.pipeline_mode<synchronous>, transform_indices = @transform_3, window_bounds = array<i64: 2, 10>}]} {
    %c0_i32 = arith.constant 0 : i32
    %0 = arith.cmpi eq, %arg1, %c0_i32 : i32
    %1 = arith.extui %0 : i1 to i32
    %c0_i32_0 = arith.constant 0 : i32
    %2 = arith.cmpi ne, %1, %c0_i32_0 : i32
    scf.if %2 {
      %c0_8 = arith.constant 0 : index
      %c0_9 = arith.constant 0 : index
      %9 = vector.load %arg4[%c0_8, %c0_9] : memref<1x10xf32, #tpu.memory_space<vmem>>, vector<1x10xf32>
      %10 = vector.shape_cast %9 : vector<1x10xf32> to vector<1x10xf32>
      %11 = vector.broadcast %10 : vector<1x10xf32> to vector<2x10xf32>
      %c0_i32_10 = arith.constant 0 : i32
      %12 = arith.cmpi eq, %arg0, %c0_i32_10 : i32
      %13 = arith.extui %12 : i1 to i32
      %14 = arith.sitofp %13 : i32 to f32
      %15 = vector.broadcast %14 : f32 to vector<2x10xf32>
      %16 = arith.mulf %11, %15 : vector<2x10xf32>
      %c0_11 = arith.constant 0 : index
      %c0_12 = arith.constant 0 : index
      %17 = vector.load %arg5[%c0_11, %c0_12] : memref<2x10xf32, #tpu.memory_space<vmem>>, vector<2x10xf32>
      tpu.vector_store %arg5[%c0_11, %c0_12], %16 {strides = array<i32>} : memref<2x10xf32, #tpu.memory_space<vmem>>, vector<2x10xf32>,
    } else {
    }
    %c0 = arith.constant 0 : index
    %c0_1 = arith.constant 0 : index
    %3 = vector.load %arg5[%c0, %c0_1] : memref<2x10xf32, #tpu.memory_space<vmem>>, vector<2x10xf32>
    %c0_2 = arith.constant 0 : index
    %c0_3 = arith.constant 0 : index
    %4 = vector.load %arg2[%c0_2, %c0_3] : memref<2x98304xf32, #tpu.memory_space<vmem>>, vector<2x98304xf32>
    %c0_4 = arith.constant 0 : index
    %c0_5 = arith.constant 0 : index
    %5 = vector.load %arg3[%c0_4, %c0_5] : memref<10x98304xf32, #tpu.memory_space<vmem>>, vector<10x98304xf32>
    %cst = arith.constant dense<0.000000e+00> : vector<2x10xf32>
    %6 = tpu.matmul %4, %5, %cst {dimension_numbers = #tpu.dot_dimension_numbers<[1], [1], [0], [0], [0, 0, 1, 0], [], []>} : vector<2x98304xf32>, vector<10x98304xf32>, vector<2x10xf32> -> vector<2x10xf32>
    %7 = arith.addf %3, %6 : vector<2x10xf32>
    %c0_6 = arith.constant 0 : index
    %c0_7 = arith.constant 0 : index
    %8 = vector.load %arg5[%c0_6, %c0_7] : memref<2x10xf32, #tpu.memory_space<vmem>>, vector<2x10xf32>
    tpu.vector_store %arg5[%c0_6, %c0_7], %7 {strides = array<i32>} : memref<2x10xf32, #tpu.memory_space<vmem>>, vector<2x10xf32>,
    return
  }
  func.func @transform_0(%arg0: i32, %arg1: i32) -> (i32, i32) {
    %c2_i32 = arith.constant 2 : i32
    %0 = arith.muli %arg0, %c2_i32 : i32
    %1 = arith.addi %0, %arg1 : i32
    %c0_i32 = arith.constant 0 : i32
    %c0_i32_0 = arith.constant 0 : i32
    return %c0_i32, %1 : i32, i32
  }
  func.func @transform_1(%arg0: i32, %arg1: i32) -> (i32, i32) {
    %c2_i32 = arith.constant 2 : i32
    %0 = arith.muli %arg0, %c2_i32 : i32
    %1 = arith.addi %0, %arg1 : i32
    %c0_i32 = arith.constant 0 : i32
    %c0_i32_0 = arith.constant 0 : i32
    return %c0_i32, %1 : i32, i32
  }
  func.func @transform_2(%arg0: i32, %arg1: i32) -> (i32, i32) {
    %c0_i32 = arith.constant 0 : i32
    %c0_i32_0 = arith.constant 0 : i32
    %c0_i32_1 = arith.constant 0 : i32
    return %c0_i32, %c0_i32_0 : i32, i32
  }
  func.func @transform_3(%arg0: i32, %arg1: i32) -> (i32, i32) {
    %c0_i32 = arith.constant 0 : i32
    %c0_i32_0 = arith.constant 0 : i32
    %c0_i32_1 = arith.constant 0 : i32
    return %c0_i32, %c0_i32_0 : i32, i32
  }
}

</mosaic_0001>

<bundles_post_ra>
// kernel: yuzhao_forward.1
= control target key start
LH: loop header
LB: loop body
LE: loop exit
PB: predicated region body
PF: predicated region fallthrough
CT: control target
= control target key end

     0   :  { %8 = vsyncpa [#allocation3], 0  ;;  %s37608_s0 = inlined_call_operand.hbm [shape: f32[2,196608], index: 0, kind: input, shape index: {}]   ;;  %s37609_s1 = inlined_call_operand.hbm [shape: f32[10,196608], index: 1, kind: input, shape index: {}]   ;;  %s37610_s2 = inlined_call_operand.hbm [shape: f32[1,10], index: 2, kind: input, shape index: {}]   ;;  %s37611_s3 = inlined_call_operand.hbm [shape: f32[2,10], index: 3, kind: output, shape index: {}]  }
   0x1   :  { %10 = vsyncpa [#allocation3 + $0x1], 0 }
   0x2   :  { %11 = vsyncpa [#allocation6], 0 }
   0x3   :  { %13 = vsyncpa [#allocation6 + $0x1], 0 }
   0x4   :  { %14 = vsyncpa [#allocation4], 0  ;;  %s35249_s12 = smov 0   ;;  %s35251_s13 = smov 0  }
   0x5   :  { %s35253_s14 = smov 0   ;;  %s35255_s15 = smov 0  }
   0x6   :  { %s35257_s16 = smov 0   ;;  %s35259_s17 = smov 0  }
   0x7 LB: > { %s35278_s18 = sadd.s32 4294967295, %s35219_s17   ;;  %s43_s19 = sadd.s32 1, %s35207_s14  ;;  %s35219_s17 = sphi %s35259_s17, %s20_s17   ;;  %s35215_s16 = sphi %s35257_s16, %s37632_s16   ;;  %s35211_s15 = sphi %s35255_s15, %s37631_s15   ;;  %s35207_s14 = sphi %s35253_s14, %s37630_s14   ;;  %s35203_s13 = sphi %s35251_s13, %s37629_s13   ;;  %s35199_s12 = sphi %s35249_s12, %s37628_s12  }
   0x8   : > { %p50_p0 = scmp.ne.s32.totalorder %s35207_s14, %s35203_s13  ;;  %p56_p1 = scmp.ne.s32.totalorder %s35203_s13, %s35199_s12 }
   0x9   : > { %p37612_p2 = scmp.eq.s32.totalorder %s35278_s18, 0  ;;  %p33214_p3 = scmp.ge.s32.totalorder %s35219_s17, 1 }
   0xa   : > { %p139_p4 = scmp.lt.s32.totalorder %s35219_s17, 3  ;;  %s35221_s22 = smov [#allocation7]  }
   0xb   : > { %p35289_p5 = por %p37612_p2, %p56_p1  ;;  %s152_s23 = sshll.u32 %s35221_s22, 4  ;;  %s153_s23 = int_to_ptr.vmem [resolvable:$true] %s152_s23 }
   0xc   : > { %p35293_p6 = pnand %p33214_p3, %p139_p4  ;;  %p51_p8 = scmp.eq.s32.totalorder %s35219_s17, 0 }
   0xd   : > { %s37615_s20 = scalar_select %p35289_p5, 1, 0 }
   0xe   : > { %s37616_s21 = scalar_select %p35293_p6, 1, 0 }
   0xf   : > { %p34781_p7 = pneg %p35293_p6  ;;  %s29_s25 = sadd.s32 1, %s35215_s16 }
  0x10   : > { %p35307_p10 = scmp.ge.s32.totalorder %s29_s25, 2  ;;  %p35314_p11 = por %p51_p8, %p50_p0 }
  0x11   : > { %p35302_p9 = pnand %p34781_p7, %p37612_p2  ;;  %s35043_s30 = scalar_lea.hbm %s37610_s2, 16 }
  0x12   : > { %s37618_s26 = scalar_select %p35307_p10, 1, 0 }
  0x13   : > { %s37619_s27 = scalar_select %p35314_p11, 1, 0 }
  0x14   : > { %p35044_p13 = scmp.ne.s32.totalorder %s37610_s2, %s35043_s30  ;;  %p35045_p1 = pneg %p35302_p9 }
  0x15   : > { %p35050_p0 = scmp.lt.u32.totalorder %s35043_s30, %s37610_s2 }
  0x16   : > { %p35046_p3 = pnand %p35045_p1, %p35044_p13 }
  0x18   : > { %p35047_p4 = pneg %p35046_p3 }
  0x1a   : > { %p35052_p7 = pnand %p35050_p0, %p35047_p4 }
  0x1c   : > { %35055 = shalt.err (!%p35052_p7)
}
  0x1d   : > { %s35056_s8 = scalar_lea.vmem %s153_s23, 16  ;;  %s35063_s9 = scalar_lea.vmem %s153_s23, 32 }
  0x1e   : > { %p35057_p8 = scmp.ne.s32.totalorder %s153_s23, %s35056_s8  ;;  %p35064_p5 = scmp.lt.s32.totalorder %s153_s23, %s153_s23 }
  0x1f   : > { %p35065_p6 = scmp.lt.s32.totalorder %s35063_s9, %s35056_s8 }
  0x20   : > { %p35059_p2 = pnand %p35057_p8, %p35045_p1 }
  0x21   : > { %p35066_p11 = por %p35065_p6, %p35064_p5 }
  0x22   : > { %p35060_p12 = pneg %p35059_p2 }
  0x24   : > { %p35067_p10 = pnand %p35066_p11, %p35060_p12 }
  0x26   : > { %35070 = shalt.err (!%p35067_p10)
}
  0x27   : > { %34784 = dma.hbm_to_vmem [thread:$0]  (!%p35302_p9), %s37610_s2, 16, %s153_s23, [#allocation6]  }
  0x28   : > { %p37620_p2 = scmp.ne.s32.totalorder %s37618_s26, 0  ;;  %s35340_s12 = sand.u32 1, %s35207_s14  }
  0x29   : > { %s33227_s22 = smul.u32 24576, %s35215_s16  ;;  %p37621_p6 = scmp.ne.s32.totalorder %s37619_s27, 0 }
  0x2a   : > { %s37634_s25 = smov (%p37620_p2, %s29_s25), 0  ;;  %s34765_s28 = smul.u32 1536, %s35340_s12 }
  0x2b   : > { %s40_s24 = ssub.s32 %s35215_s16, %s37634_s25  ;;  %s35349_s4 = scalar_lea.hbm %s37608_s0, %s33227_s22 }
  0x2c   : > { %p41_p5 = scmp.eq.s32.totalorder %s40_s24, 0  ;;  %p37622_p9 = scmp.lt.s32.totalorder %s35219_s17, 2 }
  0x2d   : > { %s167_s5 = scalar_lea.vmem [#allocation2], %s34765_s28  ;;  %s34766_s7 = smul.u32 12288, %s35340_s12 }
  0x2e   : > { %p35355_p10 = pnand %p37622_p9, %p37621_p6  ;;  %s177_s6 = sshll.u32 %s167_s5, 4  ;;  %s35365_s6 = int_to_ptr.vmem [resolvable:$true] %s177_s6 }
  0x2f   : > { %s35362_s26 = scalar_select %p41_p5, %s35207_s14, %s43_s19  }
  0x30   : > { %s33228_s27 = smul.u32 98304, %s35215_s16  ;;  %s164_s8 = scalar_lea.sflag [#allocation3], %s35340_s12 }
  0x31   : > { %s35071_s9 = scalar_lea.hbm %s35349_s4, 24576  ;;  %p35073_p12 = pneg %p35355_p10 }
  0x32   : > { %p35072_p11 = scmp.ne.s32.totalorder %s35349_s4, %s35071_s9  ;;  %s35076_s19 = scalar_lea.hbm %s37608_s0, 49152 }
  0x33   : > { %p35077_p3 = scmp.lt.u32.totalorder %s35349_s4, %s37608_s0  ;;  %p35078_p4 = scmp.lt.u32.totalorder %s35076_s19, %s35071_s9 }
  0x34   : > { %p35074_p13 = pnand %p35073_p12, %p35072_p11  ;;  %p35080_p7 = scmp.lt.u32.totalorder %s35071_s9, %s35349_s4 }
  0x35   : > { %p35079_p0 = por %p35078_p4, %p35077_p3 }
  0x36   : > { %p35075_p1 = pneg %p35074_p13 }
  0x37   : > { %p35081_p8 = por %p35080_p7, %p35079_p0 }
  0x39   : > { %p35082_p2 = pnand %p35081_p8, %p35075_p1 }
  0x3b   : > { %35085 = shalt.err (!%p35082_p2)
}
  0x3c   : > { %s35086_s28 = scalar_lea.vmem %s35365_s6, 24576  ;;  %s35222_s29 = smov [#allocation2]  }
  0x3d   : > { %p35087_p5 = scmp.ne.s32.totalorder %s35365_s6, %s35086_s28  ;;  %s35091_s30 = sshll.u32 %s35222_s29, 4  ;;  %s35092_s30 = int_to_ptr.vmem [resolvable:$false] %s35091_s30 }
  0x3e   : > { %s35093_s5 = scalar_lea.vmem %s35092_s30, 49152  ;;  %p35094_p11 = scmp.lt.s32.totalorder %s35365_s6, %s35092_s30 }
  0x3f   : > { %p35089_p6 = pnand %p35087_p5, %p35073_p12  ;;  %p35095_p13 = scmp.lt.s32.totalorder %s35093_s5, %s35086_s28 }
  0x41   : > { %p35090_p9 = pneg %p35089_p6  ;;  %p35096_p3 = por %p35095_p13, %p35094_p11 }
  0x43   : > { %p35097_p4 = pnand %p35096_p3, %p35090_p9 }
  0x45   : > { %35100 = shalt.err (!%p35097_p4)
}
  0x46   : > { %34788 = dma.hbm_to_vmem [thread:$0]  (!%p35355_p10), %s35349_s4, 24576, %s35365_s6, %s164_s8  }
  0x47   : > { %s35399_s11 = scalar_lea.hbm %s37609_s1, %s33228_s27  ;;  %s188_s19 = scalar_lea.vmem [#allocation5], %s34766_s7 }
  0x48   : > { %s197_s22 = sshll.u32 %s188_s19, 4  ;;  %s184_s24 = sand.u32 1, %s35219_s17   ;;  %s35404_s22 = int_to_ptr.vmem [resolvable:$true] %s197_s22 }
  0x49   : > { %s35406_s28 = scalar_lea.sflag [#allocation6], %s184_s24  ;;  %s35101_s29 = scalar_lea.hbm %s35399_s11, 196608 }
  0x4a   : > { %p35102_p1 = scmp.ne.s32.totalorder %s35399_s11, %s35101_s29  ;;  %s35106_s12 = scalar_lea.hbm %s37609_s1, 393216 }
  0x4b   : > { %p35107_p8 = scmp.lt.u32.totalorder %s35399_s11, %s37609_s1  ;;  %p35108_p2 = scmp.lt.u32.totalorder %s35106_s12, %s35101_s29 }
  0x4c   : > { %p35104_p0 = pnand %p35102_p1, %p35073_p12  ;;  %p35110_p6 = scmp.lt.u32.totalorder %s35101_s29, %s35399_s11 }
  0x4d   : > { %p35109_p5 = por %p35108_p2, %p35107_p8 }
  0x4e   : > { %p35105_p7 = pneg %p35104_p0 }
  0x4f   : > { %p35111_p9 = por %p35110_p6, %p35109_p5 }
  0x51   : > { %p35112_p11 = pnand %p35111_p9, %p35105_p7 }
  0x53   : > { %35115 = shalt.err (!%p35112_p11)
}
  0x54   : > { %s35116_s7 = scalar_lea.vmem %s35404_s22, 196608  ;;  %s35223_s30 = smov [#allocation5]  }
  0x55   : > { %p35117_p13 = scmp.ne.s32.totalorder %s35404_s22, %s35116_s7  ;;  %s35121_s5 = sshll.u32 %s35223_s30, 4  ;;  %s35122_s5 = int_to_ptr.vmem [resolvable:$false] %s35121_s5 }
  0x56   : > { %s35123_s9 = scalar_lea.vmem %s35122_s5, 393216  ;;  %p35124_p1 = scmp.lt.s32.totalorder %s35404_s22, %s35122_s5 }
  0x57   : > { %p35119_p3 = pnand %p35117_p13, %p35073_p12  ;;  %p35125_p0 = scmp.lt.s32.totalorder %s35123_s9, %s35116_s7 }
  0x59   : > { %p35120_p4 = pneg %p35119_p3  ;;  %p35126_p8 = por %p35125_p0, %p35124_p1 }
  0x5b   : > { %p35127_p2 = pnand %p35126_p8, %p35120_p4 }
  0x5d   : > { %35130 = shalt.err (!%p35127_p2)
}
  0x5e   : > { %s35224_s10 = smov 196608   ;;  %s35225_s19 = smov 98304  }
  0x5f   : > { %s35226_s24 = smov 6144   ;;  %p37624_p12 = scmp.ne.s32.totalorder %s37616_s21, 0 }
  0x60   : > { %34791 = dma.hbm_to_vmem [thread:$0]  (!%p35355_p10), %s35399_s11, 196608, %s35404_s22, %s35406_s28, %s35224_s10, %s35225_s19, %s35226_s24  }
  0x61   : > { %209 = sbr.rel (%p37624_p12) target bundleno = 1894 (0x766), region = 32  ;;  %s211_s29 = sand.u32 (!%p37624_p12), 1, %s35203_s13  }
  0x62   : > { %s34767_s4 = smul.u32 (!%p37624_p12), 1536, %s211_s29  ;;  %s212_s6 = scalar_lea.sflag (!%p37624_p12), [#allocation3], %s211_s29 }
  0x63   : > { %p37625_p7 = scmp.ne.s32.totalorder (!%p37624_p12), %s37615_s20, 0 }
  0x64   : > { %s35435_s12 = scalar_lea.vmem (!%p37624_p12), [#allocation2], %s34767_s4 }
  0x68   : > { %35182 = dma.done.wait (%p37625_p7), %s212_s6, 24576  }
  0x69   : > { %35184 = vsyncadd (%p37625_p7), %s212_s6, 4294942720  ;;  %s220_s27 = sand.u32 1, %s35278_s18   ;;  %s34768_s23 = smul.u32 12288, %s211_s29 }
  0x6a   : > { %s221_s11 = scalar_lea.sflag [#allocation6], %s220_s27 }
  0x6b   : > { %s35442_s22 = scalar_lea.vmem [#allocation5], %s34768_s23 }
  0x6c   : > { %35186 = dma.done.wait (%p37625_p7), %s221_s11, 196608  }
  0x6d   : > { %35188 = vsyncadd (%p37625_p7), %s221_s11, 4294770688  ;;  %p37626_p10 = scmp.eq.s32.totalorder %s35278_s18, 0 }
  0x6f   : > { %35190 = dma.done.wait (%p37626_p10), [#allocation6], 16   ;;  %p37627_p5 = pmov %p37626_p10 }
  0x70   : > { %p33221_p6 = scmp.ne.s32.totalorder %s35211_s15, 0 }
  0x71   : > { %35192 = vsyncadd (%p37627_p5), [#allocation6], 4294967280  ;;  %v33222_v0 = vld [vmem:[#allocation7] ss:$0 sm:$0xff] (!%p33221_p6)  ;;  %vm273_vm0 = vcmask (!%p33221_p6), 74752  }
  0x72   : > { %260 = sbr.rel (%p33221_p6) target bundleno = 121 (0x79), region = 48  ;;  %274 = vst.msk [vmem:[#allocation8] sm:$0x3] (!%p33221_p6), %vm273_vm0, %v33222_v0 }
  0x79 PF: > { %v469_v1 = vld [vmem:[%s35442_s22 + $0x8] sm:$0xff]  ;;  %v468_v3 = vld [vmem:[%s35442_s22] sm:$0xff]  ;;  %v2200_v4 = vlaneseq  ;;  %v471_v7 = vld [vmem:[%s35442_s22 + $0x18] sm:$0xff]  ;;  %v35227_v9 = vmov 1983009808   ;;  %s35228_s15 = smov [#allocation8]  }
  0x7a   : > { %v1237_v2 = vld [vmem:[%s35442_s22 + $0x1808] sm:$0x3]  ;;  %v1236_v6 = vld [vmem:[%s35442_s22 + $0x1800] sm:$0x3]  ;;  %v1239_v8 = vld [vmem:[%s35442_s22 + $0x1818] sm:$0x3]  ;;  %v2198_v10 = vunpack.c.l.s4 %v35227_v9 }
  0x7b   : > { %v33229_v5 = vpack.c.bf16 %v1237_v2, %v469_v1  ;;  %v33231_v11 = vpack.c.bf16 %v1236_v6, %v468_v3  ;;  %v33233_v12 = vpack.c.bf16 %v1239_v8, %v471_v7  ;;  %v470_v13 = vld [vmem:[%s35442_s22 + $0x10] sm:$0xff]  ;;  %v276_v15 = vld [vmem:[%s35435_s12] sm:$0xff]  ;;  %v2201_v16 = vshrl.u32 %v2200_v4, 7  ;;  %v473_v20 = vld [vmem:[%s35442_s22 + $0x28] sm:$0xff]  ;;  %s33118_s20 = sshll.u32 %s35228_s15, 4  ;;  %p34795_p9 = scmp.eq.s32.totalorder %s35278_s18, 1  ;;  %s33119_s20 = int_to_ptr.vmem [resolvable:$true] %s33118_s20 }
  0x7c   : > { %v1238_v14 = vld [vmem:[%s35442_s22 + $0x1810] sm:$0x3]  ;;  %v2199_v18 = vunpack.c.0.s8 %v2198_v10  ;;  %v2196_v19 = vcombine.high %v276_v15, %v276_v15  ;;  %v1241_v21 = vld [vmem:[%s35442_s22 + $0x1828] sm:$0x3]  ;;  %v475_v23 = vld [vmem:[%s35442_s22 + $0x38] sm:$0xff]  ;;  %vm33109_vm1 = vcmask 74752   ;;  %p35138_p4 = scmp.lt.s32.totalorder %s33119_s20, %s33119_s20 }
  0x7d   : > { %33230 = vmatprep.subr.bf16.mxu0 %v33229_v5  ;;  %v33235_v17 = vpack.c.bf16 %v1238_v14, %v470_v13  ;;  %33234 = vmatprep.subr.bf16.mxu1 %v33233_v12  ;;  %v33237_v22 = vpack.c.bf16 %v1241_v21, %v473_v20  ;;  %v1243_v24 = vld [vmem:[%s35442_s22 + $0x1838] sm:$0x3]  ;;  %v472_v26 = vld [vmem:[%s35442_s22 + $0x20] sm:$0xff]  ;;  %v277_v28 = vld [vmem:[%s35435_s12 + $0x8] sm:$0xff]  ;;  %s35131_s21 = scalar_lea.vmem %s33119_s20, 32 }
  0x7e   : > { %33232 = vmatpush1.bf16.xpose.msra.mxu0 %v33231_v11  ;;  %v35466_v25 = vsub.s32 %v2199_v18, %v2201_v16  ;;  %v33241_v27 = vpack.c.bf16 %v1243_v24, %v475_v23  ;;  %v1240_v29 = vld [vmem:[%s35442_s22 + $0x1820] sm:$0x3]  ;;  %v474_v30 = vld [vmem:[%s35442_s22 + $0x30] sm:$0xff]  ;;  %v2213_v32 = vcombine.high %v277_v28, %v277_v28  ;;  %v477_v36 = vld [vmem:[%s35442_s22 + $0x48] sm:$0xff]  ;;  %p35132_p11 = scmp.ne.s32.totalorder %s33119_s20, %s35131_s21  ;;  %p35139_p1 = scmp.lt.s32.totalorder %s35131_s21, %s35131_s21 }
  0x7f   : > { %33236 = vmatpush1.bf16.xpose.msra.mxu1 %v33235_v17  ;;  %33238 = vmatprep.subr.bf16.mxu0 %v33237_v22  ;;  %v1242_v31 = vld [vmem:[%s35442_s22 + $0x1830] sm:$0x3]  ;;  %v1245_v37 = vld [vmem:[%s35442_s22 + $0x1848] sm:$0x3]  ;;  %v479_v39 = vld [vmem:[%s35442_s22 + $0x58] sm:$0xff]  ;;  %v33239_v44 = vpack.c.bf16 %v1240_v29, %v472_v26 }
  0x80   : > { %v2203_v33 = vrot.slane %v276_v15, %v35466_v25  ;;  %v2210_v34 = vrot.slane %v2196_v19, %v35466_v25  ;;  %33242 = vmatprep.subr.bf16.mxu1 %v33241_v27  ;;  %v2220_v35 = vrot.slane %v277_v28, %v35466_v25  ;;  %v2227_v38 = vrot.slane %v2213_v32, %v35466_v25  ;;  %v1247_v40 = vld [vmem:[%s35442_s22 + $0x1858] sm:$0x3]  ;;  %v278_v41 = vld [vmem:[%s35435_s12 + $0x10] sm:$0xff]  ;;  %v476_v51 = vld [vmem:[%s35442_s22 + $0x40] sm:$0xff]  ;;  %p35133_p13 = pnand %p35132_p11, %p34795_p9  ;;  %p35140_p0 = por %p35139_p1, %p35138_p4 }
  0x81   : > { %v33243_v45 = vpack.c.bf16 %v1242_v31, %v474_v30  ;;  %v33245_v47 = vpack.c.bf16 %v1245_v37, %v477_v36  ;;  %v33249_v49 = vpack.c.bf16 %v1247_v40, %v479_v39  ;;  %v2230_v50 = vcombine.high %v278_v41, %v278_v41  ;;  %v1244_v52 = vld [vmem:[%s35442_s22 + $0x1840] sm:$0x3]  ;;  %v478_v53 = vld [vmem:[%s35442_s22 + $0x50] sm:$0xff]  ;;  %v481_v56 = vld [vmem:[%s35442_s22 + $0x68] sm:$0xff] }
  0x82   : > { %v2211_v42 = vcombine.high %v2203_v33, %v2203_v33  ;;  %v2212_v43 = vcombine.high %v2210_v34, %v2210_v34  ;;  %v2228_v46 = vcombine.high %v2220_v35, %v2220_v35  ;;  %v2229_v48 = vcombine.high %v2227_v38, %v2227_v38  ;;  %v1246_v54 = vld [vmem:[%s35442_s22 + $0x1850] sm:$0x3]  ;;  %v1249_v57 = vld [vmem:[%s35442_s22 + $0x1868] sm:$0x3]  ;;  %v483_v59 = vld [vmem:[%s35442_s22 + $0x78] sm:$0xff]  ;;  %p35134_p3 = pneg %p35133_p13 }
  0x83   : > { %v2237_v55 = vrot.slane %v278_v41, %v35466_v25  ;;  %v2244_v58 = vrot.slane %v2230_v50, %v35466_v25  ;;  %v1251_v60 = vld [vmem:[%s35442_s22 + $0x1878] sm:$0x3]  ;;  %v33247_v62 = vpack.c.bf16 %v1244_v52, %v476_v51  ;;  %v33251_v63 = vpack.c.bf16 %v1246_v54, %v478_v53  ;;  %v480_v5 = vld [vmem:[%s35442_s22 + $0x60] sm:$0xff]  ;;  %v482_v7 = vld [vmem:[%s35442_s22 + $0x70] sm:$0xff] }
  0x84   : > { %6292 = vmatprep.mubr.f32.mxu0 %v2211_v42  ;;  %6362 = vmatprep.mubr.f32.mxu1 %v2212_v43  ;;  %v279_v61 = vld [vmem:[%s35435_s12 + $0x18] sm:$0xff]  ;;  %v33253_v1 = vpack.c.bf16 %v1249_v57, %v481_v56  ;;  %v33257_v3 = vpack.c.bf16 %v1251_v60, %v483_v59  ;;  %v1248_v6 = vld [vmem:[%s35442_s22 + $0x1860] sm:$0x3]  ;;  %v1250_v8 = vld [vmem:[%s35442_s22 + $0x1870] sm:$0x3]  ;;  %p35141_p8 = pnand %p35140_p0, %p35134_p3 }
  0x85   : > { %6293 = vmatmul.mubr.f32.vlgmr.msra.gmra.mrb[0].mxu0 %v2203_v33  ;;  %v2245_v0 = vcombine.high %v2237_v55, %v2237_v55  ;;  %v2246_v2 = vcombine.high %v2244_v58, %v2244_v58  ;;  %v2247_v4 = vcombine.high %v279_v61, %v279_v61  ;;  %v2254_v9 = vrot.slane %v279_v61, %v35466_v25  ;;  %v485_v10 = vld [vmem:[%s35442_s22 + $0x88] sm:$0xff]  ;;  %v487_v13 = vld [vmem:[%s35442_s22 + $0x98] sm:$0xff]  ;;  %v280_v15 = vld [vmem:[%s35435_s12 + $0x20] sm:$0xff] }
  0x86   : > { %6363 = vmatmul.mubr.f32.vlgmr.msra.gmra.mrb[0].mxu1 %v2210_v34  ;;  %33240 = vmatpush1.bf16.xpose.msra.mxu0 %v33239_v44  ;;  %v1253_v11 = vld [vmem:[%s35442_s22 + $0x1888] sm:$0x3]  ;;  %v1255_v14 = vld [vmem:[%s35442_s22 + $0x1898] sm:$0x3]  ;;  %v33255_v16 = vpack.c.bf16 %v1248_v6, %v480_v5  ;;  %v33259_v17 = vpack.c.bf16 %v1250_v8, %v482_v7  ;;  %v2264_v22 = vcombine.high %v280_v15, %v280_v15  ;;  %v484_v23 = vld [vmem:[%s35442_s22 + $0x80] sm:$0xff] }
  0x87   : > { %33244 = vmatpush1.bf16.xpose.msra.mxu1 %v33243_v45  ;;  %6432 = vmatprep.mubr.f32.mxu0 %v2228_v46  ;;  %v2261_v12 = vrot.slane %v2247_v4, %v35466_v25  ;;  %v2262_v18 = vcombine.high %v2254_v9, %v2254_v9  ;;  %v33261_v19 = vpack.c.bf16 %v1253_v11, %v485_v10  ;;  %v1252_v24 = vld [vmem:[%s35442_s22 + $0x1880] sm:$0x3]  ;;  %v486_v26 = vld [vmem:[%s35442_s22 + $0x90] sm:$0xff]  ;;  %v489_v29 = vld [vmem:[%s35442_s22 + $0xa8] sm:$0xff] }
  0x88   : > { %33246 = vmatprep.subr.bf16.mxu0 %v33245_v47  ;;  %6502 = vmatprep.mubr.f32.mxu1 %v2229_v48  ;;  %v33265_v21 = vpack.c.bf16 %v1255_v14, %v487_v13  ;;  %v1254_v27 = vld [vmem:[%s35442_s22 + $0x1890] sm:$0x3]  ;;  %v2271_v28 = vrot.slane %v280_v15, %v35466_v25  ;;  %v1257_v30 = vld [vmem:[%s35442_s22 + $0x18a8] sm:$0x3]  ;;  %v2278_v31 = vrot.slane %v2264_v22, %v35466_v25  ;;  %v491_v32 = vld [vmem:[%s35442_s22 + $0xb8] sm:$0xff] }
  0x89   : > { %33250 = vmatprep.subr.bf16.mxu1 %v33249_v49  ;;  %v2263_v20 = vcombine.high %v2261_v12, %v2261_v12  ;;  %v1259_v33 = vld [vmem:[%s35442_s22 + $0x18b8] sm:$0x3]  ;;  %v281_v34 = vld [vmem:[%s35435_s12 + $0x28] sm:$0xff]  ;;  %v33267_v36 = vpack.c.bf16 %v1254_v27, %v486_v26  ;;  %v488_v42 = vld [vmem:[%s35442_s22 + $0xa0] sm:$0xff] }
  0x8a   : > { %v2279_v37 = vcombine.high %v2271_v28, %v2271_v28  ;;  %v2280_v39 = vcombine.high %v2278_v31, %v2278_v31  ;;  %v33273_v40 = vpack.c.bf16 %v1259_v33, %v491_v32  ;;  %v2281_v41 = vcombine.high %v281_v34, %v281_v34  ;;  %v1256_v43 = vld [vmem:[%s35442_s22 + $0x18a0] sm:$0x3]  ;;  %v490_v44 = vld [vmem:[%s35442_s22 + $0xb0] sm:$0xff]  ;;  %v493_v47 = vld [vmem:[%s35442_s22 + $0xc8] sm:$0xff] }
  0x8b   : > { %v1258_v45 = vld [vmem:[%s35442_s22 + $0x18b0] sm:$0x3]  ;;  %v2288_v46 = vrot.slane %v281_v34, %v35466_v25  ;;  %v1261_v48 = vld [vmem:[%s35442_s22 + $0x18c8] sm:$0x3]  ;;  %v495_v50 = vld [vmem:[%s35442_s22 + $0xd8] sm:$0xff]  ;;  %v33271_v53 = vpack.c.bf16 %v1256_v43, %v488_v42 }
  0x8c   : > { %v2295_v49 = vrot.slane %v2281_v41, %v35466_v25  ;;  %v1263_v51 = vld [vmem:[%s35442_s22 + $0x18d8] sm:$0x3]  ;;  %v282_v52 = vld [vmem:[%s35435_s12 + $0x30] sm:$0xff]  ;;  %v33275_v54 = vpack.c.bf16 %v1258_v45, %v490_v44  ;;  %v33277_v56 = vpack.c.bf16 %v1261_v48, %v493_v47  ;;  %v492_v60 = vld [vmem:[%s35442_s22 + $0xc0] sm:$0xff] }
  0x8d   : > { %6433 = vmatmul.mubr.f32.vlgmr.msra.gmra.mrb[2].mxu0 %v2220_v35  ;;  %v33263_v35 = vpack.c.bf16 %v1252_v24, %v484_v23  ;;  %v2298_v59 = vcombine.high %v282_v52, %v282_v52  ;;  %v1260_v61 = vld [vmem:[%s35442_s22 + $0x18c0] sm:$0x3]  ;;  %v499_v4 = vld [vmem:[%s35442_s22 + $0xf8] sm:$0xff]  ;;  %v285_v43 = vld [vmem:[%s35435_s12 + $0x48] sm:$0xff] }
  0x8e   : > { %6503 = vmatmul.mubr.f32.vlgmr.msra.gmra.mrb[2].mxu1 %v2227_v38  ;;  %33248 = vmatpush1.bf16.xpose.msra.mxu0 %v33247_v62  ;;  %v33269_v38 = vpack.c.bf16 %v1257_v30, %v489_v29  ;;  %v2297_v57 = vcombine.high %v2295_v49, %v2295_v49  ;;  %v494_v62 = vld [vmem:[%s35442_s22 + $0xd0] sm:$0xff]  ;;  %v1267_v5 = vld [vmem:[%s35442_s22 + $0x18f8] sm:$0x3]  ;;  %v33279_v7 = vpack.c.bf16 %v1260_v61, %v492_v60  ;;  %v496_v14 = vld [vmem:[%s35442_s22 + $0xe0] sm:$0xff] }
  0x8f   : > { %33252 = vmatpush1.bf16.xpose.msra.mxu1 %v33251_v63  ;;  %6572 = vmatprep.mubr.f32.mxu0 %v2245_v0  ;;  %v1262_v63 = vld [vmem:[%s35442_s22 + $0x18d0] sm:$0x3]  ;;  %v2305_v0 = vrot.slane %v282_v52, %v35466_v25  ;;  %v283_v6 = vld [vmem:[%s35435_s12 + $0x38] sm:$0xff]  ;;  %v1264_v15 = vld [vmem:[%s35442_s22 + $0x18e0] sm:$0x3] }
  0x90   : > { %33254 = vmatprep.subr.bf16.mxu0 %v33253_v1  ;;  %6642 = vmatprep.mubr.f32.mxu1 %v2246_v2  ;;  %v497_v1 = vld [vmem:[%s35442_s22 + $0xe8] sm:$0xff]  ;;  %v33283_v8 = vpack.c.bf16 %v1262_v63, %v494_v62  ;;  %v2315_v13 = vcombine.high %v283_v6, %v283_v6  ;;  %v503_v22 = vld [vmem:[%s35442_s22 + $0x118] sm:$0xff]  ;;  %v284_v24 = vld [vmem:[%s35435_s12 + $0x40] sm:$0xff]  ;;  %v33287_v26 = vpack.c.bf16 %v1264_v15, %v496_v14 }
  0x91   : > { %33258 = vmatprep.subr.bf16.mxu1 %v33257_v3  ;;  %v1265_v2 = vld [vmem:[%s35442_s22 + $0x18e8] sm:$0x3]  ;;  %v2312_v3 = vrot.slane %v2298_v59, %v35466_v25  ;;  %v1271_v23 = vld [vmem:[%s35442_s22 + $0x1918] sm:$0x3]  ;;  %v2332_v32 = vcombine.high %v284_v24, %v284_v24  ;;  %v500_v33 = vld [vmem:[%s35442_s22 + $0x100] sm:$0xff] }
  0x92   : > { %v33285_v10 = vpack.c.bf16 %v1265_v2, %v497_v1  ;;  %v1268_v34 = vld [vmem:[%s35442_s22 + $0x1900] sm:$0x3]  ;;  %v507_v41 = vld [vmem:[%s35442_s22 + $0x138] sm:$0xff]  ;;  %v286_v61 = vld [vmem:[%s35435_s12 + $0x50] sm:$0xff] }
  0x93   : > { %v2314_v11 = vcombine.high %v2312_v3, %v2312_v3  ;;  %v1275_v42 = vld [vmem:[%s35442_s22 + $0x1938] sm:$0x3]  ;;  %v33295_v44 = vpack.c.bf16 %v1268_v34, %v500_v33  ;;  %v1272_v52 = vld [vmem:[%s35442_s22 + $0x1920] sm:$0x3] }
  0x94   : > { %v511_v59 = vld [vmem:[%s35442_s22 + $0x158] sm:$0xff]  ;;  %v288_v34 = vld [vmem:[%s35435_s12 + $0x60] sm:$0xff] }
  0x95   : > { %6573 = vmatmul.mubr.f32.vlgmr.msra.gmra.mrb[4].mxu0 %v2237_v55  ;;  %v2296_v55 = vcombine.high %v2288_v46, %v2288_v46  ;;  %v1279_v60 = vld [vmem:[%s35442_s22 + $0x1958] sm:$0x3] }
  0x96   : > { %6643 = vmatmul.mubr.f32.vlgmr.msra.gmra.mrb[4].mxu1 %v2244_v58  ;;  %33256 = vmatpush1.bf16.xpose.msra.mxu0 %v33255_v16  ;;  %v33281_v58 = vpack.c.bf16 %v1263_v51, %v495_v50  ;;  %v498_v16 = vld [vmem:[%s35442_s22 + $0xf0] sm:$0xff]  ;;  %v2349_v50 = vcombine.high %v285_v43, %v285_v43  ;;  %v504_v51 = vld [vmem:[%s35442_s22 + $0x120] sm:$0xff]  ;;  %v1283_v14 = vld [vmem:[%s35442_s22 + $0x1978] sm:$0x3] }
  0x97   : > { %33260 = vmatpush1.bf16.xpose.msra.mxu1 %v33259_v17  ;;  %6712 = vmatprep.mubr.f32.mxu0 %v2262_v18  ;;  %v1266_v17 = vld [vmem:[%s35442_s22 + $0x18f0] sm:$0x3]  ;;  %v2322_v18 = vrot.slane %v283_v6, %v35466_v25  ;;  %v33303_v62 = vpack.c.bf16 %v1272_v52, %v504_v51  ;;  %v1276_v6 = vld [vmem:[%s35442_s22 + $0x1940] sm:$0x3]  ;;  %v287_v15 = vld [vmem:[%s35435_s12 + $0x58] sm:$0xff] }
  0x98   : > { %33262 = vmatprep.subr.bf16.mxu0 %v33261_v19  ;;  %6782 = vmatprep.mubr.f32.mxu1 %v2263_v20  ;;  %v501_v19 = vld [vmem:[%s35442_s22 + $0x108] sm:$0xff]  ;;  %v33291_v27 = vpack.c.bf16 %v1266_v17, %v498_v16  ;;  %v1287_v33 = vld [vmem:[%s35442_s22 + $0x1998] sm:$0x3] }
  0x99   : > { %33266 = vmatprep.subr.bf16.mxu1 %v33265_v21  ;;  %v1269_v20 = vld [vmem:[%s35442_s22 + $0x1908] sm:$0x3]  ;;  %v2329_v21 = vrot.slane %v2315_v13, %v35466_v25  ;;  %v515_v13 = vld [vmem:[%s35442_s22 + $0x178] sm:$0xff] }
  0x9a   : > { %v33293_v29 = vpack.c.bf16 %v1269_v20, %v501_v19  ;;  %v1291_v51 = vld [vmem:[%s35442_s22 + $0x19b8] sm:$0x3]  ;;  %v289_v52 = vld [vmem:[%s35435_s12 + $0x68] sm:$0xff] }
  0x9b   : > { %v2331_v30 = vcombine.high %v2329_v21, %v2329_v21 }
  0x9d   : > { %6713 = vmatmul.mubr.f32.vlgmr.msra.gmra.mrb[6].mxu0 %v2254_v9  ;;  %v2313_v9 = vcombine.high %v2305_v0, %v2305_v0 }
  0x9e   : > { %6783 = vmatmul.mubr.f32.vlgmr.msra.gmra.mrb[6].mxu1 %v2261_v12  ;;  %33264 = vmatpush1.bf16.xpose.msra.mxu0 %v33263_v35  ;;  %v33289_v12 = vpack.c.bf16 %v1267_v5, %v499_v4  ;;  %v502_v35 = vld [vmem:[%s35442_s22 + $0x110] sm:$0xff]  ;;  %v2366_v4 = vcombine.high %v286_v61, %v286_v61  ;;  %v508_v5 = vld [vmem:[%s35442_s22 + $0x140] sm:$0xff] }
  0x9f   : > { %33268 = vmatpush1.bf16.xpose.msra.mxu1 %v33267_v36  ;;  %6852 = vmatprep.mubr.f32.mxu0 %v2279_v37  ;;  %v1270_v36 = vld [vmem:[%s35442_s22 + $0x1910] sm:$0x3]  ;;  %v2339_v37 = vrot.slane %v284_v24, %v35466_v25  ;;  %v33311_v16 = vpack.c.bf16 %v1276_v6, %v508_v5  ;;  %v1280_v24 = vld [vmem:[%s35442_s22 + $0x1960] sm:$0x3]  ;;  %v1295_v5 = vld [vmem:[%s35442_s22 + $0x19d8] sm:$0x3] }
  0xa0   : > { %33270 = vmatprep.subr.bf16.mxu0 %v33269_v38  ;;  %6922 = vmatprep.mubr.f32.mxu1 %v2280_v39  ;;  %v505_v38 = vld [vmem:[%s35442_s22 + $0x128] sm:$0xff]  ;;  %v33299_v45 = vpack.c.bf16 %v1270_v36, %v502_v35  ;;  %v290_v6 = vld [vmem:[%s35435_s12 + $0x70] sm:$0xff] }
  0xa1   : > { %33274 = vmatprep.subr.bf16.mxu1 %v33273_v40  ;;  %v1273_v39 = vld [vmem:[%s35442_s22 + $0x1928] sm:$0x3]  ;;  %v2346_v40 = vrot.slane %v2332_v32, %v35466_v25  ;;  %v519_v32 = vld [vmem:[%s35442_s22 + $0x198] sm:$0xff] }
  0xa2   : > { %v33301_v47 = vpack.c.bf16 %v1273_v39, %v505_v38 }
  0xa3   : > { %v2348_v48 = vcombine.high %v2346_v40, %v2346_v40 }
  0xa5   : > { %6853 = vmatmul.mubr.f32.vlgmr.msra.gmra.mrb[8].mxu0 %v2271_v28  ;;  %v2330_v28 = vcombine.high %v2322_v18, %v2322_v18 }
  0xa6   : > { %6923 = vmatmul.mubr.f32.vlgmr.msra.gmra.mrb[8].mxu1 %v2278_v31  ;;  %33272 = vmatpush1.bf16.xpose.msra.mxu0 %v33271_v53  ;;  %v33297_v31 = vpack.c.bf16 %v1271_v23, %v503_v22  ;;  %v506_v53 = vld [vmem:[%s35442_s22 + $0x130] sm:$0xff]  ;;  %v2383_v22 = vcombine.high %v287_v15, %v287_v15  ;;  %v512_v23 = vld [vmem:[%s35442_s22 + $0x160] sm:$0xff] }
  0xa7   : > { %33276 = vmatpush1.bf16.xpose.msra.mxu1 %v33275_v54  ;;  %6992 = vmatprep.mubr.f32.mxu0 %v2296_v55  ;;  %v1274_v54 = vld [vmem:[%s35442_s22 + $0x1930] sm:$0x3]  ;;  %v2356_v55 = vrot.slane %v285_v43, %v35466_v25  ;;  %v33319_v35 = vpack.c.bf16 %v1280_v24, %v512_v23  ;;  %v1284_v43 = vld [vmem:[%s35442_s22 + $0x1980] sm:$0x3]  ;;  %v1299_v23 = vld [vmem:[%s35442_s22 + $0x19f8] sm:$0x3] }
  0xa8   : > { %33278 = vmatprep.subr.bf16.mxu0 %v33277_v56  ;;  %7062 = vmatprep.mubr.f32.mxu1 %v2297_v57  ;;  %v509_v56 = vld [vmem:[%s35442_s22 + $0x148] sm:$0xff]  ;;  %v33307_v63 = vpack.c.bf16 %v1274_v54, %v506_v53  ;;  %v291_v24 = vld [vmem:[%s35435_s12 + $0x78] sm:$0xff] }
  0xa9   : > { %33282 = vmatprep.subr.bf16.mxu1 %v33281_v58  ;;  %v1277_v57 = vld [vmem:[%s35442_s22 + $0x1948] sm:$0x3]  ;;  %v2363_v58 = vrot.slane %v2349_v50, %v35466_v25  ;;  %v523_v50 = vld [vmem:[%s35442_s22 + $0x1b8] sm:$0xff] }
  0xaa   : > { %v33309_v1 = vpack.c.bf16 %v1277_v57, %v509_v56 }
  0xab   : > { %v2365_v2 = vcombine.high %v2363_v58, %v2363_v58 }
  0xad   : > { %6993 = vmatmul.mubr.f32.vlgmr.msra.gmra.mrb[10].mxu0 %v2288_v46  ;;  %v2347_v46 = vcombine.high %v2339_v37, %v2339_v37 }
  0xae   : > { %7063 = vmatmul.mubr.f32.vlgmr.msra.gmra.mrb[10].mxu1 %v2295_v49  ;;  %33280 = vmatpush1.bf16.xpose.msra.mxu0 %v33279_v7  ;;  %v33305_v49 = vpack.c.bf16 %v1275_v42, %v507_v41  ;;  %v510_v7 = vld [vmem:[%s35442_s22 + $0x150] sm:$0xff]  ;;  %v2400_v41 = vcombine.high %v288_v34, %v288_v34  ;;  %v516_v42 = vld [vmem:[%s35442_s22 + $0x180] sm:$0xff] }
  0xaf   : > { %33284 = vmatpush1.bf16.xpose.msra.mxu1 %v33283_v8  ;;  %7132 = vmatprep.mubr.f32.mxu0 %v2313_v9  ;;  %v1278_v8 = vld [vmem:[%s35442_s22 + $0x1950] sm:$0x3]  ;;  %v2373_v9 = vrot.slane %v286_v61, %v35466_v25  ;;  %v33327_v53 = vpack.c.bf16 %v1284_v43, %v516_v42  ;;  %v1288_v61 = vld [vmem:[%s35442_s22 + $0x19a0] sm:$0x3]  ;;  %v1303_v42 = vld [vmem:[%s35442_s22 + $0x1a18] sm:$0x3] }
  0xb0   : > { %33286 = vmatprep.subr.bf16.mxu0 %v33285_v10  ;;  %7202 = vmatprep.mubr.f32.mxu1 %v2314_v11  ;;  %v513_v10 = vld [vmem:[%s35442_s22 + $0x168] sm:$0xff]  ;;  %v33315_v17 = vpack.c.bf16 %v1278_v8, %v510_v7  ;;  %v292_v43 = vld [vmem:[%s35435_s12 + $0x80] sm:$0xff] }
  0xb1   : > { %33290 = vmatprep.subr.bf16.mxu1 %v33289_v12  ;;  %v1281_v11 = vld [vmem:[%s35442_s22 + $0x1968] sm:$0x3]  ;;  %v2380_v12 = vrot.slane %v2366_v4, %v35466_v25  ;;  %v527_v4 = vld [vmem:[%s35442_s22 + $0x1d8] sm:$0xff] }
  0xb2   : > { %v33317_v19 = vpack.c.bf16 %v1281_v11, %v513_v10 }
  0xb3   : > { %v2382_v20 = vcombine.high %v2380_v12, %v2380_v12 }
  0xb5   : > { %7133 = vmatmul.mubr.f32.vlgmr.msra.gmra.mrb[12].mxu0 %v2305_v0  ;;  %v2364_v0 = vcombine.high %v2356_v55, %v2356_v55 }
  0xb6   : > { %7203 = vmatmul.mubr.f32.vlgmr.msra.gmra.mrb[12].mxu1 %v2312_v3  ;;  %33288 = vmatpush1.bf16.xpose.msra.mxu0 %v33287_v26  ;;  %v33313_v3 = vpack.c.bf16 %v1279_v60, %v511_v59  ;;  %v514_v26 = vld [vmem:[%s35442_s22 + $0x170] sm:$0xff]  ;;  %v2417_v59 = vcombine.high %v289_v52, %v289_v52  ;;  %v520_v60 = vld [vmem:[%s35442_s22 + $0x1a0] sm:$0xff] }
  0xb7   : > { %33292 = vmatpush1.bf16.xpose.msra.mxu1 %v33291_v27  ;;  %7272 = vmatprep.mubr.f32.mxu0 %v2330_v28  ;;  %v1282_v27 = vld [vmem:[%s35442_s22 + $0x1970] sm:$0x3]  ;;  %v2390_v28 = vrot.slane %v287_v15, %v35466_v25  ;;  %v33335_v7 = vpack.c.bf16 %v1288_v61, %v520_v60  ;;  %v1292_v15 = vld [vmem:[%s35442_s22 + $0x19c0] sm:$0x3]  ;;  %v1307_v60 = vld [vmem:[%s35442_s22 + $0x1a38] sm:$0x3] }
  0xb8   : > { %33294 = vmatprep.subr.bf16.mxu0 %v33293_v29  ;;  %7342 = vmatprep.mubr.f32.mxu1 %v2331_v30  ;;  %v517_v29 = vld [vmem:[%s35442_s22 + $0x188] sm:$0xff]  ;;  %v33323_v36 = vpack.c.bf16 %v1282_v27, %v514_v26 }
  0xb9   : > { %33298 = vmatprep.subr.bf16.mxu1 %v33297_v31  ;;  %v1285_v30 = vld [vmem:[%s35442_s22 + $0x1988] sm:$0x3]  ;;  %v2397_v31 = vrot.slane %v2383_v22, %v35466_v25  ;;  %v531_v22 = vld [vmem:[%s35442_s22 + $0x1f8] sm:$0xff] }
  0xba   : > { %v33325_v38 = vpack.c.bf16 %v1285_v30, %v517_v29  ;;  %v293_v61 = vld [vmem:[%s35435_s12 + $0x88] sm:$0xff] }
  0xbb   : > { %v2399_v39 = vcombine.high %v2397_v31, %v2397_v31 }
  0xbd   : > { %7273 = vmatmul.mubr.f32.vlgmr.msra.gmra.mrb[14].mxu0 %v2322_v18  ;;  %v2381_v18 = vcombine.high %v2373_v9, %v2373_v9 }
  0xbe   : > { %7343 = vmatmul.mubr.f32.vlgmr.msra.gmra.mrb[14].mxu1 %v2329_v21  ;;  %33296 = vmatpush1.bf16.xpose.msra.mxu0 %v33295_v44  ;;  %v33321_v21 = vpack.c.bf16 %v1283_v14, %v515_v13  ;;  %v518_v44 = vld [vmem:[%s35442_s22 + $0x190] sm:$0xff]  ;;  %v2434_v13 = vcombine.high %v290_v6, %v290_v6  ;;  %v524_v14 = vld [vmem:[%s35442_s22 + $0x1c0] sm:$0xff] }
  0xbf   : > { %33300 = vmatpush1.bf16.xpose.msra.mxu1 %v33299_v45  ;;  %7412 = vmatprep.mubr.f32.mxu0 %v2347_v46  ;;  %v1286_v45 = vld [vmem:[%s35442_s22 + $0x1990] sm:$0x3]  ;;  %v2407_v46 = vrot.slane %v288_v34, %v35466_v25  ;;  %v33343_v26 = vpack.c.bf16 %v1292_v15, %v524_v14  ;;  %v1296_v34 = vld [vmem:[%s35442_s22 + $0x19e0] sm:$0x3]  ;;  %v1311_v14 = vld [vmem:[%s35442_s22 + $0x1a58] sm:$0x3] }
  0xc0   : > { %33302 = vmatprep.subr.bf16.mxu0 %v33301_v47  ;;  %7482 = vmatprep.mubr.f32.mxu1 %v2348_v48  ;;  %v521_v47 = vld [vmem:[%s35442_s22 + $0x1a8] sm:$0xff]  ;;  %v33331_v54 = vpack.c.bf16 %v1286_v45, %v518_v44  ;;  %v294_v15 = vld [vmem:[%s35435_s12 + $0x90] sm:$0xff] }
  0xc1   : > { %33306 = vmatprep.subr.bf16.mxu1 %v33305_v49  ;;  %v1289_v48 = vld [vmem:[%s35442_s22 + $0x19a8] sm:$0x3]  ;;  %v2414_v49 = vrot.slane %v2400_v41, %v35466_v25  ;;  %v535_v41 = vld [vmem:[%s35442_s22 + $0x218] sm:$0xff] }
  0xc2   : > { %v33333_v56 = vpack.c.bf16 %v1289_v48, %v521_v47 }
  0xc3   : > { %v2416_v57 = vcombine.high %v2414_v49, %v2414_v49 }
  0xc5   : > { %7413 = vmatmul.mubr.f32.vlgmr.msra.gmra.mrb[16].mxu0 %v2339_v37  ;;  %v2398_v37 = vcombine.high %v2390_v28, %v2390_v28 }
  0xc6   : > { %7483 = vmatmul.mubr.f32.vlgmr.msra.gmra.mrb[16].mxu1 %v2346_v40  ;;  %33304 = vmatpush1.bf16.xpose.msra.mxu0 %v33303_v62  ;;  %v33329_v40 = vpack.c.bf16 %v1287_v33, %v519_v32  ;;  %v522_v62 = vld [vmem:[%s35442_s22 + $0x1b0] sm:$0xff]  ;;  %v2451_v32 = vcombine.high %v291_v24, %v291_v24  ;;  %v528_v33 = vld [vmem:[%s35442_s22 + $0x1e0] sm:$0xff] }
  0xc7   : > { %33308 = vmatpush1.bf16.xpose.msra.mxu1 %v33307_v63  ;;  %7552 = vmatprep.mubr.f32.mxu0 %v2364_v0  ;;  %v1290_v63 = vld [vmem:[%s35442_s22 + $0x19b0] sm:$0x3]  ;;  %v2424_v0 = vrot.slane %v289_v52, %v35466_v25  ;;  %v33351_v44 = vpack.c.bf16 %v1296_v34, %v528_v33  ;;  %v1300_v52 = vld [vmem:[%s35442_s22 + $0x1a00] sm:$0x3]  ;;  %v1315_v33 = vld [vmem:[%s35442_s22 + $0x1a78] sm:$0x3] }
  0xc8   : > { %33310 = vmatprep.subr.bf16.mxu0 %v33309_v1  ;;  %7622 = vmatprep.mubr.f32.mxu1 %v2365_v2  ;;  %v525_v1 = vld [vmem:[%s35442_s22 + $0x1c8] sm:$0xff]  ;;  %v33339_v8 = vpack.c.bf16 %v1290_v63, %v522_v62  ;;  %v295_v34 = vld [vmem:[%s35435_s12 + $0x98] sm:$0xff] }
  0xc9   : > { %33314 = vmatprep.subr.bf16.mxu1 %v33313_v3  ;;  %v1293_v2 = vld [vmem:[%s35442_s22 + $0x19c8] sm:$0x3]  ;;  %v2431_v3 = vrot.slane %v2417_v59, %v35466_v25  ;;  %v539_v59 = vld [vmem:[%s35442_s22 + $0x238] sm:$0xff] }
  0xca   : > { %v33341_v10 = vpack.c.bf16 %v1293_v2, %v525_v1 }
  0xcb   : > { %v2433_v11 = vcombine.high %v2431_v3, %v2431_v3 }
  0xcd   : > { %7553 = vmatmul.mubr.f32.vlgmr.msra.gmra.mrb[18].mxu0 %v2356_v55  ;;  %v2415_v55 = vcombine.high %v2407_v46, %v2407_v46 }
  0xce   : > { %7623 = vmatmul.mubr.f32.vlgmr.msra.gmra.mrb[18].mxu1 %v2363_v58  ;;  %33312 = vmatpush1.bf16.xpose.msra.mxu0 %v33311_v16  ;;  %v33337_v58 = vpack.c.bf16 %v1291_v51, %v523_v50  ;;  %v526_v16 = vld [vmem:[%s35442_s22 + $0x1d0] sm:$0xff]  ;;  %v2468_v50 = vcombine.high %v292_v43, %v292_v43  ;;  %v532_v51 = vld [vmem:[%s35442_s22 + $0x200] sm:$0xff] }
  0xcf   : > { %33316 = vmatpush1.bf16.xpose.msra.mxu1 %v33315_v17  ;;  %7692 = vmatprep.mubr.f32.mxu0 %v2381_v18  ;;  %v1294_v17 = vld [vmem:[%s35442_s22 + $0x19d0] sm:$0x3]  ;;  %v2441_v18 = vrot.slane %v290_v6, %v35466_v25  ;;  %v33359_v62 = vpack.c.bf16 %v1300_v52, %v532_v51  ;;  %v1304_v6 = vld [vmem:[%s35442_s22 + $0x1a20] sm:$0x3]  ;;  %v1319_v51 = vld [vmem:[%s35442_s22 + $0x1a98] sm:$0x3] }
  0xd0   : > { %33318 = vmatprep.subr.bf16.mxu0 %v33317_v19  ;;  %7762 = vmatprep.mubr.f32.mxu1 %v2382_v20  ;;  %v529_v19 = vld [vmem:[%s35442_s22 + $0x1e8] sm:$0xff]  ;;  %v33347_v27 = vpack.c.bf16 %v1294_v17, %v526_v16  ;;  %v296_v52 = vld [vmem:[%s35435_s12 + $0xa0] sm:$0xff] }
  0xd1   : > { %33322 = vmatprep.subr.bf16.mxu1 %v33321_v21  ;;  %v1297_v20 = vld [vmem:[%s35442_s22 + $0x19e8] sm:$0x3]  ;;  %v2448_v21 = vrot.slane %v2434_v13, %v35466_v25  ;;  %v543_v13 = vld [vmem:[%s35442_s22 + $0x258] sm:$0xff] }
  0xd2   : > { %v33349_v29 = vpack.c.bf16 %v1297_v20, %v529_v19 }
  0xd3   : > { %v2450_v30 = vcombine.high %v2448_v21, %v2448_v21 }
  0xd5   : > { %7693 = vmatmul.mubr.f32.vlgmr.msra.gmra.mrb[20].mxu0 %v2373_v9  ;;  %v2432_v9 = vcombine.high %v2424_v0, %v2424_v0 }
  0xd6   : > { %7763 = vmatmul.mubr.f32.vlgmr.msra.gmra.mrb[20].mxu1 %v2380_v12  ;;  %33320 = vmatpush1.bf16.xpose.msra.mxu0 %v33319_v35  ;;  %v33345_v12 = vpack.c.bf16 %v1295_v5, %v527_v4  ;;  %v530_v35 = vld [vmem:[%s35442_s22 + $0x1f0] sm:$0xff]  ;;  %v2485_v4 = vcombine.high %v293_v61, %v293_v61  ;;  %v536_v5 = vld [vmem:[%s35442_s22 + $0x220] sm:$0xff] }
  0xd7   : > { %33324 = vmatpush1.bf16.xpose.msra.mxu1 %v33323_v36  ;;  %7832 = vmatprep.mubr.f32.mxu0 %v2398_v37  ;;  %v1298_v36 = vld [vmem:[%s35442_s22 + $0x19f0] sm:$0x3]  ;;  %v2458_v37 = vrot.slane %v291_v24, %v35466_v25  ;;  %v33367_v16 = vpack.c.bf16 %v1304_v6, %v536_v5  ;;  %v1308_v24 = vld [vmem:[%s35442_s22 + $0x1a40] sm:$0x3]  ;;  %v1323_v5 = vld [vmem:[%s35442_s22 + $0x1ab8] sm:$0x3] }
  0xd8   : > { %33326 = vmatprep.subr.bf16.mxu0 %v33325_v38  ;;  %7902 = vmatprep.mubr.f32.mxu1 %v2399_v39  ;;  %v533_v38 = vld [vmem:[%s35442_s22 + $0x208] sm:$0xff]  ;;  %v33355_v45 = vpack.c.bf16 %v1298_v36, %v530_v35 }
  0xd9   : > { %33330 = vmatprep.subr.bf16.mxu1 %v33329_v40  ;;  %v1301_v39 = vld [vmem:[%s35442_s22 + $0x1a08] sm:$0x3]  ;;  %v2465_v40 = vrot.slane %v2451_v32, %v35466_v25  ;;  %v547_v32 = vld [vmem:[%s35442_s22 + $0x278] sm:$0xff] }
  0xda   : > { %v33357_v47 = vpack.c.bf16 %v1301_v39, %v533_v38  ;;  %v297_v6 = vld [vmem:[%s35435_s12 + $0xa8] sm:$0xff] }
  0xdb   : > { %v2467_v48 = vcombine.high %v2465_v40, %v2465_v40 }
  0xdd   : > { %7833 = vmatmul.mubr.f32.vlgmr.msra.gmra.mrb[22].mxu0 %v2390_v28  ;;  %v2449_v28 = vcombine.high %v2441_v18, %v2441_v18 }
  0xde   : > { %7903 = vmatmul.mubr.f32.vlgmr.msra.gmra.mrb[22].mxu1 %v2397_v31  ;;  %33328 = vmatpush1.bf16.xpose.msra.mxu0 %v33327_v53  ;;  %v33353_v31 = vpack.c.bf16 %v1299_v23, %v531_v22  ;;  %v534_v53 = vld [vmem:[%s35442_s22 + $0x210] sm:$0xff]  ;;  %v2502_v22 = vcombine.high %v294_v15, %v294_v15  ;;  %v540_v23 = vld [vmem:[%s35442_s22 + $0x240] sm:$0xff] }
  0xdf   : > { %33332 = vmatpush1.bf16.xpose.msra.mxu1 %v33331_v54  ;;  %7972 = vmatprep.mubr.f32.mxu0 %v2415_v55  ;;  %v1302_v54 = vld [vmem:[%s35442_s22 + $0x1a10] sm:$0x3]  ;;  %v2475_v55 = vrot.slane %v292_v43, %v35466_v25  ;;  %v33375_v35 = vpack.c.bf16 %v1308_v24, %v540_v23  ;;  %v1312_v43 = vld [vmem:[%s35442_s22 + $0x1a60] sm:$0x3]  ;;  %v1327_v23 = vld [vmem:[%s35442_s22 + $0x1ad8] sm:$0x3] }
  0xe0   : > { %33334 = vmatprep.subr.bf16.mxu0 %v33333_v56  ;;  %8042 = vmatprep.mubr.f32.mxu1 %v2416_v57  ;;  %v537_v56 = vld [vmem:[%s35442_s22 + $0x228] sm:$0xff]  ;;  %v33363_v63 = vpack.c.bf16 %v1302_v54, %v534_v53  ;;  %v298_v24 = vld [vmem:[%s35435_s12 + $0xb0] sm:$0xff] }
  0xe1   : > { %33338 = vmatprep.subr.bf16.mxu1 %v33337_v58  ;;  %v1305_v57 = vld [vmem:[%s35442_s22 + $0x1a28] sm:$0x3]  ;;  %v2482_v58 = vrot.slane %v2468_v50, %v35466_v25  ;;  %v551_v50 = vld [vmem:[%s35442_s22 + $0x298] sm:$0xff] }
  0xe2   : > { %v33365_v1 = vpack.c.bf16 %v1305_v57, %v537_v56 }
  0xe3   : > { %v2484_v2 = vcombine.high %v2482_v58, %v2482_v58 }
  0xe5   : > { %7973 = vmatmul.mubr.f32.vlgmr.msra.gmra.mrb[24].mxu0 %v2407_v46  ;;  %v2466_v46 = vcombine.high %v2458_v37, %v2458_v37 }
  0xe6   : > { %8043 = vmatmul.mubr.f32.vlgmr.msra.gmra.mrb[24].mxu1 %v2414_v49  ;;  %33336 = vmatpush1.bf16.xpose.msra.mxu0 %v33335_v7  ;;  %v33361_v49 = vpack.c.bf16 %v1303_v42, %v535_v41  ;;  %v538_v7 = vld [vmem:[%s35442_s22 + $0x230] sm:$0xff]  ;;  %v2519_v41 = vcombine.high %v295_v34, %v295_v34  ;;  %v544_v42 = vld [vmem:[%s35442_s22 + $0x260] sm:$0xff] }
  0xe7   : > { %33340 = vmatpush1.bf16.xpose.msra.mxu1 %v33339_v8  ;;  %8112 = vmatprep.mubr.f32.mxu0 %v2432_v9  ;;  %v1306_v8 = vld [vmem:[%s35442_s22 + $0x1a30] sm:$0x3]  ;;  %v2492_v9 = vrot.slane %v293_v61, %v35466_v25  ;;  %v33383_v53 = vpack.c.bf16 %v1312_v43, %v544_v42  ;;  %v1316_v61 = vld [vmem:[%s35442_s22 + $0x1a80] sm:$0x3]  ;;  %v1331_v42 = vld [vmem:[%s35442_s22 + $0x1af8] sm:$0x3] }
  0xe8   : > { %33342 = vmatprep.subr.bf16.mxu0 %v33341_v10  ;;  %8182 = vmatprep.mubr.f32.mxu1 %v2433_v11  ;;  %v541_v10 = vld [vmem:[%s35442_s22 + $0x248] sm:$0xff]  ;;  %v33371_v17 = vpack.c.bf16 %v1306_v8, %v538_v7  ;;  %v299_v43 = vld [vmem:[%s35435_s12 + $0xb8] sm:$0xff] }
  0xe9   : > { %33346 = vmatprep.subr.bf16.mxu1 %v33345_v12  ;;  %v1309_v11 = vld [vmem:[%s35442_s22 + $0x1a48] sm:$0x3]  ;;  %v2499_v12 = vrot.slane %v2485_v4, %v35466_v25  ;;  %v555_v4 = vld [vmem:[%s35442_s22 + $0x2b8] sm:$0xff] }
  0xea   : > { %v33373_v19 = vpack.c.bf16 %v1309_v11, %v541_v10 }
  0xeb   : > { %v2501_v20 = vcombine.high %v2499_v12, %v2499_v12 }
  0xed   : > { %8113 = vmatmul.mubr.f32.vlgmr.msra.gmra.mrb[26].mxu0 %v2424_v0  ;;  %v2483_v0 = vcombine.high %v2475_v55, %v2475_v55 }
  0xee   : > { %8183 = vmatmul.mubr.f32.vlgmr.msra.gmra.mrb[26].mxu1 %v2431_v3  ;;  %33344 = vmatpush1.bf16.xpose.msra.mxu0 %v33343_v26  ;;  %v33369_v3 = vpack.c.bf16 %v1307_v60, %v539_v59  ;;  %v542_v26 = vld [vmem:[%s35442_s22 + $0x250] sm:$0xff]  ;;  %v2536_v59 = vcombine.high %v296_v52, %v296_v52  ;;  %v548_v60 = vld [vmem:[%s35442_s22 + $0x280] sm:$0xff] }
  0xef   : > { %33348 = vmatpush1.bf16.xpose.msra.mxu1 %v33347_v27  ;;  %8252 = vmatprep.mubr.f32.mxu0 %v2449_v28  ;;  %v1310_v27 = vld [vmem:[%s35442_s22 + $0x1a50] sm:$0x3]  ;;  %v2509_v28 = vrot.slane %v294_v15, %v35466_v25  ;;  %v33391_v7 = vpack.c.bf16 %v1316_v61, %v548_v60  ;;  %v1320_v15 = vld [vmem:[%s35442_s22 + $0x1aa0] sm:$0x3]  ;;  %v1335_v60 = vld [vmem:[%s35442_s22 + $0x1b18] sm:$0x3] }
  0xf0   : > { %33350 = vmatprep.subr.bf16.mxu0 %v33349_v29  ;;  %8322 = vmatprep.mubr.f32.mxu1 %v2450_v30  ;;  %v545_v29 = vld [vmem:[%s35442_s22 + $0x268] sm:$0xff]  ;;  %v33379_v36 = vpack.c.bf16 %v1310_v27, %v542_v26  ;;  %v300_v61 = vld [vmem:[%s35435_s12 + $0xc0] sm:$0xff] }
  0xf1   : > { %33354 = vmatprep.subr.bf16.mxu1 %v33353_v31  ;;  %v1313_v30 = vld [vmem:[%s35442_s22 + $0x1a68] sm:$0x3]  ;;  %v2516_v31 = vrot.slane %v2502_v22, %v35466_v25  ;;  %v559_v22 = vld [vmem:[%s35442_s22 + $0x2d8] sm:$0xff] }
  0xf2   : > { %v33381_v38 = vpack.c.bf16 %v1313_v30, %v545_v29 }
  0xf3   : > { %v2518_v39 = vcombine.high %v2516_v31, %v2516_v31 }
  0xf5   : > { %8253 = vmatmul.mubr.f32.vlgmr.msra.gmra.mrb[28].mxu0 %v2441_v18  ;;  %v2500_v18 = vcombine.high %v2492_v9, %v2492_v9 }
  0xf6   : > { %8323 = vmatmul.mubr.f32.vlgmr.msra.gmra.mrb[28].mxu1 %v2448_v21  ;;  %33352 = vmatpush1.bf16.xpose.msra.mxu0 %v33351_v44  ;;  %v33377_v21 = vpack.c.bf16 %v1311_v14, %v543_v13  ;;  %v546_v44 = vld [vmem:[%s35442_s22 + $0x270] sm:$0xff]  ;;  %v2553_v13 = vcombine.high %v297_v6, %v297_v6  ;;  %v552_v14 = vld [vmem:[%s35442_s22 + $0x2a0] sm:$0xff] }
  0xf7   : > { %33356 = vmatpush1.bf16.xpose.msra.mxu1 %v33355_v45  ;;  %8392 = vmatprep.mubr.f32.mxu0 %v2466_v46  ;;  %v1314_v45 = vld [vmem:[%s35442_s22 + $0x1a70] sm:$0x3]  ;;  %v2526_v46 = vrot.slane %v295_v34, %v35466_v25  ;;  %v33399_v26 = vpack.c.bf16 %v1320_v15, %v552_v14  ;;  %v1324_v34 = vld [vmem:[%s35442_s22 + $0x1ac0] sm:$0x3]  ;;  %v1339_v14 = vld [vmem:[%s35442_s22 + $0x1b38] sm:$0x3] }
  0xf8   : > { %33358 = vmatprep.subr.bf16.mxu0 %v33357_v47  ;;  %8462 = vmatprep.mubr.f32.mxu1 %v2467_v48  ;;  %v549_v47 = vld [vmem:[%s35442_s22 + $0x288] sm:$0xff]  ;;  %v33387_v54 = vpack.c.bf16 %v1314_v45, %v546_v44 }
  0xf9   : > { %33362 = vmatprep.subr.bf16.mxu1 %v33361_v49  ;;  %v1317_v48 = vld [vmem:[%s35442_s22 + $0x1a88] sm:$0x3]  ;;  %v2533_v49 = vrot.slane %v2519_v41, %v35466_v25  ;;  %v563_v41 = vld [vmem:[%s35442_s22 + $0x2f8] sm:$0xff] }
  0xfa   : > { %v33389_v56 = vpack.c.bf16 %v1317_v48, %v549_v47  ;;  %v301_v15 = vld [vmem:[%s35435_s12 + $0xc8] sm:$0xff] }
  0xfb   : > { %v2535_v57 = vcombine.high %v2533_v49, %v2533_v49 }
  0xfd   : > { %8393 = vmatmul.mubr.f32.vlgmr.msra.gmra.mrb[30].mxu0 %v2458_v37  ;;  %v2517_v37 = vcombine.high %v2509_v28, %v2509_v28 }
  0xfe   : > { %8463 = vmatmul.mubr.f32.vlgmr.msra.gmra.mrb[30].mxu1 %v2465_v40  ;;  %33360 = vmatpush1.bf16.xpose.msra.mxu0 %v33359_v62  ;;  %v33385_v40 = vpack.c.bf16 %v1315_v33, %v547_v32  ;;  %v550_v62 = vld [vmem:[%s35442_s22 + $0x290] sm:$0xff]  ;;  %v2570_v32 = vcombine.high %v298_v24, %v298_v24  ;;  %v556_v33 = vld [vmem:[%s35442_s22 + $0x2c0] sm:$0xff] }
  0xff   : > { %33364 = vmatpush1.bf16.xpose.msra.mxu1 %v33363_v63  ;;  %8532 = vmatprep.mubr.f32.mxu0 %v2483_v0  ;;  %v1318_v63 = vld [vmem:[%s35442_s22 + $0x1a90] sm:$0x3]  ;;  %v2543_v0 = vrot.slane %v296_v52, %v35466_v25  ;;  %v33407_v44 = vpack.c.bf16 %v1324_v34, %v556_v33  ;;  %v1328_v52 = vld [vmem:[%s35442_s22 + $0x1ae0] sm:$0x3]  ;;  %v1343_v33 = vld [vmem:[%s35442_s22 + $0x1b58] sm:$0x3] }
 0x100   : > { %33366 = vmatprep.subr.bf16.mxu0 %v33365_v1  ;;  %8602 = vmatprep.mubr.f32.mxu1 %v2484_v2  ;;  %v553_v1 = vld [vmem:[%s35442_s22 + $0x2a8] sm:$0xff]  ;;  %v33395_v8 = vpack.c.bf16 %v1318_v63, %v550_v62  ;;  %v302_v34 = vld [vmem:[%s35435_s12 + $0xd0] sm:$0xff] }
 0x101   : > { %33370 = vmatprep.subr.bf16.mxu1 %v33369_v3  ;;  %v1321_v2 = vld [vmem:[%s35442_s22 + $0x1aa8] sm:$0x3]  ;;  %v2550_v3 = vrot.slane %v2536_v59, %v35466_v25  ;;  %v567_v59 = vld [vmem:[%s35442_s22 + $0x318] sm:$0xff] }
 0x102   : > { %v33397_v10 = vpack.c.bf16 %v1321_v2, %v553_v1 }
 0x103   : > { %v2552_v11 = vcombine.high %v2550_v3, %v2550_v3 }
 0x105   : > { %8533 = vmatmul.mubr.f32.vlgmr.msra.gmra.mrb[32].mxu0 %v2475_v55  ;;  %v2534_v55 = vcombine.high %v2526_v46, %v2526_v46 }
 0x106   : > { %8603 = vmatmul.mubr.f32.vlgmr.msra.gmra.mrb[32].mxu1 %v2482_v58  ;;  %33368 = vmatpush1.bf16.xpose.msra.mxu0 %v33367_v16  ;;  %v33393_v58 = vpack.c.bf16 %v1319_v51, %v551_v50  ;;  %v554_v16 = vld [vmem:[%s35442_s22 + $0x2b0] sm:$0xff]  ;;  %v2587_v50 = vcombine.high %v299_v43, %v299_v43  ;;  %v560_v51 = vld [vmem:[%s35442_s22 + $0x2e0] sm:$0xff] }
 0x107   : > { %33372 = vmatpush1.bf16.xpose.msra.mxu1 %v33371_v17  ;;  %8672 = vmatprep.mubr.f32.mxu0 %v2500_v18  ;;  %v1322_v17 = vld [vmem:[%s35442_s22 + $0x1ab0] sm:$0x3]  ;;  %v2560_v18 = vrot.slane %v297_v6, %v35466_v25  ;;  %v33415_v62 = vpack.c.bf16 %v1328_v52, %v560_v51  ;;  %v1332_v6 = vld [vmem:[%s35442_s22 + $0x1b00] sm:$0x3]  ;;  %v1347_v51 = vld [vmem:[%s35442_s22 + $0x1b78] sm:$0x3] }
 0x108   : > { %33374 = vmatprep.subr.bf16.mxu0 %v33373_v19  ;;  %8742 = vmatprep.mubr.f32.mxu1 %v2501_v20  ;;  %v557_v19 = vld [vmem:[%s35442_s22 + $0x2c8] sm:$0xff]  ;;  %v33403_v27 = vpack.c.bf16 %v1322_v17, %v554_v16  ;;  %v303_v52 = vld [vmem:[%s35435_s12 + $0xd8] sm:$0xff] }
 0x109   : > { %33378 = vmatprep.subr.bf16.mxu1 %v33377_v21  ;;  %v1325_v20 = vld [vmem:[%s35442_s22 + $0x1ac8] sm:$0x3]  ;;  %v2567_v21 = vrot.slane %v2553_v13, %v35466_v25  ;;  %v571_v13 = vld [vmem:[%s35442_s22 + $0x338] sm:$0xff] }
 0x10a   : > { %v33405_v29 = vpack.c.bf16 %v1325_v20, %v557_v19 }
 0x10b   : > { %v2569_v30 = vcombine.high %v2567_v21, %v2567_v21 }
 0x10d   : > { %8673 = vmatmul.mubr.f32.vlgmr.msra.gmra.mrb[34].mxu0 %v2492_v9  ;;  %v2551_v9 = vcombine.high %v2543_v0, %v2543_v0 }
 0x10e   : > { %8743 = vmatmul.mubr.f32.vlgmr.msra.gmra.mrb[34].mxu1 %v2499_v12  ;;  %33376 = vmatpush1.bf16.xpose.msra.mxu0 %v33375_v35  ;;  %v33401_v12 = vpack.c.bf16 %v1323_v5, %v555_v4  ;;  %v558_v35 = vld [vmem:[%s35442_s22 + $0x2d0] sm:$0xff]  ;;  %v2604_v4 = vcombine.high %v300_v61, %v300_v61  ;;  %v564_v5 = vld [vmem:[%s35442_s22 + $0x300] sm:$0xff] }
 0x10f   : > { %33380 = vmatpush1.bf16.xpose.msra.mxu1 %v33379_v36  ;;  %8812 = vmatprep.mubr.f32.mxu0 %v2517_v37  ;;  %v1326_v36 = vld [vmem:[%s35442_s22 + $0x1ad0] sm:$0x3]  ;;  %v2577_v37 = vrot.slane %v298_v24, %v35466_v25  ;;  %v33423_v16 = vpack.c.bf16 %v1332_v6, %v564_v5  ;;  %v1336_v24 = vld [vmem:[%s35442_s22 + $0x1b20] sm:$0x3]  ;;  %v1351_v5 = vld [vmem:[%s35442_s22 + $0x1b98] sm:$0x3] }
 0x110   : > { %33382 = vmatprep.subr.bf16.mxu0 %v33381_v38  ;;  %8882 = vmatprep.mubr.f32.mxu1 %v2518_v39  ;;  %v561_v38 = vld [vmem:[%s35442_s22 + $0x2e8] sm:$0xff]  ;;  %v33411_v45 = vpack.c.bf16 %v1326_v36, %v558_v35  ;;  %v304_v6 = vld [vmem:[%s35435_s12 + $0xe0] sm:$0xff] }
 0x111   : > { %33386 = vmatprep.subr.bf16.mxu1 %v33385_v40  ;;  %v1329_v39 = vld [vmem:[%s35442_s22 + $0x1ae8] sm:$0x3]  ;;  %v2584_v40 = vrot.slane %v2570_v32, %v35466_v25  ;;  %v575_v32 = vld [vmem:[%s35442_s22 + $0x358] sm:$0xff] }
 0x112   : > { %v33413_v47 = vpack.c.bf16 %v1329_v39, %v561_v38 }
 0x113   : > { %v2586_v48 = vcombine.high %v2584_v40, %v2584_v40 }
 0x115   : > { %8813 = vmatmul.mubr.f32.vlgmr.msra.gmra.mrb[36].mxu0 %v2509_v28  ;;  %v2568_v28 = vcombine.high %v2560_v18, %v2560_v18 }
 0x116   : > { %8883 = vmatmul.mubr.f32.vlgmr.msra.gmra.mrb[36].mxu1 %v2516_v31  ;;  %33384 = vmatpush1.bf16.xpose.msra.mxu0 %v33383_v53  ;;  %v33409_v31 = vpack.c.bf16 %v1327_v23, %v559_v22  ;;  %v562_v53 = vld [vmem:[%s35442_s22 + $0x2f0] sm:$0xff]  ;;  %v2621_v22 = vcombine.high %v301_v15, %v301_v15  ;;  %v568_v23 = vld [vmem:[%s35442_s22 + $0x320] sm:$0xff] }
 0x117   : > { %33388 = vmatpush1.bf16.xpose.msra.mxu1 %v33387_v54  ;;  %8952 = vmatprep.mubr.f32.mxu0 %v2534_v55  ;;  %v1330_v54 = vld [vmem:[%s35442_s22 + $0x1af0] sm:$0x3]  ;;  %v2594_v55 = vrot.slane %v299_v43, %v35466_v25  ;;  %v33431_v35 = vpack.c.bf16 %v1336_v24, %v568_v23  ;;  %v1340_v43 = vld [vmem:[%s35442_s22 + $0x1b40] sm:$0x3] }
 0x118   : > { %33390 = vmatprep.subr.bf16.mxu0 %v33389_v56  ;;  %9022 = vmatprep.mubr.f32.mxu1 %v2535_v57  ;;  %v565_v56 = vld [vmem:[%s35442_s22 + $0x308] sm:$0xff]  ;;  %v33419_v63 = vpack.c.bf16 %v1330_v54, %v562_v53 }
 0x119   : > { %33394 = vmatprep.subr.bf16.mxu1 %v33393_v58  ;;  %v1333_v57 = vld [vmem:[%s35442_s22 + $0x1b08] sm:$0x3]  ;;  %v2601_v58 = vrot.slane %v2587_v50, %v35466_v25  ;;  %v579_v50 = vld [vmem:[%s35442_s22 + $0x378] sm:$0xff] }
 0x11a   : > { %v33421_v1 = vpack.c.bf16 %v1333_v57, %v565_v56 }
 0x11b   : > { %v2603_v2 = vcombine.high %v2601_v58, %v2601_v58 }
 0x11d   : > { %8953 = vmatmul.mubr.f32.vlgmr.msra.gmra.mrb[38].mxu0 %v2526_v46  ;;  %v2585_v46 = vcombine.high %v2577_v37, %v2577_v37 }
 0x11e   : > { %9023 = vmatmul.mubr.f32.vlgmr.msra.gmra.mrb[38].mxu1 %v2533_v49  ;;  %33392 = vmatpush1.bf16.xpose.msra.mxu0 %v33391_v7  ;;  %v33417_v49 = vpack.c.bf16 %v1331_v42, %v563_v41  ;;  %v566_v7 = vld [vmem:[%s35442_s22 + $0x310] sm:$0xff]  ;;  %v2638_v41 = vcombine.high %v302_v34, %v302_v34  ;;  %v572_v42 = vld [vmem:[%s35442_s22 + $0x340] sm:$0xff] }
 0x11f   : > { %33396 = vmatpush1.bf16.xpose.msra.mxu1 %v33395_v8  ;;  %9092 = vmatprep.mubr.f32.mxu0 %v2551_v9  ;;  %v1334_v8 = vld [vmem:[%s35442_s22 + $0x1b10] sm:$0x3]  ;;  %v2611_v9 = vrot.slane %v300_v61, %v35466_v25  ;;  %v33439_v53 = vpack.c.bf16 %v1340_v43, %v572_v42  ;;  %v1344_v61 = vld [vmem:[%s35442_s22 + $0x1b60] sm:$0x3] }
 0x120   : > { %33398 = vmatprep.subr.bf16.mxu0 %v33397_v10  ;;  %9162 = vmatprep.mubr.f32.mxu1 %v2552_v11  ;;  %v569_v10 = vld [vmem:[%s35442_s22 + $0x328] sm:$0xff]  ;;  %v33427_v17 = vpack.c.bf16 %v1334_v8, %v566_v7 }
 0x121   : > { %33402 = vmatprep.subr.bf16.mxu1 %v33401_v12  ;;  %v1337_v11 = vld [vmem:[%s35442_s22 + $0x1b28] sm:$0x3]  ;;  %v2618_v12 = vrot.slane %v2604_v4, %v35466_v25  ;;  %v583_v4 = vld [vmem:[%s35442_s22 + $0x398] sm:$0xff] }
 0x122   : > { %v33429_v19 = vpack.c.bf16 %v1337_v11, %v569_v10 }
 0x123   : > { %v2620_v20 = vcombine.high %v2618_v12, %v2618_v12 }
 0x125   : > { %9093 = vmatmul.mubr.f32.vlgmr.msra.gmra.mrb[40].mxu0 %v2543_v0  ;;  %v2602_v0 = vcombine.high %v2594_v55, %v2594_v55 }
 0x126   : > { %9163 = vmatmul.mubr.f32.vlgmr.msra.gmra.mrb[40].mxu1 %v2550_v3  ;;  %33400 = vmatpush1.bf16.xpose.msra.mxu0 %v33399_v26  ;;  %v33425_v3 = vpack.c.bf16 %v1335_v60, %v567_v59  ;;  %v570_v26 = vld [vmem:[%s35442_s22 + $0x330] sm:$0xff]  ;;  %v2655_v59 = vcombine.high %v303_v52, %v303_v52  ;;  %v576_v60 = vld [vmem:[%s35442_s22 + $0x360] sm:$0xff] }
 0x127   : > { %33404 = vmatpush1.bf16.xpose.msra.mxu1 %v33403_v27  ;;  %9232 = vmatprep.mubr.f32.mxu0 %v2568_v28  ;;  %v1338_v27 = vld [vmem:[%s35442_s22 + $0x1b30] sm:$0x3]  ;;  %v2628_v28 = vrot.slane %v301_v15, %v35466_v25  ;;  %v33447_v7 = vpack.c.bf16 %v1344_v61, %v576_v60  ;;  %v1348_v15 = vld [vmem:[%s35442_s22 + $0x1b80] sm:$0x3] }
 0x128   : > { %33406 = vmatprep.subr.bf16.mxu0 %v33405_v29  ;;  %9302 = vmatprep.mubr.f32.mxu1 %v2569_v30  ;;  %v573_v29 = vld [vmem:[%s35442_s22 + $0x348] sm:$0xff]  ;;  %v33435_v36 = vpack.c.bf16 %v1338_v27, %v570_v26 }
 0x129   : > { %33410 = vmatprep.subr.bf16.mxu1 %v33409_v31  ;;  %v1341_v30 = vld [vmem:[%s35442_s22 + $0x1b48] sm:$0x3]  ;;  %v2635_v31 = vrot.slane %v2621_v22, %v35466_v25 }
 0x12a   : > { %v33437_v38 = vpack.c.bf16 %v1341_v30, %v573_v29  ;;  %v1353_v22 = vld [vmem:[%s35442_s22 + $0x1ba8] sm:$0x3]  ;;  %v1355_v29 = vld [vmem:[%s35442_s22 + $0x1bb8] sm:$0x3] }
 0x12b   : > { %v2637_v39 = vcombine.high %v2635_v31, %v2635_v31  ;;  %v305_v30 = vld [vmem:[%s35435_s12 + $0xe8] sm:$0xff] }
 0x12c   : > { %v2696_v42 = vrot.slane %v305_v30, %v35466_v25 }
 0x12d   : > { %9233 = vmatmul.mubr.f32.vlgmr.msra.gmra.mrb[42].mxu0 %v2560_v18  ;;  %v2619_v18 = vcombine.high %v2611_v9, %v2611_v9 }
 0x12e   : > { %9303 = vmatmul.mubr.f32.vlgmr.msra.gmra.mrb[42].mxu1 %v2567_v21  ;;  %33408 = vmatpush1.bf16.xpose.msra.mxu0 %v33407_v44  ;;  %v33433_v21 = vpack.c.bf16 %v1339_v14, %v571_v13  ;;  %v574_v44 = vld [vmem:[%s35442_s22 + $0x350] sm:$0xff]  ;;  %v2672_v13 = vcombine.high %v304_v6, %v304_v6  ;;  %v580_v14 = vld [vmem:[%s35442_s22 + $0x380] sm:$0xff] }
 0x12f   : > { %33412 = vmatpush1.bf16.xpose.msra.mxu1 %v33411_v45  ;;  %9372 = vmatprep.mubr.f32.mxu0 %v2585_v46  ;;  %v1342_v45 = vld [vmem:[%s35442_s22 + $0x1b50] sm:$0x3]  ;;  %v2645_v46 = vrot.slane %v302_v34, %v35466_v25 }
 0x130   : > { %33414 = vmatprep.subr.bf16.mxu0 %v33413_v47  ;;  %9442 = vmatprep.mubr.f32.mxu1 %v2586_v48  ;;  %v577_v47 = vld [vmem:[%s35442_s22 + $0x368] sm:$0xff]  ;;  %v33443_v54 = vpack.c.bf16 %v1342_v45, %v574_v44  ;;  %v2686_v23 = vrot.slane %v2672_v13, %v35466_v25  ;;  %v307_v13 = vld [vmem:[%s35435_s12 + $0xf8] sm:$0xff] }
 0x131   : > { %33418 = vmatprep.subr.bf16.mxu1 %v33417_v49  ;;  %v1345_v48 = vld [vmem:[%s35442_s22 + $0x1b68] sm:$0x3]  ;;  %v2652_v49 = vrot.slane %v2638_v41, %v35466_v25  ;;  %v1354_v41 = vld [vmem:[%s35442_s22 + $0x1bb0] sm:$0x3] }
 0x132   : > { %v33445_v56 = vpack.c.bf16 %v1345_v48, %v577_v47  ;;  %v589_v45 = vld [vmem:[%s35442_s22 + $0x3c8] sm:$0xff] }
 0x133   : > { %v2654_v57 = vcombine.high %v2652_v49, %v2652_v49 }
 0x135   : > { %9373 = vmatmul.mubr.f32.vlgmr.msra.gmra.mrb[44].mxu0 %v2577_v37  ;;  %v2636_v37 = vcombine.high %v2628_v28, %v2628_v28 }
 0x136   : > { %9443 = vmatmul.mubr.f32.vlgmr.msra.gmra.mrb[44].mxu1 %v2584_v40  ;;  %33416 = vmatpush1.bf16.xpose.msra.mxu0 %v33415_v62  ;;  %v33441_v40 = vpack.c.bf16 %v1343_v33, %v575_v32  ;;  %v578_v62 = vld [vmem:[%s35442_s22 + $0x370] sm:$0xff] }
 0x137   : > { %33420 = vmatpush1.bf16.xpose.msra.mxu1 %v33419_v63  ;;  %9512 = vmatprep.mubr.f32.mxu0 %v2602_v0  ;;  %v1346_v63 = vld [vmem:[%s35442_s22 + $0x1b70] sm:$0x3]  ;;  %v2662_v0 = vrot.slane %v303_v52, %v35466_v25  ;;  %v1359_v52 = vld [vmem:[%s35442_s22 + $0x1bd8] sm:$0x3] }
 0x138   : > { %33422 = vmatprep.subr.bf16.mxu0 %v33421_v1  ;;  %9582 = vmatprep.mubr.f32.mxu1 %v2603_v2  ;;  %v581_v1 = vld [vmem:[%s35442_s22 + $0x388] sm:$0xff]  ;;  %v33451_v8 = vpack.c.bf16 %v1346_v63, %v578_v62  ;;  %v588_v62 = vld [vmem:[%s35442_s22 + $0x3c0] sm:$0xff] }
 0x139   : > { %33426 = vmatprep.subr.bf16.mxu1 %v33425_v3  ;;  %v1349_v2 = vld [vmem:[%s35442_s22 + $0x1b88] sm:$0x3]  ;;  %v2669_v3 = vrot.slane %v2655_v59, %v35466_v25  ;;  %v1356_v63 = vld [vmem:[%s35442_s22 + $0x1bc0] sm:$0x3] }
 0x13a   : > { %v33453_v10 = vpack.c.bf16 %v1349_v2, %v581_v1  ;;  %v1358_v1 = vld [vmem:[%s35442_s22 + $0x1bd0] sm:$0x3] }
 0x13b   : > { %v2671_v11 = vcombine.high %v2669_v3, %v2669_v3 }
 0x13d   : > { %9513 = vmatmul.mubr.f32.vlgmr.msra.gmra.mrb[46].mxu0 %v2594_v55  ;;  %v2653_v55 = vcombine.high %v2645_v46, %v2645_v46 }
 0x13e   : > { %9583 = vmatmul.mubr.f32.vlgmr.msra.gmra.mrb[46].mxu1 %v2601_v58  ;;  %33424 = vmatpush1.bf16.xpose.msra.mxu0 %v33423_v16  ;;  %v33449_v58 = vpack.c.bf16 %v1347_v51, %v579_v50  ;;  %v582_v16 = vld [vmem:[%s35442_s22 + $0x390] sm:$0xff]  ;;  %v591_v51 = vld [vmem:[%s35442_s22 + $0x3d8] sm:$0xff] }
 0x13f   : > { %33428 = vmatpush1.bf16.xpose.msra.mxu1 %v33427_v17  ;;  %9652 = vmatprep.mubr.f32.mxu0 %v2619_v18  ;;  %v1350_v17 = vld [vmem:[%s35442_s22 + $0x1b90] sm:$0x3]  ;;  %v2679_v18 = vrot.slane %v304_v6, %v35466_v25  ;;  %v33473_v60 = vpack.c.bf16 %v1359_v52, %v591_v51  ;;  %v1361_v6 = vld [vmem:[%s35442_s22 + $0x1be8] sm:$0x3] }
 0x140   : > { %33430 = vmatprep.subr.bf16.mxu0 %v33429_v19  ;;  %9722 = vmatprep.mubr.f32.mxu1 %v2620_v20  ;;  %v33459_v32 = vpack.c.bf16 %v1350_v17, %v582_v16 }
 0x141   : > { %33434 = vmatprep.subr.bf16.mxu1 %v33433_v21  ;;  %v585_v21 = vld [vmem:[%s35442_s22 + $0x3a8] sm:$0xff]  ;;  %v2687_v33 = vcombine.high %v2679_v18, %v2679_v18 }
 0x142   : > { %v33461_v34 = vpack.c.bf16 %v1353_v22, %v585_v21  ;;  %v2723_v21 = vcombine.high %v307_v13, %v307_v13  ;;  %v592_v22 = vld [vmem:[%s35442_s22 + $0x3e0] sm:$0xff] }
 0x145   : > { %9653 = vmatmul.mubr.f32.vlgmr.msra.gmra.mrb[48].mxu0 %v2611_v9  ;;  %v2670_v9 = vcombine.high %v2662_v0, %v2662_v0 }
 0x146   : > { %9723 = vmatmul.mubr.f32.vlgmr.msra.gmra.mrb[48].mxu1 %v2618_v12  ;;  %33432 = vmatpush1.bf16.xpose.msra.mxu0 %v33431_v35  ;;  %v33457_v12 = vpack.c.bf16 %v1351_v5, %v583_v4  ;;  %v2688_v35 = vcombine.high %v2686_v23, %v2686_v23  ;;  %v593_v5 = vld [vmem:[%s35442_s22 + $0x3e8] sm:$0xff] }
 0x147   : > { %33436 = vmatpush1.bf16.xpose.msra.mxu1 %v33435_v36  ;;  %9792 = vmatprep.mubr.f32.mxu0 %v2636_v37  ;;  %v2689_v37 = vcombine.high %v305_v30, %v305_v30  ;;  %v597_v30 = vld [vmem:[%s35442_s22 + $0x408] sm:$0xff] }
 0x148   : > { %33438 = vmatprep.subr.bf16.mxu0 %v33437_v38  ;;  %9862 = vmatprep.mubr.f32.mxu1 %v2637_v39  ;;  %v584_v38 = vld [vmem:[%s35442_s22 + $0x3a0] sm:$0xff] }
 0x149   : > { %33442 = vmatprep.subr.bf16.mxu1 %v33441_v40  ;;  %v1352_v39 = vld [vmem:[%s35442_s22 + $0x1ba0] sm:$0x3]  ;;  %v586_v40 = vld [vmem:[%s35442_s22 + $0x3b0] sm:$0xff]  ;;  %v2703_v47 = vrot.slane %v2689_v37, %v35466_v25  ;;  %v1367_v37 = vld [vmem:[%s35442_s22 + $0x1c18] sm:$0x3] }
 0x14b   : > { %v2705_v59 = vcombine.high %v2703_v47, %v2703_v47 }
 0x14d   : > { %9793 = vmatmul.mubr.f32.vlgmr.msra.gmra.mrb[50].mxu0 %v2628_v28  ;;  %v587_v28 = vld [vmem:[%s35442_s22 + $0x3b8] sm:$0xff] }
 0x14e   : > { %9863 = vmatmul.mubr.f32.vlgmr.msra.gmra.mrb[50].mxu1 %v2635_v31  ;;  %33440 = vmatpush1.bf16.xpose.msra.mxu0 %v33439_v53  ;;  %v33455_v31 = vpack.c.bf16 %v1348_v15, %v580_v14  ;;  %v33465_v36 = vpack.c.bf16 %v1355_v29, %v587_v28  ;;  %v306_v53 = vld [vmem:[%s35435_s12 + $0xf0] sm:$0xff]  ;;  %v33471_v14 = vpack.c.bf16 %v1356_v63, %v588_v62  ;;  %v309_v62 = vld [vmem:[%s35435_s12 + $0x108] sm:$0xff] }
 0x14f   : > { %33444 = vmatpush1.bf16.xpose.msra.mxu1 %v33443_v54  ;;  %9932 = vmatprep.mubr.f32.mxu0 %v2653_v55  ;;  %v33463_v54 = vpack.c.bf16 %v1352_v39, %v584_v38  ;;  %v33467_v55 = vpack.c.bf16 %v1354_v41, %v586_v40  ;;  %v2706_v61 = vcombine.high %v306_v53, %v306_v53  ;;  %v308_v38 = vld [vmem:[%s35435_s12 + $0x100] sm:$0xff] }
 0x150   : > { %33446 = vmatprep.subr.bf16.mxu0 %v33445_v56  ;;  %10002 = vmatprep.mubr.f32.mxu1 %v2654_v57  ;;  %v2704_v57 = vcombine.high %v2696_v42, %v2696_v42  ;;  %v2713_v2 = vrot.slane %v306_v53, %v35466_v25  ;;  %v2747_v51 = vrot.slane %v308_v38, %v35466_v25 }
 0x151   : > { %33450 = vmatprep.subr.bf16.mxu1 %v33449_v58 }
 0x152   : > { %v2721_v17 = vcombine.high %v2713_v2, %v2713_v2 }
 0x155   : > { %9933 = vmatmul.mubr.f32.vlgmr.msra.gmra.mrb[52].mxu0 %v2645_v46  ;;  %v1357_v46 = vld [vmem:[%s35442_s22 + $0x1bc8] sm:$0x3] }
 0x156   : > { %10003 = vmatmul.mubr.f32.vlgmr.msra.gmra.mrb[52].mxu1 %v2652_v49  ;;  %33448 = vmatpush1.bf16.xpose.msra.mxu0 %v33447_v7  ;;  %v33469_v58 = vpack.c.bf16 %v1357_v46, %v589_v45  ;;  %v2720_v7 = vrot.slane %v2706_v61, %v35466_v25  ;;  %v2740_v46 = vcombine.high %v308_v38, %v308_v38  ;;  %v1371_v61 = vld [vmem:[%s35442_s22 + $0x1c38] sm:$0x3] }
 0x157   : > { %33452 = vmatpush1.bf16.xpose.msra.mxu1 %v33451_v8  ;;  %10072 = vmatprep.mubr.f32.mxu0 %v2670_v9 }
 0x158   : > { %33454 = vmatprep.subr.bf16.mxu0 %v33453_v10  ;;  %v6294_v19 = vpop.f32.mrb[0].mxu0  ;;  %10142 = vmatprep.mubr.f32.mxu1 %v2671_v11  ;;  %v595_v11 = vld [vmem:[%s35442_s22 + $0x3f8] sm:$0xff] }
 0x159   : > { %v6364_v20 = vpop.f32.mrb[0].mxu1  ;;  %33458 = vmatprep.subr.bf16.mxu1 %v33457_v12  ;;  %v6296_v26 = vpop.f32.mrb[1].mxu0  ;;  %v1363_v12 = vld [vmem:[%s35442_s22 + $0x1bf8] sm:$0x3] }
 0x15a   : > { %v6365_v24 = vadd.f32 %v6364_v20, %v6294_v19  ;;  %v6366_v27 = vpop.f32.mrb[1].mxu1  ;;  %v2722_v19 = vcombine.high %v2720_v7, %v2720_v7  ;;  %v33481_v20 = vpack.c.bf16 %v1363_v12, %v595_v11  ;;  %v1362_v26 = vld [vmem:[%s35442_s22 + $0x1bf0] sm:$0x3]  ;;  %v2764_v11 = vrot.slane %v309_v62, %v35466_v25 }
 0x15b   : > { %v2730_v27 = vrot.slane %v307_v13, %v35466_v25 }
 0x15d   : > { %10073 = vmatmul.mubr.f32.vlgmr.msra.gmra.mrb[54].mxu0 %v2662_v0  ;;  %v590_v0 = vld [vmem:[%s35442_s22 + $0x3d0] sm:$0xff] }
 0x15e   : > { %10143 = vmatmul.mubr.f32.vlgmr.msra.gmra.mrb[54].mxu1 %v2669_v3  ;;  %33456 = vmatpush1.bf16.xpose.msra.mxu0 %v33455_v31  ;;  %v33475_v15 = vpack.c.bf16 %v1358_v1, %v590_v0  ;;  %v1365_v31 = vld [vmem:[%s35442_s22 + $0x1c08] sm:$0x3] }
 0x15f   : > { %33460 = vmatpush1.bf16.xpose.msra.mxu1 %v33459_v32  ;;  %10212 = vmatprep.mubr.f32.mxu0 %v2687_v33  ;;  %v2737_v32 = vrot.slane %v2723_v21, %v35466_v25  ;;  %v1375_v21 = vld [vmem:[%s35442_s22 + $0x1c58] sm:$0x3] }
 0x160   : > { %33462 = vmatprep.subr.bf16.mxu0 %v33461_v34  ;;  %v6434_v43 = vpop.f32.mrb[2].mxu0  ;;  %10282 = vmatprep.mubr.f32.mxu1 %v2688_v35 }
 0x161   : > { %v6504_v44 = vpop.f32.mrb[2].mxu1  ;;  %33466 = vmatprep.subr.bf16.mxu1 %v33465_v36  ;;  %v6435_v48 = vadd.f32 %v6434_v43, %v6365_v24  ;;  %v6436_v49 = vpop.f32.mrb[3].mxu0  ;;  %v594_v24 = vld [vmem:[%s35442_s22 + $0x3f0] sm:$0xff]  ;;  %v599_v36 = vld [vmem:[%s35442_s22 + $0x418] sm:$0xff]  ;;  %v33485_v43 = vpack.c.bf16 %v1365_v31, %v597_v30 }
 0x162   : > { %v6506_v50 = vpop.f32.mrb[3].mxu1  ;;  %v33483_v40 = vpack.c.bf16 %v1362_v26, %v594_v24  ;;  %v33489_v45 = vpack.c.bf16 %v1367_v37, %v599_v36  ;;  %v598_v49 = vld [vmem:[%s35442_s22 + $0x410] sm:$0xff] }
 0x163   : > { %v6505_v56 = vadd.f32 %v6504_v44, %v6435_v48  ;;  %v2739_v44 = vcombine.high %v2737_v32, %v2737_v32  ;;  %v1364_v48 = vld [vmem:[%s35442_s22 + $0x1c00] sm:$0x3]  ;;  %v1366_v50 = vld [vmem:[%s35442_s22 + $0x1c10] sm:$0x3] }
 0x164   : > { %v33491_v0 = vpack.c.bf16 %v1366_v50, %v598_v49 }
 0x165   : > { %10213 = vmatmul.mubr.f32.vlgmr.msra.gmra.mrb[56].mxu0 %v2679_v18  ;;  %v33477_v18 = vpack.c.bf16 %v1361_v6, %v593_v5  ;;  %v2757_v6 = vcombine.high %v309_v62, %v309_v62 }
 0x166   : > { %10283 = vmatmul.mubr.f32.vlgmr.msra.gmra.mrb[56].mxu1 %v2686_v23  ;;  %33464 = vmatpush1.bf16.xpose.msra.mxu0 %v33463_v54  ;;  %v1360_v23 = vld [vmem:[%s35442_s22 + $0x1be0] sm:$0x3]  ;;  %v601_v54 = vld [vmem:[%s35442_s22 + $0x428] sm:$0xff] }
 0x167   : > { %33468 = vmatpush1.bf16.xpose.msra.mxu1 %v33467_v55  ;;  %10352 = vmatprep.mubr.f32.mxu0 %v2704_v57  ;;  %v33479_v39 = vpack.c.bf16 %v1360_v23, %v592_v22  ;;  %v1369_v55 = vld [vmem:[%s35442_s22 + $0x1c28] sm:$0x3]  ;;  %v310_v22 = vld [vmem:[%s35435_s12 + $0x110] sm:$0xff] }
 0x168   : > { %33470 = vmatprep.subr.bf16.mxu0 %v33469_v58  ;;  %v6574_v3 = vpop.f32.mrb[4].mxu0  ;;  %10422 = vmatprep.mubr.f32.mxu1 %v2705_v59  ;;  %v2774_v31 = vcombine.high %v310_v22, %v310_v22  ;;  %v2781_v36 = vrot.slane %v310_v22, %v35466_v25 }
 0x169   : > { %v6644_v4 = vpop.f32.mrb[4].mxu1  ;;  %33474 = vmatprep.subr.bf16.mxu1 %v33473_v60  ;;  %v6575_v8 = vadd.f32 %v6574_v3, %v6505_v56  ;;  %v6576_v9 = vpop.f32.mrb[5].mxu0  ;;  %v2754_v56 = vrot.slane %v2740_v46, %v35466_v25  ;;  %v603_v60 = vld [vmem:[%s35442_s22 + $0x438] sm:$0xff]  ;;  %v33493_v3 = vpack.c.bf16 %v1369_v55, %v601_v54 }
 0x16a   : > { %v6646_v10 = vpop.f32.mrb[5].mxu1  ;;  %v33497_v5 = vpack.c.bf16 %v1371_v61, %v603_v60  ;;  %v602_v9 = vld [vmem:[%s35442_s22 + $0x430] sm:$0xff]  ;;  %v1379_v46 = vld [vmem:[%s35442_s22 + $0x1c78] sm:$0x3] }
 0x16b   : > { %v6645_v16 = vadd.f32 %v6644_v4, %v6575_v8  ;;  %v2756_v4 = vcombine.high %v2754_v56, %v2754_v56  ;;  %v1368_v8 = vld [vmem:[%s35442_s22 + $0x1c20] sm:$0x3]  ;;  %v1370_v10 = vld [vmem:[%s35442_s22 + $0x1c30] sm:$0x3] }
 0x16c   : > { %v33499_v24 = vpack.c.bf16 %v1370_v10, %v602_v9 }
 0x16d   : > { %10353 = vmatmul.mubr.f32.vlgmr.msra.gmra.mrb[58].mxu0 %v2696_v42  ;;  %v2738_v42 = vcombine.high %v2730_v27, %v2730_v27 }
 0x16e   : > { %10423 = vmatmul.mubr.f32.vlgmr.msra.gmra.mrb[58].mxu1 %v2703_v47  ;;  %33472 = vmatpush1.bf16.xpose.msra.mxu0 %v33471_v14  ;;  %v596_v47 = vld [vmem:[%s35442_s22 + $0x400] sm:$0xff]  ;;  %v605_v14 = vld [vmem:[%s35442_s22 + $0x448] sm:$0xff] }
 0x16f   : > { %33476 = vmatpush1.bf16.xpose.msra.mxu1 %v33475_v15  ;;  %10492 = vmatprep.mubr.f32.mxu0 %v2721_v17  ;;  %v33487_v63 = vpack.c.bf16 %v1364_v48, %v596_v47  ;;  %v1373_v15 = vld [vmem:[%s35442_s22 + $0x1c48] sm:$0x3]  ;;  %v311_v47 = vld [vmem:[%s35435_s12 + $0x118] sm:$0xff] }
 0x170   : > { %33478 = vmatprep.subr.bf16.mxu0 %v33477_v18  ;;  %v6714_v28 = vpop.f32.mrb[6].mxu0  ;;  %10562 = vmatprep.mubr.f32.mxu1 %v2722_v19  ;;  %v2791_v55 = vcombine.high %v311_v47, %v311_v47  ;;  %v2798_v60 = vrot.slane %v311_v47, %v35466_v25 }
 0x171   : > { %v6784_v29 = vpop.f32.mrb[6].mxu1  ;;  %33482 = vmatprep.subr.bf16.mxu1 %v33481_v20  ;;  %v6715_v33 = vadd.f32 %v6714_v28, %v6645_v16  ;;  %v6716_v34 = vpop.f32.mrb[7].mxu0  ;;  %v2771_v16 = vrot.slane %v2757_v6, %v35466_v25  ;;  %v607_v20 = vld [vmem:[%s35442_s22 + $0x458] sm:$0xff]  ;;  %v33501_v28 = vpack.c.bf16 %v1373_v15, %v605_v14 }
 0x172   : > { %v6786_v35 = vpop.f32.mrb[7].mxu1  ;;  %v33505_v30 = vpack.c.bf16 %v1375_v21, %v607_v20  ;;  %v606_v34 = vld [vmem:[%s35442_s22 + $0x450] sm:$0xff]  ;;  %v1383_v6 = vld [vmem:[%s35442_s22 + $0x1c98] sm:$0x3] }
 0x173   : > { %v6785_v41 = vadd.f32 %v6784_v29, %v6715_v33  ;;  %v2773_v29 = vcombine.high %v2771_v16, %v2771_v16  ;;  %v1372_v33 = vld [vmem:[%s35442_s22 + $0x1c40] sm:$0x3]  ;;  %v1374_v35 = vld [vmem:[%s35442_s22 + $0x1c50] sm:$0x3] }
 0x174   : > { %v33507_v49 = vpack.c.bf16 %v1374_v35, %v606_v34 }
 0x175   : > { %10493 = vmatmul.mubr.f32.vlgmr.msra.gmra.mrb[60].mxu0 %v2713_v2  ;;  %v2755_v2 = vcombine.high %v2747_v51, %v2747_v51 }
 0x176   : > { %10563 = vmatmul.mubr.f32.vlgmr.msra.gmra.mrb[60].mxu1 %v2720_v7  ;;  %33480 = vmatpush1.bf16.xpose.msra.mxu0 %v33479_v39  ;;  %v600_v7 = vld [vmem:[%s35442_s22 + $0x420] sm:$0xff]  ;;  %v609_v39 = vld [vmem:[%s35442_s22 + $0x468] sm:$0xff] }
 0x177   : > { %33484 = vmatpush1.bf16.xpose.msra.mxu1 %v33483_v40  ;;  %10632 = vmatprep.mubr.f32.mxu0 %v2738_v42  ;;  %v33495_v23 = vpack.c.bf16 %v1368_v8, %v600_v7  ;;  %v1377_v40 = vld [vmem:[%s35442_s22 + $0x1c68] sm:$0x3]  ;;  %v312_v7 = vld [vmem:[%s35435_s12 + $0x120] sm:$0xff] }
 0x178   : > { %33486 = vmatprep.subr.bf16.mxu0 %v33485_v43  ;;  %v6854_v52 = vpop.f32.mrb[8].mxu0  ;;  %10702 = vmatprep.mubr.f32.mxu1 %v2739_v44  ;;  %v2808_v15 = vcombine.high %v312_v7, %v312_v7  ;;  %v2815_v20 = vrot.slane %v312_v7, %v35466_v25 }
 0x179   : > { %v6924_v53 = vpop.f32.mrb[8].mxu1  ;;  %33490 = vmatprep.subr.bf16.mxu1 %v33489_v45  ;;  %v6855_v57 = vadd.f32 %v6854_v52, %v6785_v41  ;;  %v6856_v58 = vpop.f32.mrb[9].mxu0  ;;  %v2788_v41 = vrot.slane %v2774_v31, %v35466_v25  ;;  %v611_v45 = vld [vmem:[%s35442_s22 + $0x478] sm:$0xff]  ;;  %v33509_v52 = vpack.c.bf16 %v1377_v40, %v609_v39 }
 0x17a   : > { %v6926_v59 = vpop.f32.mrb[9].mxu1  ;;  %v33513_v54 = vpack.c.bf16 %v1379_v46, %v611_v45  ;;  %v610_v58 = vld [vmem:[%s35442_s22 + $0x470] sm:$0xff]  ;;  %v1387_v31 = vld [vmem:[%s35442_s22 + $0x1cb8] sm:$0x3] }
 0x17b   : > { %v6925_v1 = vadd.f32 %v6924_v53, %v6855_v57  ;;  %v2790_v53 = vcombine.high %v2788_v41, %v2788_v41  ;;  %v1376_v57 = vld [vmem:[%s35442_s22 + $0x1c60] sm:$0x3]  ;;  %v1378_v59 = vld [vmem:[%s35442_s22 + $0x1c70] sm:$0x3] }
 0x17c   : > { %v33515_v9 = vpack.c.bf16 %v1378_v59, %v610_v58 }
 0x17d   : > { %10633 = vmatmul.mubr.f32.vlgmr.msra.gmra.mrb[62].mxu0 %v2730_v27  ;;  %v2772_v27 = vcombine.high %v2764_v11, %v2764_v11 }
 0x17e   : > { %10703 = vmatmul.mubr.f32.vlgmr.msra.gmra.mrb[62].mxu1 %v2737_v32  ;;  %33488 = vmatpush1.bf16.xpose.msra.mxu0 %v33487_v63  ;;  %v604_v32 = vld [vmem:[%s35442_s22 + $0x440] sm:$0xff]  ;;  %v613_v63 = vld [vmem:[%s35442_s22 + $0x488] sm:$0xff] }
 0x17f   : > { %33492 = vmatpush1.bf16.xpose.msra.mxu1 %v33491_v0  ;;  %10772 = vmatprep.mubr.f32.mxu0 %v2755_v2  ;;  %v33503_v48 = vpack.c.bf16 %v1372_v33, %v604_v32  ;;  %v1381_v0 = vld [vmem:[%s35442_s22 + $0x1c88] sm:$0x3] }
 0x180   : > { %33494 = vmatprep.subr.bf16.mxu0 %v33493_v3  ;;  %v6994_v12 = vpop.f32.mrb[10].mxu0  ;;  %10842 = vmatprep.mubr.f32.mxu1 %v2756_v4  ;;  %v313_v32 = vld [vmem:[%s35435_s12 + $0x128] sm:$0xff] }
 0x181   : > { %v7064_v13 = vpop.f32.mrb[10].mxu1  ;;  %33498 = vmatprep.subr.bf16.mxu1 %v33497_v5  ;;  %v6995_v17 = vadd.f32 %v6994_v12, %v6925_v1  ;;  %v6996_v18 = vpop.f32.mrb[11].mxu0  ;;  %v2805_v1 = vrot.slane %v2791_v55, %v35466_v25  ;;  %v615_v5 = vld [vmem:[%s35442_s22 + $0x498] sm:$0xff]  ;;  %v33517_v12 = vpack.c.bf16 %v1381_v0, %v613_v63  ;;  %v2825_v40 = vcombine.high %v313_v32, %v313_v32 }
 0x182   : > { %v7066_v19 = vpop.f32.mrb[11].mxu1  ;;  %v33521_v14 = vpack.c.bf16 %v1383_v6, %v615_v5  ;;  %v614_v18 = vld [vmem:[%s35442_s22 + $0x490] sm:$0xff]  ;;  %v2832_v45 = vrot.slane %v313_v32, %v35466_v25  ;;  %v1391_v55 = vld [vmem:[%s35442_s22 + $0x1cd8] sm:$0x3] }
 0x183   : > { %v7065_v26 = vadd.f32 %v7064_v13, %v6995_v17  ;;  %v2807_v13 = vcombine.high %v2805_v1, %v2805_v1  ;;  %v1380_v17 = vld [vmem:[%s35442_s22 + $0x1c80] sm:$0x3]  ;;  %v1382_v19 = vld [vmem:[%s35442_s22 + $0x1c90] sm:$0x3] }
 0x184   : > { %v33523_v34 = vpack.c.bf16 %v1382_v19, %v614_v18 }
 0x185   : > { %10773 = vmatmul.mubr.f32.vlgmr.msra.gmra.mrb[64].mxu0 %v2747_v51  ;;  %v2789_v51 = vcombine.high %v2781_v36, %v2781_v36 }
 0x186   : > { %10843 = vmatmul.mubr.f32.vlgmr.msra.gmra.mrb[64].mxu1 %v2754_v56  ;;  %33496 = vmatpush1.bf16.xpose.msra.mxu0 %v33495_v23  ;;  %v608_v56 = vld [vmem:[%s35442_s22 + $0x460] sm:$0xff]  ;;  %v617_v23 = vld [vmem:[%s35442_s22 + $0x4a8] sm:$0xff] }
 0x187   : > { %33500 = vmatpush1.bf16.xpose.msra.mxu1 %v33499_v24  ;;  %10912 = vmatprep.mubr.f32.mxu0 %v2772_v27  ;;  %v33511_v8 = vpack.c.bf16 %v1376_v57, %v608_v56  ;;  %v1385_v24 = vld [vmem:[%s35442_s22 + $0x1ca8] sm:$0x3]  ;;  %v314_v56 = vld [vmem:[%s35435_s12 + $0x130] sm:$0xff] }
 0x188   : > { %33502 = vmatprep.subr.bf16.mxu0 %v33501_v28  ;;  %v7134_v37 = vpop.f32.mrb[12].mxu0  ;;  %10982 = vmatprep.mubr.f32.mxu1 %v2773_v29  ;;  %v2842_v0 = vcombine.high %v314_v56, %v314_v56  ;;  %v2849_v5 = vrot.slane %v314_v56, %v35466_v25 }
 0x189   : > { %v7204_v38 = vpop.f32.mrb[12].mxu1  ;;  %33506 = vmatprep.subr.bf16.mxu1 %v33505_v30  ;;  %v7135_v42 = vadd.f32 %v7134_v37, %v7065_v26  ;;  %v7136_v43 = vpop.f32.mrb[13].mxu0  ;;  %v2822_v26 = vrot.slane %v2808_v15, %v35466_v25  ;;  %v619_v30 = vld [vmem:[%s35442_s22 + $0x4b8] sm:$0xff]  ;;  %v33525_v37 = vpack.c.bf16 %v1385_v24, %v617_v23 }
 0x18a   : > { %v7206_v44 = vpop.f32.mrb[13].mxu1  ;;  %v33529_v39 = vpack.c.bf16 %v1387_v31, %v619_v30  ;;  %v618_v43 = vld [vmem:[%s35442_s22 + $0x4b0] sm:$0xff]  ;;  %v1395_v15 = vld [vmem:[%s35442_s22 + $0x1cf8] sm:$0x3] }
 0x18b   : > { %v7205_v50 = vadd.f32 %v7204_v38, %v7135_v42  ;;  %v2824_v38 = vcombine.high %v2822_v26, %v2822_v26  ;;  %v1384_v42 = vld [vmem:[%s35442_s22 + $0x1ca0] sm:$0x3]  ;;  %v1386_v44 = vld [vmem:[%s35442_s22 + $0x1cb0] sm:$0x3] }
 0x18c   : > { %v33531_v58 = vpack.c.bf16 %v1386_v44, %v618_v43 }
 0x18d   : > { %10913 = vmatmul.mubr.f32.vlgmr.msra.gmra.mrb[66].mxu0 %v2764_v11  ;;  %v2806_v11 = vcombine.high %v2798_v60, %v2798_v60 }
 0x18e   : > { %10983 = vmatmul.mubr.f32.vlgmr.msra.gmra.mrb[66].mxu1 %v2771_v16  ;;  %33504 = vmatpush1.bf16.xpose.msra.mxu0 %v33503_v48  ;;  %v612_v16 = vld [vmem:[%s35442_s22 + $0x480] sm:$0xff]  ;;  %v621_v48 = vld [vmem:[%s35442_s22 + $0x4c8] sm:$0xff] }
 0x18f   : > { %33508 = vmatpush1.bf16.xpose.msra.mxu1 %v33507_v49  ;;  %11052 = vmatprep.mubr.f32.mxu0 %v2789_v51  ;;  %v33519_v33 = vpack.c.bf16 %v1380_v17, %v612_v16  ;;  %v1389_v49 = vld [vmem:[%s35442_s22 + $0x1cc8] sm:$0x3]  ;;  %v315_v16 = vld [vmem:[%s35435_s12 + $0x138] sm:$0xff] }
 0x190   : > { %33510 = vmatprep.subr.bf16.mxu0 %v33509_v52  ;;  %v7274_v61 = vpop.f32.mrb[14].mxu0  ;;  %11122 = vmatprep.mubr.f32.mxu1 %v2790_v53  ;;  %v2859_v24 = vcombine.high %v315_v16, %v315_v16  ;;  %v2866_v30 = vrot.slane %v315_v16, %v35466_v25 }
 0x191   : > { %v7344_v62 = vpop.f32.mrb[14].mxu1  ;;  %33514 = vmatprep.subr.bf16.mxu1 %v33513_v54  ;;  %v7275_v2 = vadd.f32 %v7274_v61, %v7205_v50  ;;  %v7276_v3 = vpop.f32.mrb[15].mxu0  ;;  %v2839_v50 = vrot.slane %v2825_v40, %v35466_v25  ;;  %v623_v54 = vld [vmem:[%s35442_s22 + $0x4d8] sm:$0xff]  ;;  %v33533_v61 = vpack.c.bf16 %v1389_v49, %v621_v48 }
 0x192   : > { %v7346_v4 = vpop.f32.mrb[15].mxu1  ;;  %v33537_v63 = vpack.c.bf16 %v1391_v55, %v623_v54  ;;  %v622_v3 = vld [vmem:[%s35442_s22 + $0x4d0] sm:$0xff]  ;;  %v1399_v40 = vld [vmem:[%s35442_s22 + $0x1d18] sm:$0x3] }
 0x193   : > { %v7345_v10 = vadd.f32 %v7344_v62, %v7275_v2  ;;  %v2841_v62 = vcombine.high %v2839_v50, %v2839_v50  ;;  %v1388_v2 = vld [vmem:[%s35442_s22 + $0x1cc0] sm:$0x3]  ;;  %v1390_v4 = vld [vmem:[%s35442_s22 + $0x1cd0] sm:$0x3] }
 0x194   : > { %v33539_v18 = vpack.c.bf16 %v1390_v4, %v622_v3 }
 0x195   : > { %11053 = vmatmul.mubr.f32.vlgmr.msra.gmra.mrb[68].mxu0 %v2781_v36  ;;  %v2823_v36 = vcombine.high %v2815_v20, %v2815_v20 }
 0x196   : > { %11123 = vmatmul.mubr.f32.vlgmr.msra.gmra.mrb[68].mxu1 %v2788_v41  ;;  %33512 = vmatpush1.bf16.xpose.msra.mxu0 %v33511_v8  ;;  %v616_v41 = vld [vmem:[%s35442_s22 + $0x4a0] sm:$0xff]  ;;  %v625_v8 = vld [vmem:[%s35442_s22 + $0x4e8] sm:$0xff] }
 0x197   : > { %33516 = vmatpush1.bf16.xpose.msra.mxu1 %v33515_v9  ;;  %11192 = vmatprep.mubr.f32.mxu0 %v2806_v11  ;;  %v33527_v57 = vpack.c.bf16 %v1384_v42, %v616_v41  ;;  %v1393_v9 = vld [vmem:[%s35442_s22 + $0x1ce8] sm:$0x3]  ;;  %v316_v41 = vld [vmem:[%s35435_s12 + $0x140] sm:$0xff] }
 0x198   : > { %33518 = vmatprep.subr.bf16.mxu0 %v33517_v12  ;;  %v7414_v21 = vpop.f32.mrb[16].mxu0  ;;  %11262 = vmatprep.mubr.f32.mxu1 %v2807_v13  ;;  %v2876_v49 = vcombine.high %v316_v41, %v316_v41  ;;  %v2883_v54 = vrot.slane %v316_v41, %v35466_v25 }
 0x199   : > { %v7484_v22 = vpop.f32.mrb[16].mxu1  ;;  %33522 = vmatprep.subr.bf16.mxu1 %v33521_v14  ;;  %v7415_v27 = vadd.f32 %v7414_v21, %v7345_v10  ;;  %v7416_v28 = vpop.f32.mrb[17].mxu0  ;;  %v2856_v10 = vrot.slane %v2842_v0, %v35466_v25  ;;  %v627_v14 = vld [vmem:[%s35442_s22 + $0x4f8] sm:$0xff]  ;;  %v33541_v21 = vpack.c.bf16 %v1393_v9, %v625_v8 }
 0x19a   : > { %v7486_v29 = vpop.f32.mrb[17].mxu1  ;;  %v33545_v23 = vpack.c.bf16 %v1395_v15, %v627_v14  ;;  %v626_v28 = vld [vmem:[%s35442_s22 + $0x4f0] sm:$0xff]  ;;  %v1403_v0 = vld [vmem:[%s35442_s22 + $0x1d38] sm:$0x3] }
 0x19b   : > { %v7485_v35 = vadd.f32 %v7484_v22, %v7415_v27  ;;  %v2858_v22 = vcombine.high %v2856_v10, %v2856_v10  ;;  %v1392_v27 = vld [vmem:[%s35442_s22 + $0x1ce0] sm:$0x3]  ;;  %v1394_v29 = vld [vmem:[%s35442_s22 + $0x1cf0] sm:$0x3] }
 0x19c   : > { %v33547_v43 = vpack.c.bf16 %v1394_v29, %v626_v28 }
 0x19d   : > { %11193 = vmatmul.mubr.f32.vlgmr.msra.gmra.mrb[70].mxu0 %v2798_v60  ;;  %v2840_v60 = vcombine.high %v2832_v45, %v2832_v45 }
 0x19e   : > { %11263 = vmatmul.mubr.f32.vlgmr.msra.gmra.mrb[70].mxu1 %v2805_v1  ;;  %33520 = vmatpush1.bf16.xpose.msra.mxu0 %v33519_v33  ;;  %v620_v1 = vld [vmem:[%s35442_s22 + $0x4c0] sm:$0xff]  ;;  %v629_v33 = vld [vmem:[%s35442_s22 + $0x508] sm:$0xff] }
 0x19f   : > { %33524 = vmatpush1.bf16.xpose.msra.mxu1 %v33523_v34  ;;  %11332 = vmatprep.mubr.f32.mxu0 %v2823_v36  ;;  %v33535_v17 = vpack.c.bf16 %v1388_v2, %v620_v1  ;;  %v1397_v34 = vld [vmem:[%s35442_s22 + $0x1d08] sm:$0x3] }
 0x1a0   : > { %33526 = vmatprep.subr.bf16.mxu0 %v33525_v37  ;;  %v7554_v46 = vpop.f32.mrb[18].mxu0  ;;  %11402 = vmatprep.mubr.f32.mxu1 %v2824_v38  ;;  %v317_v1 = vld [vmem:[%s35435_s12 + $0x148] sm:$0xff] }
 0x1a1   : > { %v7624_v47 = vpop.f32.mrb[18].mxu1  ;;  %33530 = vmatprep.subr.bf16.mxu1 %v33529_v39  ;;  %v7555_v51 = vadd.f32 %v7554_v46, %v7485_v35  ;;  %v7556_v52 = vpop.f32.mrb[19].mxu0  ;;  %v2873_v35 = vrot.slane %v2859_v24, %v35466_v25  ;;  %v631_v39 = vld [vmem:[%s35442_s22 + $0x518] sm:$0xff]  ;;  %v33549_v46 = vpack.c.bf16 %v1397_v34, %v629_v33  ;;  %v2893_v9 = vcombine.high %v317_v1, %v317_v1 }
 0x1a2   : > { %v7626_v53 = vpop.f32.mrb[19].mxu1  ;;  %v33553_v48 = vpack.c.bf16 %v1399_v40, %v631_v39  ;;  %v630_v52 = vld [vmem:[%s35442_s22 + $0x510] sm:$0xff]  ;;  %v2900_v14 = vrot.slane %v317_v1, %v35466_v25  ;;  %v1407_v24 = vld [vmem:[%s35442_s22 + $0x1d58] sm:$0x3] }
 0x1a3   : > { %v7625_v59 = vadd.f32 %v7624_v47, %v7555_v51  ;;  %v2875_v47 = vcombine.high %v2873_v35, %v2873_v35  ;;  %v1396_v51 = vld [vmem:[%s35442_s22 + $0x1d00] sm:$0x3]  ;;  %v1398_v53 = vld [vmem:[%s35442_s22 + $0x1d10] sm:$0x3] }
 0x1a4   : > { %v33555_v3 = vpack.c.bf16 %v1398_v53, %v630_v52 }
 0x1a5   : > { %11333 = vmatmul.mubr.f32.vlgmr.msra.gmra.mrb[72].mxu0 %v2815_v20  ;;  %v2857_v20 = vcombine.high %v2849_v5, %v2849_v5 }
 0x1a6   : > { %11403 = vmatmul.mubr.f32.vlgmr.msra.gmra.mrb[72].mxu1 %v2822_v26  ;;  %33528 = vmatpush1.bf16.xpose.msra.mxu0 %v33527_v57  ;;  %v624_v26 = vld [vmem:[%s35442_s22 + $0x4e0] sm:$0xff]  ;;  %v633_v57 = vld [vmem:[%s35442_s22 + $0x528] sm:$0xff] }
 0x1a7   : > { %33532 = vmatpush1.bf16.xpose.msra.mxu1 %v33531_v58  ;;  %11472 = vmatprep.mubr.f32.mxu0 %v2840_v60  ;;  %v33543_v42 = vpack.c.bf16 %v1392_v27, %v624_v26  ;;  %v1401_v58 = vld [vmem:[%s35442_s22 + $0x1d28] sm:$0x3]  ;;  %v318_v26 = vld [vmem:[%s35435_s12 + $0x150] sm:$0xff] }
 0x1a8   : > { %33534 = vmatprep.subr.bf16.mxu0 %v33533_v61  ;;  %v7694_v6 = vpop.f32.mrb[20].mxu0  ;;  %11542 = vmatprep.mubr.f32.mxu1 %v2841_v62  ;;  %v2910_v34 = vcombine.high %v318_v26, %v318_v26  ;;  %v2917_v39 = vrot.slane %v318_v26, %v35466_v25 }
 0x1a9   : > { %v7764_v7 = vpop.f32.mrb[20].mxu1  ;;  %33538 = vmatprep.subr.bf16.mxu1 %v33537_v63  ;;  %v7695_v11 = vadd.f32 %v7694_v6, %v7625_v59  ;;  %v7696_v12 = vpop.f32.mrb[21].mxu0  ;;  %v2890_v59 = vrot.slane %v2876_v49, %v35466_v25  ;;  %v635_v63 = vld [vmem:[%s35442_s22 + $0x538] sm:$0xff]  ;;  %v33557_v6 = vpack.c.bf16 %v1401_v58, %v633_v57 }
 0x1aa   : > { %v7766_v13 = vpop.f32.mrb[21].mxu1  ;;  %v33561_v8 = vpack.c.bf16 %v1403_v0, %v635_v63  ;;  %v634_v12 = vld [vmem:[%s35442_s22 + $0x530] sm:$0xff]  ;;  %v1411_v49 = vld [vmem:[%s35442_s22 + $0x1d78] sm:$0x3] }
 0x1ab   : > { %v7765_v19 = vadd.f32 %v7764_v7, %v7695_v11  ;;  %v2892_v7 = vcombine.high %v2890_v59, %v2890_v59  ;;  %v1400_v11 = vld [vmem:[%s35442_s22 + $0x1d20] sm:$0x3]  ;;  %v1402_v13 = vld [vmem:[%s35442_s22 + $0x1d30] sm:$0x3] }
 0x1ac   : > { %v33563_v28 = vpack.c.bf16 %v1402_v13, %v634_v12 }
 0x1ad   : > { %11473 = vmatmul.mubr.f32.vlgmr.msra.gmra.mrb[74].mxu0 %v2832_v45  ;;  %v2874_v45 = vcombine.high %v2866_v30, %v2866_v30 }
 0x1ae   : > { %11543 = vmatmul.mubr.f32.vlgmr.msra.gmra.mrb[74].mxu1 %v2839_v50  ;;  %33536 = vmatpush1.bf16.xpose.msra.mxu0 %v33535_v17  ;;  %v628_v50 = vld [vmem:[%s35442_s22 + $0x500] sm:$0xff]  ;;  %v637_v17 = vld [vmem:[%s35442_s22 + $0x548] sm:$0xff] }
 0x1af   : > { %33540 = vmatpush1.bf16.xpose.msra.mxu1 %v33539_v18  ;;  %11612 = vmatprep.mubr.f32.mxu0 %v2857_v20  ;;  %v33551_v2 = vpack.c.bf16 %v1396_v51, %v628_v50  ;;  %v1405_v18 = vld [vmem:[%s35442_s22 + $0x1d48] sm:$0x3]  ;;  %v319_v50 = vld [vmem:[%s35435_s12 + $0x158] sm:$0xff] }
 0x1b0   : > { %33542 = vmatprep.subr.bf16.mxu0 %v33541_v21  ;;  %v7834_v31 = vpop.f32.mrb[22].mxu0  ;;  %11682 = vmatprep.mubr.f32.mxu1 %v2858_v22  ;;  %v2927_v58 = vcombine.high %v319_v50, %v319_v50  ;;  %v2934_v63 = vrot.slane %v319_v50, %v35466_v25 }
 0x1b1   : > { %v7904_v32 = vpop.f32.mrb[22].mxu1  ;;  %33546 = vmatprep.subr.bf16.mxu1 %v33545_v23  ;;  %v7835_v36 = vadd.f32 %v7834_v31, %v7765_v19  ;;  %v7836_v37 = vpop.f32.mrb[23].mxu0  ;;  %v2907_v19 = vrot.slane %v2893_v9, %v35466_v25  ;;  %v639_v23 = vld [vmem:[%s35442_s22 + $0x558] sm:$0xff]  ;;  %v33565_v31 = vpack.c.bf16 %v1405_v18, %v637_v17 }
 0x1b2   : > { %v7906_v38 = vpop.f32.mrb[23].mxu1  ;;  %v33569_v33 = vpack.c.bf16 %v1407_v24, %v639_v23  ;;  %v638_v37 = vld [vmem:[%s35442_s22 + $0x550] sm:$0xff]  ;;  %v1415_v9 = vld [vmem:[%s35442_s22 + $0x1d98] sm:$0x3] }
 0x1b3   : > { %v7905_v44 = vadd.f32 %v7904_v32, %v7835_v36  ;;  %v2909_v32 = vcombine.high %v2907_v19, %v2907_v19  ;;  %v1404_v36 = vld [vmem:[%s35442_s22 + $0x1d40] sm:$0x3]  ;;  %v1406_v38 = vld [vmem:[%s35442_s22 + $0x1d50] sm:$0x3] }
 0x1b4   : > { %v33571_v52 = vpack.c.bf16 %v1406_v38, %v638_v37 }
 0x1b5   : > { %11613 = vmatmul.mubr.f32.vlgmr.msra.gmra.mrb[76].mxu0 %v2849_v5  ;;  %v2891_v5 = vcombine.high %v2883_v54, %v2883_v54 }
 0x1b6   : > { %11683 = vmatmul.mubr.f32.vlgmr.msra.gmra.mrb[76].mxu1 %v2856_v10  ;;  %33544 = vmatpush1.bf16.xpose.msra.mxu0 %v33543_v42  ;;  %v632_v10 = vld [vmem:[%s35442_s22 + $0x520] sm:$0xff]  ;;  %v641_v42 = vld [vmem:[%s35442_s22 + $0x568] sm:$0xff] }
 0x1b7   : > { %33548 = vmatpush1.bf16.xpose.msra.mxu1 %v33547_v43  ;;  %11752 = vmatprep.mubr.f32.mxu0 %v2874_v45  ;;  %v33559_v27 = vpack.c.bf16 %v1400_v11, %v632_v10  ;;  %v1409_v43 = vld [vmem:[%s35442_s22 + $0x1d68] sm:$0x3]  ;;  %v320_v10 = vld [vmem:[%s35435_s12 + $0x160] sm:$0xff] }
 0x1b8   : > { %33550 = vmatprep.subr.bf16.mxu0 %v33549_v46  ;;  %v7974_v55 = vpop.f32.mrb[24].mxu0  ;;  %11822 = vmatprep.mubr.f32.mxu1 %v2875_v47  ;;  %v2944_v18 = vcombine.high %v320_v10, %v320_v10  ;;  %v2951_v23 = vrot.slane %v320_v10, %v35466_v25 }
 0x1b9   : > { %v8044_v56 = vpop.f32.mrb[24].mxu1  ;;  %33554 = vmatprep.subr.bf16.mxu1 %v33553_v48  ;;  %v7975_v60 = vadd.f32 %v7974_v55, %v7905_v44  ;;  %v7976_v61 = vpop.f32.mrb[25].mxu0  ;;  %v2924_v44 = vrot.slane %v2910_v34, %v35466_v25  ;;  %v643_v48 = vld [vmem:[%s35442_s22 + $0x578] sm:$0xff]  ;;  %v33573_v55 = vpack.c.bf16 %v1409_v43, %v641_v42 }
 0x1ba   : > { %v8046_v62 = vpop.f32.mrb[25].mxu1  ;;  %v33577_v57 = vpack.c.bf16 %v1411_v49, %v643_v48  ;;  %v642_v61 = vld [vmem:[%s35442_s22 + $0x570] sm:$0xff]  ;;  %v1419_v34 = vld [vmem:[%s35442_s22 + $0x1db8] sm:$0x3] }
 0x1bb   : > { %v8045_v4 = vadd.f32 %v8044_v56, %v7975_v60  ;;  %v2926_v56 = vcombine.high %v2924_v44, %v2924_v44  ;;  %v1408_v60 = vld [vmem:[%s35442_s22 + $0x1d60] sm:$0x3]  ;;  %v1410_v62 = vld [vmem:[%s35442_s22 + $0x1d70] sm:$0x3] }
 0x1bc   : > { %v33579_v12 = vpack.c.bf16 %v1410_v62, %v642_v61 }
 0x1bd   : > { %11753 = vmatmul.mubr.f32.vlgmr.msra.gmra.mrb[78].mxu0 %v2866_v30  ;;  %v2908_v30 = vcombine.high %v2900_v14, %v2900_v14 }
 0x1be   : > { %11823 = vmatmul.mubr.f32.vlgmr.msra.gmra.mrb[78].mxu1 %v2873_v35  ;;  %33552 = vmatpush1.bf16.xpose.msra.mxu0 %v33551_v2  ;;  %v636_v35 = vld [vmem:[%s35442_s22 + $0x540] sm:$0xff]  ;;  %v645_v2 = vld [vmem:[%s35442_s22 + $0x588] sm:$0xff] }
 0x1bf   : > { %33556 = vmatpush1.bf16.xpose.msra.mxu1 %v33555_v3  ;;  %11892 = vmatprep.mubr.f32.mxu0 %v2891_v5  ;;  %v33567_v51 = vpack.c.bf16 %v1404_v36, %v636_v35  ;;  %v1413_v3 = vld [vmem:[%s35442_s22 + $0x1d88] sm:$0x3] }
 0x1c0   : > { %33558 = vmatprep.subr.bf16.mxu0 %v33557_v6  ;;  %v8114_v15 = vpop.f32.mrb[26].mxu0  ;;  %11962 = vmatprep.mubr.f32.mxu1 %v2892_v7  ;;  %v321_v35 = vld [vmem:[%s35435_s12 + $0x168] sm:$0xff] }
 0x1c1   : > { %v8184_v16 = vpop.f32.mrb[26].mxu1  ;;  %33562 = vmatprep.subr.bf16.mxu1 %v33561_v8  ;;  %v8115_v20 = vadd.f32 %v8114_v15, %v8045_v4  ;;  %v8116_v21 = vpop.f32.mrb[27].mxu0  ;;  %v2941_v4 = vrot.slane %v2927_v58, %v35466_v25  ;;  %v647_v8 = vld [vmem:[%s35442_s22 + $0x598] sm:$0xff]  ;;  %v33581_v15 = vpack.c.bf16 %v1413_v3, %v645_v2  ;;  %v2961_v43 = vcombine.high %v321_v35, %v321_v35 }
 0x1c2   : > { %v8186_v22 = vpop.f32.mrb[27].mxu1  ;;  %v33585_v17 = vpack.c.bf16 %v1415_v9, %v647_v8  ;;  %v646_v21 = vld [vmem:[%s35442_s22 + $0x590] sm:$0xff]  ;;  %v2968_v48 = vrot.slane %v321_v35, %v35466_v25  ;;  %v1423_v58 = vld [vmem:[%s35442_s22 + $0x1dd8] sm:$0x3] }
 0x1c3   : > { %v8185_v29 = vadd.f32 %v8184_v16, %v8115_v20  ;;  %v2943_v16 = vcombine.high %v2941_v4, %v2941_v4  ;;  %v1412_v20 = vld [vmem:[%s35442_s22 + $0x1d80] sm:$0x3]  ;;  %v1414_v22 = vld [vmem:[%s35442_s22 + $0x1d90] sm:$0x3] }
 0x1c4   : > { %v33587_v37 = vpack.c.bf16 %v1414_v22, %v646_v21 }
 0x1c5   : > { %11893 = vmatmul.mubr.f32.vlgmr.msra.gmra.mrb[80].mxu0 %v2883_v54  ;;  %v2925_v54 = vcombine.high %v2917_v39, %v2917_v39 }
 0x1c6   : > { %11963 = vmatmul.mubr.f32.vlgmr.msra.gmra.mrb[80].mxu1 %v2890_v59  ;;  %33560 = vmatpush1.bf16.xpose.msra.mxu0 %v33559_v27  ;;  %v640_v59 = vld [vmem:[%s35442_s22 + $0x560] sm:$0xff]  ;;  %v649_v27 = vld [vmem:[%s35442_s22 + $0x5a8] sm:$0xff] }
 0x1c7   : > { %33564 = vmatpush1.bf16.xpose.msra.mxu1 %v33563_v28  ;;  %12032 = vmatprep.mubr.f32.mxu0 %v2908_v30  ;;  %v33575_v11 = vpack.c.bf16 %v1408_v60, %v640_v59  ;;  %v1417_v28 = vld [vmem:[%s35442_s22 + $0x1da8] sm:$0x3]  ;;  %v322_v59 = vld [vmem:[%s35435_s12 + $0x170] sm:$0xff] }
 0x1c8   : > { %33566 = vmatprep.subr.bf16.mxu0 %v33565_v31  ;;  %v8254_v40 = vpop.f32.mrb[28].mxu0  ;;  %12102 = vmatprep.mubr.f32.mxu1 %v2909_v32  ;;  %v2978_v3 = vcombine.high %v322_v59, %v322_v59  ;;  %v2985_v8 = vrot.slane %v322_v59, %v35466_v25 }
 0x1c9   : > { %v8324_v41 = vpop.f32.mrb[28].mxu1  ;;  %33570 = vmatprep.subr.bf16.mxu1 %v33569_v33  ;;  %v8255_v45 = vadd.f32 %v8254_v40, %v8185_v29  ;;  %v8256_v46 = vpop.f32.mrb[29].mxu0  ;;  %v2958_v29 = vrot.slane %v2944_v18, %v35466_v25  ;;  %v651_v33 = vld [vmem:[%s35442_s22 + $0x5b8] sm:$0xff]  ;;  %v33589_v40 = vpack.c.bf16 %v1417_v28, %v649_v27 }
 0x1ca   : > { %v8326_v47 = vpop.f32.mrb[29].mxu1  ;;  %v33593_v42 = vpack.c.bf16 %v1419_v34, %v651_v33  ;;  %v650_v46 = vld [vmem:[%s35442_s22 + $0x5b0] sm:$0xff]  ;;  %v1427_v18 = vld [vmem:[%s35442_s22 + $0x1df8] sm:$0x3] }
 0x1cb   : > { %v8325_v53 = vadd.f32 %v8324_v41, %v8255_v45  ;;  %v2960_v41 = vcombine.high %v2958_v29, %v2958_v29  ;;  %v1416_v45 = vld [vmem:[%s35442_s22 + $0x1da0] sm:$0x3]  ;;  %v1418_v47 = vld [vmem:[%s35442_s22 + $0x1db0] sm:$0x3] }
 0x1cc   : > { %v33595_v61 = vpack.c.bf16 %v1418_v47, %v650_v46 }
 0x1cd   : > { %12033 = vmatmul.mubr.f32.vlgmr.msra.gmra.mrb[82].mxu0 %v2900_v14  ;;  %v2942_v14 = vcombine.high %v2934_v63, %v2934_v63 }
 0x1ce   : > { %12103 = vmatmul.mubr.f32.vlgmr.msra.gmra.mrb[82].mxu1 %v2907_v19  ;;  %33568 = vmatpush1.bf16.xpose.msra.mxu0 %v33567_v51  ;;  %v644_v19 = vld [vmem:[%s35442_s22 + $0x580] sm:$0xff]  ;;  %v653_v51 = vld [vmem:[%s35442_s22 + $0x5c8] sm:$0xff] }
 0x1cf   : > { %33572 = vmatpush1.bf16.xpose.msra.mxu1 %v33571_v52  ;;  %12172 = vmatprep.mubr.f32.mxu0 %v2925_v54  ;;  %v33583_v36 = vpack.c.bf16 %v1412_v20, %v644_v19  ;;  %v1421_v52 = vld [vmem:[%s35442_s22 + $0x1dc8] sm:$0x3]  ;;  %v323_v19 = vld [vmem:[%s35435_s12 + $0x178] sm:$0xff] }
 0x1d0   : > { %33574 = vmatprep.subr.bf16.mxu0 %v33573_v55  ;;  %v8394_v0 = vpop.f32.mrb[30].mxu0  ;;  %12242 = vmatprep.mubr.f32.mxu1 %v2926_v56  ;;  %v2995_v28 = vcombine.high %v323_v19, %v323_v19  ;;  %v3002_v33 = vrot.slane %v323_v19, %v35466_v25 }
 0x1d1   : > { %v8464_v1 = vpop.f32.mrb[30].mxu1  ;;  %33578 = vmatprep.subr.bf16.mxu1 %v33577_v57  ;;  %v8395_v5 = vadd.f32 %v8394_v0, %v8325_v53  ;;  %v8396_v6 = vpop.f32.mrb[31].mxu0  ;;  %v2975_v53 = vrot.slane %v2961_v43, %v35466_v25  ;;  %v655_v57 = vld [vmem:[%s35442_s22 + $0x5d8] sm:$0xff]  ;;  %v33597_v0 = vpack.c.bf16 %v1421_v52, %v653_v51 }
 0x1d2   : > { %v8466_v7 = vpop.f32.mrb[31].mxu1  ;;  %v33601_v2 = vpack.c.bf16 %v1423_v58, %v655_v57  ;;  %v654_v6 = vld [vmem:[%s35442_s22 + $0x5d0] sm:$0xff]  ;;  %v1431_v43 = vld [vmem:[%s35442_s22 + $0x1e18] sm:$0x3] }
 0x1d3   : > { %v8465_v13 = vadd.f32 %v8464_v1, %v8395_v5  ;;  %v2977_v1 = vcombine.high %v2975_v53, %v2975_v53  ;;  %v1420_v5 = vld [vmem:[%s35442_s22 + $0x1dc0] sm:$0x3]  ;;  %v1422_v7 = vld [vmem:[%s35442_s22 + $0x1dd0] sm:$0x3] }
 0x1d4   : > { %v33603_v21 = vpack.c.bf16 %v1422_v7, %v654_v6 }
 0x1d5   : > { %12173 = vmatmul.mubr.f32.vlgmr.msra.gmra.mrb[84].mxu0 %v2917_v39  ;;  %v2959_v39 = vcombine.high %v2951_v23, %v2951_v23 }
 0x1d6   : > { %12243 = vmatmul.mubr.f32.vlgmr.msra.gmra.mrb[84].mxu1 %v2924_v44  ;;  %33576 = vmatpush1.bf16.xpose.msra.mxu0 %v33575_v11  ;;  %v648_v44 = vld [vmem:[%s35442_s22 + $0x5a0] sm:$0xff]  ;;  %v657_v11 = vld [vmem:[%s35442_s22 + $0x5e8] sm:$0xff] }
 0x1d7   : > { %33580 = vmatpush1.bf16.xpose.msra.mxu1 %v33579_v12  ;;  %12312 = vmatprep.mubr.f32.mxu0 %v2942_v14  ;;  %v33591_v60 = vpack.c.bf16 %v1416_v45, %v648_v44  ;;  %v1425_v12 = vld [vmem:[%s35442_s22 + $0x1de8] sm:$0x3]  ;;  %v324_v44 = vld [vmem:[%s35435_s12 + $0x180] sm:$0xff] }
 0x1d8   : > { %33582 = vmatprep.subr.bf16.mxu0 %v33581_v15  ;;  %v8534_v24 = vpop.f32.mrb[32].mxu0  ;;  %12382 = vmatprep.mubr.f32.mxu1 %v2943_v16  ;;  %v3012_v52 = vcombine.high %v324_v44, %v324_v44  ;;  %v3019_v57 = vrot.slane %v324_v44, %v35466_v25 }
 0x1d9   : > { %v8604_v26 = vpop.f32.mrb[32].mxu1  ;;  %33586 = vmatprep.subr.bf16.mxu1 %v33585_v17  ;;  %v8535_v30 = vadd.f32 %v8534_v24, %v8465_v13  ;;  %v8536_v31 = vpop.f32.mrb[33].mxu0  ;;  %v2992_v13 = vrot.slane %v2978_v3, %v35466_v25  ;;  %v659_v17 = vld [vmem:[%s35442_s22 + $0x5f8] sm:$0xff]  ;;  %v33605_v24 = vpack.c.bf16 %v1425_v12, %v657_v11 }
 0x1da   : > { %v8606_v32 = vpop.f32.mrb[33].mxu1  ;;  %v33609_v27 = vpack.c.bf16 %v1427_v18, %v659_v17  ;;  %v658_v31 = vld [vmem:[%s35442_s22 + $0x5f0] sm:$0xff]  ;;  %v1435_v3 = vld [vmem:[%s35442_s22 + $0x1e38] sm:$0x3] }
 0x1db   : > { %v8605_v38 = vadd.f32 %v8604_v26, %v8535_v30  ;;  %v2994_v26 = vcombine.high %v2992_v13, %v2992_v13  ;;  %v1424_v30 = vld [vmem:[%s35442_s22 + $0x1de0] sm:$0x3]  ;;  %v1426_v32 = vld [vmem:[%s35442_s22 + $0x1df0] sm:$0x3] }
 0x1dc   : > { %v33611_v46 = vpack.c.bf16 %v1426_v32, %v658_v31 }
 0x1dd   : > { %12313 = vmatmul.mubr.f32.vlgmr.msra.gmra.mrb[86].mxu0 %v2934_v63  ;;  %v2976_v63 = vcombine.high %v2968_v48, %v2968_v48 }
 0x1de   : > { %12383 = vmatmul.mubr.f32.vlgmr.msra.gmra.mrb[86].mxu1 %v2941_v4  ;;  %33584 = vmatpush1.bf16.xpose.msra.mxu0 %v33583_v36  ;;  %v652_v4 = vld [vmem:[%s35442_s22 + $0x5c0] sm:$0xff]  ;;  %v661_v36 = vld [vmem:[%s35442_s22 + $0x608] sm:$0xff] }
 0x1df   : > { %33588 = vmatpush1.bf16.xpose.msra.mxu1 %v33587_v37  ;;  %12452 = vmatprep.mubr.f32.mxu0 %v2959_v39  ;;  %v33599_v20 = vpack.c.bf16 %v1420_v5, %v652_v4  ;;  %v1429_v37 = vld [vmem:[%s35442_s22 + $0x1e08] sm:$0x3] }
 0x1e0   : > { %33590 = vmatprep.subr.bf16.mxu0 %v33589_v40  ;;  %v8674_v49 = vpop.f32.mrb[34].mxu0  ;;  %12522 = vmatprep.mubr.f32.mxu1 %v2960_v41  ;;  %v325_v4 = vld [vmem:[%s35435_s12 + $0x188] sm:$0xff] }
 0x1e1   : > { %v8744_v50 = vpop.f32.mrb[34].mxu1  ;;  %33594 = vmatprep.subr.bf16.mxu1 %v33593_v42  ;;  %v8675_v54 = vadd.f32 %v8674_v49, %v8605_v38  ;;  %v8676_v55 = vpop.f32.mrb[35].mxu0  ;;  %v3009_v38 = vrot.slane %v2995_v28, %v35466_v25  ;;  %v663_v42 = vld [vmem:[%s35442_s22 + $0x618] sm:$0xff]  ;;  %v33613_v49 = vpack.c.bf16 %v1429_v37, %v661_v36  ;;  %v3029_v12 = vcombine.high %v325_v4, %v325_v4 }
 0x1e2   : > { %v8746_v56 = vpop.f32.mrb[35].mxu1  ;;  %v33617_v51 = vpack.c.bf16 %v1431_v43, %v663_v42  ;;  %v662_v55 = vld [vmem:[%s35442_s22 + $0x610] sm:$0xff]  ;;  %v3036_v17 = vrot.slane %v325_v4, %v35466_v25  ;;  %v1439_v28 = vld [vmem:[%s35442_s22 + $0x1e58] sm:$0x3] }
 0x1e3   : > { %v8745_v62 = vadd.f32 %v8744_v50, %v8675_v54  ;;  %v3011_v50 = vcombine.high %v3009_v38, %v3009_v38  ;;  %v1428_v54 = vld [vmem:[%s35442_s22 + $0x1e00] sm:$0x3]  ;;  %v1430_v56 = vld [vmem:[%s35442_s22 + $0x1e10] sm:$0x3] }
 0x1e4   : > { %v33619_v6 = vpack.c.bf16 %v1430_v56, %v662_v55 }
 0x1e5   : > { %12453 = vmatmul.mubr.f32.vlgmr.msra.gmra.mrb[88].mxu0 %v2951_v23  ;;  %v2993_v23 = vcombine.high %v2985_v8, %v2985_v8 }
 0x1e6   : > { %12523 = vmatmul.mubr.f32.vlgmr.msra.gmra.mrb[88].mxu1 %v2958_v29  ;;  %33592 = vmatpush1.bf16.xpose.msra.mxu0 %v33591_v60  ;;  %v656_v29 = vld [vmem:[%s35442_s22 + $0x5e0] sm:$0xff]  ;;  %v665_v60 = vld [vmem:[%s35442_s22 + $0x628] sm:$0xff] }
 0x1e7   : > { %33596 = vmatpush1.bf16.xpose.msra.mxu1 %v33595_v61  ;;  %12592 = vmatprep.mubr.f32.mxu0 %v2976_v63  ;;  %v33607_v45 = vpack.c.bf16 %v1424_v30, %v656_v29  ;;  %v1433_v61 = vld [vmem:[%s35442_s22 + $0x1e28] sm:$0x3]  ;;  %v326_v29 = vld [vmem:[%s35435_s12 + $0x190] sm:$0xff] }
 0x1e8   : > { %33598 = vmatprep.subr.bf16.mxu0 %v33597_v0  ;;  %v8814_v9 = vpop.f32.mrb[36].mxu0  ;;  %12662 = vmatprep.mubr.f32.mxu1 %v2977_v1  ;;  %v3046_v37 = vcombine.high %v326_v29, %v326_v29  ;;  %v3053_v42 = vrot.slane %v326_v29, %v35466_v25 }
 0x1e9   : > { %v8884_v10 = vpop.f32.mrb[36].mxu1  ;;  %33602 = vmatprep.subr.bf16.mxu1 %v33601_v2  ;;  %v8815_v14 = vadd.f32 %v8814_v9, %v8745_v62  ;;  %v8816_v15 = vpop.f32.mrb[37].mxu0  ;;  %v3026_v62 = vrot.slane %v3012_v52, %v35466_v25  ;;  %v667_v2 = vld [vmem:[%s35442_s22 + $0x638] sm:$0xff]  ;;  %v33621_v9 = vpack.c.bf16 %v1433_v61, %v665_v60 }
 0x1ea   : > { %v8886_v16 = vpop.f32.mrb[37].mxu1  ;;  %v33625_v11 = vpack.c.bf16 %v1435_v3, %v667_v2  ;;  %v666_v15 = vld [vmem:[%s35442_s22 + $0x630] sm:$0xff]  ;;  %v1443_v52 = vld [vmem:[%s35442_s22 + $0x1e78] sm:$0x3] }
 0x1eb   : > { %v8885_v22 = vadd.f32 %v8884_v10, %v8815_v14  ;;  %v3028_v10 = vcombine.high %v3026_v62, %v3026_v62  ;;  %v1432_v14 = vld [vmem:[%s35442_s22 + $0x1e20] sm:$0x3]  ;;  %v1434_v16 = vld [vmem:[%s35442_s22 + $0x1e30] sm:$0x3] }
 0x1ec   : > { %v33627_v31 = vpack.c.bf16 %v1434_v16, %v666_v15 }
 0x1ed   : > { %12593 = vmatmul.mubr.f32.vlgmr.msra.gmra.mrb[90].mxu0 %v2968_v48  ;;  %v3010_v48 = vcombine.high %v3002_v33, %v3002_v33 }
 0x1ee   : > { %12663 = vmatmul.mubr.f32.vlgmr.msra.gmra.mrb[90].mxu1 %v2975_v53  ;;  %33600 = vmatpush1.bf16.xpose.msra.mxu0 %v33599_v20  ;;  %v660_v53 = vld [vmem:[%s35442_s22 + $0x600] sm:$0xff]  ;;  %v669_v20 = vld [vmem:[%s35442_s22 + $0x648] sm:$0xff] }
 0x1ef   : > { %33604 = vmatpush1.bf16.xpose.msra.mxu1 %v33603_v21  ;;  %12732 = vmatprep.mubr.f32.mxu0 %v2993_v23  ;;  %v33615_v5 = vpack.c.bf16 %v1428_v54, %v660_v53  ;;  %v1437_v21 = vld [vmem:[%s35442_s22 + $0x1e48] sm:$0x3]  ;;  %v327_v53 = vld [vmem:[%s35435_s12 + $0x198] sm:$0xff] }
 0x1f0   : > { %33606 = vmatprep.subr.bf16.mxu0 %v33605_v24  ;;  %v8954_v34 = vpop.f32.mrb[38].mxu0  ;;  %12802 = vmatprep.mubr.f32.mxu1 %v2994_v26  ;;  %v3063_v61 = vcombine.high %v327_v53, %v327_v53  ;;  %v3070_v2 = vrot.slane %v327_v53, %v35466_v25 }
 0x1f1   : > { %v9024_v35 = vpop.f32.mrb[38].mxu1  ;;  %33610 = vmatprep.subr.bf16.mxu1 %v33609_v27  ;;  %v8955_v39 = vadd.f32 %v8954_v34, %v8885_v22  ;;  %v8956_v40 = vpop.f32.mrb[39].mxu0  ;;  %v3043_v22 = vrot.slane %v3029_v12, %v35466_v25  ;;  %v671_v27 = vld [vmem:[%s35442_s22 + $0x658] sm:$0xff]  ;;  %v33629_v34 = vpack.c.bf16 %v1437_v21, %v669_v20 }
 0x1f2   : > { %v9026_v41 = vpop.f32.mrb[39].mxu1  ;;  %v33633_v36 = vpack.c.bf16 %v1439_v28, %v671_v27  ;;  %v670_v40 = vld [vmem:[%s35442_s22 + $0x650] sm:$0xff]  ;;  %v1447_v12 = vld [vmem:[%s35442_s22 + $0x1e98] sm:$0x3] }
 0x1f3   : > { %v9025_v47 = vadd.f32 %v9024_v35, %v8955_v39  ;;  %v3045_v35 = vcombine.high %v3043_v22, %v3043_v22  ;;  %v1436_v39 = vld [vmem:[%s35442_s22 + $0x1e40] sm:$0x3]  ;;  %v1438_v41 = vld [vmem:[%s35442_s22 + $0x1e50] sm:$0x3] }
 0x1f4   : > { %v33635_v55 = vpack.c.bf16 %v1438_v41, %v670_v40 }
 0x1f5   : > { %12733 = vmatmul.mubr.f32.vlgmr.msra.gmra.mrb[92].mxu0 %v2985_v8  ;;  %v3027_v8 = vcombine.high %v3019_v57, %v3019_v57 }
 0x1f6   : > { %12803 = vmatmul.mubr.f32.vlgmr.msra.gmra.mrb[92].mxu1 %v2992_v13  ;;  %33608 = vmatpush1.bf16.xpose.msra.mxu0 %v33607_v45  ;;  %v664_v13 = vld [vmem:[%s35442_s22 + $0x620] sm:$0xff]  ;;  %v673_v45 = vld [vmem:[%s35442_s22 + $0x668] sm:$0xff] }
 0x1f7   : > { %33612 = vmatpush1.bf16.xpose.msra.mxu1 %v33611_v46  ;;  %12872 = vmatprep.mubr.f32.mxu0 %v3010_v48  ;;  %v33623_v30 = vpack.c.bf16 %v1432_v14, %v664_v13  ;;  %v1441_v46 = vld [vmem:[%s35442_s22 + $0x1e68] sm:$0x3]  ;;  %v328_v13 = vld [vmem:[%s35435_s12 + $0x1a0] sm:$0xff] }
 0x1f8   : > { %33614 = vmatprep.subr.bf16.mxu0 %v33613_v49  ;;  %v9094_v58 = vpop.f32.mrb[40].mxu0  ;;  %12942 = vmatprep.mubr.f32.mxu1 %v3011_v50  ;;  %v3080_v21 = vcombine.high %v328_v13, %v328_v13  ;;  %v3087_v27 = vrot.slane %v328_v13, %v35466_v25 }
 0x1f9   : > { %v9164_v59 = vpop.f32.mrb[40].mxu1  ;;  %33618 = vmatprep.subr.bf16.mxu1 %v33617_v51  ;;  %v9095_v63 = vadd.f32 %v9094_v58, %v9025_v47  ;;  %v9096_v0 = vpop.f32.mrb[41].mxu0  ;;  %v3060_v47 = vrot.slane %v3046_v37, %v35466_v25  ;;  %v675_v51 = vld [vmem:[%s35442_s22 + $0x678] sm:$0xff]  ;;  %v33637_v58 = vpack.c.bf16 %v1441_v46, %v673_v45 }
 0x1fa   : > { %v9166_v1 = vpop.f32.mrb[41].mxu1  ;;  %v33641_v60 = vpack.c.bf16 %v1443_v52, %v675_v51  ;;  %v674_v0 = vld [vmem:[%s35442_s22 + $0x670] sm:$0xff]  ;;  %v1451_v37 = vld [vmem:[%s35442_s22 + $0x1eb8] sm:$0x3] }
 0x1fb   : > { %v9165_v7 = vadd.f32 %v9164_v59, %v9095_v63  ;;  %v3062_v59 = vcombine.high %v3060_v47, %v3060_v47  ;;  %v1440_v63 = vld [vmem:[%s35442_s22 + $0x1e60] sm:$0x3]  ;;  %v1442_v1 = vld [vmem:[%s35442_s22 + $0x1e70] sm:$0x3] }
 0x1fc   : > { %v33643_v15 = vpack.c.bf16 %v1442_v1, %v674_v0 }
 0x1fd   : > { %12873 = vmatmul.mubr.f32.vlgmr.msra.gmra.mrb[94].mxu0 %v3002_v33  ;;  %v3044_v33 = vcombine.high %v3036_v17, %v3036_v17 }
 0x1fe   : > { %12943 = vmatmul.mubr.f32.vlgmr.msra.gmra.mrb[94].mxu1 %v3009_v38  ;;  %33616 = vmatpush1.bf16.xpose.msra.mxu0 %v33615_v5  ;;  %v668_v38 = vld [vmem:[%s35442_s22 + $0x640] sm:$0xff]  ;;  %v677_v5 = vld [vmem:[%s35442_s22 + $0x688] sm:$0xff] }
 0x1ff   : > { %33620 = vmatpush1.bf16.xpose.msra.mxu1 %v33619_v6  ;;  %13012 = vmatprep.mubr.f32.mxu0 %v3027_v8  ;;  %v33631_v54 = vpack.c.bf16 %v1436_v39, %v668_v38  ;;  %v1445_v6 = vld [vmem:[%s35442_s22 + $0x1e88] sm:$0x3] }
 0x200   : > { %33622 = vmatprep.subr.bf16.mxu0 %v33621_v9  ;;  %v9234_v18 = vpop.f32.mrb[42].mxu0  ;;  %13082 = vmatprep.mubr.f32.mxu1 %v3028_v10  ;;  %v329_v38 = vld [vmem:[%s35435_s12 + $0x1a8] sm:$0xff] }
 0x201   : > { %v9304_v19 = vpop.f32.mrb[42].mxu1  ;;  %33626 = vmatprep.subr.bf16.mxu1 %v33625_v11  ;;  %v9235_v23 = vadd.f32 %v9234_v18, %v9165_v7  ;;  %v9236_v24 = vpop.f32.mrb[43].mxu0  ;;  %v3077_v7 = vrot.slane %v3063_v61, %v35466_v25  ;;  %v679_v11 = vld [vmem:[%s35442_s22 + $0x698] sm:$0xff]  ;;  %v33645_v18 = vpack.c.bf16 %v1445_v6, %v677_v5  ;;  %v3097_v46 = vcombine.high %v329_v38, %v329_v38 }
 0x202   : > { %v9306_v26 = vpop.f32.mrb[43].mxu1  ;;  %v33649_v20 = vpack.c.bf16 %v1447_v12, %v679_v11  ;;  %v678_v24 = vld [vmem:[%s35442_s22 + $0x690] sm:$0xff]  ;;  %v3104_v51 = vrot.slane %v329_v38, %v35466_v25  ;;  %v1455_v61 = vld [vmem:[%s35442_s22 + $0x1ed8] sm:$0x3] }
 0x203   : > { %v9305_v32 = vadd.f32 %v9304_v19, %v9235_v23  ;;  %v3079_v19 = vcombine.high %v3077_v7, %v3077_v7  ;;  %v1444_v23 = vld [vmem:[%s35442_s22 + $0x1e80] sm:$0x3]  ;;  %v1446_v26 = vld [vmem:[%s35442_s22 + $0x1e90] sm:$0x3] }
 0x204   : > { %v33651_v40 = vpack.c.bf16 %v1446_v26, %v678_v24 }
 0x205   : > { %13013 = vmatmul.mubr.f32.vlgmr.msra.gmra.mrb[96].mxu0 %v3019_v57  ;;  %v3061_v57 = vcombine.high %v3053_v42, %v3053_v42 }
 0x206   : > { %13083 = vmatmul.mubr.f32.vlgmr.msra.gmra.mrb[96].mxu1 %v3026_v62  ;;  %33624 = vmatpush1.bf16.xpose.msra.mxu0 %v33623_v30  ;;  %v672_v62 = vld [vmem:[%s35442_s22 + $0x660] sm:$0xff]  ;;  %v681_v30 = vld [vmem:[%s35442_s22 + $0x6a8] sm:$0xff] }
 0x207   : > { %33628 = vmatpush1.bf16.xpose.msra.mxu1 %v33627_v31  ;;  %13152 = vmatprep.mubr.f32.mxu0 %v3044_v33  ;;  %v33639_v14 = vpack.c.bf16 %v1440_v63, %v672_v62  ;;  %v1449_v31 = vld [vmem:[%s35442_s22 + $0x1ea8] sm:$0x3]  ;;  %v330_v62 = vld [vmem:[%s35435_s12 + $0x1b0] sm:$0xff] }
 0x208   : > { %33630 = vmatprep.subr.bf16.mxu0 %v33629_v34  ;;  %v9374_v43 = vpop.f32.mrb[44].mxu0  ;;  %13222 = vmatprep.mubr.f32.mxu1 %v3045_v35  ;;  %v3114_v6 = vcombine.high %v330_v62, %v330_v62  ;;  %v3121_v11 = vrot.slane %v330_v62, %v35466_v25 }
 0x209   : > { %v9444_v44 = vpop.f32.mrb[44].mxu1  ;;  %33634 = vmatprep.subr.bf16.mxu1 %v33633_v36  ;;  %v9375_v48 = vadd.f32 %v9374_v43, %v9305_v32  ;;  %v9376_v49 = vpop.f32.mrb[45].mxu0  ;;  %v3094_v32 = vrot.slane %v3080_v21, %v35466_v25  ;;  %v683_v36 = vld [vmem:[%s35442_s22 + $0x6b8] sm:$0xff]  ;;  %v33653_v43 = vpack.c.bf16 %v1449_v31, %v681_v30 }
 0x20a   : > { %v9446_v50 = vpop.f32.mrb[45].mxu1  ;;  %v33657_v45 = vpack.c.bf16 %v1451_v37, %v683_v36  ;;  %v682_v49 = vld [vmem:[%s35442_s22 + $0x6b0] sm:$0xff]  ;;  %v1459_v21 = vld [vmem:[%s35442_s22 + $0x1ef8] sm:$0x3] }
 0x20b   : > { %v9445_v56 = vadd.f32 %v9444_v44, %v9375_v48  ;;  %v3096_v44 = vcombine.high %v3094_v32, %v3094_v32  ;;  %v1448_v48 = vld [vmem:[%s35442_s22 + $0x1ea0] sm:$0x3]  ;;  %v1450_v50 = vld [vmem:[%s35442_s22 + $0x1eb0] sm:$0x3] }
 0x20c   : > { %v33659_v0 = vpack.c.bf16 %v1450_v50, %v682_v49 }
 0x20d   : > { %13153 = vmatmul.mubr.f32.vlgmr.msra.gmra.mrb[98].mxu0 %v3036_v17  ;;  %v3078_v17 = vcombine.high %v3070_v2, %v3070_v2 }
 0x20e   : > { %13223 = vmatmul.mubr.f32.vlgmr.msra.gmra.mrb[98].mxu1 %v3043_v22  ;;  %33632 = vmatpush1.bf16.xpose.msra.mxu0 %v33631_v54  ;;  %v676_v22 = vld [vmem:[%s35442_s22 + $0x680] sm:$0xff]  ;;  %v685_v54 = vld [vmem:[%s35442_s22 + $0x6c8] sm:$0xff] }
 0x20f   : > { %33636 = vmatpush1.bf16.xpose.msra.mxu1 %v33635_v55  ;;  %13292 = vmatprep.mubr.f32.mxu0 %v3061_v57  ;;  %v33647_v39 = vpack.c.bf16 %v1444_v23, %v676_v22  ;;  %v1453_v55 = vld [vmem:[%s35442_s22 + $0x1ec8] sm:$0x3]  ;;  %v331_v22 = vld [vmem:[%s35435_s12 + $0x1b8] sm:$0xff] }
 0x210   : > { %33638 = vmatprep.subr.bf16.mxu0 %v33637_v58  ;;  %v9514_v3 = vpop.f32.mrb[46].mxu0  ;;  %13362 = vmatprep.mubr.f32.mxu1 %v3062_v59  ;;  %v3131_v31 = vcombine.high %v331_v22, %v331_v22  ;;  %v3138_v36 = vrot.slane %v331_v22, %v35466_v25 }
 0x211   : > { %v9584_v4 = vpop.f32.mrb[46].mxu1  ;;  %33642 = vmatprep.subr.bf16.mxu1 %v33641_v60  ;;  %v9515_v8 = vadd.f32 %v9514_v3, %v9445_v56  ;;  %v9516_v9 = vpop.f32.mrb[47].mxu0  ;;  %v3111_v56 = vrot.slane %v3097_v46, %v35466_v25  ;;  %v687_v60 = vld [vmem:[%s35442_s22 + $0x6d8] sm:$0xff]  ;;  %v33661_v3 = vpack.c.bf16 %v1453_v55, %v685_v54 }
 0x212   : > { %v9586_v10 = vpop.f32.mrb[47].mxu1  ;;  %v33665_v5 = vpack.c.bf16 %v1455_v61, %v687_v60  ;;  %v686_v9 = vld [vmem:[%s35442_s22 + $0x6d0] sm:$0xff]  ;;  %v1463_v46 = vld [vmem:[%s35442_s22 + $0x1f18] sm:$0x3] }
 0x213   : > { %v9585_v16 = vadd.f32 %v9584_v4, %v9515_v8  ;;  %v3113_v4 = vcombine.high %v3111_v56, %v3111_v56  ;;  %v1452_v8 = vld [vmem:[%s35442_s22 + $0x1ec0] sm:$0x3]  ;;  %v1454_v10 = vld [vmem:[%s35442_s22 + $0x1ed0] sm:$0x3] }
 0x214   : > { %v33667_v24 = vpack.c.bf16 %v1454_v10, %v686_v9 }
 0x215   : > { %13293 = vmatmul.mubr.f32.vlgmr.msra.gmra.mrb[100].mxu0 %v3053_v42  ;;  %v3095_v42 = vcombine.high %v3087_v27, %v3087_v27 }
 0x216   : > { %13363 = vmatmul.mubr.f32.vlgmr.msra.gmra.mrb[100].mxu1 %v3060_v47  ;;  %33640 = vmatpush1.bf16.xpose.msra.mxu0 %v33639_v14  ;;  %v680_v47 = vld [vmem:[%s35442_s22 + $0x6a0] sm:$0xff]  ;;  %v689_v14 = vld [vmem:[%s35442_s22 + $0x6e8] sm:$0xff] }
 0x217   : > { %33644 = vmatpush1.bf16.xpose.msra.mxu1 %v33643_v15  ;;  %13432 = vmatprep.mubr.f32.mxu0 %v3078_v17  ;;  %v33655_v63 = vpack.c.bf16 %v1448_v48, %v680_v47  ;;  %v1457_v15 = vld [vmem:[%s35442_s22 + $0x1ee8] sm:$0x3]  ;;  %v332_v47 = vld [vmem:[%s35435_s12 + $0x1c0] sm:$0xff] }
 0x218   : > { %33646 = vmatprep.subr.bf16.mxu0 %v33645_v18  ;;  %v9654_v28 = vpop.f32.mrb[48].mxu0  ;;  %13502 = vmatprep.mubr.f32.mxu1 %v3079_v19  ;;  %v3148_v55 = vcombine.high %v332_v47, %v332_v47  ;;  %v3155_v60 = vrot.slane %v332_v47, %v35466_v25 }
 0x219   : > { %v9724_v29 = vpop.f32.mrb[48].mxu1  ;;  %33650 = vmatprep.subr.bf16.mxu1 %v33649_v20  ;;  %v9655_v33 = vadd.f32 %v9654_v28, %v9585_v16  ;;  %v9656_v34 = vpop.f32.mrb[49].mxu0  ;;  %v3128_v16 = vrot.slane %v3114_v6, %v35466_v25  ;;  %v691_v20 = vld [vmem:[%s35442_s22 + $0x6f8] sm:$0xff]  ;;  %v33669_v28 = vpack.c.bf16 %v1457_v15, %v689_v14 }
 0x21a   : > { %v9726_v35 = vpop.f32.mrb[49].mxu1  ;;  %v33673_v30 = vpack.c.bf16 %v1459_v21, %v691_v20  ;;  %v690_v34 = vld [vmem:[%s35442_s22 + $0x6f0] sm:$0xff]  ;;  %v1467_v6 = vld [vmem:[%s35442_s22 + $0x1f38] sm:$0x3] }
 0x21b   : > { %v9725_v41 = vadd.f32 %v9724_v29, %v9655_v33  ;;  %v3130_v29 = vcombine.high %v3128_v16, %v3128_v16  ;;  %v1456_v33 = vld [vmem:[%s35442_s22 + $0x1ee0] sm:$0x3]  ;;  %v1458_v35 = vld [vmem:[%s35442_s22 + $0x1ef0] sm:$0x3] }
 0x21c   : > { %v33675_v49 = vpack.c.bf16 %v1458_v35, %v690_v34 }
 0x21d   : > { %13433 = vmatmul.mubr.f32.vlgmr.msra.gmra.mrb[102].mxu0 %v3070_v2  ;;  %v3112_v2 = vcombine.high %v3104_v51, %v3104_v51 }
 0x21e   : > { %13503 = vmatmul.mubr.f32.vlgmr.msra.gmra.mrb[102].mxu1 %v3077_v7  ;;  %33648 = vmatpush1.bf16.xpose.msra.mxu0 %v33647_v39  ;;  %v684_v7 = vld [vmem:[%s35442_s22 + $0x6c0] sm:$0xff]  ;;  %v693_v39 = vld [vmem:[%s35442_s22 + $0x708] sm:$0xff] }
 0x21f   : > { %33652 = vmatpush1.bf16.xpose.msra.mxu1 %v33651_v40  ;;  %13572 = vmatprep.mubr.f32.mxu0 %v3095_v42  ;;  %v33663_v23 = vpack.c.bf16 %v1452_v8, %v684_v7  ;;  %v1461_v40 = vld [vmem:[%s35442_s22 + $0x1f08] sm:$0x3] }
 0x220   : > { %33654 = vmatprep.subr.bf16.mxu0 %v33653_v43  ;;  %v9794_v52 = vpop.f32.mrb[50].mxu0  ;;  %13642 = vmatprep.mubr.f32.mxu1 %v3096_v44  ;;  %v333_v7 = vld [vmem:[%s35435_s12 + $0x1c8] sm:$0xff] }
 0x221   : > { %v9864_v53 = vpop.f32.mrb[50].mxu1  ;;  %33658 = vmatprep.subr.bf16.mxu1 %v33657_v45  ;;  %v9795_v57 = vadd.f32 %v9794_v52, %v9725_v41  ;;  %v9796_v58 = vpop.f32.mrb[51].mxu0  ;;  %v3145_v41 = vrot.slane %v3131_v31, %v35466_v25  ;;  %v695_v45 = vld [vmem:[%s35442_s22 + $0x718] sm:$0xff]  ;;  %v33677_v52 = vpack.c.bf16 %v1461_v40, %v693_v39  ;;  %v3165_v15 = vcombine.high %v333_v7, %v333_v7 }
 0x222   : > { %v9866_v59 = vpop.f32.mrb[51].mxu1  ;;  %v33681_v54 = vpack.c.bf16 %v1463_v46, %v695_v45  ;;  %v694_v58 = vld [vmem:[%s35442_s22 + $0x710] sm:$0xff]  ;;  %v3172_v20 = vrot.slane %v333_v7, %v35466_v25  ;;  %v1471_v31 = vld [vmem:[%s35442_s22 + $0x1f58] sm:$0x3] }
 0x223   : > { %v9865_v1 = vadd.f32 %v9864_v53, %v9795_v57  ;;  %v3147_v53 = vcombine.high %v3145_v41, %v3145_v41  ;;  %v1460_v57 = vld [vmem:[%s35442_s22 + $0x1f00] sm:$0x3]  ;;  %v1462_v59 = vld [vmem:[%s35442_s22 + $0x1f10] sm:$0x3] }
 0x224   : > { %v33683_v9 = vpack.c.bf16 %v1462_v59, %v694_v58 }
 0x225   : > { %13573 = vmatmul.mubr.f32.vlgmr.msra.gmra.mrb[104].mxu0 %v3087_v27  ;;  %v3129_v27 = vcombine.high %v3121_v11, %v3121_v11 }
 0x226   : > { %13643 = vmatmul.mubr.f32.vlgmr.msra.gmra.mrb[104].mxu1 %v3094_v32  ;;  %33656 = vmatpush1.bf16.xpose.msra.mxu0 %v33655_v63  ;;  %v688_v32 = vld [vmem:[%s35442_s22 + $0x6e0] sm:$0xff]  ;;  %v697_v63 = vld [vmem:[%s35442_s22 + $0x728] sm:$0xff] }
 0x227   : > { %33660 = vmatpush1.bf16.xpose.msra.mxu1 %v33659_v0  ;;  %13712 = vmatprep.mubr.f32.mxu0 %v3112_v2  ;;  %v33671_v48 = vpack.c.bf16 %v1456_v33, %v688_v32  ;;  %v1465_v0 = vld [vmem:[%s35442_s22 + $0x1f28] sm:$0x3]  ;;  %v334_v32 = vld [vmem:[%s35435_s12 + $0x1d0] sm:$0xff] }
 0x228   : > { %33662 = vmatprep.subr.bf16.mxu0 %v33661_v3  ;;  %v9934_v12 = vpop.f32.mrb[52].mxu0  ;;  %13782 = vmatprep.mubr.f32.mxu1 %v3113_v4  ;;  %v3182_v40 = vcombine.high %v334_v32, %v334_v32  ;;  %v3189_v45 = vrot.slane %v334_v32, %v35466_v25 }
 0x229   : > { %v10004_v13 = vpop.f32.mrb[52].mxu1  ;;  %33666 = vmatprep.subr.bf16.mxu1 %v33665_v5  ;;  %v9935_v17 = vadd.f32 %v9934_v12, %v9865_v1  ;;  %v9936_v18 = vpop.f32.mrb[53].mxu0  ;;  %v3162_v1 = vrot.slane %v3148_v55, %v35466_v25  ;;  %v699_v5 = vld [vmem:[%s35442_s22 + $0x738] sm:$0xff]  ;;  %v33685_v12 = vpack.c.bf16 %v1465_v0, %v697_v63 }
 0x22a   : > { %v10006_v19 = vpop.f32.mrb[53].mxu1  ;;  %v33689_v14 = vpack.c.bf16 %v1467_v6, %v699_v5  ;;  %v698_v18 = vld [vmem:[%s35442_s22 + $0x730] sm:$0xff]  ;;  %v1475_v55 = vld [vmem:[%s35442_s22 + $0x1f78] sm:$0x3] }
 0x22b   : > { %v10005_v26 = vadd.f32 %v10004_v13, %v9935_v17  ;;  %v3164_v13 = vcombine.high %v3162_v1, %v3162_v1  ;;  %v1464_v17 = vld [vmem:[%s35442_s22 + $0x1f20] sm:$0x3]  ;;  %v1466_v19 = vld [vmem:[%s35442_s22 + $0x1f30] sm:$0x3] }
 0x22c   : > { %v33691_v34 = vpack.c.bf16 %v1466_v19, %v698_v18 }
 0x22d   : > { %13713 = vmatmul.mubr.f32.vlgmr.msra.gmra.mrb[106].mxu0 %v3104_v51  ;;  %v3146_v51 = vcombine.high %v3138_v36, %v3138_v36 }
 0x22e   : > { %13783 = vmatmul.mubr.f32.vlgmr.msra.gmra.mrb[106].mxu1 %v3111_v56  ;;  %33664 = vmatpush1.bf16.xpose.msra.mxu0 %v33663_v23  ;;  %v692_v56 = vld [vmem:[%s35442_s22 + $0x700] sm:$0xff]  ;;  %v701_v23 = vld [vmem:[%s35442_s22 + $0x748] sm:$0xff] }
 0x22f   : > { %33668 = vmatpush1.bf16.xpose.msra.mxu1 %v33667_v24  ;;  %13852 = vmatprep.mubr.f32.mxu0 %v3129_v27  ;;  %v33679_v8 = vpack.c.bf16 %v1460_v57, %v692_v56  ;;  %v1469_v24 = vld [vmem:[%s35442_s22 + $0x1f48] sm:$0x3]  ;;  %v335_v56 = vld [vmem:[%s35435_s12 + $0x1d8] sm:$0xff] }
 0x230   : > { %33670 = vmatprep.subr.bf16.mxu0 %v33669_v28  ;;  %v10074_v37 = vpop.f32.mrb[54].mxu0  ;;  %13922 = vmatprep.mubr.f32.mxu1 %v3130_v29  ;;  %v3199_v0 = vcombine.high %v335_v56, %v335_v56  ;;  %v3206_v5 = vrot.slane %v335_v56, %v35466_v25 }
 0x231   : > { %v10144_v38 = vpop.f32.mrb[54].mxu1  ;;  %33674 = vmatprep.subr.bf16.mxu1 %v33673_v30  ;;  %v10075_v42 = vadd.f32 %v10074_v37, %v10005_v26  ;;  %v10076_v43 = vpop.f32.mrb[55].mxu0  ;;  %v3179_v26 = vrot.slane %v3165_v15, %v35466_v25  ;;  %v703_v30 = vld [vmem:[%s35442_s22 + $0x758] sm:$0xff]  ;;  %v33693_v37 = vpack.c.bf16 %v1469_v24, %v701_v23 }
 0x232   : > { %v10146_v44 = vpop.f32.mrb[55].mxu1  ;;  %v33697_v39 = vpack.c.bf16 %v1471_v31, %v703_v30  ;;  %v702_v43 = vld [vmem:[%s35442_s22 + $0x750] sm:$0xff]  ;;  %v1479_v15 = vld [vmem:[%s35442_s22 + $0x1f98] sm:$0x3] }
 0x233   : > { %v10145_v50 = vadd.f32 %v10144_v38, %v10075_v42  ;;  %v3181_v38 = vcombine.high %v3179_v26, %v3179_v26  ;;  %v1468_v42 = vld [vmem:[%s35442_s22 + $0x1f40] sm:$0x3]  ;;  %v1470_v44 = vld [vmem:[%s35442_s22 + $0x1f50] sm:$0x3] }
 0x234   : > { %v33699_v58 = vpack.c.bf16 %v1470_v44, %v702_v43 }
 0x235   : > { %13853 = vmatmul.mubr.f32.vlgmr.msra.gmra.mrb[108].mxu0 %v3121_v11  ;;  %v3163_v11 = vcombine.high %v3155_v60, %v3155_v60 }
 0x236   : > { %13923 = vmatmul.mubr.f32.vlgmr.msra.gmra.mrb[108].mxu1 %v3128_v16  ;;  %33672 = vmatpush1.bf16.xpose.msra.mxu0 %v33671_v48  ;;  %v696_v16 = vld [vmem:[%s35442_s22 + $0x720] sm:$0xff]  ;;  %v705_v48 = vld [vmem:[%s35442_s22 + $0x768] sm:$0xff] }
 0x237   : > { %33676 = vmatpush1.bf16.xpose.msra.mxu1 %v33675_v49  ;;  %13992 = vmatprep.mubr.f32.mxu0 %v3146_v51  ;;  %v33687_v33 = vpack.c.bf16 %v1464_v17, %v696_v16  ;;  %v1473_v49 = vld [vmem:[%s35442_s22 + $0x1f68] sm:$0x3]  ;;  %v336_v16 = vld [vmem:[%s35435_s12 + $0x1e0] sm:$0xff] }
 0x238   : > { %33678 = vmatprep.subr.bf16.mxu0 %v33677_v52  ;;  %v10214_v61 = vpop.f32.mrb[56].mxu0  ;;  %14062 = vmatprep.mubr.f32.mxu1 %v3147_v53  ;;  %v3216_v24 = vcombine.high %v336_v16, %v336_v16  ;;  %v3223_v30 = vrot.slane %v336_v16, %v35466_v25 }
 0x239   : > { %v10284_v62 = vpop.f32.mrb[56].mxu1  ;;  %33682 = vmatprep.subr.bf16.mxu1 %v33681_v54  ;;  %v10215_v2 = vadd.f32 %v10214_v61, %v10145_v50  ;;  %v10216_v3 = vpop.f32.mrb[57].mxu0  ;;  %v3196_v50 = vrot.slane %v3182_v40, %v35466_v25  ;;  %v707_v54 = vld [vmem:[%s35442_s22 + $0x778] sm:$0xff]  ;;  %v33701_v61 = vpack.c.bf16 %v1473_v49, %v705_v48 }
 0x23a   : > { %v10286_v4 = vpop.f32.mrb[57].mxu1  ;;  %v33705_v63 = vpack.c.bf16 %v1475_v55, %v707_v54  ;;  %v706_v3 = vld [vmem:[%s35442_s22 + $0x770] sm:$0xff]  ;;  %v1483_v40 = vld [vmem:[%s35442_s22 + $0x1fb8] sm:$0x3] }
 0x23b   : > { %v10285_v10 = vadd.f32 %v10284_v62, %v10215_v2  ;;  %v3198_v62 = vcombine.high %v3196_v50, %v3196_v50  ;;  %v1472_v2 = vld [vmem:[%s35442_s22 + $0x1f60] sm:$0x3]  ;;  %v1474_v4 = vld [vmem:[%s35442_s22 + $0x1f70] sm:$0x3] }
 0x23c   : > { %v33707_v18 = vpack.c.bf16 %v1474_v4, %v706_v3 }
 0x23d   : > { %13993 = vmatmul.mubr.f32.vlgmr.msra.gmra.mrb[110].mxu0 %v3138_v36  ;;  %v3180_v36 = vcombine.high %v3172_v20, %v3172_v20 }
 0x23e   : > { %14063 = vmatmul.mubr.f32.vlgmr.msra.gmra.mrb[110].mxu1 %v3145_v41  ;;  %33680 = vmatpush1.bf16.xpose.msra.mxu0 %v33679_v8  ;;  %v700_v41 = vld [vmem:[%s35442_s22 + $0x740] sm:$0xff]  ;;  %v709_v8 = vld [vmem:[%s35442_s22 + $0x788] sm:$0xff] }
 0x23f   : > { %33684 = vmatpush1.bf16.xpose.msra.mxu1 %v33683_v9  ;;  %14132 = vmatprep.mubr.f32.mxu0 %v3163_v11  ;;  %v33695_v57 = vpack.c.bf16 %v1468_v42, %v700_v41  ;;  %v1477_v9 = vld [vmem:[%s35442_s22 + $0x1f88] sm:$0x3] }
 0x240   : > { %33686 = vmatprep.subr.bf16.mxu0 %v33685_v12  ;;  %v10354_v21 = vpop.f32.mrb[58].mxu0  ;;  %14202 = vmatprep.mubr.f32.mxu1 %v3164_v13  ;;  %v337_v41 = vld [vmem:[%s35435_s12 + $0x1e8] sm:$0xff] }
 0x241   : > { %v10424_v22 = vpop.f32.mrb[58].mxu1  ;;  %33690 = vmatprep.subr.bf16.mxu1 %v33689_v14  ;;  %v10355_v27 = vadd.f32 %v10354_v21, %v10285_v10  ;;  %v10356_v28 = vpop.f32.mrb[59].mxu0  ;;  %v3213_v10 = vrot.slane %v3199_v0, %v35466_v25  ;;  %v711_v14 = vld [vmem:[%s35442_s22 + $0x798] sm:$0xff]  ;;  %v33709_v21 = vpack.c.bf16 %v1477_v9, %v709_v8  ;;  %v3233_v49 = vcombine.high %v337_v41, %v337_v41 }
 0x242   : > { %v10426_v29 = vpop.f32.mrb[59].mxu1  ;;  %v33713_v23 = vpack.c.bf16 %v1479_v15, %v711_v14  ;;  %v710_v28 = vld [vmem:[%s35442_s22 + $0x790] sm:$0xff]  ;;  %v3240_v54 = vrot.slane %v337_v41, %v35466_v25  ;;  %v1487_v0 = vld [vmem:[%s35442_s22 + $0x1fd8] sm:$0x3] }
 0x243   : > { %v10425_v35 = vadd.f32 %v10424_v22, %v10355_v27  ;;  %v3215_v22 = vcombine.high %v3213_v10, %v3213_v10  ;;  %v1476_v27 = vld [vmem:[%s35442_s22 + $0x1f80] sm:$0x3]  ;;  %v1478_v29 = vld [vmem:[%s35442_s22 + $0x1f90] sm:$0x3] }
 0x244   : > { %v33715_v43 = vpack.c.bf16 %v1478_v29, %v710_v28 }
 0x245   : > { %14133 = vmatmul.mubr.f32.vlgmr.msra.gmra.mrb[112].mxu0 %v3155_v60  ;;  %v3197_v60 = vcombine.high %v3189_v45, %v3189_v45 }
 0x246   : > { %14203 = vmatmul.mubr.f32.vlgmr.msra.gmra.mrb[112].mxu1 %v3162_v1  ;;  %33688 = vmatpush1.bf16.xpose.msra.mxu0 %v33687_v33  ;;  %v704_v1 = vld [vmem:[%s35442_s22 + $0x760] sm:$0xff]  ;;  %v713_v33 = vld [vmem:[%s35442_s22 + $0x7a8] sm:$0xff] }
 0x247   : > { %33692 = vmatpush1.bf16.xpose.msra.mxu1 %v33691_v34  ;;  %14272 = vmatprep.mubr.f32.mxu0 %v3180_v36  ;;  %v33703_v17 = vpack.c.bf16 %v1472_v2, %v704_v1  ;;  %v1481_v34 = vld [vmem:[%s35442_s22 + $0x1fa8] sm:$0x3]  ;;  %v338_v1 = vld [vmem:[%s35435_s12 + $0x1f0] sm:$0xff] }
 0x248   : > { %33694 = vmatprep.subr.bf16.mxu0 %v33693_v37  ;;  %v10494_v46 = vpop.f32.mrb[60].mxu0  ;;  %14342 = vmatprep.mubr.f32.mxu1 %v3181_v38  ;;  %v3250_v9 = vcombine.high %v338_v1, %v338_v1  ;;  %v3257_v14 = vrot.slane %v338_v1, %v35466_v25 }
 0x249   : > { %v10564_v47 = vpop.f32.mrb[60].mxu1  ;;  %33698 = vmatprep.subr.bf16.mxu1 %v33697_v39  ;;  %v10495_v51 = vadd.f32 %v10494_v46, %v10425_v35  ;;  %v10496_v52 = vpop.f32.mrb[61].mxu0  ;;  %v3230_v35 = vrot.slane %v3216_v24, %v35466_v25  ;;  %v715_v39 = vld [vmem:[%s35442_s22 + $0x7b8] sm:$0xff]  ;;  %v33717_v46 = vpack.c.bf16 %v1481_v34, %v713_v33 }
 0x24a   : > { %v10566_v53 = vpop.f32.mrb[61].mxu1  ;;  %v33721_v48 = vpack.c.bf16 %v1483_v40, %v715_v39  ;;  %v714_v52 = vld [vmem:[%s35442_s22 + $0x7b0] sm:$0xff]  ;;  %v1491_v24 = vld [vmem:[%s35442_s22 + $0x1ff8] sm:$0x3] }
 0x24b   : > { %v10565_v59 = vadd.f32 %v10564_v47, %v10495_v51  ;;  %v3232_v47 = vcombine.high %v3230_v35, %v3230_v35  ;;  %v1480_v51 = vld [vmem:[%s35442_s22 + $0x1fa0] sm:$0x3]  ;;  %v1482_v53 = vld [vmem:[%s35442_s22 + $0x1fb0] sm:$0x3] }
 0x24c   : > { %v33723_v3 = vpack.c.bf16 %v1482_v53, %v714_v52 }
 0x24d   : > { %14273 = vmatmul.mubr.f32.vlgmr.msra.gmra.mrb[114].mxu0 %v3172_v20  ;;  %v3214_v20 = vcombine.high %v3206_v5, %v3206_v5 }
 0x24e   : > { %14343 = vmatmul.mubr.f32.vlgmr.msra.gmra.mrb[114].mxu1 %v3179_v26  ;;  %33696 = vmatpush1.bf16.xpose.msra.mxu0 %v33695_v57  ;;  %v708_v26 = vld [vmem:[%s35442_s22 + $0x780] sm:$0xff]  ;;  %v717_v57 = vld [vmem:[%s35442_s22 + $0x7c8] sm:$0xff] }
 0x24f   : > { %33700 = vmatpush1.bf16.xpose.msra.mxu1 %v33699_v58  ;;  %14412 = vmatprep.mubr.f32.mxu0 %v3197_v60  ;;  %v33711_v42 = vpack.c.bf16 %v1476_v27, %v708_v26  ;;  %v1485_v58 = vld [vmem:[%s35442_s22 + $0x1fc8] sm:$0x3]  ;;  %v339_v26 = vld [vmem:[%s35435_s12 + $0x1f8] sm:$0xff] }
 0x250   : > { %33702 = vmatprep.subr.bf16.mxu0 %v33701_v61  ;;  %v10634_v6 = vpop.f32.mrb[62].mxu0  ;;  %14482 = vmatprep.mubr.f32.mxu1 %v3198_v62  ;;  %v3267_v34 = vcombine.high %v339_v26, %v339_v26  ;;  %v3274_v39 = vrot.slane %v339_v26, %v35466_v25 }
 0x251   : > { %v10704_v7 = vpop.f32.mrb[62].mxu1  ;;  %33706 = vmatprep.subr.bf16.mxu1 %v33705_v63  ;;  %v10635_v11 = vadd.f32 %v10634_v6, %v10565_v59  ;;  %v10636_v12 = vpop.f32.mrb[63].mxu0  ;;  %v3247_v59 = vrot.slane %v3233_v49, %v35466_v25  ;;  %v719_v63 = vld [vmem:[%s35442_s22 + $0x7d8] sm:$0xff]  ;;  %v33725_v6 = vpack.c.bf16 %v1485_v58, %v717_v57 }
 0x252   : > { %v10706_v13 = vpop.f32.mrb[63].mxu1  ;;  %v33729_v8 = vpack.c.bf16 %v1487_v0, %v719_v63  ;;  %v718_v12 = vld [vmem:[%s35442_s22 + $0x7d0] sm:$0xff]  ;;  %v1495_v49 = vld [vmem:[%s35442_s22 + $0x2018] sm:$0x3] }
 0x253   : > { %v10705_v19 = vadd.f32 %v10704_v7, %v10635_v11  ;;  %v3249_v7 = vcombine.high %v3247_v59, %v3247_v59  ;;  %v1484_v11 = vld [vmem:[%s35442_s22 + $0x1fc0] sm:$0x3]  ;;  %v1486_v13 = vld [vmem:[%s35442_s22 + $0x1fd0] sm:$0x3] }
 0x254   : > { %v33731_v28 = vpack.c.bf16 %v1486_v13, %v718_v12 }
 0x255   : > { %14413 = vmatmul.mubr.f32.vlgmr.msra.gmra.mrb[116].mxu0 %v3189_v45  ;;  %v3231_v45 = vcombine.high %v3223_v30, %v3223_v30 }
 0x256   : > { %14483 = vmatmul.mubr.f32.vlgmr.msra.gmra.mrb[116].mxu1 %v3196_v50  ;;  %33704 = vmatpush1.bf16.xpose.msra.mxu0 %v33703_v17  ;;  %v712_v50 = vld [vmem:[%s35442_s22 + $0x7a0] sm:$0xff]  ;;  %v721_v17 = vld [vmem:[%s35442_s22 + $0x7e8] sm:$0xff] }
 0x257   : > { %33708 = vmatpush1.bf16.xpose.msra.mxu1 %v33707_v18  ;;  %14552 = vmatprep.mubr.f32.mxu0 %v3214_v20  ;;  %v33719_v2 = vpack.c.bf16 %v1480_v51, %v712_v50  ;;  %v1489_v18 = vld [vmem:[%s35442_s22 + $0x1fe8] sm:$0x3]  ;;  %v340_v50 = vld [vmem:[%s35435_s12 + $0x200] sm:$0xff] }
 0x258   : > { %33710 = vmatprep.subr.bf16.mxu0 %v33709_v21  ;;  %v10774_v31 = vpop.f32.mrb[64].mxu0  ;;  %14622 = vmatprep.mubr.f32.mxu1 %v3215_v22  ;;  %v3284_v58 = vcombine.high %v340_v50, %v340_v50  ;;  %v3291_v63 = vrot.slane %v340_v50, %v35466_v25 }
 0x259   : > { %v10844_v32 = vpop.f32.mrb[64].mxu1  ;;  %33714 = vmatprep.subr.bf16.mxu1 %v33713_v23  ;;  %v10775_v36 = vadd.f32 %v10774_v31, %v10705_v19  ;;  %v10776_v37 = vpop.f32.mrb[65].mxu0  ;;  %v3264_v19 = vrot.slane %v3250_v9, %v35466_v25  ;;  %v723_v23 = vld [vmem:[%s35442_s22 + $0x7f8] sm:$0xff]  ;;  %v33733_v31 = vpack.c.bf16 %v1489_v18, %v721_v17 }
 0x25a   : > { %v10846_v38 = vpop.f32.mrb[65].mxu1  ;;  %v33737_v33 = vpack.c.bf16 %v1491_v24, %v723_v23  ;;  %v722_v37 = vld [vmem:[%s35442_s22 + $0x7f0] sm:$0xff]  ;;  %v1499_v9 = vld [vmem:[%s35442_s22 + $0x2038] sm:$0x3] }
 0x25b   : > { %v10845_v44 = vadd.f32 %v10844_v32, %v10775_v36  ;;  %v3266_v32 = vcombine.high %v3264_v19, %v3264_v19  ;;  %v1488_v36 = vld [vmem:[%s35442_s22 + $0x1fe0] sm:$0x3]  ;;  %v1490_v38 = vld [vmem:[%s35442_s22 + $0x1ff0] sm:$0x3] }
 0x25c   : > { %v33739_v52 = vpack.c.bf16 %v1490_v38, %v722_v37 }
 0x25d   : > { %14553 = vmatmul.mubr.f32.vlgmr.msra.gmra.mrb[118].mxu0 %v3206_v5  ;;  %v3248_v5 = vcombine.high %v3240_v54, %v3240_v54 }
 0x25e   : > { %14623 = vmatmul.mubr.f32.vlgmr.msra.gmra.mrb[118].mxu1 %v3213_v10  ;;  %33712 = vmatpush1.bf16.xpose.msra.mxu0 %v33711_v42  ;;  %v716_v10 = vld [vmem:[%s35442_s22 + $0x7c0] sm:$0xff]  ;;  %v725_v42 = vld [vmem:[%s35442_s22 + $0x808] sm:$0xff] }
 0x25f   : > { %33716 = vmatpush1.bf16.xpose.msra.mxu1 %v33715_v43  ;;  %14692 = vmatprep.mubr.f32.mxu0 %v3231_v45  ;;  %v33727_v27 = vpack.c.bf16 %v1484_v11, %v716_v10  ;;  %v1493_v43 = vld [vmem:[%s35442_s22 + $0x2008] sm:$0x3] }
 0x260   : > { %33718 = vmatprep.subr.bf16.mxu0 %v33717_v46  ;;  %v10914_v55 = vpop.f32.mrb[66].mxu0  ;;  %14762 = vmatprep.mubr.f32.mxu1 %v3232_v47  ;;  %v341_v10 = vld [vmem:[%s35435_s12 + $0x208] sm:$0xff] }
 0x261   : > { %v10984_v56 = vpop.f32.mrb[66].mxu1  ;;  %33722 = vmatprep.subr.bf16.mxu1 %v33721_v48  ;;  %v10915_v60 = vadd.f32 %v10914_v55, %v10845_v44  ;;  %v10916_v61 = vpop.f32.mrb[67].mxu0  ;;  %v3281_v44 = vrot.slane %v3267_v34, %v35466_v25  ;;  %v727_v48 = vld [vmem:[%s35442_s22 + $0x818] sm:$0xff]  ;;  %v33741_v55 = vpack.c.bf16 %v1493_v43, %v725_v42  ;;  %v3301_v18 = vcombine.high %v341_v10, %v341_v10 }
 0x262   : > { %v10986_v62 = vpop.f32.mrb[67].mxu1  ;;  %v33745_v57 = vpack.c.bf16 %v1495_v49, %v727_v48  ;;  %v726_v61 = vld [vmem:[%s35442_s22 + $0x810] sm:$0xff]  ;;  %v3308_v23 = vrot.slane %v341_v10, %v35466_v25  ;;  %v1503_v34 = vld [vmem:[%s35442_s22 + $0x2058] sm:$0x3] }
 0x263   : > { %v10985_v4 = vadd.f32 %v10984_v56, %v10915_v60  ;;  %v3283_v56 = vcombine.high %v3281_v44, %v3281_v44  ;;  %v1492_v60 = vld [vmem:[%s35442_s22 + $0x2000] sm:$0x3]  ;;  %v1494_v62 = vld [vmem:[%s35442_s22 + $0x2010] sm:$0x3] }
 0x264   : > { %v33747_v12 = vpack.c.bf16 %v1494_v62, %v726_v61 }
 0x265   : > { %14693 = vmatmul.mubr.f32.vlgmr.msra.gmra.mrb[120].mxu0 %v3223_v30  ;;  %v3265_v30 = vcombine.high %v3257_v14, %v3257_v14 }
 0x266   : > { %14763 = vmatmul.mubr.f32.vlgmr.msra.gmra.mrb[120].mxu1 %v3230_v35  ;;  %33720 = vmatpush1.bf16.xpose.msra.mxu0 %v33719_v2  ;;  %v720_v35 = vld [vmem:[%s35442_s22 + $0x7e0] sm:$0xff]  ;;  %v729_v2 = vld [vmem:[%s35442_s22 + $0x828] sm:$0xff] }
 0x267   : > { %33724 = vmatpush1.bf16.xpose.msra.mxu1 %v33723_v3  ;;  %14832 = vmatprep.mubr.f32.mxu0 %v3248_v5  ;;  %v33735_v51 = vpack.c.bf16 %v1488_v36, %v720_v35  ;;  %v1497_v3 = vld [vmem:[%s35442_s22 + $0x2028] sm:$0x3]  ;;  %v342_v35 = vld [vmem:[%s35435_s12 + $0x210] sm:$0xff] }
 0x268   : > { %33726 = vmatprep.subr.bf16.mxu0 %v33725_v6  ;;  %v11054_v15 = vpop.f32.mrb[68].mxu0  ;;  %14902 = vmatprep.mubr.f32.mxu1 %v3249_v7  ;;  %v3318_v43 = vcombine.high %v342_v35, %v342_v35  ;;  %v3325_v48 = vrot.slane %v342_v35, %v35466_v25 }
 0x269   : > { %v11124_v16 = vpop.f32.mrb[68].mxu1  ;;  %33730 = vmatprep.subr.bf16.mxu1 %v33729_v8  ;;  %v11055_v20 = vadd.f32 %v11054_v15, %v10985_v4  ;;  %v11056_v21 = vpop.f32.mrb[69].mxu0  ;;  %v3298_v4 = vrot.slane %v3284_v58, %v35466_v25  ;;  %v731_v8 = vld [vmem:[%s35442_s22 + $0x838] sm:$0xff]  ;;  %v33749_v15 = vpack.c.bf16 %v1497_v3, %v729_v2 }
 0x26a   : > { %v11126_v22 = vpop.f32.mrb[69].mxu1  ;;  %v33753_v17 = vpack.c.bf16 %v1499_v9, %v731_v8  ;;  %v730_v21 = vld [vmem:[%s35442_s22 + $0x830] sm:$0xff]  ;;  %v1507_v58 = vld [vmem:[%s35442_s22 + $0x2078] sm:$0x3] }
 0x26b   : > { %v11125_v29 = vadd.f32 %v11124_v16, %v11055_v20  ;;  %v3300_v16 = vcombine.high %v3298_v4, %v3298_v4  ;;  %v1496_v20 = vld [vmem:[%s35442_s22 + $0x2020] sm:$0x3]  ;;  %v1498_v22 = vld [vmem:[%s35442_s22 + $0x2030] sm:$0x3] }
 0x26c   : > { %v33755_v37 = vpack.c.bf16 %v1498_v22, %v730_v21 }
 0x26d   : > { %14833 = vmatmul.mubr.f32.vlgmr.msra.gmra.mrb[122].mxu0 %v3240_v54  ;;  %v3282_v54 = vcombine.high %v3274_v39, %v3274_v39 }
 0x26e   : > { %14903 = vmatmul.mubr.f32.vlgmr.msra.gmra.mrb[122].mxu1 %v3247_v59  ;;  %33728 = vmatpush1.bf16.xpose.msra.mxu0 %v33727_v27  ;;  %v724_v59 = vld [vmem:[%s35442_s22 + $0x800] sm:$0xff]  ;;  %v733_v27 = vld [vmem:[%s35442_s22 + $0x848] sm:$0xff] }
 0x26f   : > { %33732 = vmatpush1.bf16.xpose.msra.mxu1 %v33731_v28  ;;  %14972 = vmatprep.mubr.f32.mxu0 %v3265_v30  ;;  %v33743_v11 = vpack.c.bf16 %v1492_v60, %v724_v59  ;;  %v1501_v28 = vld [vmem:[%s35442_s22 + $0x2048] sm:$0x3]  ;;  %v343_v59 = vld [vmem:[%s35435_s12 + $0x218] sm:$0xff] }
 0x270   : > { %33734 = vmatprep.subr.bf16.mxu0 %v33733_v31  ;;  %v11194_v40 = vpop.f32.mrb[70].mxu0  ;;  %15042 = vmatprep.mubr.f32.mxu1 %v3266_v32  ;;  %v3335_v3 = vcombine.high %v343_v59, %v343_v59  ;;  %v3342_v8 = vrot.slane %v343_v59, %v35466_v25 }
 0x271   : > { %v11264_v41 = vpop.f32.mrb[70].mxu1  ;;  %33738 = vmatprep.subr.bf16.mxu1 %v33737_v33  ;;  %v11195_v45 = vadd.f32 %v11194_v40, %v11125_v29  ;;  %v11196_v46 = vpop.f32.mrb[71].mxu0  ;;  %v3315_v29 = vrot.slane %v3301_v18, %v35466_v25  ;;  %v735_v33 = vld [vmem:[%s35442_s22 + $0x858] sm:$0xff]  ;;  %v33757_v40 = vpack.c.bf16 %v1501_v28, %v733_v27 }
 0x272   : > { %v11266_v47 = vpop.f32.mrb[71].mxu1  ;;  %v33761_v42 = vpack.c.bf16 %v1503_v34, %v735_v33  ;;  %v734_v46 = vld [vmem:[%s35442_s22 + $0x850] sm:$0xff]  ;;  %v1511_v18 = vld [vmem:[%s35442_s22 + $0x2098] sm:$0x3] }
 0x273   : > { %v11265_v53 = vadd.f32 %v11264_v41, %v11195_v45  ;;  %v3317_v41 = vcombine.high %v3315_v29, %v3315_v29  ;;  %v1500_v45 = vld [vmem:[%s35442_s22 + $0x2040] sm:$0x3]  ;;  %v1502_v47 = vld [vmem:[%s35442_s22 + $0x2050] sm:$0x3] }
 0x274   : > { %v33763_v61 = vpack.c.bf16 %v1502_v47, %v734_v46 }
 0x275   : > { %14973 = vmatmul.mubr.f32.vlgmr.msra.gmra.mrb[124].mxu0 %v3257_v14  ;;  %v3299_v14 = vcombine.high %v3291_v63, %v3291_v63 }
 0x276   : > { %15043 = vmatmul.mubr.f32.vlgmr.msra.gmra.mrb[124].mxu1 %v3264_v19  ;;  %33736 = vmatpush1.bf16.xpose.msra.mxu0 %v33735_v51  ;;  %v728_v19 = vld [vmem:[%s35442_s22 + $0x820] sm:$0xff]  ;;  %v737_v51 = vld [vmem:[%s35442_s22 + $0x868] sm:$0xff] }
 0x277   : > { %33740 = vmatpush1.bf16.xpose.msra.mxu1 %v33739_v52  ;;  %15112 = vmatprep.mubr.f32.mxu0 %v3282_v54  ;;  %v33751_v36 = vpack.c.bf16 %v1496_v20, %v728_v19  ;;  %v1505_v52 = vld [vmem:[%s35442_s22 + $0x2068] sm:$0x3]  ;;  %v344_v19 = vld [vmem:[%s35435_s12 + $0x220] sm:$0xff] }
 0x278   : > { %33742 = vmatprep.subr.bf16.mxu0 %v33741_v55  ;;  %v11334_v0 = vpop.f32.mrb[72].mxu0  ;;  %15182 = vmatprep.mubr.f32.mxu1 %v3283_v56  ;;  %v3352_v28 = vcombine.high %v344_v19, %v344_v19  ;;  %v3359_v33 = vrot.slane %v344_v19, %v35466_v25 }
 0x279   : > { %v11404_v1 = vpop.f32.mrb[72].mxu1  ;;  %33746 = vmatprep.subr.bf16.mxu1 %v33745_v57  ;;  %v11335_v5 = vadd.f32 %v11334_v0, %v11265_v53  ;;  %v11336_v6 = vpop.f32.mrb[73].mxu0  ;;  %v3332_v53 = vrot.slane %v3318_v43, %v35466_v25  ;;  %v739_v57 = vld [vmem:[%s35442_s22 + $0x878] sm:$0xff]  ;;  %v33765_v0 = vpack.c.bf16 %v1505_v52, %v737_v51 }
 0x27a   : > { %v11406_v7 = vpop.f32.mrb[73].mxu1  ;;  %v33769_v2 = vpack.c.bf16 %v1507_v58, %v739_v57  ;;  %v738_v6 = vld [vmem:[%s35442_s22 + $0x870] sm:$0xff]  ;;  %v1515_v43 = vld [vmem:[%s35442_s22 + $0x20b8] sm:$0x3] }
 0x27b   : > { %v11405_v13 = vadd.f32 %v11404_v1, %v11335_v5  ;;  %v3334_v1 = vcombine.high %v3332_v53, %v3332_v53  ;;  %v1504_v5 = vld [vmem:[%s35442_s22 + $0x2060] sm:$0x3]  ;;  %v1506_v7 = vld [vmem:[%s35442_s22 + $0x2070] sm:$0x3] }
 0x27c   : > { %v33771_v21 = vpack.c.bf16 %v1506_v7, %v738_v6 }
 0x27d   : > { %15113 = vmatmul.mubr.f32.vlgmr.msra.gmra.mrb[126].mxu0 %v3274_v39  ;;  %v3316_v39 = vcombine.high %v3308_v23, %v3308_v23 }
 0x27e   : > { %15183 = vmatmul.mubr.f32.vlgmr.msra.gmra.mrb[126].mxu1 %v3281_v44  ;;  %33744 = vmatpush1.bf16.xpose.msra.mxu0 %v33743_v11  ;;  %v732_v44 = vld [vmem:[%s35442_s22 + $0x840] sm:$0xff]  ;;  %v741_v11 = vld [vmem:[%s35442_s22 + $0x888] sm:$0xff] }
 0x27f   : > { %33748 = vmatpush1.bf16.xpose.msra.mxu1 %v33747_v12  ;;  %15252 = vmatprep.mubr.f32.mxu0 %v3299_v14  ;;  %v33759_v60 = vpack.c.bf16 %v1500_v45, %v732_v44  ;;  %v1509_v12 = vld [vmem:[%s35442_s22 + $0x2088] sm:$0x3] }
 0x280   : > { %33750 = vmatprep.subr.bf16.mxu0 %v33749_v15  ;;  %v11474_v24 = vpop.f32.mrb[74].mxu0  ;;  %15322 = vmatprep.mubr.f32.mxu1 %v3300_v16  ;;  %v345_v44 = vld [vmem:[%s35435_s12 + $0x228] sm:$0xff] }
 0x281   : > { %v11544_v26 = vpop.f32.mrb[74].mxu1  ;;  %33754 = vmatprep.subr.bf16.mxu1 %v33753_v17  ;;  %v11475_v30 = vadd.f32 %v11474_v24, %v11405_v13  ;;  %v11476_v31 = vpop.f32.mrb[75].mxu0  ;;  %v3349_v13 = vrot.slane %v3335_v3, %v35466_v25  ;;  %v743_v17 = vld [vmem:[%s35442_s22 + $0x898] sm:$0xff]  ;;  %v33773_v24 = vpack.c.bf16 %v1509_v12, %v741_v11  ;;  %v3369_v52 = vcombine.high %v345_v44, %v345_v44 }
 0x282   : > { %v11546_v32 = vpop.f32.mrb[75].mxu1  ;;  %v33777_v27 = vpack.c.bf16 %v1511_v18, %v743_v17  ;;  %v742_v31 = vld [vmem:[%s35442_s22 + $0x890] sm:$0xff]  ;;  %v3376_v57 = vrot.slane %v345_v44, %v35466_v25  ;;  %v1519_v3 = vld [vmem:[%s35442_s22 + $0x20d8] sm:$0x3] }
 0x283   : > { %v11545_v38 = vadd.f32 %v11544_v26, %v11475_v30  ;;  %v3351_v26 = vcombine.high %v3349_v13, %v3349_v13  ;;  %v1508_v30 = vld [vmem:[%s35442_s22 + $0x2080] sm:$0x3]  ;;  %v1510_v32 = vld [vmem:[%s35442_s22 + $0x2090] sm:$0x3] }
 0x284   : > { %v33779_v46 = vpack.c.bf16 %v1510_v32, %v742_v31 }
 0x285   : > { %15253 = vmatmul.mubr.f32.vlgmr.msra.gmra.mrb[128].mxu0 %v3291_v63  ;;  %v3333_v63 = vcombine.high %v3325_v48, %v3325_v48 }
 0x286   : > { %15323 = vmatmul.mubr.f32.vlgmr.msra.gmra.mrb[128].mxu1 %v3298_v4  ;;  %33752 = vmatpush1.bf16.xpose.msra.mxu0 %v33751_v36  ;;  %v736_v4 = vld [vmem:[%s35442_s22 + $0x860] sm:$0xff]  ;;  %v745_v36 = vld [vmem:[%s35442_s22 + $0x8a8] sm:$0xff] }
 0x287   : > { %33756 = vmatpush1.bf16.xpose.msra.mxu1 %v33755_v37  ;;  %15392 = vmatprep.mubr.f32.mxu0 %v3316_v39  ;;  %v33767_v20 = vpack.c.bf16 %v1504_v5, %v736_v4  ;;  %v1513_v37 = vld [vmem:[%s35442_s22 + $0x20a8] sm:$0x3]  ;;  %v346_v4 = vld [vmem:[%s35435_s12 + $0x230] sm:$0xff] }
 0x288   : > { %33758 = vmatprep.subr.bf16.mxu0 %v33757_v40  ;;  %v11614_v49 = vpop.f32.mrb[76].mxu0  ;;  %15462 = vmatprep.mubr.f32.mxu1 %v3317_v41  ;;  %v3386_v12 = vcombine.high %v346_v4, %v346_v4  ;;  %v3393_v17 = vrot.slane %v346_v4, %v35466_v25 }
 0x289   : > { %v11684_v50 = vpop.f32.mrb[76].mxu1  ;;  %33762 = vmatprep.subr.bf16.mxu1 %v33761_v42  ;;  %v11615_v54 = vadd.f32 %v11614_v49, %v11545_v38  ;;  %v11616_v55 = vpop.f32.mrb[77].mxu0  ;;  %v3366_v38 = vrot.slane %v3352_v28, %v35466_v25  ;;  %v747_v42 = vld [vmem:[%s35442_s22 + $0x8b8] sm:$0xff]  ;;  %v33781_v49 = vpack.c.bf16 %v1513_v37, %v745_v36 }
 0x28a   : > { %v11686_v56 = vpop.f32.mrb[77].mxu1  ;;  %v33785_v51 = vpack.c.bf16 %v1515_v43, %v747_v42  ;;  %v746_v55 = vld [vmem:[%s35442_s22 + $0x8b0] sm:$0xff]  ;;  %v1523_v28 = vld [vmem:[%s35442_s22 + $0x20f8] sm:$0x3] }
 0x28b   : > { %v11685_v62 = vadd.f32 %v11684_v50, %v11615_v54  ;;  %v3368_v50 = vcombine.high %v3366_v38, %v3366_v38  ;;  %v1512_v54 = vld [vmem:[%s35442_s22 + $0x20a0] sm:$0x3]  ;;  %v1514_v56 = vld [vmem:[%s35442_s22 + $0x20b0] sm:$0x3] }
 0x28c   : > { %v33787_v6 = vpack.c.bf16 %v1514_v56, %v746_v55 }
 0x28d   : > { %15393 = vmatmul.mubr.f32.vlgmr.msra.gmra.mrb[130].mxu0 %v3308_v23  ;;  %v3350_v23 = vcombine.high %v3342_v8, %v3342_v8 }
 0x28e   : > { %15463 = vmatmul.mubr.f32.vlgmr.msra.gmra.mrb[130].mxu1 %v3315_v29  ;;  %33760 = vmatpush1.bf16.xpose.msra.mxu0 %v33759_v60  ;;  %v740_v29 = vld [vmem:[%s35442_s22 + $0x880] sm:$0xff]  ;;  %v749_v60 = vld [vmem:[%s35442_s22 + $0x8c8] sm:$0xff] }
 0x28f   : > { %33764 = vmatpush1.bf16.xpose.msra.mxu1 %v33763_v61  ;;  %15532 = vmatprep.mubr.f32.mxu0 %v3333_v63  ;;  %v33775_v45 = vpack.c.bf16 %v1508_v30, %v740_v29  ;;  %v1517_v61 = vld [vmem:[%s35442_s22 + $0x20c8] sm:$0x3]  ;;  %v347_v29 = vld [vmem:[%s35435_s12 + $0x238] sm:$0xff] }
 0x290   : > { %33766 = vmatprep.subr.bf16.mxu0 %v33765_v0  ;;  %v11754_v9 = vpop.f32.mrb[78].mxu0  ;;  %15602 = vmatprep.mubr.f32.mxu1 %v3334_v1  ;;  %v3403_v37 = vcombine.high %v347_v29, %v347_v29  ;;  %v3410_v42 = vrot.slane %v347_v29, %v35466_v25 }
 0x291   : > { %v11824_v10 = vpop.f32.mrb[78].mxu1  ;;  %33770 = vmatprep.subr.bf16.mxu1 %v33769_v2  ;;  %v11755_v14 = vadd.f32 %v11754_v9, %v11685_v62  ;;  %v11756_v15 = vpop.f32.mrb[79].mxu0  ;;  %v3383_v62 = vrot.slane %v3369_v52, %v35466_v25  ;;  %v751_v2 = vld [vmem:[%s35442_s22 + $0x8d8] sm:$0xff]  ;;  %v33789_v9 = vpack.c.bf16 %v1517_v61, %v749_v60 }
 0x292   : > { %v11826_v16 = vpop.f32.mrb[79].mxu1  ;;  %v33793_v11 = vpack.c.bf16 %v1519_v3, %v751_v2  ;;  %v750_v15 = vld [vmem:[%s35442_s22 + $0x8d0] sm:$0xff]  ;;  %v1527_v52 = vld [vmem:[%s35442_s22 + $0x2118] sm:$0x3] }
 0x293   : > { %v11825_v22 = vadd.f32 %v11824_v10, %v11755_v14  ;;  %v3385_v10 = vcombine.high %v3383_v62, %v3383_v62  ;;  %v1516_v14 = vld [vmem:[%s35442_s22 + $0x20c0] sm:$0x3]  ;;  %v1518_v16 = vld [vmem:[%s35442_s22 + $0x20d0] sm:$0x3] }
 0x294   : > { %v33795_v31 = vpack.c.bf16 %v1518_v16, %v750_v15 }
 0x295   : > { %15533 = vmatmul.mubr.f32.vlgmr.msra.gmra.mrb[132].mxu0 %v3325_v48  ;;  %v3367_v48 = vcombine.high %v3359_v33, %v3359_v33 }
 0x296   : > { %15603 = vmatmul.mubr.f32.vlgmr.msra.gmra.mrb[132].mxu1 %v3332_v53  ;;  %33768 = vmatpush1.bf16.xpose.msra.mxu0 %v33767_v20  ;;  %v744_v53 = vld [vmem:[%s35442_s22 + $0x8a0] sm:$0xff]  ;;  %v753_v20 = vld [vmem:[%s35442_s22 + $0x8e8] sm:$0xff] }
 0x297   : > { %33772 = vmatpush1.bf16.xpose.msra.mxu1 %v33771_v21  ;;  %15672 = vmatprep.mubr.f32.mxu0 %v3350_v23  ;;  %v33783_v5 = vpack.c.bf16 %v1512_v54, %v744_v53  ;;  %v1521_v21 = vld [vmem:[%s35442_s22 + $0x20e8] sm:$0x3]  ;;  %v348_v53 = vld [vmem:[%s35435_s12 + $0x240] sm:$0xff] }
 0x298   : > { %33774 = vmatprep.subr.bf16.mxu0 %v33773_v24  ;;  %v11894_v34 = vpop.f32.mrb[80].mxu0  ;;  %15742 = vmatprep.mubr.f32.mxu1 %v3351_v26  ;;  %v3420_v61 = vcombine.high %v348_v53, %v348_v53  ;;  %v3427_v2 = vrot.slane %v348_v53, %v35466_v25 }
 0x299   : > { %v11964_v35 = vpop.f32.mrb[80].mxu1  ;;  %33778 = vmatprep.subr.bf16.mxu1 %v33777_v27  ;;  %v11895_v39 = vadd.f32 %v11894_v34, %v11825_v22  ;;  %v11896_v40 = vpop.f32.mrb[81].mxu0  ;;  %v3400_v22 = vrot.slane %v3386_v12, %v35466_v25  ;;  %v755_v27 = vld [vmem:[%s35442_s22 + $0x8f8] sm:$0xff]  ;;  %v33797_v34 = vpack.c.bf16 %v1521_v21, %v753_v20 }
 0x29a   : > { %v11966_v41 = vpop.f32.mrb[81].mxu1  ;;  %v33801_v36 = vpack.c.bf16 %v1523_v28, %v755_v27  ;;  %v754_v40 = vld [vmem:[%s35442_s22 + $0x8f0] sm:$0xff]  ;;  %v1531_v12 = vld [vmem:[%s35442_s22 + $0x2138] sm:$0x3] }
 0x29b   : > { %v11965_v47 = vadd.f32 %v11964_v35, %v11895_v39  ;;  %v3402_v35 = vcombine.high %v3400_v22, %v3400_v22  ;;  %v1520_v39 = vld [vmem:[%s35442_s22 + $0x20e0] sm:$0x3]  ;;  %v1522_v41 = vld [vmem:[%s35442_s22 + $0x20f0] sm:$0x3] }
 0x29c   : > { %v33803_v55 = vpack.c.bf16 %v1522_v41, %v754_v40 }
 0x29d   : > { %15673 = vmatmul.mubr.f32.vlgmr.msra.gmra.mrb[134].mxu0 %v3342_v8  ;;  %v3384_v8 = vcombine.high %v3376_v57, %v3376_v57 }
 0x29e   : > { %15743 = vmatmul.mubr.f32.vlgmr.msra.gmra.mrb[134].mxu1 %v3349_v13  ;;  %33776 = vmatpush1.bf16.xpose.msra.mxu0 %v33775_v45  ;;  %v748_v13 = vld [vmem:[%s35442_s22 + $0x8c0] sm:$0xff]  ;;  %v757_v45 = vld [vmem:[%s35442_s22 + $0x908] sm:$0xff] }
 0x29f   : > { %33780 = vmatpush1.bf16.xpose.msra.mxu1 %v33779_v46  ;;  %15812 = vmatprep.mubr.f32.mxu0 %v3367_v48  ;;  %v33791_v30 = vpack.c.bf16 %v1516_v14, %v748_v13  ;;  %v1525_v46 = vld [vmem:[%s35442_s22 + $0x2108] sm:$0x3] }
 0x2a0   : > { %33782 = vmatprep.subr.bf16.mxu0 %v33781_v49  ;;  %v12034_v58 = vpop.f32.mrb[82].mxu0  ;;  %15882 = vmatprep.mubr.f32.mxu1 %v3368_v50  ;;  %v349_v13 = vld [vmem:[%s35435_s12 + $0x248] sm:$0xff] }
 0x2a1   : > { %v12104_v59 = vpop.f32.mrb[82].mxu1  ;;  %33786 = vmatprep.subr.bf16.mxu1 %v33785_v51  ;;  %v12035_v63 = vadd.f32 %v12034_v58, %v11965_v47  ;;  %v12036_v0 = vpop.f32.mrb[83].mxu0  ;;  %v3417_v47 = vrot.slane %v3403_v37, %v35466_v25  ;;  %v759_v51 = vld [vmem:[%s35442_s22 + $0x918] sm:$0xff]  ;;  %v33805_v58 = vpack.c.bf16 %v1525_v46, %v757_v45  ;;  %v3437_v21 = vcombine.high %v349_v13, %v349_v13 }
 0x2a2   : > { %v12106_v1 = vpop.f32.mrb[83].mxu1  ;;  %v33809_v60 = vpack.c.bf16 %v1527_v52, %v759_v51  ;;  %v758_v0 = vld [vmem:[%s35442_s22 + $0x910] sm:$0xff]  ;;  %v3444_v27 = vrot.slane %v349_v13, %v35466_v25  ;;  %v1535_v37 = vld [vmem:[%s35442_s22 + $0x2158] sm:$0x3] }
 0x2a3   : > { %v12105_v7 = vadd.f32 %v12104_v59, %v12035_v63  ;;  %v3419_v59 = vcombine.high %v3417_v47, %v3417_v47  ;;  %v1524_v63 = vld [vmem:[%s35442_s22 + $0x2100] sm:$0x3]  ;;  %v1526_v1 = vld [vmem:[%s35442_s22 + $0x2110] sm:$0x3] }
 0x2a4   : > { %v33811_v15 = vpack.c.bf16 %v1526_v1, %v758_v0 }
 0x2a5   : > { %15813 = vmatmul.mubr.f32.vlgmr.msra.gmra.mrb[136].mxu0 %v3359_v33  ;;  %v3401_v33 = vcombine.high %v3393_v17, %v3393_v17 }
 0x2a6   : > { %15883 = vmatmul.mubr.f32.vlgmr.msra.gmra.mrb[136].mxu1 %v3366_v38  ;;  %33784 = vmatpush1.bf16.xpose.msra.mxu0 %v33783_v5  ;;  %v752_v38 = vld [vmem:[%s35442_s22 + $0x8e0] sm:$0xff]  ;;  %v761_v5 = vld [vmem:[%s35442_s22 + $0x928] sm:$0xff] }
 0x2a7   : > { %33788 = vmatpush1.bf16.xpose.msra.mxu1 %v33787_v6  ;;  %15952 = vmatprep.mubr.f32.mxu0 %v3384_v8  ;;  %v33799_v54 = vpack.c.bf16 %v1520_v39, %v752_v38  ;;  %v1529_v6 = vld [vmem:[%s35442_s22 + $0x2128] sm:$0x3]  ;;  %v350_v38 = vld [vmem:[%s35435_s12 + $0x250] sm:$0xff] }
 0x2a8   : > { %33790 = vmatprep.subr.bf16.mxu0 %v33789_v9  ;;  %v12174_v18 = vpop.f32.mrb[84].mxu0  ;;  %16022 = vmatprep.mubr.f32.mxu1 %v3385_v10  ;;  %v3454_v46 = vcombine.high %v350_v38, %v350_v38  ;;  %v3461_v51 = vrot.slane %v350_v38, %v35466_v25 }
 0x2a9   : > { %v12244_v19 = vpop.f32.mrb[84].mxu1  ;;  %33794 = vmatprep.subr.bf16.mxu1 %v33793_v11  ;;  %v12175_v23 = vadd.f32 %v12174_v18, %v12105_v7  ;;  %v12176_v24 = vpop.f32.mrb[85].mxu0  ;;  %v3434_v7 = vrot.slane %v3420_v61, %v35466_v25  ;;  %v763_v11 = vld [vmem:[%s35442_s22 + $0x938] sm:$0xff]  ;;  %v33813_v18 = vpack.c.bf16 %v1529_v6, %v761_v5 }
 0x2aa   : > { %v12246_v26 = vpop.f32.mrb[85].mxu1  ;;  %v33817_v20 = vpack.c.bf16 %v1531_v12, %v763_v11  ;;  %v762_v24 = vld [vmem:[%s35442_s22 + $0x930] sm:$0xff]  ;;  %v1539_v61 = vld [vmem:[%s35442_s22 + $0x2178] sm:$0x3] }
 0x2ab   : > { %v12245_v32 = vadd.f32 %v12244_v19, %v12175_v23  ;;  %v3436_v19 = vcombine.high %v3434_v7, %v3434_v7  ;;  %v1528_v23 = vld [vmem:[%s35442_s22 + $0x2120] sm:$0x3]  ;;  %v1530_v26 = vld [vmem:[%s35442_s22 + $0x2130] sm:$0x3] }
 0x2ac   : > { %v33819_v40 = vpack.c.bf16 %v1530_v26, %v762_v24 }
 0x2ad   : > { %15953 = vmatmul.mubr.f32.vlgmr.msra.gmra.mrb[138].mxu0 %v3376_v57  ;;  %v3418_v57 = vcombine.high %v3410_v42, %v3410_v42 }
 0x2ae   : > { %16023 = vmatmul.mubr.f32.vlgmr.msra.gmra.mrb[138].mxu1 %v3383_v62  ;;  %33792 = vmatpush1.bf16.xpose.msra.mxu0 %v33791_v30  ;;  %v756_v62 = vld [vmem:[%s35442_s22 + $0x900] sm:$0xff]  ;;  %v765_v30 = vld [vmem:[%s35442_s22 + $0x948] sm:$0xff] }
 0x2af   : > { %33796 = vmatpush1.bf16.xpose.msra.mxu1 %v33795_v31  ;;  %16092 = vmatprep.mubr.f32.mxu0 %v3401_v33  ;;  %v33807_v14 = vpack.c.bf16 %v1524_v63, %v756_v62  ;;  %v1533_v31 = vld [vmem:[%s35442_s22 + $0x2148] sm:$0x3]  ;;  %v351_v62 = vld [vmem:[%s35435_s12 + $0x258] sm:$0xff] }
 0x2b0   : > { %33798 = vmatprep.subr.bf16.mxu0 %v33797_v34  ;;  %v12314_v43 = vpop.f32.mrb[86].mxu0  ;;  %16162 = vmatprep.mubr.f32.mxu1 %v3402_v35  ;;  %v3471_v6 = vcombine.high %v351_v62, %v351_v62  ;;  %v3478_v11 = vrot.slane %v351_v62, %v35466_v25 }
 0x2b1   : > { %v12384_v44 = vpop.f32.mrb[86].mxu1  ;;  %33802 = vmatprep.subr.bf16.mxu1 %v33801_v36  ;;  %v12315_v48 = vadd.f32 %v12314_v43, %v12245_v32  ;;  %v12316_v49 = vpop.f32.mrb[87].mxu0  ;;  %v3451_v32 = vrot.slane %v3437_v21, %v35466_v25  ;;  %v767_v36 = vld [vmem:[%s35442_s22 + $0x958] sm:$0xff]  ;;  %v33821_v43 = vpack.c.bf16 %v1533_v31, %v765_v30 }
 0x2b2   : > { %v12386_v50 = vpop.f32.mrb[87].mxu1  ;;  %v33825_v45 = vpack.c.bf16 %v1535_v37, %v767_v36  ;;  %v766_v49 = vld [vmem:[%s35442_s22 + $0x950] sm:$0xff]  ;;  %v1543_v21 = vld [vmem:[%s35442_s22 + $0x2198] sm:$0x3] }
 0x2b3   : > { %v12385_v56 = vadd.f32 %v12384_v44, %v12315_v48  ;;  %v3453_v44 = vcombine.high %v3451_v32, %v3451_v32  ;;  %v1532_v48 = vld [vmem:[%s35442_s22 + $0x2140] sm:$0x3]  ;;  %v1534_v50 = vld [vmem:[%s35442_s22 + $0x2150] sm:$0x3] }
 0x2b4   : > { %v33827_v0 = vpack.c.bf16 %v1534_v50, %v766_v49 }
 0x2b5   : > { %16093 = vmatmul.mubr.f32.vlgmr.msra.gmra.mrb[140].mxu0 %v3393_v17  ;;  %v3435_v17 = vcombine.high %v3427_v2, %v3427_v2 }
 0x2b6   : > { %16163 = vmatmul.mubr.f32.vlgmr.msra.gmra.mrb[140].mxu1 %v3400_v22  ;;  %33800 = vmatpush1.bf16.xpose.msra.mxu0 %v33799_v54  ;;  %v760_v22 = vld [vmem:[%s35442_s22 + $0x920] sm:$0xff]  ;;  %v769_v54 = vld [vmem:[%s35442_s22 + $0x968] sm:$0xff] }
 0x2b7   : > { %33804 = vmatpush1.bf16.xpose.msra.mxu1 %v33803_v55  ;;  %16232 = vmatprep.mubr.f32.mxu0 %v3418_v57  ;;  %v33815_v39 = vpack.c.bf16 %v1528_v23, %v760_v22  ;;  %v1537_v55 = vld [vmem:[%s35442_s22 + $0x2168] sm:$0x3]  ;;  %v352_v22 = vld [vmem:[%s35435_s12 + $0x260] sm:$0xff] }
 0x2b8   : > { %33806 = vmatprep.subr.bf16.mxu0 %v33805_v58  ;;  %v12454_v3 = vpop.f32.mrb[88].mxu0  ;;  %16302 = vmatprep.mubr.f32.mxu1 %v3419_v59  ;;  %v3488_v31 = vcombine.high %v352_v22, %v352_v22  ;;  %v3495_v36 = vrot.slane %v352_v22, %v35466_v25 }
 0x2b9   : > { %v12524_v4 = vpop.f32.mrb[88].mxu1  ;;  %33810 = vmatprep.subr.bf16.mxu1 %v33809_v60  ;;  %v12455_v8 = vadd.f32 %v12454_v3, %v12385_v56  ;;  %v12456_v9 = vpop.f32.mrb[89].mxu0  ;;  %v3468_v56 = vrot.slane %v3454_v46, %v35466_v25  ;;  %v771_v60 = vld [vmem:[%s35442_s22 + $0x978] sm:$0xff]  ;;  %v33829_v3 = vpack.c.bf16 %v1537_v55, %v769_v54 }
 0x2ba   : > { %v12526_v10 = vpop.f32.mrb[89].mxu1  ;;  %v33833_v5 = vpack.c.bf16 %v1539_v61, %v771_v60  ;;  %v770_v9 = vld [vmem:[%s35442_s22 + $0x970] sm:$0xff]  ;;  %v1547_v46 = vld [vmem:[%s35442_s22 + $0x21b8] sm:$0x3] }
 0x2bb   : > { %v12525_v16 = vadd.f32 %v12524_v4, %v12455_v8  ;;  %v3470_v4 = vcombine.high %v3468_v56, %v3468_v56  ;;  %v1536_v8 = vld [vmem:[%s35442_s22 + $0x2160] sm:$0x3]  ;;  %v1538_v10 = vld [vmem:[%s35442_s22 + $0x2170] sm:$0x3] }
 0x2bc   : > { %v33835_v24 = vpack.c.bf16 %v1538_v10, %v770_v9 }
 0x2bd   : > { %16233 = vmatmul.mubr.f32.vlgmr.msra.gmra.mrb[142].mxu0 %v3410_v42  ;;  %v3452_v42 = vcombine.high %v3444_v27, %v3444_v27 }
 0x2be   : > { %16303 = vmatmul.mubr.f32.vlgmr.msra.gmra.mrb[142].mxu1 %v3417_v47  ;;  %33808 = vmatpush1.bf16.xpose.msra.mxu0 %v33807_v14  ;;  %v764_v47 = vld [vmem:[%s35442_s22 + $0x940] sm:$0xff]  ;;  %v773_v14 = vld [vmem:[%s35442_s22 + $0x988] sm:$0xff] }
 0x2bf   : > { %33812 = vmatpush1.bf16.xpose.msra.mxu1 %v33811_v15  ;;  %16372 = vmatprep.mubr.f32.mxu0 %v3435_v17  ;;  %v33823_v63 = vpack.c.bf16 %v1532_v48, %v764_v47  ;;  %v1541_v15 = vld [vmem:[%s35442_s22 + $0x2188] sm:$0x3] }
 0x2c0   : > { %33814 = vmatprep.subr.bf16.mxu0 %v33813_v18  ;;  %v12594_v28 = vpop.f32.mrb[90].mxu0  ;;  %16442 = vmatprep.mubr.f32.mxu1 %v3436_v19  ;;  %v353_v47 = vld [vmem:[%s35435_s12 + $0x268] sm:$0xff] }
 0x2c1   : > { %v12664_v29 = vpop.f32.mrb[90].mxu1  ;;  %33818 = vmatprep.subr.bf16.mxu1 %v33817_v20  ;;  %v12595_v33 = vadd.f32 %v12594_v28, %v12525_v16  ;;  %v12596_v34 = vpop.f32.mrb[91].mxu0  ;;  %v3485_v16 = vrot.slane %v3471_v6, %v35466_v25  ;;  %v775_v20 = vld [vmem:[%s35442_s22 + $0x998] sm:$0xff]  ;;  %v33837_v28 = vpack.c.bf16 %v1541_v15, %v773_v14  ;;  %v3505_v55 = vcombine.high %v353_v47, %v353_v47 }
 0x2c2   : > { %v12666_v35 = vpop.f32.mrb[91].mxu1  ;;  %v33841_v30 = vpack.c.bf16 %v1543_v21, %v775_v20  ;;  %v774_v34 = vld [vmem:[%s35442_s22 + $0x990] sm:$0xff]  ;;  %v3512_v60 = vrot.slane %v353_v47, %v35466_v25  ;;  %v1551_v6 = vld [vmem:[%s35442_s22 + $0x21d8] sm:$0x3] }
 0x2c3   : > { %v12665_v41 = vadd.f32 %v12664_v29, %v12595_v33  ;;  %v3487_v29 = vcombine.high %v3485_v16, %v3485_v16  ;;  %v1540_v33 = vld [vmem:[%s35442_s22 + $0x2180] sm:$0x3]  ;;  %v1542_v35 = vld [vmem:[%s35442_s22 + $0x2190] sm:$0x3] }
 0x2c4   : > { %v33843_v49 = vpack.c.bf16 %v1542_v35, %v774_v34 }
 0x2c5   : > { %16373 = vmatmul.mubr.f32.vlgmr.msra.gmra.mrb[144].mxu0 %v3427_v2  ;;  %v3469_v2 = vcombine.high %v3461_v51, %v3461_v51 }
 0x2c6   : > { %16443 = vmatmul.mubr.f32.vlgmr.msra.gmra.mrb[144].mxu1 %v3434_v7  ;;  %33816 = vmatpush1.bf16.xpose.msra.mxu0 %v33815_v39  ;;  %v768_v7 = vld [vmem:[%s35442_s22 + $0x960] sm:$0xff]  ;;  %v777_v39 = vld [vmem:[%s35442_s22 + $0x9a8] sm:$0xff] }
 0x2c7   : > { %33820 = vmatpush1.bf16.xpose.msra.mxu1 %v33819_v40  ;;  %16512 = vmatprep.mubr.f32.mxu0 %v3452_v42  ;;  %v33831_v23 = vpack.c.bf16 %v1536_v8, %v768_v7  ;;  %v1545_v40 = vld [vmem:[%s35442_s22 + $0x21a8] sm:$0x3]  ;;  %v354_v7 = vld [vmem:[%s35435_s12 + $0x270] sm:$0xff] }
 0x2c8   : > { %33822 = vmatprep.subr.bf16.mxu0 %v33821_v43  ;;  %v12734_v52 = vpop.f32.mrb[92].mxu0  ;;  %16582 = vmatprep.mubr.f32.mxu1 %v3453_v44  ;;  %v3522_v15 = vcombine.high %v354_v7, %v354_v7  ;;  %v3529_v20 = vrot.slane %v354_v7, %v35466_v25 }
 0x2c9   : > { %v12804_v53 = vpop.f32.mrb[92].mxu1  ;;  %33826 = vmatprep.subr.bf16.mxu1 %v33825_v45  ;;  %v12735_v57 = vadd.f32 %v12734_v52, %v12665_v41  ;;  %v12736_v58 = vpop.f32.mrb[93].mxu0  ;;  %v3502_v41 = vrot.slane %v3488_v31, %v35466_v25  ;;  %v779_v45 = vld [vmem:[%s35442_s22 + $0x9b8] sm:$0xff]  ;;  %v33845_v52 = vpack.c.bf16 %v1545_v40, %v777_v39 }
 0x2ca   : > { %v12806_v59 = vpop.f32.mrb[93].mxu1  ;;  %v33849_v54 = vpack.c.bf16 %v1547_v46, %v779_v45  ;;  %v778_v58 = vld [vmem:[%s35442_s22 + $0x9b0] sm:$0xff]  ;;  %v1555_v31 = vld [vmem:[%s35442_s22 + $0x21f8] sm:$0x3] }
 0x2cb   : > { %v12805_v1 = vadd.f32 %v12804_v53, %v12735_v57  ;;  %v3504_v53 = vcombine.high %v3502_v41, %v3502_v41  ;;  %v1544_v57 = vld [vmem:[%s35442_s22 + $0x21a0] sm:$0x3]  ;;  %v1546_v59 = vld [vmem:[%s35442_s22 + $0x21b0] sm:$0x3] }
 0x2cc   : > { %v33851_v9 = vpack.c.bf16 %v1546_v59, %v778_v58 }
 0x2cd   : > { %16513 = vmatmul.mubr.f32.vlgmr.msra.gmra.mrb[146].mxu0 %v3444_v27  ;;  %v3486_v27 = vcombine.high %v3478_v11, %v3478_v11 }
 0x2ce   : > { %16583 = vmatmul.mubr.f32.vlgmr.msra.gmra.mrb[146].mxu1 %v3451_v32  ;;  %33824 = vmatpush1.bf16.xpose.msra.mxu0 %v33823_v63  ;;  %v772_v32 = vld [vmem:[%s35442_s22 + $0x980] sm:$0xff]  ;;  %v781_v63 = vld [vmem:[%s35442_s22 + $0x9c8] sm:$0xff] }
 0x2cf   : > { %33828 = vmatpush1.bf16.xpose.msra.mxu1 %v33827_v0  ;;  %16652 = vmatprep.mubr.f32.mxu0 %v3469_v2  ;;  %v33839_v48 = vpack.c.bf16 %v1540_v33, %v772_v32  ;;  %v1549_v0 = vld [vmem:[%s35442_s22 + $0x21c8] sm:$0x3]  ;;  %v355_v32 = vld [vmem:[%s35435_s12 + $0x278] sm:$0xff] }
 0x2d0   : > { %33830 = vmatprep.subr.bf16.mxu0 %v33829_v3  ;;  %v12874_v12 = vpop.f32.mrb[94].mxu0  ;;  %16722 = vmatprep.mubr.f32.mxu1 %v3470_v4  ;;  %v3539_v40 = vcombine.high %v355_v32, %v355_v32  ;;  %v3546_v45 = vrot.slane %v355_v32, %v35466_v25 }
 0x2d1   : > { %v12944_v13 = vpop.f32.mrb[94].mxu1  ;;  %33834 = vmatprep.subr.bf16.mxu1 %v33833_v5  ;;  %v12875_v17 = vadd.f32 %v12874_v12, %v12805_v1  ;;  %v12876_v18 = vpop.f32.mrb[95].mxu0  ;;  %v3519_v1 = vrot.slane %v3505_v55, %v35466_v25  ;;  %v783_v5 = vld [vmem:[%s35442_s22 + $0x9d8] sm:$0xff]  ;;  %v33853_v12 = vpack.c.bf16 %v1549_v0, %v781_v63 }
 0x2d2   : > { %v12946_v19 = vpop.f32.mrb[95].mxu1  ;;  %v33857_v14 = vpack.c.bf16 %v1551_v6, %v783_v5  ;;  %v782_v18 = vld [vmem:[%s35442_s22 + $0x9d0] sm:$0xff]  ;;  %v1559_v55 = vld [vmem:[%s35442_s22 + $0x2218] sm:$0x3] }
 0x2d3   : > { %v12945_v26 = vadd.f32 %v12944_v13, %v12875_v17  ;;  %v3521_v13 = vcombine.high %v3519_v1, %v3519_v1  ;;  %v1548_v17 = vld [vmem:[%s35442_s22 + $0x21c0] sm:$0x3]  ;;  %v1550_v19 = vld [vmem:[%s35442_s22 + $0x21d0] sm:$0x3] }
 0x2d4   : > { %v33859_v34 = vpack.c.bf16 %v1550_v19, %v782_v18 }
 0x2d5   : > { %16653 = vmatmul.mubr.f32.vlgmr.msra.gmra.mrb[148].mxu0 %v3461_v51  ;;  %v3503_v51 = vcombine.high %v3495_v36, %v3495_v36 }
 0x2d6   : > { %16723 = vmatmul.mubr.f32.vlgmr.msra.gmra.mrb[148].mxu1 %v3468_v56  ;;  %33832 = vmatpush1.bf16.xpose.msra.mxu0 %v33831_v23  ;;  %v776_v56 = vld [vmem:[%s35442_s22 + $0x9a0] sm:$0xff]  ;;  %v785_v23 = vld [vmem:[%s35442_s22 + $0x9e8] sm:$0xff] }
 0x2d7   : > { %33836 = vmatpush1.bf16.xpose.msra.mxu1 %v33835_v24  ;;  %16792 = vmatprep.mubr.f32.mxu0 %v3486_v27  ;;  %v33847_v8 = vpack.c.bf16 %v1544_v57, %v776_v56  ;;  %v1553_v24 = vld [vmem:[%s35442_s22 + $0x21e8] sm:$0x3]  ;;  %v356_v56 = vld [vmem:[%s35435_s12 + $0x280] sm:$0xff] }
 0x2d8   : > { %33838 = vmatprep.subr.bf16.mxu0 %v33837_v28  ;;  %v13014_v37 = vpop.f32.mrb[96].mxu0  ;;  %16862 = vmatprep.mubr.f32.mxu1 %v3487_v29  ;;  %v3556_v0 = vcombine.high %v356_v56, %v356_v56  ;;  %v3563_v5 = vrot.slane %v356_v56, %v35466_v25 }
 0x2d9   : > { %v13084_v38 = vpop.f32.mrb[96].mxu1  ;;  %33842 = vmatprep.subr.bf16.mxu1 %v33841_v30  ;;  %v13015_v42 = vadd.f32 %v13014_v37, %v12945_v26  ;;  %v13016_v43 = vpop.f32.mrb[97].mxu0  ;;  %v3536_v26 = vrot.slane %v3522_v15, %v35466_v25  ;;  %v787_v30 = vld [vmem:[%s35442_s22 + $0x9f8] sm:$0xff]  ;;  %v33861_v37 = vpack.c.bf16 %v1553_v24, %v785_v23 }
 0x2da   : > { %v13086_v44 = vpop.f32.mrb[97].mxu1  ;;  %v33865_v39 = vpack.c.bf16 %v1555_v31, %v787_v30  ;;  %v786_v43 = vld [vmem:[%s35442_s22 + $0x9f0] sm:$0xff]  ;;  %v1563_v15 = vld [vmem:[%s35442_s22 + $0x2238] sm:$0x3] }
 0x2db   : > { %v13085_v50 = vadd.f32 %v13084_v38, %v13015_v42  ;;  %v3538_v38 = vcombine.high %v3536_v26, %v3536_v26  ;;  %v1552_v42 = vld [vmem:[%s35442_s22 + $0x21e0] sm:$0x3]  ;;  %v1554_v44 = vld [vmem:[%s35442_s22 + $0x21f0] sm:$0x3] }
 0x2dc   : > { %v33867_v58 = vpack.c.bf16 %v1554_v44, %v786_v43 }
 0x2dd   : > { %16793 = vmatmul.mubr.f32.vlgmr.msra.gmra.mrb[150].mxu0 %v3478_v11  ;;  %v3520_v11 = vcombine.high %v3512_v60, %v3512_v60 }
 0x2de   : > { %16863 = vmatmul.mubr.f32.vlgmr.msra.gmra.mrb[150].mxu1 %v3485_v16  ;;  %33840 = vmatpush1.bf16.xpose.msra.mxu0 %v33839_v48  ;;  %v780_v16 = vld [vmem:[%s35442_s22 + $0x9c0] sm:$0xff]  ;;  %v789_v48 = vld [vmem:[%s35442_s22 + $0xa08] sm:$0xff] }
 0x2df   : > { %33844 = vmatpush1.bf16.xpose.msra.mxu1 %v33843_v49  ;;  %16932 = vmatprep.mubr.f32.mxu0 %v3503_v51  ;;  %v33855_v33 = vpack.c.bf16 %v1548_v17, %v780_v16  ;;  %v1557_v49 = vld [vmem:[%s35442_s22 + $0x2208] sm:$0x3] }
 0x2e0   : > { %33846 = vmatprep.subr.bf16.mxu0 %v33845_v52  ;;  %v13154_v61 = vpop.f32.mrb[98].mxu0  ;;  %17002 = vmatprep.mubr.f32.mxu1 %v3504_v53  ;;  %v357_v16 = vld [vmem:[%s35435_s12 + $0x288] sm:$0xff] }
 0x2e1   : > { %v13224_v62 = vpop.f32.mrb[98].mxu1  ;;  %33850 = vmatprep.subr.bf16.mxu1 %v33849_v54  ;;  %v13155_v2 = vadd.f32 %v13154_v61, %v13085_v50  ;;  %v13156_v3 = vpop.f32.mrb[99].mxu0  ;;  %v3553_v50 = vrot.slane %v3539_v40, %v35466_v25  ;;  %v791_v54 = vld [vmem:[%s35442_s22 + $0xa18] sm:$0xff]  ;;  %v33869_v61 = vpack.c.bf16 %v1557_v49, %v789_v48  ;;  %v3573_v24 = vcombine.high %v357_v16, %v357_v16 }
 0x2e2   : > { %v13226_v4 = vpop.f32.mrb[99].mxu1  ;;  %v33873_v63 = vpack.c.bf16 %v1559_v55, %v791_v54  ;;  %v790_v3 = vld [vmem:[%s35442_s22 + $0xa10] sm:$0xff]  ;;  %v3580_v30 = vrot.slane %v357_v16, %v35466_v25  ;;  %v1567_v40 = vld [vmem:[%s35442_s22 + $0x2258] sm:$0x3] }
 0x2e3   : > { %v13225_v10 = vadd.f32 %v13224_v62, %v13155_v2  ;;  %v3555_v62 = vcombine.high %v3553_v50, %v3553_v50  ;;  %v1556_v2 = vld [vmem:[%s35442_s22 + $0x2200] sm:$0x3]  ;;  %v1558_v4 = vld [vmem:[%s35442_s22 + $0x2210] sm:$0x3] }
 0x2e4   : > { %v33875_v18 = vpack.c.bf16 %v1558_v4, %v790_v3 }
 0x2e5   : > { %16933 = vmatmul.mubr.f32.vlgmr.msra.gmra.mrb[152].mxu0 %v3495_v36  ;;  %v3537_v36 = vcombine.high %v3529_v20, %v3529_v20 }
 0x2e6   : > { %17003 = vmatmul.mubr.f32.vlgmr.msra.gmra.mrb[152].mxu1 %v3502_v41  ;;  %33848 = vmatpush1.bf16.xpose.msra.mxu0 %v33847_v8  ;;  %v784_v41 = vld [vmem:[%s35442_s22 + $0x9e0] sm:$0xff]  ;;  %v793_v8 = vld [vmem:[%s35442_s22 + $0xa28] sm:$0xff] }
 0x2e7   : > { %33852 = vmatpush1.bf16.xpose.msra.mxu1 %v33851_v9  ;;  %17072 = vmatprep.mubr.f32.mxu0 %v3520_v11  ;;  %v33863_v57 = vpack.c.bf16 %v1552_v42, %v784_v41  ;;  %v1561_v9 = vld [vmem:[%s35442_s22 + $0x2228] sm:$0x3]  ;;  %v358_v41 = vld [vmem:[%s35435_s12 + $0x290] sm:$0xff] }
 0x2e8   : > { %33854 = vmatprep.subr.bf16.mxu0 %v33853_v12  ;;  %v13294_v21 = vpop.f32.mrb[100].mxu0  ;;  %17142 = vmatprep.mubr.f32.mxu1 %v3521_v13  ;;  %v3590_v49 = vcombine.high %v358_v41, %v358_v41  ;;  %v3597_v54 = vrot.slane %v358_v41, %v35466_v25 }
 0x2e9   : > { %v13364_v22 = vpop.f32.mrb[100].mxu1  ;;  %33858 = vmatprep.subr.bf16.mxu1 %v33857_v14  ;;  %v13295_v27 = vadd.f32 %v13294_v21, %v13225_v10  ;;  %v13296_v28 = vpop.f32.mrb[101].mxu0  ;;  %v3570_v10 = vrot.slane %v3556_v0, %v35466_v25  ;;  %v795_v14 = vld [vmem:[%s35442_s22 + $0xa38] sm:$0xff]  ;;  %v33877_v21 = vpack.c.bf16 %v1561_v9, %v793_v8 }
 0x2ea   : > { %v13366_v29 = vpop.f32.mrb[101].mxu1  ;;  %v33881_v23 = vpack.c.bf16 %v1563_v15, %v795_v14  ;;  %v794_v28 = vld [vmem:[%s35442_s22 + $0xa30] sm:$0xff]  ;;  %v1571_v0 = vld [vmem:[%s35442_s22 + $0x2278] sm:$0x3] }
 0x2eb   : > { %v13365_v35 = vadd.f32 %v13364_v22, %v13295_v27  ;;  %v3572_v22 = vcombine.high %v3570_v10, %v3570_v10  ;;  %v1560_v27 = vld [vmem:[%s35442_s22 + $0x2220] sm:$0x3]  ;;  %v1562_v29 = vld [vmem:[%s35442_s22 + $0x2230] sm:$0x3] }
 0x2ec   : > { %v33883_v43 = vpack.c.bf16 %v1562_v29, %v794_v28 }
 0x2ed   : > { %17073 = vmatmul.mubr.f32.vlgmr.msra.gmra.mrb[154].mxu0 %v3512_v60  ;;  %v3554_v60 = vcombine.high %v3546_v45, %v3546_v45 }
 0x2ee   : > { %17143 = vmatmul.mubr.f32.vlgmr.msra.gmra.mrb[154].mxu1 %v3519_v1  ;;  %33856 = vmatpush1.bf16.xpose.msra.mxu0 %v33855_v33  ;;  %v788_v1 = vld [vmem:[%s35442_s22 + $0xa00] sm:$0xff]  ;;  %v797_v33 = vld [vmem:[%s35442_s22 + $0xa48] sm:$0xff] }
 0x2ef   : > { %33860 = vmatpush1.bf16.xpose.msra.mxu1 %v33859_v34  ;;  %17212 = vmatprep.mubr.f32.mxu0 %v3537_v36  ;;  %v33871_v17 = vpack.c.bf16 %v1556_v2, %v788_v1  ;;  %v1565_v34 = vld [vmem:[%s35442_s22 + $0x2248] sm:$0x3]  ;;  %v359_v1 = vld [vmem:[%s35435_s12 + $0x298] sm:$0xff] }
 0x2f0   : > { %33862 = vmatprep.subr.bf16.mxu0 %v33861_v37  ;;  %v13434_v46 = vpop.f32.mrb[102].mxu0  ;;  %17282 = vmatprep.mubr.f32.mxu1 %v3538_v38  ;;  %v3607_v9 = vcombine.high %v359_v1, %v359_v1  ;;  %v3614_v14 = vrot.slane %v359_v1, %v35466_v25 }
 0x2f1   : > { %v13504_v47 = vpop.f32.mrb[102].mxu1  ;;  %33866 = vmatprep.subr.bf16.mxu1 %v33865_v39  ;;  %v13435_v51 = vadd.f32 %v13434_v46, %v13365_v35  ;;  %v13436_v52 = vpop.f32.mrb[103].mxu0  ;;  %v3587_v35 = vrot.slane %v3573_v24, %v35466_v25  ;;  %v799_v39 = vld [vmem:[%s35442_s22 + $0xa58] sm:$0xff]  ;;  %v33885_v46 = vpack.c.bf16 %v1565_v34, %v797_v33 }
 0x2f2   : > { %v13506_v53 = vpop.f32.mrb[103].mxu1  ;;  %v33889_v48 = vpack.c.bf16 %v1567_v40, %v799_v39  ;;  %v798_v52 = vld [vmem:[%s35442_s22 + $0xa50] sm:$0xff]  ;;  %v1575_v24 = vld [vmem:[%s35442_s22 + $0x2298] sm:$0x3] }
 0x2f3   : > { %v13505_v59 = vadd.f32 %v13504_v47, %v13435_v51  ;;  %v3589_v47 = vcombine.high %v3587_v35, %v3587_v35  ;;  %v1564_v51 = vld [vmem:[%s35442_s22 + $0x2240] sm:$0x3]  ;;  %v1566_v53 = vld [vmem:[%s35442_s22 + $0x2250] sm:$0x3] }
 0x2f4   : > { %v33891_v3 = vpack.c.bf16 %v1566_v53, %v798_v52 }
 0x2f5   : > { %17213 = vmatmul.mubr.f32.vlgmr.msra.gmra.mrb[156].mxu0 %v3529_v20  ;;  %v3571_v20 = vcombine.high %v3563_v5, %v3563_v5 }
 0x2f6   : > { %17283 = vmatmul.mubr.f32.vlgmr.msra.gmra.mrb[156].mxu1 %v3536_v26  ;;  %33864 = vmatpush1.bf16.xpose.msra.mxu0 %v33863_v57  ;;  %v792_v26 = vld [vmem:[%s35442_s22 + $0xa20] sm:$0xff]  ;;  %v801_v57 = vld [vmem:[%s35442_s22 + $0xa68] sm:$0xff] }
 0x2f7   : > { %33868 = vmatpush1.bf16.xpose.msra.mxu1 %v33867_v58  ;;  %17352 = vmatprep.mubr.f32.mxu0 %v3554_v60  ;;  %v33879_v42 = vpack.c.bf16 %v1560_v27, %v792_v26  ;;  %v1569_v58 = vld [vmem:[%s35442_s22 + $0x2268] sm:$0x3]  ;;  %v360_v26 = vld [vmem:[%s35435_s12 + $0x2a0] sm:$0xff] }
 0x2f8   : > { %33870 = vmatprep.subr.bf16.mxu0 %v33869_v61  ;;  %v13574_v6 = vpop.f32.mrb[104].mxu0  ;;  %17422 = vmatprep.mubr.f32.mxu1 %v3555_v62  ;;  %v3624_v34 = vcombine.high %v360_v26, %v360_v26  ;;  %v3631_v39 = vrot.slane %v360_v26, %v35466_v25 }
 0x2f9   : > { %v13644_v7 = vpop.f32.mrb[104].mxu1  ;;  %33874 = vmatprep.subr.bf16.mxu1 %v33873_v63  ;;  %v13575_v11 = vadd.f32 %v13574_v6, %v13505_v59  ;;  %v13576_v12 = vpop.f32.mrb[105].mxu0  ;;  %v3604_v59 = vrot.slane %v3590_v49, %v35466_v25  ;;  %v803_v63 = vld [vmem:[%s35442_s22 + $0xa78] sm:$0xff]  ;;  %v33893_v6 = vpack.c.bf16 %v1569_v58, %v801_v57 }
 0x2fa   : > { %v13646_v13 = vpop.f32.mrb[105].mxu1  ;;  %v33897_v8 = vpack.c.bf16 %v1571_v0, %v803_v63  ;;  %v802_v12 = vld [vmem:[%s35442_s22 + $0xa70] sm:$0xff]  ;;  %v1579_v49 = vld [vmem:[%s35442_s22 + $0x22b8] sm:$0x3] }
 0x2fb   : > { %v13645_v19 = vadd.f32 %v13644_v7, %v13575_v11  ;;  %v3606_v7 = vcombine.high %v3604_v59, %v3604_v59  ;;  %v1568_v11 = vld [vmem:[%s35442_s22 + $0x2260] sm:$0x3]  ;;  %v1570_v13 = vld [vmem:[%s35442_s22 + $0x2270] sm:$0x3] }
 0x2fc   : > { %v33899_v28 = vpack.c.bf16 %v1570_v13, %v802_v12 }
 0x2fd   : > { %17353 = vmatmul.mubr.f32.vlgmr.msra.gmra.mrb[158].mxu0 %v3546_v45  ;;  %v3588_v45 = vcombine.high %v3580_v30, %v3580_v30 }
 0x2fe   : > { %17423 = vmatmul.mubr.f32.vlgmr.msra.gmra.mrb[158].mxu1 %v3553_v50  ;;  %33872 = vmatpush1.bf16.xpose.msra.mxu0 %v33871_v17  ;;  %v796_v50 = vld [vmem:[%s35442_s22 + $0xa40] sm:$0xff]  ;;  %v805_v17 = vld [vmem:[%s35442_s22 + $0xa88] sm:$0xff] }
 0x2ff   : > { %33876 = vmatpush1.bf16.xpose.msra.mxu1 %v33875_v18  ;;  %17492 = vmatprep.mubr.f32.mxu0 %v3571_v20  ;;  %v33887_v2 = vpack.c.bf16 %v1564_v51, %v796_v50  ;;  %v1573_v18 = vld [vmem:[%s35442_s22 + $0x2288] sm:$0x3] }
 0x300   : > { %33878 = vmatprep.subr.bf16.mxu0 %v33877_v21  ;;  %v13714_v31 = vpop.f32.mrb[106].mxu0  ;;  %17562 = vmatprep.mubr.f32.mxu1 %v3572_v22  ;;  %v361_v50 = vld [vmem:[%s35435_s12 + $0x2a8] sm:$0xff] }
 0x301   : > { %v13784_v32 = vpop.f32.mrb[106].mxu1  ;;  %33882 = vmatprep.subr.bf16.mxu1 %v33881_v23  ;;  %v13715_v36 = vadd.f32 %v13714_v31, %v13645_v19  ;;  %v13716_v37 = vpop.f32.mrb[107].mxu0  ;;  %v3621_v19 = vrot.slane %v3607_v9, %v35466_v25  ;;  %v807_v23 = vld [vmem:[%s35442_s22 + $0xa98] sm:$0xff]  ;;  %v33901_v31 = vpack.c.bf16 %v1573_v18, %v805_v17  ;;  %v3641_v58 = vcombine.high %v361_v50, %v361_v50 }
 0x302   : > { %v13786_v38 = vpop.f32.mrb[107].mxu1  ;;  %v33905_v33 = vpack.c.bf16 %v1575_v24, %v807_v23  ;;  %v806_v37 = vld [vmem:[%s35442_s22 + $0xa90] sm:$0xff]  ;;  %v3648_v63 = vrot.slane %v361_v50, %v35466_v25  ;;  %v1583_v9 = vld [vmem:[%s35442_s22 + $0x22d8] sm:$0x3] }
 0x303   : > { %v13785_v44 = vadd.f32 %v13784_v32, %v13715_v36  ;;  %v3623_v32 = vcombine.high %v3621_v19, %v3621_v19  ;;  %v1572_v36 = vld [vmem:[%s35442_s22 + $0x2280] sm:$0x3]  ;;  %v1574_v38 = vld [vmem:[%s35442_s22 + $0x2290] sm:$0x3] }
 0x304   : > { %v33907_v52 = vpack.c.bf16 %v1574_v38, %v806_v37 }
 0x305   : > { %17493 = vmatmul.mubr.f32.vlgmr.msra.gmra.mrb[160].mxu0 %v3563_v5  ;;  %v3605_v5 = vcombine.high %v3597_v54, %v3597_v54 }
 0x306   : > { %17563 = vmatmul.mubr.f32.vlgmr.msra.gmra.mrb[160].mxu1 %v3570_v10  ;;  %33880 = vmatpush1.bf16.xpose.msra.mxu0 %v33879_v42  ;;  %v800_v10 = vld [vmem:[%s35442_s22 + $0xa60] sm:$0xff]  ;;  %v809_v42 = vld [vmem:[%s35442_s22 + $0xaa8] sm:$0xff] }
 0x307   : > { %33884 = vmatpush1.bf16.xpose.msra.mxu1 %v33883_v43  ;;  %17632 = vmatprep.mubr.f32.mxu0 %v3588_v45  ;;  %v33895_v27 = vpack.c.bf16 %v1568_v11, %v800_v10  ;;  %v1577_v43 = vld [vmem:[%s35442_s22 + $0x22a8] sm:$0x3]  ;;  %v362_v10 = vld [vmem:[%s35435_s12 + $0x2b0] sm:$0xff] }
 0x308   : > { %33886 = vmatprep.subr.bf16.mxu0 %v33885_v46  ;;  %v13854_v55 = vpop.f32.mrb[108].mxu0  ;;  %17702 = vmatprep.mubr.f32.mxu1 %v3589_v47  ;;  %v3658_v18 = vcombine.high %v362_v10, %v362_v10  ;;  %v3665_v23 = vrot.slane %v362_v10, %v35466_v25 }
 0x309   : > { %v13924_v56 = vpop.f32.mrb[108].mxu1  ;;  %33890 = vmatprep.subr.bf16.mxu1 %v33889_v48  ;;  %v13855_v60 = vadd.f32 %v13854_v55, %v13785_v44  ;;  %v13856_v61 = vpop.f32.mrb[109].mxu0  ;;  %v3638_v44 = vrot.slane %v3624_v34, %v35466_v25  ;;  %v811_v48 = vld [vmem:[%s35442_s22 + $0xab8] sm:$0xff]  ;;  %v33909_v55 = vpack.c.bf16 %v1577_v43, %v809_v42 }
 0x30a   : > { %v13926_v62 = vpop.f32.mrb[109].mxu1  ;;  %v33913_v57 = vpack.c.bf16 %v1579_v49, %v811_v48  ;;  %v810_v61 = vld [vmem:[%s35442_s22 + $0xab0] sm:$0xff]  ;;  %v1587_v34 = vld [vmem:[%s35442_s22 + $0x22f8] sm:$0x3] }
 0x30b   : > { %v13925_v4 = vadd.f32 %v13924_v56, %v13855_v60  ;;  %v3640_v56 = vcombine.high %v3638_v44, %v3638_v44  ;;  %v1576_v60 = vld [vmem:[%s35442_s22 + $0x22a0] sm:$0x3]  ;;  %v1578_v62 = vld [vmem:[%s35442_s22 + $0x22b0] sm:$0x3] }
 0x30c   : > { %v33915_v12 = vpack.c.bf16 %v1578_v62, %v810_v61 }
 0x30d   : > { %17633 = vmatmul.mubr.f32.vlgmr.msra.gmra.mrb[162].mxu0 %v3580_v30  ;;  %v3622_v30 = vcombine.high %v3614_v14, %v3614_v14 }
 0x30e   : > { %17703 = vmatmul.mubr.f32.vlgmr.msra.gmra.mrb[162].mxu1 %v3587_v35  ;;  %33888 = vmatpush1.bf16.xpose.msra.mxu0 %v33887_v2  ;;  %v804_v35 = vld [vmem:[%s35442_s22 + $0xa80] sm:$0xff]  ;;  %v813_v2 = vld [vmem:[%s35442_s22 + $0xac8] sm:$0xff] }
 0x30f   : > { %33892 = vmatpush1.bf16.xpose.msra.mxu1 %v33891_v3  ;;  %17772 = vmatprep.mubr.f32.mxu0 %v3605_v5  ;;  %v33903_v51 = vpack.c.bf16 %v1572_v36, %v804_v35  ;;  %v1581_v3 = vld [vmem:[%s35442_s22 + $0x22c8] sm:$0x3]  ;;  %v363_v35 = vld [vmem:[%s35435_s12 + $0x2b8] sm:$0xff] }
 0x310   : > { %33894 = vmatprep.subr.bf16.mxu0 %v33893_v6  ;;  %v13994_v15 = vpop.f32.mrb[110].mxu0  ;;  %17842 = vmatprep.mubr.f32.mxu1 %v3606_v7  ;;  %v3675_v43 = vcombine.high %v363_v35, %v363_v35  ;;  %v3682_v48 = vrot.slane %v363_v35, %v35466_v25 }
 0x311   : > { %v14064_v16 = vpop.f32.mrb[110].mxu1  ;;  %33898 = vmatprep.subr.bf16.mxu1 %v33897_v8  ;;  %v13995_v20 = vadd.f32 %v13994_v15, %v13925_v4  ;;  %v13996_v21 = vpop.f32.mrb[111].mxu0  ;;  %v3655_v4 = vrot.slane %v3641_v58, %v35466_v25  ;;  %v815_v8 = vld [vmem:[%s35442_s22 + $0xad8] sm:$0xff]  ;;  %v33917_v15 = vpack.c.bf16 %v1581_v3, %v813_v2 }
 0x312   : > { %v14066_v22 = vpop.f32.mrb[111].mxu1  ;;  %v33921_v17 = vpack.c.bf16 %v1583_v9, %v815_v8  ;;  %v814_v21 = vld [vmem:[%s35442_s22 + $0xad0] sm:$0xff]  ;;  %v1591_v58 = vld [vmem:[%s35442_s22 + $0x2318] sm:$0x3] }
 0x313   : > { %v14065_v29 = vadd.f32 %v14064_v16, %v13995_v20  ;;  %v3657_v16 = vcombine.high %v3655_v4, %v3655_v4  ;;  %v1580_v20 = vld [vmem:[%s35442_s22 + $0x22c0] sm:$0x3]  ;;  %v1582_v22 = vld [vmem:[%s35442_s22 + $0x22d0] sm:$0x3] }
 0x314   : > { %v33923_v37 = vpack.c.bf16 %v1582_v22, %v814_v21 }
 0x315   : > { %17773 = vmatmul.mubr.f32.vlgmr.msra.gmra.mrb[164].mxu0 %v3597_v54  ;;  %v3639_v54 = vcombine.high %v3631_v39, %v3631_v39 }
 0x316   : > { %17843 = vmatmul.mubr.f32.vlgmr.msra.gmra.mrb[164].mxu1 %v3604_v59  ;;  %33896 = vmatpush1.bf16.xpose.msra.mxu0 %v33895_v27  ;;  %v808_v59 = vld [vmem:[%s35442_s22 + $0xaa0] sm:$0xff]  ;;  %v817_v27 = vld [vmem:[%s35442_s22 + $0xae8] sm:$0xff] }
 0x317   : > { %33900 = vmatpush1.bf16.xpose.msra.mxu1 %v33899_v28  ;;  %17912 = vmatprep.mubr.f32.mxu0 %v3622_v30  ;;  %v33911_v11 = vpack.c.bf16 %v1576_v60, %v808_v59  ;;  %v1585_v28 = vld [vmem:[%s35442_s22 + $0x22e8] sm:$0x3]  ;;  %v364_v59 = vld [vmem:[%s35435_s12 + $0x2c0] sm:$0xff] }
 0x318   : > { %33902 = vmatprep.subr.bf16.mxu0 %v33901_v31  ;;  %v14134_v40 = vpop.f32.mrb[112].mxu0  ;;  %17982 = vmatprep.mubr.f32.mxu1 %v3623_v32  ;;  %v3692_v3 = vcombine.high %v364_v59, %v364_v59  ;;  %v3699_v8 = vrot.slane %v364_v59, %v35466_v25 }
 0x319   : > { %v14204_v41 = vpop.f32.mrb[112].mxu1  ;;  %33906 = vmatprep.subr.bf16.mxu1 %v33905_v33  ;;  %v14135_v45 = vadd.f32 %v14134_v40, %v14065_v29  ;;  %v14136_v46 = vpop.f32.mrb[113].mxu0  ;;  %v3672_v29 = vrot.slane %v3658_v18, %v35466_v25  ;;  %v819_v33 = vld [vmem:[%s35442_s22 + $0xaf8] sm:$0xff]  ;;  %v33925_v40 = vpack.c.bf16 %v1585_v28, %v817_v27 }
 0x31a   : > { %v14206_v47 = vpop.f32.mrb[113].mxu1  ;;  %v33929_v42 = vpack.c.bf16 %v1587_v34, %v819_v33  ;;  %v818_v46 = vld [vmem:[%s35442_s22 + $0xaf0] sm:$0xff]  ;;  %v1595_v18 = vld [vmem:[%s35442_s22 + $0x2338] sm:$0x3] }
 0x31b   : > { %v14205_v53 = vadd.f32 %v14204_v41, %v14135_v45  ;;  %v3674_v41 = vcombine.high %v3672_v29, %v3672_v29  ;;  %v1584_v45 = vld [vmem:[%s35442_s22 + $0x22e0] sm:$0x3]  ;;  %v1586_v47 = vld [vmem:[%s35442_s22 + $0x22f0] sm:$0x3] }
 0x31c   : > { %v33931_v61 = vpack.c.bf16 %v1586_v47, %v818_v46 }
 0x31d   : > { %17913 = vmatmul.mubr.f32.vlgmr.msra.gmra.mrb[166].mxu0 %v3614_v14  ;;  %v3656_v14 = vcombine.high %v3648_v63, %v3648_v63 }
 0x31e   : > { %17983 = vmatmul.mubr.f32.vlgmr.msra.gmra.mrb[166].mxu1 %v3621_v19  ;;  %33904 = vmatpush1.bf16.xpose.msra.mxu0 %v33903_v51  ;;  %v812_v19 = vld [vmem:[%s35442_s22 + $0xac0] sm:$0xff]  ;;  %v821_v51 = vld [vmem:[%s35442_s22 + $0xb08] sm:$0xff] }
 0x31f   : > { %33908 = vmatpush1.bf16.xpose.msra.mxu1 %v33907_v52  ;;  %18052 = vmatprep.mubr.f32.mxu0 %v3639_v54  ;;  %v33919_v36 = vpack.c.bf16 %v1580_v20, %v812_v19  ;;  %v1589_v52 = vld [vmem:[%s35442_s22 + $0x2308] sm:$0x3] }
 0x320   : > { %33910 = vmatprep.subr.bf16.mxu0 %v33909_v55  ;;  %v14274_v0 = vpop.f32.mrb[114].mxu0  ;;  %18122 = vmatprep.mubr.f32.mxu1 %v3640_v56  ;;  %v365_v19 = vld [vmem:[%s35435_s12 + $0x2c8] sm:$0xff] }
 0x321   : > { %v14344_v1 = vpop.f32.mrb[114].mxu1  ;;  %33914 = vmatprep.subr.bf16.mxu1 %v33913_v57  ;;  %v14275_v5 = vadd.f32 %v14274_v0, %v14205_v53  ;;  %v14276_v6 = vpop.f32.mrb[115].mxu0  ;;  %v3689_v53 = vrot.slane %v3675_v43, %v35466_v25  ;;  %v823_v57 = vld [vmem:[%s35442_s22 + $0xb18] sm:$0xff]  ;;  %v33933_v0 = vpack.c.bf16 %v1589_v52, %v821_v51  ;;  %v3709_v28 = vcombine.high %v365_v19, %v365_v19 }
 0x322   : > { %v14346_v7 = vpop.f32.mrb[115].mxu1  ;;  %v33937_v2 = vpack.c.bf16 %v1591_v58, %v823_v57  ;;  %v822_v6 = vld [vmem:[%s35442_s22 + $0xb10] sm:$0xff]  ;;  %v3716_v33 = vrot.slane %v365_v19, %v35466_v25  ;;  %v1599_v43 = vld [vmem:[%s35442_s22 + $0x2358] sm:$0x3] }
 0x323   : > { %v14345_v13 = vadd.f32 %v14344_v1, %v14275_v5  ;;  %v3691_v1 = vcombine.high %v3689_v53, %v3689_v53  ;;  %v1588_v5 = vld [vmem:[%s35442_s22 + $0x2300] sm:$0x3]  ;;  %v1590_v7 = vld [vmem:[%s35442_s22 + $0x2310] sm:$0x3] }
 0x324   : > { %v33939_v21 = vpack.c.bf16 %v1590_v7, %v822_v6 }
 0x325   : > { %18053 = vmatmul.mubr.f32.vlgmr.msra.gmra.mrb[168].mxu0 %v3631_v39  ;;  %v3673_v39 = vcombine.high %v3665_v23, %v3665_v23 }
 0x326   : > { %18123 = vmatmul.mubr.f32.vlgmr.msra.gmra.mrb[168].mxu1 %v3638_v44  ;;  %33912 = vmatpush1.bf16.xpose.msra.mxu0 %v33911_v11  ;;  %v816_v44 = vld [vmem:[%s35442_s22 + $0xae0] sm:$0xff]  ;;  %v825_v11 = vld [vmem:[%s35442_s22 + $0xb28] sm:$0xff] }
 0x327   : > { %33916 = vmatpush1.bf16.xpose.msra.mxu1 %v33915_v12  ;;  %18192 = vmatprep.mubr.f32.mxu0 %v3656_v14  ;;  %v33927_v60 = vpack.c.bf16 %v1584_v45, %v816_v44  ;;  %v1593_v12 = vld [vmem:[%s35442_s22 + $0x2328] sm:$0x3]  ;;  %v366_v44 = vld [vmem:[%s35435_s12 + $0x2d0] sm:$0xff] }
 0x328   : > { %33918 = vmatprep.subr.bf16.mxu0 %v33917_v15  ;;  %v14414_v24 = vpop.f32.mrb[116].mxu0  ;;  %18262 = vmatprep.mubr.f32.mxu1 %v3657_v16  ;;  %v3726_v52 = vcombine.high %v366_v44, %v366_v44  ;;  %v3733_v57 = vrot.slane %v366_v44, %v35466_v25 }
 0x329   : > { %v14484_v26 = vpop.f32.mrb[116].mxu1  ;;  %33922 = vmatprep.subr.bf16.mxu1 %v33921_v17  ;;  %v14415_v30 = vadd.f32 %v14414_v24, %v14345_v13  ;;  %v14416_v31 = vpop.f32.mrb[117].mxu0  ;;  %v3706_v13 = vrot.slane %v3692_v3, %v35466_v25  ;;  %v827_v17 = vld [vmem:[%s35442_s22 + $0xb38] sm:$0xff]  ;;  %v33941_v24 = vpack.c.bf16 %v1593_v12, %v825_v11 }
 0x32a   : > { %v14486_v32 = vpop.f32.mrb[117].mxu1  ;;  %v33945_v27 = vpack.c.bf16 %v1595_v18, %v827_v17  ;;  %v826_v31 = vld [vmem:[%s35442_s22 + $0xb30] sm:$0xff]  ;;  %v1603_v3 = vld [vmem:[%s35442_s22 + $0x2378] sm:$0x3] }
 0x32b   : > { %v14485_v38 = vadd.f32 %v14484_v26, %v14415_v30  ;;  %v3708_v26 = vcombine.high %v3706_v13, %v3706_v13  ;;  %v1592_v30 = vld [vmem:[%s35442_s22 + $0x2320] sm:$0x3]  ;;  %v1594_v32 = vld [vmem:[%s35442_s22 + $0x2330] sm:$0x3] }
 0x32c   : > { %v33947_v46 = vpack.c.bf16 %v1594_v32, %v826_v31 }
 0x32d   : > { %18193 = vmatmul.mubr.f32.vlgmr.msra.gmra.mrb[170].mxu0 %v3648_v63  ;;  %v3690_v63 = vcombine.high %v3682_v48, %v3682_v48 }
 0x32e   : > { %18263 = vmatmul.mubr.f32.vlgmr.msra.gmra.mrb[170].mxu1 %v3655_v4  ;;  %33920 = vmatpush1.bf16.xpose.msra.mxu0 %v33919_v36  ;;  %v820_v4 = vld [vmem:[%s35442_s22 + $0xb00] sm:$0xff]  ;;  %v829_v36 = vld [vmem:[%s35442_s22 + $0xb48] sm:$0xff] }
 0x32f   : > { %33924 = vmatpush1.bf16.xpose.msra.mxu1 %v33923_v37  ;;  %18332 = vmatprep.mubr.f32.mxu0 %v3673_v39  ;;  %v33935_v20 = vpack.c.bf16 %v1588_v5, %v820_v4  ;;  %v1597_v37 = vld [vmem:[%s35442_s22 + $0x2348] sm:$0x3]  ;;  %v367_v4 = vld [vmem:[%s35435_s12 + $0x2d8] sm:$0xff] }
 0x330   : > { %33926 = vmatprep.subr.bf16.mxu0 %v33925_v40  ;;  %v14554_v49 = vpop.f32.mrb[118].mxu0  ;;  %18402 = vmatprep.mubr.f32.mxu1 %v3674_v41  ;;  %v3743_v12 = vcombine.high %v367_v4, %v367_v4  ;;  %v3750_v17 = vrot.slane %v367_v4, %v35466_v25 }
 0x331   : > { %v14624_v50 = vpop.f32.mrb[118].mxu1  ;;  %33930 = vmatprep.subr.bf16.mxu1 %v33929_v42  ;;  %v14555_v54 = vadd.f32 %v14554_v49, %v14485_v38  ;;  %v14556_v55 = vpop.f32.mrb[119].mxu0  ;;  %v3723_v38 = vrot.slane %v3709_v28, %v35466_v25  ;;  %v831_v42 = vld [vmem:[%s35442_s22 + $0xb58] sm:$0xff]  ;;  %v33949_v49 = vpack.c.bf16 %v1597_v37, %v829_v36 }
 0x332   : > { %v14626_v56 = vpop.f32.mrb[119].mxu1  ;;  %v33953_v51 = vpack.c.bf16 %v1599_v43, %v831_v42  ;;  %v830_v55 = vld [vmem:[%s35442_s22 + $0xb50] sm:$0xff]  ;;  %v1607_v28 = vld [vmem:[%s35442_s22 + $0x2398] sm:$0x3] }
 0x333   : > { %v14625_v62 = vadd.f32 %v14624_v50, %v14555_v54  ;;  %v3725_v50 = vcombine.high %v3723_v38, %v3723_v38  ;;  %v1596_v54 = vld [vmem:[%s35442_s22 + $0x2340] sm:$0x3]  ;;  %v1598_v56 = vld [vmem:[%s35442_s22 + $0x2350] sm:$0x3] }
 0x334   : > { %v33955_v6 = vpack.c.bf16 %v1598_v56, %v830_v55 }
 0x335   : > { %18333 = vmatmul.mubr.f32.vlgmr.msra.gmra.mrb[172].mxu0 %v3665_v23  ;;  %v3707_v23 = vcombine.high %v3699_v8, %v3699_v8 }
 0x336   : > { %18403 = vmatmul.mubr.f32.vlgmr.msra.gmra.mrb[172].mxu1 %v3672_v29  ;;  %33928 = vmatpush1.bf16.xpose.msra.mxu0 %v33927_v60  ;;  %v824_v29 = vld [vmem:[%s35442_s22 + $0xb20] sm:$0xff]  ;;  %v833_v60 = vld [vmem:[%s35442_s22 + $0xb68] sm:$0xff] }
 0x337   : > { %33932 = vmatpush1.bf16.xpose.msra.mxu1 %v33931_v61  ;;  %18472 = vmatprep.mubr.f32.mxu0 %v3690_v63  ;;  %v33943_v45 = vpack.c.bf16 %v1592_v30, %v824_v29  ;;  %v1601_v61 = vld [vmem:[%s35442_s22 + $0x2368] sm:$0x3]  ;;  %v368_v29 = vld [vmem:[%s35435_s12 + $0x2e0] sm:$0xff] }
 0x338   : > { %33934 = vmatprep.subr.bf16.mxu0 %v33933_v0  ;;  %v14694_v9 = vpop.f32.mrb[120].mxu0  ;;  %18542 = vmatprep.mubr.f32.mxu1 %v3691_v1  ;;  %v3760_v37 = vcombine.high %v368_v29, %v368_v29  ;;  %v3767_v42 = vrot.slane %v368_v29, %v35466_v25 }
 0x339   : > { %v14764_v10 = vpop.f32.mrb[120].mxu1  ;;  %33938 = vmatprep.subr.bf16.mxu1 %v33937_v2  ;;  %v14695_v14 = vadd.f32 %v14694_v9, %v14625_v62  ;;  %v14696_v15 = vpop.f32.mrb[121].mxu0  ;;  %v3740_v62 = vrot.slane %v3726_v52, %v35466_v25  ;;  %v835_v2 = vld [vmem:[%s35442_s22 + $0xb78] sm:$0xff]  ;;  %v33957_v9 = vpack.c.bf16 %v1601_v61, %v833_v60 }
 0x33a   : > { %v14766_v16 = vpop.f32.mrb[121].mxu1  ;;  %v33961_v11 = vpack.c.bf16 %v1603_v3, %v835_v2  ;;  %v834_v15 = vld [vmem:[%s35442_s22 + $0xb70] sm:$0xff]  ;;  %v1611_v52 = vld [vmem:[%s35442_s22 + $0x23b8] sm:$0x3] }
 0x33b   : > { %v14765_v22 = vadd.f32 %v14764_v10, %v14695_v14  ;;  %v3742_v10 = vcombine.high %v3740_v62, %v3740_v62  ;;  %v1600_v14 = vld [vmem:[%s35442_s22 + $0x2360] sm:$0x3]  ;;  %v1602_v16 = vld [vmem:[%s35442_s22 + $0x2370] sm:$0x3] }
 0x33c   : > { %v33963_v31 = vpack.c.bf16 %v1602_v16, %v834_v15 }
 0x33d   : > { %18473 = vmatmul.mubr.f32.vlgmr.msra.gmra.mrb[174].mxu0 %v3682_v48  ;;  %v3724_v48 = vcombine.high %v3716_v33, %v3716_v33 }
 0x33e   : > { %18543 = vmatmul.mubr.f32.vlgmr.msra.gmra.mrb[174].mxu1 %v3689_v53  ;;  %33936 = vmatpush1.bf16.xpose.msra.mxu0 %v33935_v20  ;;  %v828_v53 = vld [vmem:[%s35442_s22 + $0xb40] sm:$0xff]  ;;  %v837_v20 = vld [vmem:[%s35442_s22 + $0xb88] sm:$0xff] }
 0x33f   : > { %33940 = vmatpush1.bf16.xpose.msra.mxu1 %v33939_v21  ;;  %18612 = vmatprep.mubr.f32.mxu0 %v3707_v23  ;;  %v33951_v5 = vpack.c.bf16 %v1596_v54, %v828_v53  ;;  %v1605_v21 = vld [vmem:[%s35442_s22 + $0x2388] sm:$0x3] }
 0x340   : > { %33942 = vmatprep.subr.bf16.mxu0 %v33941_v24  ;;  %v14834_v34 = vpop.f32.mrb[122].mxu0  ;;  %18682 = vmatprep.mubr.f32.mxu1 %v3708_v26  ;;  %v369_v53 = vld [vmem:[%s35435_s12 + $0x2e8] sm:$0xff] }
 0x341   : > { %v14904_v35 = vpop.f32.mrb[122].mxu1  ;;  %33946 = vmatprep.subr.bf16.mxu1 %v33945_v27  ;;  %v14835_v39 = vadd.f32 %v14834_v34, %v14765_v22  ;;  %v14836_v40 = vpop.f32.mrb[123].mxu0  ;;  %v3757_v22 = vrot.slane %v3743_v12, %v35466_v25  ;;  %v839_v27 = vld [vmem:[%s35442_s22 + $0xb98] sm:$0xff]  ;;  %v33965_v34 = vpack.c.bf16 %v1605_v21, %v837_v20  ;;  %v3777_v61 = vcombine.high %v369_v53, %v369_v53 }
 0x342   : > { %v14906_v41 = vpop.f32.mrb[123].mxu1  ;;  %v33969_v36 = vpack.c.bf16 %v1607_v28, %v839_v27  ;;  %v838_v40 = vld [vmem:[%s35442_s22 + $0xb90] sm:$0xff]  ;;  %v3784_v2 = vrot.slane %v369_v53, %v35466_v25  ;;  %v1615_v12 = vld [vmem:[%s35442_s22 + $0x23d8] sm:$0x3] }
 0x343   : > { %v14905_v47 = vadd.f32 %v14904_v35, %v14835_v39  ;;  %v3759_v35 = vcombine.high %v3757_v22, %v3757_v22  ;;  %v1604_v39 = vld [vmem:[%s35442_s22 + $0x2380] sm:$0x3]  ;;  %v1606_v41 = vld [vmem:[%s35442_s22 + $0x2390] sm:$0x3] }
 0x344   : > { %v33971_v55 = vpack.c.bf16 %v1606_v41, %v838_v40 }
 0x345   : > { %18613 = vmatmul.mubr.f32.vlgmr.msra.gmra.mrb[176].mxu0 %v3699_v8  ;;  %v3741_v8 = vcombine.high %v3733_v57, %v3733_v57 }
 0x346   : > { %18683 = vmatmul.mubr.f32.vlgmr.msra.gmra.mrb[176].mxu1 %v3706_v13  ;;  %33944 = vmatpush1.bf16.xpose.msra.mxu0 %v33943_v45  ;;  %v832_v13 = vld [vmem:[%s35442_s22 + $0xb60] sm:$0xff]  ;;  %v841_v45 = vld [vmem:[%s35442_s22 + $0xba8] sm:$0xff] }
 0x347   : > { %33948 = vmatpush1.bf16.xpose.msra.mxu1 %v33947_v46  ;;  %18752 = vmatprep.mubr.f32.mxu0 %v3724_v48  ;;  %v33959_v30 = vpack.c.bf16 %v1600_v14, %v832_v13  ;;  %v1609_v46 = vld [vmem:[%s35442_s22 + $0x23a8] sm:$0x3]  ;;  %v370_v13 = vld [vmem:[%s35435_s12 + $0x2f0] sm:$0xff] }
 0x348   : > { %33950 = vmatprep.subr.bf16.mxu0 %v33949_v49  ;;  %v14974_v58 = vpop.f32.mrb[124].mxu0  ;;  %18822 = vmatprep.mubr.f32.mxu1 %v3725_v50  ;;  %v3794_v21 = vcombine.high %v370_v13, %v370_v13  ;;  %v3801_v27 = vrot.slane %v370_v13, %v35466_v25 }
 0x349   : > { %v15044_v59 = vpop.f32.mrb[124].mxu1  ;;  %33954 = vmatprep.subr.bf16.mxu1 %v33953_v51  ;;  %v14975_v63 = vadd.f32 %v14974_v58, %v14905_v47  ;;  %v14976_v0 = vpop.f32.mrb[125].mxu0  ;;  %v3774_v47 = vrot.slane %v3760_v37, %v35466_v25  ;;  %v843_v51 = vld [vmem:[%s35442_s22 + $0xbb8] sm:$0xff]  ;;  %v33973_v58 = vpack.c.bf16 %v1609_v46, %v841_v45 }
 0x34a   : > { %v15046_v1 = vpop.f32.mrb[125].mxu1  ;;  %v33977_v60 = vpack.c.bf16 %v1611_v52, %v843_v51  ;;  %v842_v0 = vld [vmem:[%s35442_s22 + $0xbb0] sm:$0xff]  ;;  %v1619_v37 = vld [vmem:[%s35442_s22 + $0x23f8] sm:$0x3] }
 0x34b   : > { %v15045_v7 = vadd.f32 %v15044_v59, %v14975_v63  ;;  %v3776_v59 = vcombine.high %v3774_v47, %v3774_v47  ;;  %v1608_v63 = vld [vmem:[%s35442_s22 + $0x23a0] sm:$0x3]  ;;  %v1610_v1 = vld [vmem:[%s35442_s22 + $0x23b0] sm:$0x3] }
 0x34c   : > { %v33979_v15 = vpack.c.bf16 %v1610_v1, %v842_v0 }
 0x34d   : > { %18753 = vmatmul.mubr.f32.vlgmr.msra.gmra.mrb[178].mxu0 %v3716_v33  ;;  %v3758_v33 = vcombine.high %v3750_v17, %v3750_v17 }
 0x34e   : > { %18823 = vmatmul.mubr.f32.vlgmr.msra.gmra.mrb[178].mxu1 %v3723_v38  ;;  %33952 = vmatpush1.bf16.xpose.msra.mxu0 %v33951_v5  ;;  %v836_v38 = vld [vmem:[%s35442_s22 + $0xb80] sm:$0xff]  ;;  %v845_v5 = vld [vmem:[%s35442_s22 + $0xbc8] sm:$0xff] }
 0x34f   : > { %33956 = vmatpush1.bf16.xpose.msra.mxu1 %v33955_v6  ;;  %18892 = vmatprep.mubr.f32.mxu0 %v3741_v8  ;;  %v33967_v54 = vpack.c.bf16 %v1604_v39, %v836_v38  ;;  %v1613_v6 = vld [vmem:[%s35442_s22 + $0x23c8] sm:$0x3]  ;;  %v371_v38 = vld [vmem:[%s35435_s12 + $0x2f8] sm:$0xff] }
 0x350   : > { %33958 = vmatprep.subr.bf16.mxu0 %v33957_v9  ;;  %v15114_v18 = vpop.f32.mrb[126].mxu0  ;;  %18962 = vmatprep.mubr.f32.mxu1 %v3742_v10  ;;  %v3811_v46 = vcombine.high %v371_v38, %v371_v38  ;;  %v3818_v51 = vrot.slane %v371_v38, %v35466_v25 }
 0x351   : > { %v15184_v19 = vpop.f32.mrb[126].mxu1  ;;  %33962 = vmatprep.subr.bf16.mxu1 %v33961_v11  ;;  %v15115_v23 = vadd.f32 %v15114_v18, %v15045_v7  ;;  %v15116_v24 = vpop.f32.mrb[127].mxu0  ;;  %v3791_v7 = vrot.slane %v3777_v61, %v35466_v25  ;;  %v847_v11 = vld [vmem:[%s35442_s22 + $0xbd8] sm:$0xff]  ;;  %v33981_v18 = vpack.c.bf16 %v1613_v6, %v845_v5 }
 0x352   : > { %v15186_v26 = vpop.f32.mrb[127].mxu1  ;;  %v33985_v20 = vpack.c.bf16 %v1615_v12, %v847_v11  ;;  %v846_v24 = vld [vmem:[%s35442_s22 + $0xbd0] sm:$0xff]  ;;  %v1623_v61 = vld [vmem:[%s35442_s22 + $0x2418] sm:$0x3] }
 0x353   : > { %v15185_v32 = vadd.f32 %v15184_v19, %v15115_v23  ;;  %v3793_v19 = vcombine.high %v3791_v7, %v3791_v7  ;;  %v1612_v23 = vld [vmem:[%s35442_s22 + $0x23c0] sm:$0x3]  ;;  %v1614_v26 = vld [vmem:[%s35442_s22 + $0x23d0] sm:$0x3] }
 0x354   : > { %v33987_v40 = vpack.c.bf16 %v1614_v26, %v846_v24 }
 0x355   : > { %18893 = vmatmul.mubr.f32.vlgmr.msra.gmra.mrb[180].mxu0 %v3733_v57  ;;  %v3775_v57 = vcombine.high %v3767_v42, %v3767_v42 }
 0x356   : > { %18963 = vmatmul.mubr.f32.vlgmr.msra.gmra.mrb[180].mxu1 %v3740_v62  ;;  %33960 = vmatpush1.bf16.xpose.msra.mxu0 %v33959_v30  ;;  %v840_v62 = vld [vmem:[%s35442_s22 + $0xba0] sm:$0xff]  ;;  %v849_v30 = vld [vmem:[%s35442_s22 + $0xbe8] sm:$0xff] }
 0x357   : > { %33964 = vmatpush1.bf16.xpose.msra.mxu1 %v33963_v31  ;;  %19032 = vmatprep.mubr.f32.mxu0 %v3758_v33  ;;  %v33975_v14 = vpack.c.bf16 %v1608_v63, %v840_v62  ;;  %v1617_v31 = vld [vmem:[%s35442_s22 + $0x23e8] sm:$0x3]  ;;  %v372_v62 = vld [vmem:[%s35435_s12 + $0x300] sm:$0xff] }
 0x358   : > { %33966 = vmatprep.subr.bf16.mxu0 %v33965_v34  ;;  %v15254_v43 = vpop.f32.mrb[128].mxu0  ;;  %19102 = vmatprep.mubr.f32.mxu1 %v3759_v35  ;;  %v3828_v6 = vcombine.high %v372_v62, %v372_v62  ;;  %v3835_v11 = vrot.slane %v372_v62, %v35466_v25 }
 0x359   : > { %v15324_v44 = vpop.f32.mrb[128].mxu1  ;;  %33970 = vmatprep.subr.bf16.mxu1 %v33969_v36  ;;  %v15255_v48 = vadd.f32 %v15254_v43, %v15185_v32  ;;  %v15256_v49 = vpop.f32.mrb[129].mxu0  ;;  %v3808_v32 = vrot.slane %v3794_v21, %v35466_v25  ;;  %v851_v36 = vld [vmem:[%s35442_s22 + $0xbf8] sm:$0xff]  ;;  %v33989_v43 = vpack.c.bf16 %v1617_v31, %v849_v30 }
 0x35a   : > { %v15326_v50 = vpop.f32.mrb[129].mxu1  ;;  %v33993_v45 = vpack.c.bf16 %v1619_v37, %v851_v36  ;;  %v850_v49 = vld [vmem:[%s35442_s22 + $0xbf0] sm:$0xff]  ;;  %v1627_v21 = vld [vmem:[%s35442_s22 + $0x2438] sm:$0x3] }
 0x35b   : > { %v15325_v56 = vadd.f32 %v15324_v44, %v15255_v48  ;;  %v3810_v44 = vcombine.high %v3808_v32, %v3808_v32  ;;  %v1616_v48 = vld [vmem:[%s35442_s22 + $0x23e0] sm:$0x3]  ;;  %v1618_v50 = vld [vmem:[%s35442_s22 + $0x23f0] sm:$0x3] }
 0x35c   : > { %v33995_v0 = vpack.c.bf16 %v1618_v50, %v850_v49 }
 0x35d   : > { %19033 = vmatmul.mubr.f32.vlgmr.msra.gmra.mrb[182].mxu0 %v3750_v17  ;;  %v3792_v17 = vcombine.high %v3784_v2, %v3784_v2 }
 0x35e   : > { %19103 = vmatmul.mubr.f32.vlgmr.msra.gmra.mrb[182].mxu1 %v3757_v22  ;;  %33968 = vmatpush1.bf16.xpose.msra.mxu0 %v33967_v54  ;;  %v844_v22 = vld [vmem:[%s35442_s22 + $0xbc0] sm:$0xff]  ;;  %v853_v54 = vld [vmem:[%s35442_s22 + $0xc08] sm:$0xff] }
 0x35f   : > { %33972 = vmatpush1.bf16.xpose.msra.mxu1 %v33971_v55  ;;  %19172 = vmatprep.mubr.f32.mxu0 %v3775_v57  ;;  %v33983_v39 = vpack.c.bf16 %v1612_v23, %v844_v22  ;;  %v1621_v55 = vld [vmem:[%s35442_s22 + $0x2408] sm:$0x3] }
 0x360   : > { %33974 = vmatprep.subr.bf16.mxu0 %v33973_v58  ;;  %v15394_v3 = vpop.f32.mrb[130].mxu0  ;;  %19242 = vmatprep.mubr.f32.mxu1 %v3776_v59  ;;  %v373_v22 = vld [vmem:[%s35435_s12 + $0x308] sm:$0xff] }
 0x361   : > { %v15464_v4 = vpop.f32.mrb[130].mxu1  ;;  %33978 = vmatprep.subr.bf16.mxu1 %v33977_v60  ;;  %v15395_v8 = vadd.f32 %v15394_v3, %v15325_v56  ;;  %v15396_v9 = vpop.f32.mrb[131].mxu0  ;;  %v3825_v56 = vrot.slane %v3811_v46, %v35466_v25  ;;  %v855_v60 = vld [vmem:[%s35442_s22 + $0xc18] sm:$0xff]  ;;  %v33997_v3 = vpack.c.bf16 %v1621_v55, %v853_v54  ;;  %v3845_v31 = vcombine.high %v373_v22, %v373_v22 }
 0x362   : > { %v15466_v10 = vpop.f32.mrb[131].mxu1  ;;  %v34001_v5 = vpack.c.bf16 %v1623_v61, %v855_v60  ;;  %v854_v9 = vld [vmem:[%s35442_s22 + $0xc10] sm:$0xff]  ;;  %v3852_v36 = vrot.slane %v373_v22, %v35466_v25  ;;  %v1631_v46 = vld [vmem:[%s35442_s22 + $0x2458] sm:$0x3] }
 0x363   : > { %v15465_v16 = vadd.f32 %v15464_v4, %v15395_v8  ;;  %v3827_v4 = vcombine.high %v3825_v56, %v3825_v56  ;;  %v1620_v8 = vld [vmem:[%s35442_s22 + $0x2400] sm:$0x3]  ;;  %v1622_v10 = vld [vmem:[%s35442_s22 + $0x2410] sm:$0x3] }
 0x364   : > { %v34003_v24 = vpack.c.bf16 %v1622_v10, %v854_v9 }
 0x365   : > { %19173 = vmatmul.mubr.f32.vlgmr.msra.gmra.mrb[184].mxu0 %v3767_v42  ;;  %v3809_v42 = vcombine.high %v3801_v27, %v3801_v27 }
 0x366   : > { %19243 = vmatmul.mubr.f32.vlgmr.msra.gmra.mrb[184].mxu1 %v3774_v47  ;;  %33976 = vmatpush1.bf16.xpose.msra.mxu0 %v33975_v14  ;;  %v848_v47 = vld [vmem:[%s35442_s22 + $0xbe0] sm:$0xff]  ;;  %v857_v14 = vld [vmem:[%s35442_s22 + $0xc28] sm:$0xff] }
 0x367   : > { %33980 = vmatpush1.bf16.xpose.msra.mxu1 %v33979_v15  ;;  %19312 = vmatprep.mubr.f32.mxu0 %v3792_v17  ;;  %v33991_v63 = vpack.c.bf16 %v1616_v48, %v848_v47  ;;  %v1625_v15 = vld [vmem:[%s35442_s22 + $0x2428] sm:$0x3]  ;;  %v374_v47 = vld [vmem:[%s35435_s12 + $0x310] sm:$0xff] }
 0x368   : > { %33982 = vmatprep.subr.bf16.mxu0 %v33981_v18  ;;  %v15534_v28 = vpop.f32.mrb[132].mxu0  ;;  %19382 = vmatprep.mubr.f32.mxu1 %v3793_v19  ;;  %v3862_v55 = vcombine.high %v374_v47, %v374_v47  ;;  %v3869_v60 = vrot.slane %v374_v47, %v35466_v25 }
 0x369   : > { %v15604_v29 = vpop.f32.mrb[132].mxu1  ;;  %33986 = vmatprep.subr.bf16.mxu1 %v33985_v20  ;;  %v15535_v33 = vadd.f32 %v15534_v28, %v15465_v16  ;;  %v15536_v34 = vpop.f32.mrb[133].mxu0  ;;  %v3842_v16 = vrot.slane %v3828_v6, %v35466_v25  ;;  %v859_v20 = vld [vmem:[%s35442_s22 + $0xc38] sm:$0xff]  ;;  %v34005_v28 = vpack.c.bf16 %v1625_v15, %v857_v14 }
 0x36a   : > { %v15606_v35 = vpop.f32.mrb[133].mxu1  ;;  %v34009_v30 = vpack.c.bf16 %v1627_v21, %v859_v20  ;;  %v858_v34 = vld [vmem:[%s35442_s22 + $0xc30] sm:$0xff]  ;;  %v1635_v6 = vld [vmem:[%s35442_s22 + $0x2478] sm:$0x3] }
 0x36b   : > { %v15605_v41 = vadd.f32 %v15604_v29, %v15535_v33  ;;  %v3844_v29 = vcombine.high %v3842_v16, %v3842_v16  ;;  %v1624_v33 = vld [vmem:[%s35442_s22 + $0x2420] sm:$0x3]  ;;  %v1626_v35 = vld [vmem:[%s35442_s22 + $0x2430] sm:$0x3] }
 0x36c   : > { %v34011_v49 = vpack.c.bf16 %v1626_v35, %v858_v34 }
 0x36d   : > { %19313 = vmatmul.mubr.f32.vlgmr.msra.gmra.mrb[186].mxu0 %v3784_v2  ;;  %v3826_v2 = vcombine.high %v3818_v51, %v3818_v51 }
 0x36e   : > { %19383 = vmatmul.mubr.f32.vlgmr.msra.gmra.mrb[186].mxu1 %v3791_v7  ;;  %33984 = vmatpush1.bf16.xpose.msra.mxu0 %v33983_v39  ;;  %v852_v7 = vld [vmem:[%s35442_s22 + $0xc00] sm:$0xff]  ;;  %v861_v39 = vld [vmem:[%s35442_s22 + $0xc48] sm:$0xff] }
 0x36f   : > { %33988 = vmatpush1.bf16.xpose.msra.mxu1 %v33987_v40  ;;  %19452 = vmatprep.mubr.f32.mxu0 %v3809_v42  ;;  %v33999_v23 = vpack.c.bf16 %v1620_v8, %v852_v7  ;;  %v1629_v40 = vld [vmem:[%s35442_s22 + $0x2448] sm:$0x3]  ;;  %v375_v7 = vld [vmem:[%s35435_s12 + $0x318] sm:$0xff] }
 0x370   : > { %33990 = vmatprep.subr.bf16.mxu0 %v33989_v43  ;;  %v15674_v52 = vpop.f32.mrb[134].mxu0  ;;  %19522 = vmatprep.mubr.f32.mxu1 %v3810_v44  ;;  %v3879_v15 = vcombine.high %v375_v7, %v375_v7  ;;  %v3886_v20 = vrot.slane %v375_v7, %v35466_v25 }
 0x371   : > { %v15744_v53 = vpop.f32.mrb[134].mxu1  ;;  %33994 = vmatprep.subr.bf16.mxu1 %v33993_v45  ;;  %v15675_v57 = vadd.f32 %v15674_v52, %v15605_v41  ;;  %v15676_v58 = vpop.f32.mrb[135].mxu0  ;;  %v3859_v41 = vrot.slane %v3845_v31, %v35466_v25  ;;  %v863_v45 = vld [vmem:[%s35442_s22 + $0xc58] sm:$0xff]  ;;  %v34013_v52 = vpack.c.bf16 %v1629_v40, %v861_v39 }
 0x372   : > { %v15746_v59 = vpop.f32.mrb[135].mxu1  ;;  %v34017_v54 = vpack.c.bf16 %v1631_v46, %v863_v45  ;;  %v862_v58 = vld [vmem:[%s35442_s22 + $0xc50] sm:$0xff]  ;;  %v1639_v31 = vld [vmem:[%s35442_s22 + $0x2498] sm:$0x3] }
 0x373   : > { %v15745_v1 = vadd.f32 %v15744_v53, %v15675_v57  ;;  %v3861_v53 = vcombine.high %v3859_v41, %v3859_v41  ;;  %v1628_v57 = vld [vmem:[%s35442_s22 + $0x2440] sm:$0x3]  ;;  %v1630_v59 = vld [vmem:[%s35442_s22 + $0x2450] sm:$0x3] }
 0x374   : > { %v34019_v9 = vpack.c.bf16 %v1630_v59, %v862_v58 }
 0x375   : > { %19453 = vmatmul.mubr.f32.vlgmr.msra.gmra.mrb[188].mxu0 %v3801_v27  ;;  %v3843_v27 = vcombine.high %v3835_v11, %v3835_v11 }
 0x376   : > { %19523 = vmatmul.mubr.f32.vlgmr.msra.gmra.mrb[188].mxu1 %v3808_v32  ;;  %33992 = vmatpush1.bf16.xpose.msra.mxu0 %v33991_v63  ;;  %v856_v32 = vld [vmem:[%s35442_s22 + $0xc20] sm:$0xff]  ;;  %v865_v63 = vld [vmem:[%s35442_s22 + $0xc68] sm:$0xff] }
 0x377   : > { %33996 = vmatpush1.bf16.xpose.msra.mxu1 %v33995_v0  ;;  %19592 = vmatprep.mubr.f32.mxu0 %v3826_v2  ;;  %v34007_v48 = vpack.c.bf16 %v1624_v33, %v856_v32  ;;  %v1633_v0 = vld [vmem:[%s35442_s22 + $0x2468] sm:$0x3]  ;;  %v376_v32 = vld [vmem:[%s35435_s12 + $0x320] sm:$0xff] }
 0x378   : > { %33998 = vmatprep.subr.bf16.mxu0 %v33997_v3  ;;  %v15814_v12 = vpop.f32.mrb[136].mxu0  ;;  %19662 = vmatprep.mubr.f32.mxu1 %v3827_v4  ;;  %v3896_v40 = vcombine.high %v376_v32, %v376_v32  ;;  %v3903_v45 = vrot.slane %v376_v32, %v35466_v25 }
 0x379   : > { %v15884_v13 = vpop.f32.mrb[136].mxu1  ;;  %34002 = vmatprep.subr.bf16.mxu1 %v34001_v5  ;;  %v15815_v17 = vadd.f32 %v15814_v12, %v15745_v1  ;;  %v15816_v18 = vpop.f32.mrb[137].mxu0  ;;  %v3876_v1 = vrot.slane %v3862_v55, %v35466_v25  ;;  %v867_v5 = vld [vmem:[%s35442_s22 + $0xc78] sm:$0xff]  ;;  %v34021_v12 = vpack.c.bf16 %v1633_v0, %v865_v63 }
 0x37a   : > { %v15886_v19 = vpop.f32.mrb[137].mxu1  ;;  %v34025_v14 = vpack.c.bf16 %v1635_v6, %v867_v5  ;;  %v866_v18 = vld [vmem:[%s35442_s22 + $0xc70] sm:$0xff]  ;;  %v1643_v55 = vld [vmem:[%s35442_s22 + $0x24b8] sm:$0x3] }
 0x37b   : > { %v15885_v26 = vadd.f32 %v15884_v13, %v15815_v17  ;;  %v3878_v13 = vcombine.high %v3876_v1, %v3876_v1  ;;  %v1632_v17 = vld [vmem:[%s35442_s22 + $0x2460] sm:$0x3]  ;;  %v1634_v19 = vld [vmem:[%s35442_s22 + $0x2470] sm:$0x3] }
 0x37c   : > { %v34027_v34 = vpack.c.bf16 %v1634_v19, %v866_v18 }
 0x37d   : > { %19593 = vmatmul.mubr.f32.vlgmr.msra.gmra.mrb[190].mxu0 %v3818_v51  ;;  %v3860_v51 = vcombine.high %v3852_v36, %v3852_v36 }
 0x37e   : > { %19663 = vmatmul.mubr.f32.vlgmr.msra.gmra.mrb[190].mxu1 %v3825_v56  ;;  %34000 = vmatpush1.bf16.xpose.msra.mxu0 %v33999_v23  ;;  %v860_v56 = vld [vmem:[%s35442_s22 + $0xc40] sm:$0xff]  ;;  %v869_v23 = vld [vmem:[%s35442_s22 + $0xc88] sm:$0xff] }
 0x37f   : > { %34004 = vmatpush1.bf16.xpose.msra.mxu1 %v34003_v24  ;;  %19732 = vmatprep.mubr.f32.mxu0 %v3843_v27  ;;  %v34015_v8 = vpack.c.bf16 %v1628_v57, %v860_v56  ;;  %v1637_v24 = vld [vmem:[%s35442_s22 + $0x2488] sm:$0x3] }
 0x380   : > { %34006 = vmatprep.subr.bf16.mxu0 %v34005_v28  ;;  %v15954_v37 = vpop.f32.mrb[138].mxu0  ;;  %19802 = vmatprep.mubr.f32.mxu1 %v3844_v29  ;;  %v377_v56 = vld [vmem:[%s35435_s12 + $0x328] sm:$0xff] }
 0x381   : > { %v16024_v38 = vpop.f32.mrb[138].mxu1  ;;  %34010 = vmatprep.subr.bf16.mxu1 %v34009_v30  ;;  %v15955_v42 = vadd.f32 %v15954_v37, %v15885_v26  ;;  %v15956_v43 = vpop.f32.mrb[139].mxu0  ;;  %v3893_v26 = vrot.slane %v3879_v15, %v35466_v25  ;;  %v871_v30 = vld [vmem:[%s35442_s22 + $0xc98] sm:$0xff]  ;;  %v34029_v37 = vpack.c.bf16 %v1637_v24, %v869_v23  ;;  %v3913_v0 = vcombine.high %v377_v56, %v377_v56 }
 0x382   : > { %v16026_v44 = vpop.f32.mrb[139].mxu1  ;;  %v34033_v39 = vpack.c.bf16 %v1639_v31, %v871_v30  ;;  %v870_v43 = vld [vmem:[%s35442_s22 + $0xc90] sm:$0xff]  ;;  %v3920_v5 = vrot.slane %v377_v56, %v35466_v25  ;;  %v1647_v15 = vld [vmem:[%s35442_s22 + $0x24d8] sm:$0x3] }
 0x383   : > { %v16025_v50 = vadd.f32 %v16024_v38, %v15955_v42  ;;  %v3895_v38 = vcombine.high %v3893_v26, %v3893_v26  ;;  %v1636_v42 = vld [vmem:[%s35442_s22 + $0x2480] sm:$0x3]  ;;  %v1638_v44 = vld [vmem:[%s35442_s22 + $0x2490] sm:$0x3] }
 0x384   : > { %v34035_v58 = vpack.c.bf16 %v1638_v44, %v870_v43 }
 0x385   : > { %19733 = vmatmul.mubr.f32.vlgmr.msra.gmra.mrb[192].mxu0 %v3835_v11  ;;  %v3877_v11 = vcombine.high %v3869_v60, %v3869_v60 }
 0x386   : > { %19803 = vmatmul.mubr.f32.vlgmr.msra.gmra.mrb[192].mxu1 %v3842_v16  ;;  %34008 = vmatpush1.bf16.xpose.msra.mxu0 %v34007_v48  ;;  %v864_v16 = vld [vmem:[%s35442_s22 + $0xc60] sm:$0xff]  ;;  %v873_v48 = vld [vmem:[%s35442_s22 + $0xca8] sm:$0xff] }
 0x387   : > { %34012 = vmatpush1.bf16.xpose.msra.mxu1 %v34011_v49  ;;  %19872 = vmatprep.mubr.f32.mxu0 %v3860_v51  ;;  %v34023_v33 = vpack.c.bf16 %v1632_v17, %v864_v16  ;;  %v1641_v49 = vld [vmem:[%s35442_s22 + $0x24a8] sm:$0x3]  ;;  %v378_v16 = vld [vmem:[%s35435_s12 + $0x330] sm:$0xff] }
 0x388   : > { %34014 = vmatprep.subr.bf16.mxu0 %v34013_v52  ;;  %v16094_v61 = vpop.f32.mrb[140].mxu0  ;;  %19942 = vmatprep.mubr.f32.mxu1 %v3861_v53  ;;  %v3930_v24 = vcombine.high %v378_v16, %v378_v16  ;;  %v3937_v30 = vrot.slane %v378_v16, %v35466_v25 }
 0x389   : > { %v16164_v62 = vpop.f32.mrb[140].mxu1  ;;  %34018 = vmatprep.subr.bf16.mxu1 %v34017_v54  ;;  %v16095_v2 = vadd.f32 %v16094_v61, %v16025_v50  ;;  %v16096_v3 = vpop.f32.mrb[141].mxu0  ;;  %v3910_v50 = vrot.slane %v3896_v40, %v35466_v25  ;;  %v875_v54 = vld [vmem:[%s35442_s22 + $0xcb8] sm:$0xff]  ;;  %v34037_v61 = vpack.c.bf16 %v1641_v49, %v873_v48 }
 0x38a   : > { %v16166_v4 = vpop.f32.mrb[141].mxu1  ;;  %v34041_v63 = vpack.c.bf16 %v1643_v55, %v875_v54  ;;  %v874_v3 = vld [vmem:[%s35442_s22 + $0xcb0] sm:$0xff]  ;;  %v1651_v40 = vld [vmem:[%s35442_s22 + $0x24f8] sm:$0x3] }
 0x38b   : > { %v16165_v10 = vadd.f32 %v16164_v62, %v16095_v2  ;;  %v3912_v62 = vcombine.high %v3910_v50, %v3910_v50  ;;  %v1640_v2 = vld [vmem:[%s35442_s22 + $0x24a0] sm:$0x3]  ;;  %v1642_v4 = vld [vmem:[%s35442_s22 + $0x24b0] sm:$0x3] }
 0x38c   : > { %v34043_v18 = vpack.c.bf16 %v1642_v4, %v874_v3 }
 0x38d   : > { %19873 = vmatmul.mubr.f32.vlgmr.msra.gmra.mrb[194].mxu0 %v3852_v36  ;;  %v3894_v36 = vcombine.high %v3886_v20, %v3886_v20 }
 0x38e   : > { %19943 = vmatmul.mubr.f32.vlgmr.msra.gmra.mrb[194].mxu1 %v3859_v41  ;;  %34016 = vmatpush1.bf16.xpose.msra.mxu0 %v34015_v8  ;;  %v868_v41 = vld [vmem:[%s35442_s22 + $0xc80] sm:$0xff]  ;;  %v877_v8 = vld [vmem:[%s35442_s22 + $0xcc8] sm:$0xff] }
 0x38f   : > { %34020 = vmatpush1.bf16.xpose.msra.mxu1 %v34019_v9  ;;  %20012 = vmatprep.mubr.f32.mxu0 %v3877_v11  ;;  %v34031_v57 = vpack.c.bf16 %v1636_v42, %v868_v41  ;;  %v1645_v9 = vld [vmem:[%s35442_s22 + $0x24c8] sm:$0x3]  ;;  %v379_v41 = vld [vmem:[%s35435_s12 + $0x338] sm:$0xff] }
 0x390   : > { %34022 = vmatprep.subr.bf16.mxu0 %v34021_v12  ;;  %v16234_v21 = vpop.f32.mrb[142].mxu0  ;;  %20082 = vmatprep.mubr.f32.mxu1 %v3878_v13  ;;  %v3947_v49 = vcombine.high %v379_v41, %v379_v41  ;;  %v3954_v54 = vrot.slane %v379_v41, %v35466_v25 }
 0x391   : > { %v16304_v22 = vpop.f32.mrb[142].mxu1  ;;  %34026 = vmatprep.subr.bf16.mxu1 %v34025_v14  ;;  %v16235_v27 = vadd.f32 %v16234_v21, %v16165_v10  ;;  %v16236_v28 = vpop.f32.mrb[143].mxu0  ;;  %v3927_v10 = vrot.slane %v3913_v0, %v35466_v25  ;;  %v879_v14 = vld [vmem:[%s35442_s22 + $0xcd8] sm:$0xff]  ;;  %v34045_v21 = vpack.c.bf16 %v1645_v9, %v877_v8 }
 0x392   : > { %v16306_v29 = vpop.f32.mrb[143].mxu1  ;;  %v34049_v23 = vpack.c.bf16 %v1647_v15, %v879_v14  ;;  %v878_v28 = vld [vmem:[%s35442_s22 + $0xcd0] sm:$0xff]  ;;  %v1655_v0 = vld [vmem:[%s35442_s22 + $0x2518] sm:$0x3] }
 0x393   : > { %v16305_v35 = vadd.f32 %v16304_v22, %v16235_v27  ;;  %v3929_v22 = vcombine.high %v3927_v10, %v3927_v10  ;;  %v1644_v27 = vld [vmem:[%s35442_s22 + $0x24c0] sm:$0x3]  ;;  %v1646_v29 = vld [vmem:[%s35442_s22 + $0x24d0] sm:$0x3] }
 0x394   : > { %v34051_v43 = vpack.c.bf16 %v1646_v29, %v878_v28 }
 0x395   : > { %20013 = vmatmul.mubr.f32.vlgmr.msra.gmra.mrb[196].mxu0 %v3869_v60  ;;  %v3911_v60 = vcombine.high %v3903_v45, %v3903_v45 }
 0x396   : > { %20083 = vmatmul.mubr.f32.vlgmr.msra.gmra.mrb[196].mxu1 %v3876_v1  ;;  %34024 = vmatpush1.bf16.xpose.msra.mxu0 %v34023_v33  ;;  %v872_v1 = vld [vmem:[%s35442_s22 + $0xca0] sm:$0xff]  ;;  %v881_v33 = vld [vmem:[%s35442_s22 + $0xce8] sm:$0xff] }
 0x397   : > { %34028 = vmatpush1.bf16.xpose.msra.mxu1 %v34027_v34  ;;  %20152 = vmatprep.mubr.f32.mxu0 %v3894_v36  ;;  %v34039_v17 = vpack.c.bf16 %v1640_v2, %v872_v1  ;;  %v1649_v34 = vld [vmem:[%s35442_s22 + $0x24e8] sm:$0x3]  ;;  %v380_v1 = vld [vmem:[%s35435_s12 + $0x340] sm:$0xff] }
 0x398   : > { %34030 = vmatprep.subr.bf16.mxu0 %v34029_v37  ;;  %v16374_v46 = vpop.f32.mrb[144].mxu0  ;;  %20222 = vmatprep.mubr.f32.mxu1 %v3895_v38  ;;  %v3964_v9 = vcombine.high %v380_v1, %v380_v1  ;;  %v3971_v14 = vrot.slane %v380_v1, %v35466_v25 }
 0x399   : > { %v16444_v47 = vpop.f32.mrb[144].mxu1  ;;  %34034 = vmatprep.subr.bf16.mxu1 %v34033_v39  ;;  %v16375_v51 = vadd.f32 %v16374_v46, %v16305_v35  ;;  %v16376_v52 = vpop.f32.mrb[145].mxu0  ;;  %v3944_v35 = vrot.slane %v3930_v24, %v35466_v25  ;;  %v883_v39 = vld [vmem:[%s35442_s22 + $0xcf8] sm:$0xff]  ;;  %v34053_v46 = vpack.c.bf16 %v1649_v34, %v881_v33 }
 0x39a   : > { %v16446_v53 = vpop.f32.mrb[145].mxu1  ;;  %v34057_v48 = vpack.c.bf16 %v1651_v40, %v883_v39  ;;  %v882_v52 = vld [vmem:[%s35442_s22 + $0xcf0] sm:$0xff]  ;;  %v1659_v24 = vld [vmem:[%s35442_s22 + $0x2538] sm:$0x3] }
 0x39b   : > { %v16445_v59 = vadd.f32 %v16444_v47, %v16375_v51  ;;  %v3946_v47 = vcombine.high %v3944_v35, %v3944_v35  ;;  %v1648_v51 = vld [vmem:[%s35442_s22 + $0x24e0] sm:$0x3]  ;;  %v1650_v53 = vld [vmem:[%s35442_s22 + $0x24f0] sm:$0x3] }
 0x39c   : > { %v34059_v3 = vpack.c.bf16 %v1650_v53, %v882_v52 }
 0x39d   : > { %20153 = vmatmul.mubr.f32.vlgmr.msra.gmra.mrb[198].mxu0 %v3886_v20  ;;  %v3928_v20 = vcombine.high %v3920_v5, %v3920_v5 }
 0x39e   : > { %20223 = vmatmul.mubr.f32.vlgmr.msra.gmra.mrb[198].mxu1 %v3893_v26  ;;  %34032 = vmatpush1.bf16.xpose.msra.mxu0 %v34031_v57  ;;  %v876_v26 = vld [vmem:[%s35442_s22 + $0xcc0] sm:$0xff]  ;;  %v885_v57 = vld [vmem:[%s35442_s22 + $0xd08] sm:$0xff] }
 0x39f   : > { %34036 = vmatpush1.bf16.xpose.msra.mxu1 %v34035_v58  ;;  %20292 = vmatprep.mubr.f32.mxu0 %v3911_v60  ;;  %v34047_v42 = vpack.c.bf16 %v1644_v27, %v876_v26  ;;  %v1653_v58 = vld [vmem:[%s35442_s22 + $0x2508] sm:$0x3] }
 0x3a0   : > { %34038 = vmatprep.subr.bf16.mxu0 %v34037_v61  ;;  %v16514_v6 = vpop.f32.mrb[146].mxu0  ;;  %20362 = vmatprep.mubr.f32.mxu1 %v3912_v62  ;;  %v381_v26 = vld [vmem:[%s35435_s12 + $0x348] sm:$0xff] }
 0x3a1   : > { %v16584_v7 = vpop.f32.mrb[146].mxu1  ;;  %34042 = vmatprep.subr.bf16.mxu1 %v34041_v63  ;;  %v16515_v11 = vadd.f32 %v16514_v6, %v16445_v59  ;;  %v16516_v12 = vpop.f32.mrb[147].mxu0  ;;  %v3961_v59 = vrot.slane %v3947_v49, %v35466_v25  ;;  %v887_v63 = vld [vmem:[%s35442_s22 + $0xd18] sm:$0xff]  ;;  %v34061_v6 = vpack.c.bf16 %v1653_v58, %v885_v57  ;;  %v3981_v34 = vcombine.high %v381_v26, %v381_v26 }
 0x3a2   : > { %v16586_v13 = vpop.f32.mrb[147].mxu1  ;;  %v34065_v8 = vpack.c.bf16 %v1655_v0, %v887_v63  ;;  %v886_v12 = vld [vmem:[%s35442_s22 + $0xd10] sm:$0xff]  ;;  %v3988_v39 = vrot.slane %v381_v26, %v35466_v25  ;;  %v1663_v49 = vld [vmem:[%s35442_s22 + $0x2558] sm:$0x3] }
 0x3a3   : > { %v16585_v19 = vadd.f32 %v16584_v7, %v16515_v11  ;;  %v3963_v7 = vcombine.high %v3961_v59, %v3961_v59  ;;  %v1652_v11 = vld [vmem:[%s35442_s22 + $0x2500] sm:$0x3]  ;;  %v1654_v13 = vld [vmem:[%s35442_s22 + $0x2510] sm:$0x3] }
 0x3a4   : > { %v34067_v28 = vpack.c.bf16 %v1654_v13, %v886_v12 }
 0x3a5   : > { %20293 = vmatmul.mubr.f32.vlgmr.msra.gmra.mrb[200].mxu0 %v3903_v45  ;;  %v3945_v45 = vcombine.high %v3937_v30, %v3937_v30 }
 0x3a6   : > { %20363 = vmatmul.mubr.f32.vlgmr.msra.gmra.mrb[200].mxu1 %v3910_v50  ;;  %34040 = vmatpush1.bf16.xpose.msra.mxu0 %v34039_v17  ;;  %v880_v50 = vld [vmem:[%s35442_s22 + $0xce0] sm:$0xff]  ;;  %v889_v17 = vld [vmem:[%s35442_s22 + $0xd28] sm:$0xff] }
 0x3a7   : > { %34044 = vmatpush1.bf16.xpose.msra.mxu1 %v34043_v18  ;;  %20432 = vmatprep.mubr.f32.mxu0 %v3928_v20  ;;  %v34055_v2 = vpack.c.bf16 %v1648_v51, %v880_v50  ;;  %v1657_v18 = vld [vmem:[%s35442_s22 + $0x2528] sm:$0x3]  ;;  %v382_v50 = vld [vmem:[%s35435_s12 + $0x350] sm:$0xff] }
 0x3a8   : > { %34046 = vmatprep.subr.bf16.mxu0 %v34045_v21  ;;  %v16654_v31 = vpop.f32.mrb[148].mxu0  ;;  %20502 = vmatprep.mubr.f32.mxu1 %v3929_v22  ;;  %v3998_v58 = vcombine.high %v382_v50, %v382_v50  ;;  %v4005_v63 = vrot.slane %v382_v50, %v35466_v25 }
 0x3a9   : > { %v16724_v32 = vpop.f32.mrb[148].mxu1  ;;  %34050 = vmatprep.subr.bf16.mxu1 %v34049_v23  ;;  %v16655_v36 = vadd.f32 %v16654_v31, %v16585_v19  ;;  %v16656_v37 = vpop.f32.mrb[149].mxu0  ;;  %v3978_v19 = vrot.slane %v3964_v9, %v35466_v25  ;;  %v891_v23 = vld [vmem:[%s35442_s22 + $0xd38] sm:$0xff]  ;;  %v34069_v31 = vpack.c.bf16 %v1657_v18, %v889_v17 }
 0x3aa   : > { %v16726_v38 = vpop.f32.mrb[149].mxu1  ;;  %v34073_v33 = vpack.c.bf16 %v1659_v24, %v891_v23  ;;  %v890_v37 = vld [vmem:[%s35442_s22 + $0xd30] sm:$0xff]  ;;  %v1667_v9 = vld [vmem:[%s35442_s22 + $0x2578] sm:$0x3] }
 0x3ab   : > { %v16725_v44 = vadd.f32 %v16724_v32, %v16655_v36  ;;  %v3980_v32 = vcombine.high %v3978_v19, %v3978_v19  ;;  %v1656_v36 = vld [vmem:[%s35442_s22 + $0x2520] sm:$0x3]  ;;  %v1658_v38 = vld [vmem:[%s35442_s22 + $0x2530] sm:$0x3] }
 0x3ac   : > { %v34075_v52 = vpack.c.bf16 %v1658_v38, %v890_v37 }
 0x3ad   : > { %20433 = vmatmul.mubr.f32.vlgmr.msra.gmra.mrb[202].mxu0 %v3920_v5  ;;  %v3962_v5 = vcombine.high %v3954_v54, %v3954_v54 }
 0x3ae   : > { %20503 = vmatmul.mubr.f32.vlgmr.msra.gmra.mrb[202].mxu1 %v3927_v10  ;;  %34048 = vmatpush1.bf16.xpose.msra.mxu0 %v34047_v42  ;;  %v884_v10 = vld [vmem:[%s35442_s22 + $0xd00] sm:$0xff]  ;;  %v893_v42 = vld [vmem:[%s35442_s22 + $0xd48] sm:$0xff] }
 0x3af   : > { %34052 = vmatpush1.bf16.xpose.msra.mxu1 %v34051_v43  ;;  %20572 = vmatprep.mubr.f32.mxu0 %v3945_v45  ;;  %v34063_v27 = vpack.c.bf16 %v1652_v11, %v884_v10  ;;  %v1661_v43 = vld [vmem:[%s35442_s22 + $0x2548] sm:$0x3]  ;;  %v383_v10 = vld [vmem:[%s35435_s12 + $0x358] sm:$0xff] }
 0x3b0   : > { %34054 = vmatprep.subr.bf16.mxu0 %v34053_v46  ;;  %v16794_v55 = vpop.f32.mrb[150].mxu0  ;;  %20642 = vmatprep.mubr.f32.mxu1 %v3946_v47  ;;  %v4015_v18 = vcombine.high %v383_v10, %v383_v10  ;;  %v4022_v23 = vrot.slane %v383_v10, %v35466_v25 }
 0x3b1   : > { %v16864_v56 = vpop.f32.mrb[150].mxu1  ;;  %34058 = vmatprep.subr.bf16.mxu1 %v34057_v48  ;;  %v16795_v60 = vadd.f32 %v16794_v55, %v16725_v44  ;;  %v16796_v61 = vpop.f32.mrb[151].mxu0  ;;  %v3995_v44 = vrot.slane %v3981_v34, %v35466_v25  ;;  %v895_v48 = vld [vmem:[%s35442_s22 + $0xd58] sm:$0xff]  ;;  %v34077_v55 = vpack.c.bf16 %v1661_v43, %v893_v42 }
 0x3b2   : > { %v16866_v62 = vpop.f32.mrb[151].mxu1  ;;  %v34081_v57 = vpack.c.bf16 %v1663_v49, %v895_v48  ;;  %v894_v61 = vld [vmem:[%s35442_s22 + $0xd50] sm:$0xff]  ;;  %v1671_v34 = vld [vmem:[%s35442_s22 + $0x2598] sm:$0x3] }
 0x3b3   : > { %v16865_v4 = vadd.f32 %v16864_v56, %v16795_v60  ;;  %v3997_v56 = vcombine.high %v3995_v44, %v3995_v44  ;;  %v1660_v60 = vld [vmem:[%s35442_s22 + $0x2540] sm:$0x3]  ;;  %v1662_v62 = vld [vmem:[%s35442_s22 + $0x2550] sm:$0x3] }
 0x3b4   : > { %v34083_v12 = vpack.c.bf16 %v1662_v62, %v894_v61 }
 0x3b5   : > { %20573 = vmatmul.mubr.f32.vlgmr.msra.gmra.mrb[204].mxu0 %v3937_v30  ;;  %v3979_v30 = vcombine.high %v3971_v14, %v3971_v14 }
 0x3b6   : > { %20643 = vmatmul.mubr.f32.vlgmr.msra.gmra.mrb[204].mxu1 %v3944_v35  ;;  %34056 = vmatpush1.bf16.xpose.msra.mxu0 %v34055_v2  ;;  %v888_v35 = vld [vmem:[%s35442_s22 + $0xd20] sm:$0xff]  ;;  %v897_v2 = vld [vmem:[%s35442_s22 + $0xd68] sm:$0xff] }
 0x3b7   : > { %34060 = vmatpush1.bf16.xpose.msra.mxu1 %v34059_v3  ;;  %20712 = vmatprep.mubr.f32.mxu0 %v3962_v5  ;;  %v34071_v51 = vpack.c.bf16 %v1656_v36, %v888_v35  ;;  %v1665_v3 = vld [vmem:[%s35442_s22 + $0x2568] sm:$0x3]  ;;  %v384_v35 = vld [vmem:[%s35435_s12 + $0x360] sm:$0xff] }
 0x3b8   : > { %34062 = vmatprep.subr.bf16.mxu0 %v34061_v6  ;;  %v16934_v15 = vpop.f32.mrb[152].mxu0  ;;  %20782 = vmatprep.mubr.f32.mxu1 %v3963_v7  ;;  %v4032_v43 = vcombine.high %v384_v35, %v384_v35  ;;  %v4039_v48 = vrot.slane %v384_v35, %v35466_v25 }
 0x3b9   : > { %v17004_v16 = vpop.f32.mrb[152].mxu1  ;;  %34066 = vmatprep.subr.bf16.mxu1 %v34065_v8  ;;  %v16935_v20 = vadd.f32 %v16934_v15, %v16865_v4  ;;  %v16936_v21 = vpop.f32.mrb[153].mxu0  ;;  %v4012_v4 = vrot.slane %v3998_v58, %v35466_v25  ;;  %v899_v8 = vld [vmem:[%s35442_s22 + $0xd78] sm:$0xff]  ;;  %v34085_v15 = vpack.c.bf16 %v1665_v3, %v897_v2 }
 0x3ba   : > { %v17006_v22 = vpop.f32.mrb[153].mxu1  ;;  %v34089_v17 = vpack.c.bf16 %v1667_v9, %v899_v8  ;;  %v898_v21 = vld [vmem:[%s35442_s22 + $0xd70] sm:$0xff]  ;;  %v1675_v58 = vld [vmem:[%s35442_s22 + $0x25b8] sm:$0x3] }
 0x3bb   : > { %v17005_v29 = vadd.f32 %v17004_v16, %v16935_v20  ;;  %v4014_v16 = vcombine.high %v4012_v4, %v4012_v4  ;;  %v1664_v20 = vld [vmem:[%s35442_s22 + $0x2560] sm:$0x3]  ;;  %v1666_v22 = vld [vmem:[%s35442_s22 + $0x2570] sm:$0x3] }
 0x3bc   : > { %v34091_v37 = vpack.c.bf16 %v1666_v22, %v898_v21 }
 0x3bd   : > { %20713 = vmatmul.mubr.f32.vlgmr.msra.gmra.mrb[206].mxu0 %v3954_v54  ;;  %v3996_v54 = vcombine.high %v3988_v39, %v3988_v39 }
 0x3be   : > { %20783 = vmatmul.mubr.f32.vlgmr.msra.gmra.mrb[206].mxu1 %v3961_v59  ;;  %34064 = vmatpush1.bf16.xpose.msra.mxu0 %v34063_v27  ;;  %v892_v59 = vld [vmem:[%s35442_s22 + $0xd40] sm:$0xff]  ;;  %v901_v27 = vld [vmem:[%s35442_s22 + $0xd88] sm:$0xff] }
 0x3bf   : > { %34068 = vmatpush1.bf16.xpose.msra.mxu1 %v34067_v28  ;;  %20852 = vmatprep.mubr.f32.mxu0 %v3979_v30  ;;  %v34079_v11 = vpack.c.bf16 %v1660_v60, %v892_v59  ;;  %v1669_v28 = vld [vmem:[%s35442_s22 + $0x2588] sm:$0x3] }
 0x3c0   : > { %34070 = vmatprep.subr.bf16.mxu0 %v34069_v31  ;;  %v17074_v40 = vpop.f32.mrb[154].mxu0  ;;  %20922 = vmatprep.mubr.f32.mxu1 %v3980_v32  ;;  %v385_v59 = vld [vmem:[%s35435_s12 + $0x368] sm:$0xff] }
 0x3c1   : > { %v17144_v41 = vpop.f32.mrb[154].mxu1  ;;  %34074 = vmatprep.subr.bf16.mxu1 %v34073_v33  ;;  %v17075_v45 = vadd.f32 %v17074_v40, %v17005_v29  ;;  %v17076_v46 = vpop.f32.mrb[155].mxu0  ;;  %v4029_v29 = vrot.slane %v4015_v18, %v35466_v25  ;;  %v903_v33 = vld [vmem:[%s35442_s22 + $0xd98] sm:$0xff]  ;;  %v34093_v40 = vpack.c.bf16 %v1669_v28, %v901_v27  ;;  %v4049_v3 = vcombine.high %v385_v59, %v385_v59 }
 0x3c2   : > { %v17146_v47 = vpop.f32.mrb[155].mxu1  ;;  %v34097_v42 = vpack.c.bf16 %v1671_v34, %v903_v33  ;;  %v902_v46 = vld [vmem:[%s35442_s22 + $0xd90] sm:$0xff]  ;;  %v4056_v8 = vrot.slane %v385_v59, %v35466_v25  ;;  %v1679_v18 = vld [vmem:[%s35442_s22 + $0x25d8] sm:$0x3] }
 0x3c3   : > { %v17145_v53 = vadd.f32 %v17144_v41, %v17075_v45  ;;  %v4031_v41 = vcombine.high %v4029_v29, %v4029_v29  ;;  %v1668_v45 = vld [vmem:[%s35442_s22 + $0x2580] sm:$0x3]  ;;  %v1670_v47 = vld [vmem:[%s35442_s22 + $0x2590] sm:$0x3] }
 0x3c4   : > { %v34099_v61 = vpack.c.bf16 %v1670_v47, %v902_v46 }
 0x3c5   : > { %20853 = vmatmul.mubr.f32.vlgmr.msra.gmra.mrb[208].mxu0 %v3971_v14  ;;  %v4013_v14 = vcombine.high %v4005_v63, %v4005_v63 }
 0x3c6   : > { %20923 = vmatmul.mubr.f32.vlgmr.msra.gmra.mrb[208].mxu1 %v3978_v19  ;;  %34072 = vmatpush1.bf16.xpose.msra.mxu0 %v34071_v51  ;;  %v896_v19 = vld [vmem:[%s35442_s22 + $0xd60] sm:$0xff]  ;;  %v905_v51 = vld [vmem:[%s35442_s22 + $0xda8] sm:$0xff] }
 0x3c7   : > { %34076 = vmatpush1.bf16.xpose.msra.mxu1 %v34075_v52  ;;  %20992 = vmatprep.mubr.f32.mxu0 %v3996_v54  ;;  %v34087_v36 = vpack.c.bf16 %v1664_v20, %v896_v19  ;;  %v1673_v52 = vld [vmem:[%s35442_s22 + $0x25a8] sm:$0x3]  ;;  %v386_v19 = vld [vmem:[%s35435_s12 + $0x370] sm:$0xff] }
 0x3c8   : > { %34078 = vmatprep.subr.bf16.mxu0 %v34077_v55  ;;  %v17214_v0 = vpop.f32.mrb[156].mxu0  ;;  %21062 = vmatprep.mubr.f32.mxu1 %v3997_v56  ;;  %v4066_v28 = vcombine.high %v386_v19, %v386_v19  ;;  %v4073_v33 = vrot.slane %v386_v19, %v35466_v25 }
 0x3c9   : > { %v17284_v1 = vpop.f32.mrb[156].mxu1  ;;  %34082 = vmatprep.subr.bf16.mxu1 %v34081_v57  ;;  %v17215_v5 = vadd.f32 %v17214_v0, %v17145_v53  ;;  %v17216_v6 = vpop.f32.mrb[157].mxu0  ;;  %v4046_v53 = vrot.slane %v4032_v43, %v35466_v25  ;;  %v907_v57 = vld [vmem:[%s35442_s22 + $0xdb8] sm:$0xff]  ;;  %v34101_v0 = vpack.c.bf16 %v1673_v52, %v905_v51 }
 0x3ca   : > { %v17286_v7 = vpop.f32.mrb[157].mxu1  ;;  %v34105_v2 = vpack.c.bf16 %v1675_v58, %v907_v57  ;;  %v906_v6 = vld [vmem:[%s35442_s22 + $0xdb0] sm:$0xff]  ;;  %v1683_v43 = vld [vmem:[%s35442_s22 + $0x25f8] sm:$0x3] }
 0x3cb   : > { %v17285_v13 = vadd.f32 %v17284_v1, %v17215_v5  ;;  %v4048_v1 = vcombine.high %v4046_v53, %v4046_v53  ;;  %v1672_v5 = vld [vmem:[%s35442_s22 + $0x25a0] sm:$0x3]  ;;  %v1674_v7 = vld [vmem:[%s35442_s22 + $0x25b0] sm:$0x3] }
 0x3cc   : > { %v34107_v21 = vpack.c.bf16 %v1674_v7, %v906_v6 }
 0x3cd   : > { %20993 = vmatmul.mubr.f32.vlgmr.msra.gmra.mrb[210].mxu0 %v3988_v39  ;;  %v4030_v39 = vcombine.high %v4022_v23, %v4022_v23 }
 0x3ce   : > { %21063 = vmatmul.mubr.f32.vlgmr.msra.gmra.mrb[210].mxu1 %v3995_v44  ;;  %34080 = vmatpush1.bf16.xpose.msra.mxu0 %v34079_v11  ;;  %v900_v44 = vld [vmem:[%s35442_s22 + $0xd80] sm:$0xff]  ;;  %v909_v11 = vld [vmem:[%s35442_s22 + $0xdc8] sm:$0xff] }
 0x3cf   : > { %34084 = vmatpush1.bf16.xpose.msra.mxu1 %v34083_v12  ;;  %21132 = vmatprep.mubr.f32.mxu0 %v4013_v14  ;;  %v34095_v60 = vpack.c.bf16 %v1668_v45, %v900_v44  ;;  %v1677_v12 = vld [vmem:[%s35442_s22 + $0x25c8] sm:$0x3]  ;;  %v387_v44 = vld [vmem:[%s35435_s12 + $0x378] sm:$0xff] }
 0x3d0   : > { %34086 = vmatprep.subr.bf16.mxu0 %v34085_v15  ;;  %v17354_v24 = vpop.f32.mrb[158].mxu0  ;;  %21202 = vmatprep.mubr.f32.mxu1 %v4014_v16  ;;  %v4083_v52 = vcombine.high %v387_v44, %v387_v44  ;;  %v4090_v57 = vrot.slane %v387_v44, %v35466_v25 }
 0x3d1   : > { %v17424_v26 = vpop.f32.mrb[158].mxu1  ;;  %34090 = vmatprep.subr.bf16.mxu1 %v34089_v17  ;;  %v17355_v30 = vadd.f32 %v17354_v24, %v17285_v13  ;;  %v17356_v31 = vpop.f32.mrb[159].mxu0  ;;  %v4063_v13 = vrot.slane %v4049_v3, %v35466_v25  ;;  %v911_v17 = vld [vmem:[%s35442_s22 + $0xdd8] sm:$0xff]  ;;  %v34109_v24 = vpack.c.bf16 %v1677_v12, %v909_v11 }
 0x3d2   : > { %v17426_v32 = vpop.f32.mrb[159].mxu1  ;;  %v34113_v27 = vpack.c.bf16 %v1679_v18, %v911_v17  ;;  %v910_v31 = vld [vmem:[%s35442_s22 + $0xdd0] sm:$0xff]  ;;  %v1687_v3 = vld [vmem:[%s35442_s22 + $0x2618] sm:$0x3] }
 0x3d3   : > { %v17425_v38 = vadd.f32 %v17424_v26, %v17355_v30  ;;  %v4065_v26 = vcombine.high %v4063_v13, %v4063_v13  ;;  %v1676_v30 = vld [vmem:[%s35442_s22 + $0x25c0] sm:$0x3]  ;;  %v1678_v32 = vld [vmem:[%s35442_s22 + $0x25d0] sm:$0x3] }
 0x3d4   : > { %v34115_v46 = vpack.c.bf16 %v1678_v32, %v910_v31 }
 0x3d5   : > { %21133 = vmatmul.mubr.f32.vlgmr.msra.gmra.mrb[212].mxu0 %v4005_v63  ;;  %v4047_v63 = vcombine.high %v4039_v48, %v4039_v48 }
 0x3d6   : > { %21203 = vmatmul.mubr.f32.vlgmr.msra.gmra.mrb[212].mxu1 %v4012_v4  ;;  %34088 = vmatpush1.bf16.xpose.msra.mxu0 %v34087_v36  ;;  %v904_v4 = vld [vmem:[%s35442_s22 + $0xda0] sm:$0xff]  ;;  %v913_v36 = vld [vmem:[%s35442_s22 + $0xde8] sm:$0xff] }
 0x3d7   : > { %34092 = vmatpush1.bf16.xpose.msra.mxu1 %v34091_v37  ;;  %21272 = vmatprep.mubr.f32.mxu0 %v4030_v39  ;;  %v34103_v20 = vpack.c.bf16 %v1672_v5, %v904_v4  ;;  %v1681_v37 = vld [vmem:[%s35442_s22 + $0x25e8] sm:$0x3]  ;;  %v388_v4 = vld [vmem:[%s35435_s12 + $0x380] sm:$0xff] }
 0x3d8   : > { %34094 = vmatprep.subr.bf16.mxu0 %v34093_v40  ;;  %v17494_v49 = vpop.f32.mrb[160].mxu0  ;;  %21342 = vmatprep.mubr.f32.mxu1 %v4031_v41  ;;  %v4100_v12 = vcombine.high %v388_v4, %v388_v4  ;;  %v4107_v17 = vrot.slane %v388_v4, %v35466_v25 }
 0x3d9   : > { %v17564_v50 = vpop.f32.mrb[160].mxu1  ;;  %34098 = vmatprep.subr.bf16.mxu1 %v34097_v42  ;;  %v17495_v54 = vadd.f32 %v17494_v49, %v17425_v38  ;;  %v17496_v55 = vpop.f32.mrb[161].mxu0  ;;  %v4080_v38 = vrot.slane %v4066_v28, %v35466_v25  ;;  %v915_v42 = vld [vmem:[%s35442_s22 + $0xdf8] sm:$0xff]  ;;  %v34117_v49 = vpack.c.bf16 %v1681_v37, %v913_v36 }
 0x3da   : > { %v17566_v56 = vpop.f32.mrb[161].mxu1  ;;  %v34121_v51 = vpack.c.bf16 %v1683_v43, %v915_v42  ;;  %v914_v55 = vld [vmem:[%s35442_s22 + $0xdf0] sm:$0xff]  ;;  %v1691_v28 = vld [vmem:[%s35442_s22 + $0x2638] sm:$0x3] }
 0x3db   : > { %v17565_v62 = vadd.f32 %v17564_v50, %v17495_v54  ;;  %v4082_v50 = vcombine.high %v4080_v38, %v4080_v38  ;;  %v1680_v54 = vld [vmem:[%s35442_s22 + $0x25e0] sm:$0x3]  ;;  %v1682_v56 = vld [vmem:[%s35442_s22 + $0x25f0] sm:$0x3] }
 0x3dc   : > { %v34123_v6 = vpack.c.bf16 %v1682_v56, %v914_v55 }
 0x3dd   : > { %21273 = vmatmul.mubr.f32.vlgmr.msra.gmra.mrb[214].mxu0 %v4022_v23  ;;  %v4064_v23 = vcombine.high %v4056_v8, %v4056_v8 }
 0x3de   : > { %21343 = vmatmul.mubr.f32.vlgmr.msra.gmra.mrb[214].mxu1 %v4029_v29  ;;  %34096 = vmatpush1.bf16.xpose.msra.mxu0 %v34095_v60  ;;  %v908_v29 = vld [vmem:[%s35442_s22 + $0xdc0] sm:$0xff]  ;;  %v917_v60 = vld [vmem:[%s35442_s22 + $0xe08] sm:$0xff] }
 0x3df   : > { %34100 = vmatpush1.bf16.xpose.msra.mxu1 %v34099_v61  ;;  %21412 = vmatprep.mubr.f32.mxu0 %v4047_v63  ;;  %v34111_v45 = vpack.c.bf16 %v1676_v30, %v908_v29  ;;  %v1685_v61 = vld [vmem:[%s35442_s22 + $0x2608] sm:$0x3] }
 0x3e0   : > { %34102 = vmatprep.subr.bf16.mxu0 %v34101_v0  ;;  %v17634_v9 = vpop.f32.mrb[162].mxu0  ;;  %21482 = vmatprep.mubr.f32.mxu1 %v4048_v1  ;;  %v389_v29 = vld [vmem:[%s35435_s12 + $0x388] sm:$0xff] }
 0x3e1   : > { %v17704_v10 = vpop.f32.mrb[162].mxu1  ;;  %34106 = vmatprep.subr.bf16.mxu1 %v34105_v2  ;;  %v17635_v14 = vadd.f32 %v17634_v9, %v17565_v62  ;;  %v17636_v15 = vpop.f32.mrb[163].mxu0  ;;  %v4097_v62 = vrot.slane %v4083_v52, %v35466_v25  ;;  %v919_v2 = vld [vmem:[%s35442_s22 + $0xe18] sm:$0xff]  ;;  %v34125_v9 = vpack.c.bf16 %v1685_v61, %v917_v60  ;;  %v4117_v37 = vcombine.high %v389_v29, %v389_v29 }
 0x3e2   : > { %v17706_v16 = vpop.f32.mrb[163].mxu1  ;;  %v34129_v11 = vpack.c.bf16 %v1687_v3, %v919_v2  ;;  %v918_v15 = vld [vmem:[%s35442_s22 + $0xe10] sm:$0xff]  ;;  %v4124_v42 = vrot.slane %v389_v29, %v35466_v25  ;;  %v1695_v52 = vld [vmem:[%s35442_s22 + $0x2658] sm:$0x3] }
 0x3e3   : > { %v17705_v22 = vadd.f32 %v17704_v10, %v17635_v14  ;;  %v4099_v10 = vcombine.high %v4097_v62, %v4097_v62  ;;  %v1684_v14 = vld [vmem:[%s35442_s22 + $0x2600] sm:$0x3]  ;;  %v1686_v16 = vld [vmem:[%s35442_s22 + $0x2610] sm:$0x3] }
 0x3e4   : > { %v34131_v31 = vpack.c.bf16 %v1686_v16, %v918_v15 }
 0x3e5   : > { %21413 = vmatmul.mubr.f32.vlgmr.msra.gmra.mrb[216].mxu0 %v4039_v48  ;;  %v4081_v48 = vcombine.high %v4073_v33, %v4073_v33 }
 0x3e6   : > { %21483 = vmatmul.mubr.f32.vlgmr.msra.gmra.mrb[216].mxu1 %v4046_v53  ;;  %34104 = vmatpush1.bf16.xpose.msra.mxu0 %v34103_v20  ;;  %v912_v53 = vld [vmem:[%s35442_s22 + $0xde0] sm:$0xff]  ;;  %v921_v20 = vld [vmem:[%s35442_s22 + $0xe28] sm:$0xff] }
 0x3e7   : > { %34108 = vmatpush1.bf16.xpose.msra.mxu1 %v34107_v21  ;;  %21552 = vmatprep.mubr.f32.mxu0 %v4064_v23  ;;  %v34119_v5 = vpack.c.bf16 %v1680_v54, %v912_v53  ;;  %v1689_v21 = vld [vmem:[%s35442_s22 + $0x2628] sm:$0x3]  ;;  %v390_v53 = vld [vmem:[%s35435_s12 + $0x390] sm:$0xff] }
 0x3e8   : > { %34110 = vmatprep.subr.bf16.mxu0 %v34109_v24  ;;  %v17774_v34 = vpop.f32.mrb[164].mxu0  ;;  %21622 = vmatprep.mubr.f32.mxu1 %v4065_v26  ;;  %v4134_v61 = vcombine.high %v390_v53, %v390_v53  ;;  %v4141_v2 = vrot.slane %v390_v53, %v35466_v25 }
 0x3e9   : > { %v17844_v35 = vpop.f32.mrb[164].mxu1  ;;  %34114 = vmatprep.subr.bf16.mxu1 %v34113_v27  ;;  %v17775_v39 = vadd.f32 %v17774_v34, %v17705_v22  ;;  %v17776_v40 = vpop.f32.mrb[165].mxu0  ;;  %v4114_v22 = vrot.slane %v4100_v12, %v35466_v25  ;;  %v923_v27 = vld [vmem:[%s35442_s22 + $0xe38] sm:$0xff]  ;;  %v34133_v34 = vpack.c.bf16 %v1689_v21, %v921_v20 }
 0x3ea   : > { %v17846_v41 = vpop.f32.mrb[165].mxu1  ;;  %v34137_v36 = vpack.c.bf16 %v1691_v28, %v923_v27  ;;  %v922_v40 = vld [vmem:[%s35442_s22 + $0xe30] sm:$0xff]  ;;  %v1699_v12 = vld [vmem:[%s35442_s22 + $0x2678] sm:$0x3] }
 0x3eb   : > { %v17845_v47 = vadd.f32 %v17844_v35, %v17775_v39  ;;  %v4116_v35 = vcombine.high %v4114_v22, %v4114_v22  ;;  %v1688_v39 = vld [vmem:[%s35442_s22 + $0x2620] sm:$0x3]  ;;  %v1690_v41 = vld [vmem:[%s35442_s22 + $0x2630] sm:$0x3] }
 0x3ec   : > { %v34139_v55 = vpack.c.bf16 %v1690_v41, %v922_v40 }
 0x3ed   : > { %21553 = vmatmul.mubr.f32.vlgmr.msra.gmra.mrb[218].mxu0 %v4056_v8  ;;  %v4098_v8 = vcombine.high %v4090_v57, %v4090_v57 }
 0x3ee   : > { %21623 = vmatmul.mubr.f32.vlgmr.msra.gmra.mrb[218].mxu1 %v4063_v13  ;;  %34112 = vmatpush1.bf16.xpose.msra.mxu0 %v34111_v45  ;;  %v916_v13 = vld [vmem:[%s35442_s22 + $0xe00] sm:$0xff]  ;;  %v925_v45 = vld [vmem:[%s35442_s22 + $0xe48] sm:$0xff] }
 0x3ef   : > { %34116 = vmatpush1.bf16.xpose.msra.mxu1 %v34115_v46  ;;  %21692 = vmatprep.mubr.f32.mxu0 %v4081_v48  ;;  %v34127_v30 = vpack.c.bf16 %v1684_v14, %v916_v13  ;;  %v1693_v46 = vld [vmem:[%s35442_s22 + $0x2648] sm:$0x3]  ;;  %v391_v13 = vld [vmem:[%s35435_s12 + $0x398] sm:$0xff] }
 0x3f0   : > { %34118 = vmatprep.subr.bf16.mxu0 %v34117_v49  ;;  %v17914_v58 = vpop.f32.mrb[166].mxu0  ;;  %21762 = vmatprep.mubr.f32.mxu1 %v4082_v50  ;;  %v4151_v21 = vcombine.high %v391_v13, %v391_v13  ;;  %v4158_v27 = vrot.slane %v391_v13, %v35466_v25 }
 0x3f1   : > { %v17984_v59 = vpop.f32.mrb[166].mxu1  ;;  %34122 = vmatprep.subr.bf16.mxu1 %v34121_v51  ;;  %v17915_v63 = vadd.f32 %v17914_v58, %v17845_v47  ;;  %v17916_v0 = vpop.f32.mrb[167].mxu0  ;;  %v4131_v47 = vrot.slane %v4117_v37, %v35466_v25  ;;  %v927_v51 = vld [vmem:[%s35442_s22 + $0xe58] sm:$0xff]  ;;  %v34141_v58 = vpack.c.bf16 %v1693_v46, %v925_v45 }
 0x3f2   : > { %v17986_v1 = vpop.f32.mrb[167].mxu1  ;;  %v34145_v60 = vpack.c.bf16 %v1695_v52, %v927_v51  ;;  %v926_v0 = vld [vmem:[%s35442_s22 + $0xe50] sm:$0xff]  ;;  %v1703_v37 = vld [vmem:[%s35442_s22 + $0x2698] sm:$0x3] }
 0x3f3   : > { %v17985_v7 = vadd.f32 %v17984_v59, %v17915_v63  ;;  %v4133_v59 = vcombine.high %v4131_v47, %v4131_v47  ;;  %v1692_v63 = vld [vmem:[%s35442_s22 + $0x2640] sm:$0x3]  ;;  %v1694_v1 = vld [vmem:[%s35442_s22 + $0x2650] sm:$0x3] }
 0x3f4   : > { %v34147_v15 = vpack.c.bf16 %v1694_v1, %v926_v0 }
 0x3f5   : > { %21693 = vmatmul.mubr.f32.vlgmr.msra.gmra.mrb[220].mxu0 %v4073_v33  ;;  %v4115_v33 = vcombine.high %v4107_v17, %v4107_v17 }
 0x3f6   : > { %21763 = vmatmul.mubr.f32.vlgmr.msra.gmra.mrb[220].mxu1 %v4080_v38  ;;  %34120 = vmatpush1.bf16.xpose.msra.mxu0 %v34119_v5  ;;  %v920_v38 = vld [vmem:[%s35442_s22 + $0xe20] sm:$0xff]  ;;  %v929_v5 = vld [vmem:[%s35442_s22 + $0xe68] sm:$0xff] }
 0x3f7   : > { %34124 = vmatpush1.bf16.xpose.msra.mxu1 %v34123_v6  ;;  %21832 = vmatprep.mubr.f32.mxu0 %v4098_v8  ;;  %v34135_v54 = vpack.c.bf16 %v1688_v39, %v920_v38  ;;  %v1697_v6 = vld [vmem:[%s35442_s22 + $0x2668] sm:$0x3]  ;;  %v392_v38 = vld [vmem:[%s35435_s12 + $0x3a0] sm:$0xff] }
 0x3f8   : > { %34126 = vmatprep.subr.bf16.mxu0 %v34125_v9  ;;  %v18054_v18 = vpop.f32.mrb[168].mxu0  ;;  %21902 = vmatprep.mubr.f32.mxu1 %v4099_v10  ;;  %v4168_v46 = vcombine.high %v392_v38, %v392_v38  ;;  %v4175_v51 = vrot.slane %v392_v38, %v35466_v25 }
 0x3f9   : > { %v18124_v19 = vpop.f32.mrb[168].mxu1  ;;  %34130 = vmatprep.subr.bf16.mxu1 %v34129_v11  ;;  %v18055_v23 = vadd.f32 %v18054_v18, %v17985_v7  ;;  %v18056_v24 = vpop.f32.mrb[169].mxu0  ;;  %v4148_v7 = vrot.slane %v4134_v61, %v35466_v25  ;;  %v931_v11 = vld [vmem:[%s35442_s22 + $0xe78] sm:$0xff]  ;;  %v34149_v18 = vpack.c.bf16 %v1697_v6, %v929_v5 }
 0x3fa   : > { %v18126_v26 = vpop.f32.mrb[169].mxu1  ;;  %v34153_v20 = vpack.c.bf16 %v1699_v12, %v931_v11  ;;  %v930_v24 = vld [vmem:[%s35442_s22 + $0xe70] sm:$0xff]  ;;  %v1707_v61 = vld [vmem:[%s35442_s22 + $0x26b8] sm:$0x3] }
 0x3fb   : > { %v18125_v32 = vadd.f32 %v18124_v19, %v18055_v23  ;;  %v4150_v19 = vcombine.high %v4148_v7, %v4148_v7  ;;  %v1696_v23 = vld [vmem:[%s35442_s22 + $0x2660] sm:$0x3]  ;;  %v1698_v26 = vld [vmem:[%s35442_s22 + $0x2670] sm:$0x3] }
 0x3fc   : > { %v34155_v40 = vpack.c.bf16 %v1698_v26, %v930_v24 }
 0x3fd   : > { %21833 = vmatmul.mubr.f32.vlgmr.msra.gmra.mrb[222].mxu0 %v4090_v57  ;;  %v4132_v57 = vcombine.high %v4124_v42, %v4124_v42 }
 0x3fe   : > { %21903 = vmatmul.mubr.f32.vlgmr.msra.gmra.mrb[222].mxu1 %v4097_v62  ;;  %34128 = vmatpush1.bf16.xpose.msra.mxu0 %v34127_v30  ;;  %v924_v62 = vld [vmem:[%s35442_s22 + $0xe40] sm:$0xff]  ;;  %v933_v30 = vld [vmem:[%s35442_s22 + $0xe88] sm:$0xff] }
 0x3ff   : > { %34132 = vmatpush1.bf16.xpose.msra.mxu1 %v34131_v31  ;;  %21972 = vmatprep.mubr.f32.mxu0 %v4115_v33  ;;  %v34143_v14 = vpack.c.bf16 %v1692_v63, %v924_v62  ;;  %v1701_v31 = vld [vmem:[%s35442_s22 + $0x2688] sm:$0x3] }
 0x400   : > { %34134 = vmatprep.subr.bf16.mxu0 %v34133_v34  ;;  %v18194_v43 = vpop.f32.mrb[170].mxu0  ;;  %22042 = vmatprep.mubr.f32.mxu1 %v4116_v35  ;;  %v393_v62 = vld [vmem:[%s35435_s12 + $0x3a8] sm:$0xff] }
 0x401   : > { %v18264_v44 = vpop.f32.mrb[170].mxu1  ;;  %34138 = vmatprep.subr.bf16.mxu1 %v34137_v36  ;;  %v18195_v48 = vadd.f32 %v18194_v43, %v18125_v32  ;;  %v18196_v49 = vpop.f32.mrb[171].mxu0  ;;  %v4165_v32 = vrot.slane %v4151_v21, %v35466_v25  ;;  %v935_v36 = vld [vmem:[%s35442_s22 + $0xe98] sm:$0xff]  ;;  %v34157_v43 = vpack.c.bf16 %v1701_v31, %v933_v30  ;;  %v4185_v6 = vcombine.high %v393_v62, %v393_v62 }
 0x402   : > { %v18266_v50 = vpop.f32.mrb[171].mxu1  ;;  %v34161_v45 = vpack.c.bf16 %v1703_v37, %v935_v36  ;;  %v934_v49 = vld [vmem:[%s35442_s22 + $0xe90] sm:$0xff]  ;;  %v4192_v11 = vrot.slane %v393_v62, %v35466_v25  ;;  %v1711_v21 = vld [vmem:[%s35442_s22 + $0x26d8] sm:$0x3] }
 0x403   : > { %v18265_v56 = vadd.f32 %v18264_v44, %v18195_v48  ;;  %v4167_v44 = vcombine.high %v4165_v32, %v4165_v32  ;;  %v1700_v48 = vld [vmem:[%s35442_s22 + $0x2680] sm:$0x3]  ;;  %v1702_v50 = vld [vmem:[%s35442_s22 + $0x2690] sm:$0x3] }
 0x404   : > { %v34163_v0 = vpack.c.bf16 %v1702_v50, %v934_v49 }
 0x405   : > { %21973 = vmatmul.mubr.f32.vlgmr.msra.gmra.mrb[224].mxu0 %v4107_v17  ;;  %v4149_v17 = vcombine.high %v4141_v2, %v4141_v2 }
 0x406   : > { %22043 = vmatmul.mubr.f32.vlgmr.msra.gmra.mrb[224].mxu1 %v4114_v22  ;;  %34136 = vmatpush1.bf16.xpose.msra.mxu0 %v34135_v54  ;;  %v928_v22 = vld [vmem:[%s35442_s22 + $0xe60] sm:$0xff]  ;;  %v937_v54 = vld [vmem:[%s35442_s22 + $0xea8] sm:$0xff] }
 0x407   : > { %34140 = vmatpush1.bf16.xpose.msra.mxu1 %v34139_v55  ;;  %22112 = vmatprep.mubr.f32.mxu0 %v4132_v57  ;;  %v34151_v39 = vpack.c.bf16 %v1696_v23, %v928_v22  ;;  %v1705_v55 = vld [vmem:[%s35442_s22 + $0x26a8] sm:$0x3]  ;;  %v394_v22 = vld [vmem:[%s35435_s12 + $0x3b0] sm:$0xff] }
 0x408   : > { %34142 = vmatprep.subr.bf16.mxu0 %v34141_v58  ;;  %v18334_v3 = vpop.f32.mrb[172].mxu0  ;;  %22182 = vmatprep.mubr.f32.mxu1 %v4133_v59  ;;  %v4202_v31 = vcombine.high %v394_v22, %v394_v22  ;;  %v4209_v36 = vrot.slane %v394_v22, %v35466_v25 }
 0x409   : > { %v18404_v4 = vpop.f32.mrb[172].mxu1  ;;  %34146 = vmatprep.subr.bf16.mxu1 %v34145_v60  ;;  %v18335_v8 = vadd.f32 %v18334_v3, %v18265_v56  ;;  %v18336_v9 = vpop.f32.mrb[173].mxu0  ;;  %v4182_v56 = vrot.slane %v4168_v46, %v35466_v25  ;;  %v939_v60 = vld [vmem:[%s35442_s22 + $0xeb8] sm:$0xff]  ;;  %v34165_v3 = vpack.c.bf16 %v1705_v55, %v937_v54 }
 0x40a   : > { %v18406_v10 = vpop.f32.mrb[173].mxu1  ;;  %v34169_v5 = vpack.c.bf16 %v1707_v61, %v939_v60  ;;  %v938_v9 = vld [vmem:[%s35442_s22 + $0xeb0] sm:$0xff]  ;;  %v1715_v46 = vld [vmem:[%s35442_s22 + $0x26f8] sm:$0x3] }
 0x40b   : > { %v18405_v16 = vadd.f32 %v18404_v4, %v18335_v8  ;;  %v4184_v4 = vcombine.high %v4182_v56, %v4182_v56  ;;  %v1704_v8 = vld [vmem:[%s35442_s22 + $0x26a0] sm:$0x3]  ;;  %v1706_v10 = vld [vmem:[%s35442_s22 + $0x26b0] sm:$0x3] }
 0x40c   : > { %v34171_v24 = vpack.c.bf16 %v1706_v10, %v938_v9 }
 0x40d   : > { %22113 = vmatmul.mubr.f32.vlgmr.msra.gmra.mrb[226].mxu0 %v4124_v42  ;;  %v4166_v42 = vcombine.high %v4158_v27, %v4158_v27 }
 0x40e   : > { %22183 = vmatmul.mubr.f32.vlgmr.msra.gmra.mrb[226].mxu1 %v4131_v47  ;;  %34144 = vmatpush1.bf16.xpose.msra.mxu0 %v34143_v14  ;;  %v932_v47 = vld [vmem:[%s35442_s22 + $0xe80] sm:$0xff]  ;;  %v941_v14 = vld [vmem:[%s35442_s22 + $0xec8] sm:$0xff] }
 0x40f   : > { %34148 = vmatpush1.bf16.xpose.msra.mxu1 %v34147_v15  ;;  %22252 = vmatprep.mubr.f32.mxu0 %v4149_v17  ;;  %v34159_v63 = vpack.c.bf16 %v1700_v48, %v932_v47  ;;  %v1709_v15 = vld [vmem:[%s35442_s22 + $0x26c8] sm:$0x3]  ;;  %v395_v47 = vld [vmem:[%s35435_s12 + $0x3b8] sm:$0xff] }
 0x410   : > { %34150 = vmatprep.subr.bf16.mxu0 %v34149_v18  ;;  %v18474_v28 = vpop.f32.mrb[174].mxu0  ;;  %22322 = vmatprep.mubr.f32.mxu1 %v4150_v19  ;;  %v4219_v55 = vcombine.high %v395_v47, %v395_v47  ;;  %v4226_v60 = vrot.slane %v395_v47, %v35466_v25 }
 0x411   : > { %v18544_v29 = vpop.f32.mrb[174].mxu1  ;;  %34154 = vmatprep.subr.bf16.mxu1 %v34153_v20  ;;  %v18475_v33 = vadd.f32 %v18474_v28, %v18405_v16  ;;  %v18476_v34 = vpop.f32.mrb[175].mxu0  ;;  %v4199_v16 = vrot.slane %v4185_v6, %v35466_v25  ;;  %v943_v20 = vld [vmem:[%s35442_s22 + $0xed8] sm:$0xff]  ;;  %v34173_v28 = vpack.c.bf16 %v1709_v15, %v941_v14 }
 0x412   : > { %v18546_v35 = vpop.f32.mrb[175].mxu1  ;;  %v34177_v30 = vpack.c.bf16 %v1711_v21, %v943_v20  ;;  %v942_v34 = vld [vmem:[%s35442_s22 + $0xed0] sm:$0xff]  ;;  %v1719_v6 = vld [vmem:[%s35442_s22 + $0x2718] sm:$0x3] }
 0x413   : > { %v18545_v41 = vadd.f32 %v18544_v29, %v18475_v33  ;;  %v4201_v29 = vcombine.high %v4199_v16, %v4199_v16  ;;  %v1708_v33 = vld [vmem:[%s35442_s22 + $0x26c0] sm:$0x3]  ;;  %v1710_v35 = vld [vmem:[%s35442_s22 + $0x26d0] sm:$0x3] }
 0x414   : > { %v34179_v49 = vpack.c.bf16 %v1710_v35, %v942_v34 }
 0x415   : > { %22253 = vmatmul.mubr.f32.vlgmr.msra.gmra.mrb[228].mxu0 %v4141_v2  ;;  %v4183_v2 = vcombine.high %v4175_v51, %v4175_v51 }
 0x416   : > { %22323 = vmatmul.mubr.f32.vlgmr.msra.gmra.mrb[228].mxu1 %v4148_v7  ;;  %34152 = vmatpush1.bf16.xpose.msra.mxu0 %v34151_v39  ;;  %v936_v7 = vld [vmem:[%s35442_s22 + $0xea0] sm:$0xff]  ;;  %v945_v39 = vld [vmem:[%s35442_s22 + $0xee8] sm:$0xff] }
 0x417   : > { %34156 = vmatpush1.bf16.xpose.msra.mxu1 %v34155_v40  ;;  %22392 = vmatprep.mubr.f32.mxu0 %v4166_v42  ;;  %v34167_v23 = vpack.c.bf16 %v1704_v8, %v936_v7  ;;  %v1713_v40 = vld [vmem:[%s35442_s22 + $0x26e8] sm:$0x3]  ;;  %v396_v7 = vld [vmem:[%s35435_s12 + $0x3c0] sm:$0xff] }
 0x418   : > { %34158 = vmatprep.subr.bf16.mxu0 %v34157_v43  ;;  %v18614_v52 = vpop.f32.mrb[176].mxu0  ;;  %22462 = vmatprep.mubr.f32.mxu1 %v4167_v44  ;;  %v4236_v15 = vcombine.high %v396_v7, %v396_v7  ;;  %v4243_v20 = vrot.slane %v396_v7, %v35466_v25 }
 0x419   : > { %v18684_v53 = vpop.f32.mrb[176].mxu1  ;;  %34162 = vmatprep.subr.bf16.mxu1 %v34161_v45  ;;  %v18615_v57 = vadd.f32 %v18614_v52, %v18545_v41  ;;  %v18616_v58 = vpop.f32.mrb[177].mxu0  ;;  %v4216_v41 = vrot.slane %v4202_v31, %v35466_v25  ;;  %v947_v45 = vld [vmem:[%s35442_s22 + $0xef8] sm:$0xff]  ;;  %v34181_v52 = vpack.c.bf16 %v1713_v40, %v945_v39 }
 0x41a   : > { %v18686_v59 = vpop.f32.mrb[177].mxu1  ;;  %v34185_v54 = vpack.c.bf16 %v1715_v46, %v947_v45  ;;  %v946_v58 = vld [vmem:[%s35442_s22 + $0xef0] sm:$0xff]  ;;  %v1723_v31 = vld [vmem:[%s35442_s22 + $0x2738] sm:$0x3] }
 0x41b   : > { %v18685_v1 = vadd.f32 %v18684_v53, %v18615_v57  ;;  %v4218_v53 = vcombine.high %v4216_v41, %v4216_v41  ;;  %v1712_v57 = vld [vmem:[%s35442_s22 + $0x26e0] sm:$0x3]  ;;  %v1714_v59 = vld [vmem:[%s35442_s22 + $0x26f0] sm:$0x3] }
 0x41c   : > { %v34187_v9 = vpack.c.bf16 %v1714_v59, %v946_v58 }
 0x41d   : > { %22393 = vmatmul.mubr.f32.vlgmr.msra.gmra.mrb[230].mxu0 %v4158_v27  ;;  %v4200_v27 = vcombine.high %v4192_v11, %v4192_v11 }
 0x41e   : > { %22463 = vmatmul.mubr.f32.vlgmr.msra.gmra.mrb[230].mxu1 %v4165_v32  ;;  %34160 = vmatpush1.bf16.xpose.msra.mxu0 %v34159_v63  ;;  %v940_v32 = vld [vmem:[%s35442_s22 + $0xec0] sm:$0xff]  ;;  %v949_v63 = vld [vmem:[%s35442_s22 + $0xf08] sm:$0xff] }
 0x41f   : > { %34164 = vmatpush1.bf16.xpose.msra.mxu1 %v34163_v0  ;;  %22532 = vmatprep.mubr.f32.mxu0 %v4183_v2  ;;  %v34175_v48 = vpack.c.bf16 %v1708_v33, %v940_v32  ;;  %v1717_v0 = vld [vmem:[%s35442_s22 + $0x2708] sm:$0x3] }
 0x420   : > { %34166 = vmatprep.subr.bf16.mxu0 %v34165_v3  ;;  %v18754_v12 = vpop.f32.mrb[178].mxu0  ;;  %22602 = vmatprep.mubr.f32.mxu1 %v4184_v4  ;;  %v397_v32 = vld [vmem:[%s35435_s12 + $0x3c8] sm:$0xff] }
 0x421   : > { %v18824_v13 = vpop.f32.mrb[178].mxu1  ;;  %34170 = vmatprep.subr.bf16.mxu1 %v34169_v5  ;;  %v18755_v17 = vadd.f32 %v18754_v12, %v18685_v1  ;;  %v18756_v18 = vpop.f32.mrb[179].mxu0  ;;  %v4233_v1 = vrot.slane %v4219_v55, %v35466_v25  ;;  %v951_v5 = vld [vmem:[%s35442_s22 + $0xf18] sm:$0xff]  ;;  %v34189_v12 = vpack.c.bf16 %v1717_v0, %v949_v63  ;;  %v4253_v40 = vcombine.high %v397_v32, %v397_v32 }
 0x422   : > { %v18826_v19 = vpop.f32.mrb[179].mxu1  ;;  %v34193_v14 = vpack.c.bf16 %v1719_v6, %v951_v5  ;;  %v950_v18 = vld [vmem:[%s35442_s22 + $0xf10] sm:$0xff]  ;;  %v4260_v45 = vrot.slane %v397_v32, %v35466_v25  ;;  %v1727_v55 = vld [vmem:[%s35442_s22 + $0x2758] sm:$0x3] }
 0x423   : > { %v18825_v26 = vadd.f32 %v18824_v13, %v18755_v17  ;;  %v4235_v13 = vcombine.high %v4233_v1, %v4233_v1  ;;  %v1716_v17 = vld [vmem:[%s35442_s22 + $0x2700] sm:$0x3]  ;;  %v1718_v19 = vld [vmem:[%s35442_s22 + $0x2710] sm:$0x3] }
 0x424   : > { %v34195_v34 = vpack.c.bf16 %v1718_v19, %v950_v18 }
 0x425   : > { %22533 = vmatmul.mubr.f32.vlgmr.msra.gmra.mrb[232].mxu0 %v4175_v51  ;;  %v4217_v51 = vcombine.high %v4209_v36, %v4209_v36 }
 0x426   : > { %22603 = vmatmul.mubr.f32.vlgmr.msra.gmra.mrb[232].mxu1 %v4182_v56  ;;  %34168 = vmatpush1.bf16.xpose.msra.mxu0 %v34167_v23  ;;  %v944_v56 = vld [vmem:[%s35442_s22 + $0xee0] sm:$0xff]  ;;  %v953_v23 = vld [vmem:[%s35442_s22 + $0xf28] sm:$0xff] }
 0x427   : > { %34172 = vmatpush1.bf16.xpose.msra.mxu1 %v34171_v24  ;;  %22672 = vmatprep.mubr.f32.mxu0 %v4200_v27  ;;  %v34183_v8 = vpack.c.bf16 %v1712_v57, %v944_v56  ;;  %v1721_v24 = vld [vmem:[%s35442_s22 + $0x2728] sm:$0x3]  ;;  %v398_v56 = vld [vmem:[%s35435_s12 + $0x3d0] sm:$0xff] }
 0x428   : > { %34174 = vmatprep.subr.bf16.mxu0 %v34173_v28  ;;  %v18894_v37 = vpop.f32.mrb[180].mxu0  ;;  %22742 = vmatprep.mubr.f32.mxu1 %v4201_v29  ;;  %v4270_v0 = vcombine.high %v398_v56, %v398_v56  ;;  %v4277_v5 = vrot.slane %v398_v56, %v35466_v25 }
 0x429   : > { %v18964_v38 = vpop.f32.mrb[180].mxu1  ;;  %34178 = vmatprep.subr.bf16.mxu1 %v34177_v30  ;;  %v18895_v42 = vadd.f32 %v18894_v37, %v18825_v26  ;;  %v18896_v43 = vpop.f32.mrb[181].mxu0  ;;  %v4250_v26 = vrot.slane %v4236_v15, %v35466_v25  ;;  %v955_v30 = vld [vmem:[%s35442_s22 + $0xf38] sm:$0xff]  ;;  %v34197_v37 = vpack.c.bf16 %v1721_v24, %v953_v23 }
 0x42a   : > { %v18966_v44 = vpop.f32.mrb[181].mxu1  ;;  %v34201_v39 = vpack.c.bf16 %v1723_v31, %v955_v30  ;;  %v954_v43 = vld [vmem:[%s35442_s22 + $0xf30] sm:$0xff]  ;;  %v1731_v15 = vld [vmem:[%s35442_s22 + $0x2778] sm:$0x3] }
 0x42b   : > { %v18965_v50 = vadd.f32 %v18964_v38, %v18895_v42  ;;  %v4252_v38 = vcombine.high %v4250_v26, %v4250_v26  ;;  %v1720_v42 = vld [vmem:[%s35442_s22 + $0x2720] sm:$0x3]  ;;  %v1722_v44 = vld [vmem:[%s35442_s22 + $0x2730] sm:$0x3] }
 0x42c   : > { %v34203_v58 = vpack.c.bf16 %v1722_v44, %v954_v43 }
 0x42d   : > { %22673 = vmatmul.mubr.f32.vlgmr.msra.gmra.mrb[234].mxu0 %v4192_v11  ;;  %v4234_v11 = vcombine.high %v4226_v60, %v4226_v60 }
 0x42e   : > { %22743 = vmatmul.mubr.f32.vlgmr.msra.gmra.mrb[234].mxu1 %v4199_v16  ;;  %34176 = vmatpush1.bf16.xpose.msra.mxu0 %v34175_v48  ;;  %v948_v16 = vld [vmem:[%s35442_s22 + $0xf00] sm:$0xff]  ;;  %v957_v48 = vld [vmem:[%s35442_s22 + $0xf48] sm:$0xff] }
 0x42f   : > { %34180 = vmatpush1.bf16.xpose.msra.mxu1 %v34179_v49  ;;  %22812 = vmatprep.mubr.f32.mxu0 %v4217_v51  ;;  %v34191_v33 = vpack.c.bf16 %v1716_v17, %v948_v16  ;;  %v1725_v49 = vld [vmem:[%s35442_s22 + $0x2748] sm:$0x3]  ;;  %v399_v16 = vld [vmem:[%s35435_s12 + $0x3d8] sm:$0xff] }
 0x430   : > { %34182 = vmatprep.subr.bf16.mxu0 %v34181_v52  ;;  %v19034_v61 = vpop.f32.mrb[182].mxu0  ;;  %22882 = vmatprep.mubr.f32.mxu1 %v4218_v53  ;;  %v4287_v24 = vcombine.high %v399_v16, %v399_v16  ;;  %v4294_v30 = vrot.slane %v399_v16, %v35466_v25 }
 0x431   : > { %v19104_v62 = vpop.f32.mrb[182].mxu1  ;;  %34186 = vmatprep.subr.bf16.mxu1 %v34185_v54  ;;  %v19035_v2 = vadd.f32 %v19034_v61, %v18965_v50  ;;  %v19036_v3 = vpop.f32.mrb[183].mxu0  ;;  %v4267_v50 = vrot.slane %v4253_v40, %v35466_v25  ;;  %v959_v54 = vld [vmem:[%s35442_s22 + $0xf58] sm:$0xff]  ;;  %v34205_v61 = vpack.c.bf16 %v1725_v49, %v957_v48 }
 0x432   : > { %v19106_v4 = vpop.f32.mrb[183].mxu1  ;;  %v34209_v63 = vpack.c.bf16 %v1727_v55, %v959_v54  ;;  %v958_v3 = vld [vmem:[%s35442_s22 + $0xf50] sm:$0xff]  ;;  %v1735_v40 = vld [vmem:[%s35442_s22 + $0x2798] sm:$0x3] }
 0x433   : > { %v19105_v10 = vadd.f32 %v19104_v62, %v19035_v2  ;;  %v4269_v62 = vcombine.high %v4267_v50, %v4267_v50  ;;  %v1724_v2 = vld [vmem:[%s35442_s22 + $0x2740] sm:$0x3]  ;;  %v1726_v4 = vld [vmem:[%s35442_s22 + $0x2750] sm:$0x3] }
 0x434   : > { %v34211_v18 = vpack.c.bf16 %v1726_v4, %v958_v3 }
 0x435   : > { %22813 = vmatmul.mubr.f32.vlgmr.msra.gmra.mrb[236].mxu0 %v4209_v36  ;;  %v4251_v36 = vcombine.high %v4243_v20, %v4243_v20 }
 0x436   : > { %22883 = vmatmul.mubr.f32.vlgmr.msra.gmra.mrb[236].mxu1 %v4216_v41  ;;  %34184 = vmatpush1.bf16.xpose.msra.mxu0 %v34183_v8  ;;  %v952_v41 = vld [vmem:[%s35442_s22 + $0xf20] sm:$0xff]  ;;  %v961_v8 = vld [vmem:[%s35442_s22 + $0xf68] sm:$0xff] }
 0x437   : > { %34188 = vmatpush1.bf16.xpose.msra.mxu1 %v34187_v9  ;;  %22952 = vmatprep.mubr.f32.mxu0 %v4234_v11  ;;  %v34199_v57 = vpack.c.bf16 %v1720_v42, %v952_v41  ;;  %v1729_v9 = vld [vmem:[%s35442_s22 + $0x2768] sm:$0x3]  ;;  %v400_v41 = vld [vmem:[%s35435_s12 + $0x3e0] sm:$0xff] }
 0x438   : > { %34190 = vmatprep.subr.bf16.mxu0 %v34189_v12  ;;  %v19174_v21 = vpop.f32.mrb[184].mxu0  ;;  %23022 = vmatprep.mubr.f32.mxu1 %v4235_v13  ;;  %v4304_v49 = vcombine.high %v400_v41, %v400_v41  ;;  %v4311_v54 = vrot.slane %v400_v41, %v35466_v25 }
 0x439   : > { %v19244_v22 = vpop.f32.mrb[184].mxu1  ;;  %34194 = vmatprep.subr.bf16.mxu1 %v34193_v14  ;;  %v19175_v27 = vadd.f32 %v19174_v21, %v19105_v10  ;;  %v19176_v28 = vpop.f32.mrb[185].mxu0  ;;  %v4284_v10 = vrot.slane %v4270_v0, %v35466_v25  ;;  %v963_v14 = vld [vmem:[%s35442_s22 + $0xf78] sm:$0xff]  ;;  %v34213_v21 = vpack.c.bf16 %v1729_v9, %v961_v8 }
 0x43a   : > { %v19246_v29 = vpop.f32.mrb[185].mxu1  ;;  %v34217_v23 = vpack.c.bf16 %v1731_v15, %v963_v14  ;;  %v962_v28 = vld [vmem:[%s35442_s22 + $0xf70] sm:$0xff]  ;;  %v1739_v0 = vld [vmem:[%s35442_s22 + $0x27b8] sm:$0x3] }
 0x43b   : > { %v19245_v35 = vadd.f32 %v19244_v22, %v19175_v27  ;;  %v4286_v22 = vcombine.high %v4284_v10, %v4284_v10  ;;  %v1728_v27 = vld [vmem:[%s35442_s22 + $0x2760] sm:$0x3]  ;;  %v1730_v29 = vld [vmem:[%s35442_s22 + $0x2770] sm:$0x3] }
 0x43c   : > { %v34219_v43 = vpack.c.bf16 %v1730_v29, %v962_v28 }
 0x43d   : > { %22953 = vmatmul.mubr.f32.vlgmr.msra.gmra.mrb[238].mxu0 %v4226_v60  ;;  %v4268_v60 = vcombine.high %v4260_v45, %v4260_v45 }
 0x43e   : > { %23023 = vmatmul.mubr.f32.vlgmr.msra.gmra.mrb[238].mxu1 %v4233_v1  ;;  %34192 = vmatpush1.bf16.xpose.msra.mxu0 %v34191_v33  ;;  %v956_v1 = vld [vmem:[%s35442_s22 + $0xf40] sm:$0xff]  ;;  %v965_v33 = vld [vmem:[%s35442_s22 + $0xf88] sm:$0xff] }
 0x43f   : > { %34196 = vmatpush1.bf16.xpose.msra.mxu1 %v34195_v34  ;;  %23092 = vmatprep.mubr.f32.mxu0 %v4251_v36  ;;  %v34207_v17 = vpack.c.bf16 %v1724_v2, %v956_v1  ;;  %v1733_v34 = vld [vmem:[%s35442_s22 + $0x2788] sm:$0x3] }
 0x440   : > { %34198 = vmatprep.subr.bf16.mxu0 %v34197_v37  ;;  %v19314_v46 = vpop.f32.mrb[186].mxu0  ;;  %23162 = vmatprep.mubr.f32.mxu1 %v4252_v38  ;;  %v401_v1 = vld [vmem:[%s35435_s12 + $0x3e8] sm:$0xff] }
 0x441   : > { %v19384_v47 = vpop.f32.mrb[186].mxu1  ;;  %34202 = vmatprep.subr.bf16.mxu1 %v34201_v39  ;;  %v19315_v51 = vadd.f32 %v19314_v46, %v19245_v35  ;;  %v19316_v52 = vpop.f32.mrb[187].mxu0  ;;  %v4301_v35 = vrot.slane %v4287_v24, %v35466_v25  ;;  %v967_v39 = vld [vmem:[%s35442_s22 + $0xf98] sm:$0xff]  ;;  %v34221_v46 = vpack.c.bf16 %v1733_v34, %v965_v33  ;;  %v4321_v9 = vcombine.high %v401_v1, %v401_v1 }
 0x442   : > { %v19386_v53 = vpop.f32.mrb[187].mxu1  ;;  %v34225_v48 = vpack.c.bf16 %v1735_v40, %v967_v39  ;;  %v966_v52 = vld [vmem:[%s35442_s22 + $0xf90] sm:$0xff]  ;;  %v4328_v14 = vrot.slane %v401_v1, %v35466_v25  ;;  %v1743_v24 = vld [vmem:[%s35442_s22 + $0x27d8] sm:$0x3] }
 0x443   : > { %v19385_v59 = vadd.f32 %v19384_v47, %v19315_v51  ;;  %v4303_v47 = vcombine.high %v4301_v35, %v4301_v35  ;;  %v1732_v51 = vld [vmem:[%s35442_s22 + $0x2780] sm:$0x3]  ;;  %v1734_v53 = vld [vmem:[%s35442_s22 + $0x2790] sm:$0x3] }
 0x444   : > { %v34227_v3 = vpack.c.bf16 %v1734_v53, %v966_v52 }
 0x445   : > { %23093 = vmatmul.mubr.f32.vlgmr.msra.gmra.mrb[240].mxu0 %v4243_v20  ;;  %v4285_v20 = vcombine.high %v4277_v5, %v4277_v5 }
 0x446   : > { %23163 = vmatmul.mubr.f32.vlgmr.msra.gmra.mrb[240].mxu1 %v4250_v26  ;;  %34200 = vmatpush1.bf16.xpose.msra.mxu0 %v34199_v57  ;;  %v960_v26 = vld [vmem:[%s35442_s22 + $0xf60] sm:$0xff]  ;;  %v969_v57 = vld [vmem:[%s35442_s22 + $0xfa8] sm:$0xff] }
 0x447   : > { %34204 = vmatpush1.bf16.xpose.msra.mxu1 %v34203_v58  ;;  %23232 = vmatprep.mubr.f32.mxu0 %v4268_v60  ;;  %v34215_v42 = vpack.c.bf16 %v1728_v27, %v960_v26  ;;  %v1737_v58 = vld [vmem:[%s35442_s22 + $0x27a8] sm:$0x3]  ;;  %v402_v26 = vld [vmem:[%s35435_s12 + $0x3f0] sm:$0xff] }
 0x448   : > { %34206 = vmatprep.subr.bf16.mxu0 %v34205_v61  ;;  %v19454_v6 = vpop.f32.mrb[188].mxu0  ;;  %23302 = vmatprep.mubr.f32.mxu1 %v4269_v62  ;;  %v4338_v34 = vcombine.high %v402_v26, %v402_v26  ;;  %v4345_v39 = vrot.slane %v402_v26, %v35466_v25 }
 0x449   : > { %v19524_v7 = vpop.f32.mrb[188].mxu1  ;;  %34210 = vmatprep.subr.bf16.mxu1 %v34209_v63  ;;  %v19455_v11 = vadd.f32 %v19454_v6, %v19385_v59  ;;  %v19456_v12 = vpop.f32.mrb[189].mxu0  ;;  %v4318_v59 = vrot.slane %v4304_v49, %v35466_v25  ;;  %v971_v63 = vld [vmem:[%s35442_s22 + $0xfb8] sm:$0xff]  ;;  %v34229_v6 = vpack.c.bf16 %v1737_v58, %v969_v57 }
 0x44a   : > { %v19526_v13 = vpop.f32.mrb[189].mxu1  ;;  %v34233_v8 = vpack.c.bf16 %v1739_v0, %v971_v63  ;;  %v970_v12 = vld [vmem:[%s35442_s22 + $0xfb0] sm:$0xff]  ;;  %v1747_v49 = vld [vmem:[%s35442_s22 + $0x27f8] sm:$0x3] }
 0x44b   : > { %v19525_v19 = vadd.f32 %v19524_v7, %v19455_v11  ;;  %v4320_v7 = vcombine.high %v4318_v59, %v4318_v59  ;;  %v1736_v11 = vld [vmem:[%s35442_s22 + $0x27a0] sm:$0x3]  ;;  %v1738_v13 = vld [vmem:[%s35442_s22 + $0x27b0] sm:$0x3] }
 0x44c   : > { %v34235_v28 = vpack.c.bf16 %v1738_v13, %v970_v12 }
 0x44d   : > { %23233 = vmatmul.mubr.f32.vlgmr.msra.gmra.mrb[242].mxu0 %v4260_v45  ;;  %v4302_v45 = vcombine.high %v4294_v30, %v4294_v30 }
 0x44e   : > { %23303 = vmatmul.mubr.f32.vlgmr.msra.gmra.mrb[242].mxu1 %v4267_v50  ;;  %34208 = vmatpush1.bf16.xpose.msra.mxu0 %v34207_v17  ;;  %v964_v50 = vld [vmem:[%s35442_s22 + $0xf80] sm:$0xff]  ;;  %v973_v17 = vld [vmem:[%s35442_s22 + $0xfc8] sm:$0xff] }
 0x44f   : > { %34212 = vmatpush1.bf16.xpose.msra.mxu1 %v34211_v18  ;;  %23372 = vmatprep.mubr.f32.mxu0 %v4285_v20  ;;  %v34223_v2 = vpack.c.bf16 %v1732_v51, %v964_v50  ;;  %v1741_v18 = vld [vmem:[%s35442_s22 + $0x27c8] sm:$0x3]  ;;  %v403_v50 = vld [vmem:[%s35435_s12 + $0x3f8] sm:$0xff] }
 0x450   : > { %34214 = vmatprep.subr.bf16.mxu0 %v34213_v21  ;;  %v19594_v31 = vpop.f32.mrb[190].mxu0  ;;  %23442 = vmatprep.mubr.f32.mxu1 %v4286_v22  ;;  %v4355_v58 = vcombine.high %v403_v50, %v403_v50  ;;  %v4362_v63 = vrot.slane %v403_v50, %v35466_v25 }
 0x451   : > { %v19664_v32 = vpop.f32.mrb[190].mxu1  ;;  %34218 = vmatprep.subr.bf16.mxu1 %v34217_v23  ;;  %v19595_v36 = vadd.f32 %v19594_v31, %v19525_v19  ;;  %v19596_v37 = vpop.f32.mrb[191].mxu0  ;;  %v4335_v19 = vrot.slane %v4321_v9, %v35466_v25  ;;  %v975_v23 = vld [vmem:[%s35442_s22 + $0xfd8] sm:$0xff]  ;;  %v34237_v31 = vpack.c.bf16 %v1741_v18, %v973_v17 }
 0x452   : > { %v19666_v38 = vpop.f32.mrb[191].mxu1  ;;  %v34241_v33 = vpack.c.bf16 %v1743_v24, %v975_v23  ;;  %v974_v37 = vld [vmem:[%s35442_s22 + $0xfd0] sm:$0xff]  ;;  %v1751_v9 = vld [vmem:[%s35442_s22 + $0x2818] sm:$0x3] }
 0x453   : > { %v19665_v44 = vadd.f32 %v19664_v32, %v19595_v36  ;;  %v4337_v32 = vcombine.high %v4335_v19, %v4335_v19  ;;  %v1740_v36 = vld [vmem:[%s35442_s22 + $0x27c0] sm:$0x3]  ;;  %v1742_v38 = vld [vmem:[%s35442_s22 + $0x27d0] sm:$0x3] }
 0x454   : > { %v34243_v52 = vpack.c.bf16 %v1742_v38, %v974_v37 }
 0x455   : > { %23373 = vmatmul.mubr.f32.vlgmr.msra.gmra.mrb[244].mxu0 %v4277_v5  ;;  %v4319_v5 = vcombine.high %v4311_v54, %v4311_v54 }
 0x456   : > { %23443 = vmatmul.mubr.f32.vlgmr.msra.gmra.mrb[244].mxu1 %v4284_v10  ;;  %34216 = vmatpush1.bf16.xpose.msra.mxu0 %v34215_v42  ;;  %v968_v10 = vld [vmem:[%s35442_s22 + $0xfa0] sm:$0xff]  ;;  %v977_v42 = vld [vmem:[%s35442_s22 + $0xfe8] sm:$0xff] }
 0x457   : > { %34220 = vmatpush1.bf16.xpose.msra.mxu1 %v34219_v43  ;;  %23512 = vmatprep.mubr.f32.mxu0 %v4302_v45  ;;  %v34231_v27 = vpack.c.bf16 %v1736_v11, %v968_v10  ;;  %v1745_v43 = vld [vmem:[%s35442_s22 + $0x27e8] sm:$0x3]  ;;  %v404_v10 = vld [vmem:[%s35435_s12 + $0x400] sm:$0xff] }
 0x458   : > { %34222 = vmatprep.subr.bf16.mxu0 %v34221_v46  ;;  %v19734_v55 = vpop.f32.mrb[192].mxu0  ;;  %23582 = vmatprep.mubr.f32.mxu1 %v4303_v47  ;;  %v4372_v18 = vcombine.high %v404_v10, %v404_v10  ;;  %v4379_v23 = vrot.slane %v404_v10, %v35466_v25 }
 0x459   : > { %v19804_v56 = vpop.f32.mrb[192].mxu1  ;;  %34226 = vmatprep.subr.bf16.mxu1 %v34225_v48  ;;  %v19735_v60 = vadd.f32 %v19734_v55, %v19665_v44  ;;  %v19736_v61 = vpop.f32.mrb[193].mxu0  ;;  %v4352_v44 = vrot.slane %v4338_v34, %v35466_v25  ;;  %v979_v48 = vld [vmem:[%s35442_s22 + $0xff8] sm:$0xff]  ;;  %v34245_v55 = vpack.c.bf16 %v1745_v43, %v977_v42 }
 0x45a   : > { %v19806_v62 = vpop.f32.mrb[193].mxu1  ;;  %v34249_v57 = vpack.c.bf16 %v1747_v49, %v979_v48  ;;  %v978_v61 = vld [vmem:[%s35442_s22 + $0xff0] sm:$0xff]  ;;  %v1755_v34 = vld [vmem:[%s35442_s22 + $0x2838] sm:$0x3] }
 0x45b   : > { %v19805_v4 = vadd.f32 %v19804_v56, %v19735_v60  ;;  %v4354_v56 = vcombine.high %v4352_v44, %v4352_v44  ;;  %v1744_v60 = vld [vmem:[%s35442_s22 + $0x27e0] sm:$0x3]  ;;  %v1746_v62 = vld [vmem:[%s35442_s22 + $0x27f0] sm:$0x3] }
 0x45c   : > { %v34251_v12 = vpack.c.bf16 %v1746_v62, %v978_v61 }
 0x45d   : > { %23513 = vmatmul.mubr.f32.vlgmr.msra.gmra.mrb[246].mxu0 %v4294_v30  ;;  %v4336_v30 = vcombine.high %v4328_v14, %v4328_v14 }
 0x45e   : > { %23583 = vmatmul.mubr.f32.vlgmr.msra.gmra.mrb[246].mxu1 %v4301_v35  ;;  %34224 = vmatpush1.bf16.xpose.msra.mxu0 %v34223_v2  ;;  %v972_v35 = vld [vmem:[%s35442_s22 + $0xfc0] sm:$0xff]  ;;  %v981_v2 = vld [vmem:[%s35442_s22 + $0x1008] sm:$0xff] }
 0x45f   : > { %34228 = vmatpush1.bf16.xpose.msra.mxu1 %v34227_v3  ;;  %23652 = vmatprep.mubr.f32.mxu0 %v4319_v5  ;;  %v34239_v51 = vpack.c.bf16 %v1740_v36, %v972_v35  ;;  %v1749_v3 = vld [vmem:[%s35442_s22 + $0x2808] sm:$0x3] }
 0x460   : > { %34230 = vmatprep.subr.bf16.mxu0 %v34229_v6  ;;  %v19874_v15 = vpop.f32.mrb[194].mxu0  ;;  %23722 = vmatprep.mubr.f32.mxu1 %v4320_v7  ;;  %v405_v35 = vld [vmem:[%s35435_s12 + $0x408] sm:$0xff] }
 0x461   : > { %v19944_v16 = vpop.f32.mrb[194].mxu1  ;;  %34234 = vmatprep.subr.bf16.mxu1 %v34233_v8  ;;  %v19875_v20 = vadd.f32 %v19874_v15, %v19805_v4  ;;  %v19876_v21 = vpop.f32.mrb[195].mxu0  ;;  %v4369_v4 = vrot.slane %v4355_v58, %v35466_v25  ;;  %v983_v8 = vld [vmem:[%s35442_s22 + $0x1018] sm:$0xff]  ;;  %v34253_v15 = vpack.c.bf16 %v1749_v3, %v981_v2  ;;  %v4389_v43 = vcombine.high %v405_v35, %v405_v35 }
 0x462   : > { %v19946_v22 = vpop.f32.mrb[195].mxu1  ;;  %v34257_v17 = vpack.c.bf16 %v1751_v9, %v983_v8  ;;  %v982_v21 = vld [vmem:[%s35442_s22 + $0x1010] sm:$0xff]  ;;  %v4396_v48 = vrot.slane %v405_v35, %v35466_v25  ;;  %v1759_v58 = vld [vmem:[%s35442_s22 + $0x2858] sm:$0x3] }
 0x463   : > { %v19945_v29 = vadd.f32 %v19944_v16, %v19875_v20  ;;  %v4371_v16 = vcombine.high %v4369_v4, %v4369_v4  ;;  %v1748_v20 = vld [vmem:[%s35442_s22 + $0x2800] sm:$0x3]  ;;  %v1750_v22 = vld [vmem:[%s35442_s22 + $0x2810] sm:$0x3] }
 0x464   : > { %v34259_v37 = vpack.c.bf16 %v1750_v22, %v982_v21 }
 0x465   : > { %23653 = vmatmul.mubr.f32.vlgmr.msra.gmra.mrb[248].mxu0 %v4311_v54  ;;  %v4353_v54 = vcombine.high %v4345_v39, %v4345_v39 }
 0x466   : > { %23723 = vmatmul.mubr.f32.vlgmr.msra.gmra.mrb[248].mxu1 %v4318_v59  ;;  %34232 = vmatpush1.bf16.xpose.msra.mxu0 %v34231_v27  ;;  %v976_v59 = vld [vmem:[%s35442_s22 + $0xfe0] sm:$0xff]  ;;  %v985_v27 = vld [vmem:[%s35442_s22 + $0x1028] sm:$0xff] }
 0x467   : > { %34236 = vmatpush1.bf16.xpose.msra.mxu1 %v34235_v28  ;;  %23792 = vmatprep.mubr.f32.mxu0 %v4336_v30  ;;  %v34247_v11 = vpack.c.bf16 %v1744_v60, %v976_v59  ;;  %v1753_v28 = vld [vmem:[%s35442_s22 + $0x2828] sm:$0x3]  ;;  %v406_v59 = vld [vmem:[%s35435_s12 + $0x410] sm:$0xff] }
 0x468   : > { %34238 = vmatprep.subr.bf16.mxu0 %v34237_v31  ;;  %v20014_v40 = vpop.f32.mrb[196].mxu0  ;;  %23862 = vmatprep.mubr.f32.mxu1 %v4337_v32  ;;  %v4406_v3 = vcombine.high %v406_v59, %v406_v59  ;;  %v4413_v8 = vrot.slane %v406_v59, %v35466_v25 }
 0x469   : > { %v20084_v41 = vpop.f32.mrb[196].mxu1  ;;  %34242 = vmatprep.subr.bf16.mxu1 %v34241_v33  ;;  %v20015_v45 = vadd.f32 %v20014_v40, %v19945_v29  ;;  %v20016_v46 = vpop.f32.mrb[197].mxu0  ;;  %v4386_v29 = vrot.slane %v4372_v18, %v35466_v25  ;;  %v987_v33 = vld [vmem:[%s35442_s22 + $0x1038] sm:$0xff]  ;;  %v34261_v40 = vpack.c.bf16 %v1753_v28, %v985_v27 }
 0x46a   : > { %v20086_v47 = vpop.f32.mrb[197].mxu1  ;;  %v34265_v42 = vpack.c.bf16 %v1755_v34, %v987_v33  ;;  %v986_v46 = vld [vmem:[%s35442_s22 + $0x1030] sm:$0xff]  ;;  %v1763_v18 = vld [vmem:[%s35442_s22 + $0x2878] sm:$0x3] }
 0x46b   : > { %v20085_v53 = vadd.f32 %v20084_v41, %v20015_v45  ;;  %v4388_v41 = vcombine.high %v4386_v29, %v4386_v29  ;;  %v1752_v45 = vld [vmem:[%s35442_s22 + $0x2820] sm:$0x3]  ;;  %v1754_v47 = vld [vmem:[%s35442_s22 + $0x2830] sm:$0x3] }
 0x46c   : > { %v34267_v61 = vpack.c.bf16 %v1754_v47, %v986_v46 }
 0x46d   : > { %23793 = vmatmul.mubr.f32.vlgmr.msra.gmra.mrb[250].mxu0 %v4328_v14  ;;  %v4370_v14 = vcombine.high %v4362_v63, %v4362_v63 }
 0x46e   : > { %23863 = vmatmul.mubr.f32.vlgmr.msra.gmra.mrb[250].mxu1 %v4335_v19  ;;  %34240 = vmatpush1.bf16.xpose.msra.mxu0 %v34239_v51  ;;  %v980_v19 = vld [vmem:[%s35442_s22 + $0x1000] sm:$0xff]  ;;  %v989_v51 = vld [vmem:[%s35442_s22 + $0x1048] sm:$0xff] }
 0x46f   : > { %34244 = vmatpush1.bf16.xpose.msra.mxu1 %v34243_v52  ;;  %23932 = vmatprep.mubr.f32.mxu0 %v4353_v54  ;;  %v34255_v36 = vpack.c.bf16 %v1748_v20, %v980_v19  ;;  %v1757_v52 = vld [vmem:[%s35442_s22 + $0x2848] sm:$0x3]  ;;  %v407_v19 = vld [vmem:[%s35435_s12 + $0x418] sm:$0xff] }
 0x470   : > { %34246 = vmatprep.subr.bf16.mxu0 %v34245_v55  ;;  %v20154_v0 = vpop.f32.mrb[198].mxu0  ;;  %24002 = vmatprep.mubr.f32.mxu1 %v4354_v56  ;;  %v4423_v28 = vcombine.high %v407_v19, %v407_v19  ;;  %v4430_v33 = vrot.slane %v407_v19, %v35466_v25 }
 0x471   : > { %v20224_v1 = vpop.f32.mrb[198].mxu1  ;;  %34250 = vmatprep.subr.bf16.mxu1 %v34249_v57  ;;  %v20155_v5 = vadd.f32 %v20154_v0, %v20085_v53  ;;  %v20156_v6 = vpop.f32.mrb[199].mxu0  ;;  %v4403_v53 = vrot.slane %v4389_v43, %v35466_v25  ;;  %v991_v57 = vld [vmem:[%s35442_s22 + $0x1058] sm:$0xff]  ;;  %v34269_v0 = vpack.c.bf16 %v1757_v52, %v989_v51 }
 0x472   : > { %v20226_v7 = vpop.f32.mrb[199].mxu1  ;;  %v34273_v2 = vpack.c.bf16 %v1759_v58, %v991_v57  ;;  %v990_v6 = vld [vmem:[%s35442_s22 + $0x1050] sm:$0xff]  ;;  %v1767_v43 = vld [vmem:[%s35442_s22 + $0x2898] sm:$0x3] }
 0x473   : > { %v20225_v13 = vadd.f32 %v20224_v1, %v20155_v5  ;;  %v4405_v1 = vcombine.high %v4403_v53, %v4403_v53  ;;  %v1756_v5 = vld [vmem:[%s35442_s22 + $0x2840] sm:$0x3]  ;;  %v1758_v7 = vld [vmem:[%s35442_s22 + $0x2850] sm:$0x3] }
 0x474   : > { %v34275_v21 = vpack.c.bf16 %v1758_v7, %v990_v6 }
 0x475   : > { %23933 = vmatmul.mubr.f32.vlgmr.msra.gmra.mrb[252].mxu0 %v4345_v39  ;;  %v4387_v39 = vcombine.high %v4379_v23, %v4379_v23 }
 0x476   : > { %24003 = vmatmul.mubr.f32.vlgmr.msra.gmra.mrb[252].mxu1 %v4352_v44  ;;  %34248 = vmatpush1.bf16.xpose.msra.mxu0 %v34247_v11  ;;  %v984_v44 = vld [vmem:[%s35442_s22 + $0x1020] sm:$0xff]  ;;  %v993_v11 = vld [vmem:[%s35442_s22 + $0x1068] sm:$0xff] }
 0x477   : > { %34252 = vmatpush1.bf16.xpose.msra.mxu1 %v34251_v12  ;;  %24072 = vmatprep.mubr.f32.mxu0 %v4370_v14  ;;  %v34263_v60 = vpack.c.bf16 %v1752_v45, %v984_v44  ;;  %v1761_v12 = vld [vmem:[%s35442_s22 + $0x2868] sm:$0x3]  ;;  %v408_v44 = vld [vmem:[%s35435_s12 + $0x420] sm:$0xff] }
 0x478   : > { %34254 = vmatprep.subr.bf16.mxu0 %v34253_v15  ;;  %v20294_v24 = vpop.f32.mrb[200].mxu0  ;;  %24142 = vmatprep.mubr.f32.mxu1 %v4371_v16  ;;  %v4440_v52 = vcombine.high %v408_v44, %v408_v44  ;;  %v4447_v57 = vrot.slane %v408_v44, %v35466_v25 }
 0x479   : > { %v20364_v26 = vpop.f32.mrb[200].mxu1  ;;  %34258 = vmatprep.subr.bf16.mxu1 %v34257_v17  ;;  %v20295_v30 = vadd.f32 %v20294_v24, %v20225_v13  ;;  %v20296_v31 = vpop.f32.mrb[201].mxu0  ;;  %v4420_v13 = vrot.slane %v4406_v3, %v35466_v25  ;;  %v995_v17 = vld [vmem:[%s35442_s22 + $0x1078] sm:$0xff]  ;;  %v34277_v24 = vpack.c.bf16 %v1761_v12, %v993_v11 }
 0x47a   : > { %v20366_v32 = vpop.f32.mrb[201].mxu1  ;;  %v34281_v27 = vpack.c.bf16 %v1763_v18, %v995_v17  ;;  %v994_v31 = vld [vmem:[%s35442_s22 + $0x1070] sm:$0xff]  ;;  %v1771_v3 = vld [vmem:[%s35442_s22 + $0x28b8] sm:$0x3] }
 0x47b   : > { %v20365_v38 = vadd.f32 %v20364_v26, %v20295_v30  ;;  %v4422_v26 = vcombine.high %v4420_v13, %v4420_v13  ;;  %v1760_v30 = vld [vmem:[%s35442_s22 + $0x2860] sm:$0x3]  ;;  %v1762_v32 = vld [vmem:[%s35442_s22 + $0x2870] sm:$0x3] }
 0x47c   : > { %v34283_v46 = vpack.c.bf16 %v1762_v32, %v994_v31 }
 0x47d   : > { %24073 = vmatmul.mubr.f32.vlgmr.msra.gmra.mrb[254].mxu0 %v4362_v63  ;;  %v4404_v63 = vcombine.high %v4396_v48, %v4396_v48 }
 0x47e   : > { %24143 = vmatmul.mubr.f32.vlgmr.msra.gmra.mrb[254].mxu1 %v4369_v4  ;;  %34256 = vmatpush1.bf16.xpose.msra.mxu0 %v34255_v36  ;;  %v988_v4 = vld [vmem:[%s35442_s22 + $0x1040] sm:$0xff]  ;;  %v997_v36 = vld [vmem:[%s35442_s22 + $0x1088] sm:$0xff] }
 0x47f   : > { %34260 = vmatpush1.bf16.xpose.msra.mxu1 %v34259_v37  ;;  %24212 = vmatprep.mubr.f32.mxu0 %v4387_v39  ;;  %v34271_v20 = vpack.c.bf16 %v1756_v5, %v988_v4  ;;  %v1765_v37 = vld [vmem:[%s35442_s22 + $0x2888] sm:$0x3] }
 0x480   : > { %34262 = vmatprep.subr.bf16.mxu0 %v34261_v40  ;;  %v20434_v49 = vpop.f32.mrb[202].mxu0  ;;  %24282 = vmatprep.mubr.f32.mxu1 %v4388_v41  ;;  %v409_v4 = vld [vmem:[%s35435_s12 + $0x428] sm:$0xff] }
 0x481   : > { %v20504_v50 = vpop.f32.mrb[202].mxu1  ;;  %34266 = vmatprep.subr.bf16.mxu1 %v34265_v42  ;;  %v20435_v54 = vadd.f32 %v20434_v49, %v20365_v38  ;;  %v20436_v55 = vpop.f32.mrb[203].mxu0  ;;  %v4437_v38 = vrot.slane %v4423_v28, %v35466_v25  ;;  %v999_v42 = vld [vmem:[%s35442_s22 + $0x1098] sm:$0xff]  ;;  %v34285_v49 = vpack.c.bf16 %v1765_v37, %v997_v36  ;;  %v4457_v12 = vcombine.high %v409_v4, %v409_v4 }
 0x482   : > { %v20506_v56 = vpop.f32.mrb[203].mxu1  ;;  %v34289_v51 = vpack.c.bf16 %v1767_v43, %v999_v42  ;;  %v998_v55 = vld [vmem:[%s35442_s22 + $0x1090] sm:$0xff]  ;;  %v4464_v17 = vrot.slane %v409_v4, %v35466_v25  ;;  %v1775_v28 = vld [vmem:[%s35442_s22 + $0x28d8] sm:$0x3] }
 0x483   : > { %v20505_v62 = vadd.f32 %v20504_v50, %v20435_v54  ;;  %v4439_v50 = vcombine.high %v4437_v38, %v4437_v38  ;;  %v1764_v54 = vld [vmem:[%s35442_s22 + $0x2880] sm:$0x3]  ;;  %v1766_v56 = vld [vmem:[%s35442_s22 + $0x2890] sm:$0x3] }
 0x484   : > { %v34291_v6 = vpack.c.bf16 %v1766_v56, %v998_v55 }
 0x485   : > { %24213 = vmatmul.mubr.f32.vlgmr.msra.gmra.mrb[0].mxu0 %v4379_v23  ;;  %v4421_v23 = vcombine.high %v4413_v8, %v4413_v8 }
 0x486   : > { %24283 = vmatmul.mubr.f32.vlgmr.msra.gmra.mrb[0].mxu1 %v4386_v29  ;;  %34264 = vmatpush1.bf16.xpose.msra.mxu0 %v34263_v60  ;;  %v992_v29 = vld [vmem:[%s35442_s22 + $0x1060] sm:$0xff]  ;;  %v1001_v60 = vld [vmem:[%s35442_s22 + $0x10a8] sm:$0xff] }
 0x487   : > { %34268 = vmatpush1.bf16.xpose.msra.mxu1 %v34267_v61  ;;  %24352 = vmatprep.mubr.f32.mxu0 %v4404_v63  ;;  %v34279_v45 = vpack.c.bf16 %v1760_v30, %v992_v29  ;;  %v1769_v61 = vld [vmem:[%s35442_s22 + $0x28a8] sm:$0x3]  ;;  %v410_v29 = vld [vmem:[%s35435_s12 + $0x430] sm:$0xff] }
 0x488   : > { %34270 = vmatprep.subr.bf16.mxu0 %v34269_v0  ;;  %v20574_v9 = vpop.f32.mrb[204].mxu0  ;;  %24422 = vmatprep.mubr.f32.mxu1 %v4405_v1  ;;  %v4474_v37 = vcombine.high %v410_v29, %v410_v29  ;;  %v4481_v42 = vrot.slane %v410_v29, %v35466_v25 }
 0x489   : > { %v20644_v10 = vpop.f32.mrb[204].mxu1  ;;  %34274 = vmatprep.subr.bf16.mxu1 %v34273_v2  ;;  %v20575_v14 = vadd.f32 %v20574_v9, %v20505_v62  ;;  %v20576_v15 = vpop.f32.mrb[205].mxu0  ;;  %v4454_v62 = vrot.slane %v4440_v52, %v35466_v25  ;;  %v1003_v2 = vld [vmem:[%s35442_s22 + $0x10b8] sm:$0xff]  ;;  %v34293_v9 = vpack.c.bf16 %v1769_v61, %v1001_v60 }
 0x48a   : > { %v20646_v16 = vpop.f32.mrb[205].mxu1  ;;  %v34297_v11 = vpack.c.bf16 %v1771_v3, %v1003_v2  ;;  %v1002_v15 = vld [vmem:[%s35442_s22 + $0x10b0] sm:$0xff]  ;;  %v1779_v52 = vld [vmem:[%s35442_s22 + $0x28f8] sm:$0x3] }
 0x48b   : > { %v20645_v22 = vadd.f32 %v20644_v10, %v20575_v14  ;;  %v4456_v10 = vcombine.high %v4454_v62, %v4454_v62  ;;  %v1768_v14 = vld [vmem:[%s35442_s22 + $0x28a0] sm:$0x3]  ;;  %v1770_v16 = vld [vmem:[%s35442_s22 + $0x28b0] sm:$0x3] }
 0x48c   : > { %v34299_v31 = vpack.c.bf16 %v1770_v16, %v1002_v15 }
 0x48d   : > { %24353 = vmatmul.mubr.f32.vlgmr.msra.gmra.mrb[2].mxu0 %v4396_v48  ;;  %v4438_v48 = vcombine.high %v4430_v33, %v4430_v33 }
 0x48e   : > { %24423 = vmatmul.mubr.f32.vlgmr.msra.gmra.mrb[2].mxu1 %v4403_v53  ;;  %34272 = vmatpush1.bf16.xpose.msra.mxu0 %v34271_v20  ;;  %v996_v53 = vld [vmem:[%s35442_s22 + $0x1080] sm:$0xff]  ;;  %v1005_v20 = vld [vmem:[%s35442_s22 + $0x10c8] sm:$0xff] }
 0x48f   : > { %34276 = vmatpush1.bf16.xpose.msra.mxu1 %v34275_v21  ;;  %24492 = vmatprep.mubr.f32.mxu0 %v4421_v23  ;;  %v34287_v5 = vpack.c.bf16 %v1764_v54, %v996_v53  ;;  %v1773_v21 = vld [vmem:[%s35442_s22 + $0x28c8] sm:$0x3]  ;;  %v411_v53 = vld [vmem:[%s35435_s12 + $0x438] sm:$0xff] }
 0x490   : > { %34278 = vmatprep.subr.bf16.mxu0 %v34277_v24  ;;  %v20714_v34 = vpop.f32.mrb[206].mxu0  ;;  %24562 = vmatprep.mubr.f32.mxu1 %v4422_v26  ;;  %v4491_v61 = vcombine.high %v411_v53, %v411_v53  ;;  %v4498_v2 = vrot.slane %v411_v53, %v35466_v25 }
 0x491   : > { %v20784_v35 = vpop.f32.mrb[206].mxu1  ;;  %34282 = vmatprep.subr.bf16.mxu1 %v34281_v27  ;;  %v20715_v39 = vadd.f32 %v20714_v34, %v20645_v22  ;;  %v20716_v40 = vpop.f32.mrb[207].mxu0  ;;  %v4471_v22 = vrot.slane %v4457_v12, %v35466_v25  ;;  %v1007_v27 = vld [vmem:[%s35442_s22 + $0x10d8] sm:$0xff]  ;;  %v34301_v34 = vpack.c.bf16 %v1773_v21, %v1005_v20 }
 0x492   : > { %v20786_v41 = vpop.f32.mrb[207].mxu1  ;;  %v34305_v36 = vpack.c.bf16 %v1775_v28, %v1007_v27  ;;  %v1006_v40 = vld [vmem:[%s35442_s22 + $0x10d0] sm:$0xff]  ;;  %v1783_v12 = vld [vmem:[%s35442_s22 + $0x2918] sm:$0x3] }
 0x493   : > { %v20785_v47 = vadd.f32 %v20784_v35, %v20715_v39  ;;  %v4473_v35 = vcombine.high %v4471_v22, %v4471_v22  ;;  %v1772_v39 = vld [vmem:[%s35442_s22 + $0x28c0] sm:$0x3]  ;;  %v1774_v41 = vld [vmem:[%s35442_s22 + $0x28d0] sm:$0x3] }
 0x494   : > { %v34307_v55 = vpack.c.bf16 %v1774_v41, %v1006_v40 }
 0x495   : > { %24493 = vmatmul.mubr.f32.vlgmr.msra.gmra.mrb[4].mxu0 %v4413_v8  ;;  %v4455_v8 = vcombine.high %v4447_v57, %v4447_v57 }
 0x496   : > { %24563 = vmatmul.mubr.f32.vlgmr.msra.gmra.mrb[4].mxu1 %v4420_v13  ;;  %34280 = vmatpush1.bf16.xpose.msra.mxu0 %v34279_v45  ;;  %v1000_v13 = vld [vmem:[%s35442_s22 + $0x10a0] sm:$0xff]  ;;  %v1009_v45 = vld [vmem:[%s35442_s22 + $0x10e8] sm:$0xff] }
 0x497   : > { %34284 = vmatpush1.bf16.xpose.msra.mxu1 %v34283_v46  ;;  %24632 = vmatprep.mubr.f32.mxu0 %v4438_v48  ;;  %v34295_v30 = vpack.c.bf16 %v1768_v14, %v1000_v13  ;;  %v1777_v46 = vld [vmem:[%s35442_s22 + $0x28e8] sm:$0x3]  ;;  %v412_v13 = vld [vmem:[%s35435_s12 + $0x440] sm:$0xff] }
 0x498   : > { %34286 = vmatprep.subr.bf16.mxu0 %v34285_v49  ;;  %v20854_v58 = vpop.f32.mrb[208].mxu0  ;;  %24702 = vmatprep.mubr.f32.mxu1 %v4439_v50  ;;  %v4508_v21 = vcombine.high %v412_v13, %v412_v13  ;;  %v4515_v27 = vrot.slane %v412_v13, %v35466_v25 }
 0x499   : > { %v20924_v59 = vpop.f32.mrb[208].mxu1  ;;  %34290 = vmatprep.subr.bf16.mxu1 %v34289_v51  ;;  %v20855_v63 = vadd.f32 %v20854_v58, %v20785_v47  ;;  %v20856_v0 = vpop.f32.mrb[209].mxu0  ;;  %v4488_v47 = vrot.slane %v4474_v37, %v35466_v25  ;;  %v1011_v51 = vld [vmem:[%s35442_s22 + $0x10f8] sm:$0xff]  ;;  %v34309_v58 = vpack.c.bf16 %v1777_v46, %v1009_v45 }
 0x49a   : > { %v20926_v1 = vpop.f32.mrb[209].mxu1  ;;  %v34313_v60 = vpack.c.bf16 %v1779_v52, %v1011_v51  ;;  %v1010_v0 = vld [vmem:[%s35442_s22 + $0x10f0] sm:$0xff]  ;;  %v1787_v37 = vld [vmem:[%s35442_s22 + $0x2938] sm:$0x3] }
 0x49b   : > { %v20925_v7 = vadd.f32 %v20924_v59, %v20855_v63  ;;  %v4490_v59 = vcombine.high %v4488_v47, %v4488_v47  ;;  %v1776_v63 = vld [vmem:[%s35442_s22 + $0x28e0] sm:$0x3]  ;;  %v1778_v1 = vld [vmem:[%s35442_s22 + $0x28f0] sm:$0x3] }
 0x49c   : > { %v34315_v15 = vpack.c.bf16 %v1778_v1, %v1010_v0 }
 0x49d   : > { %24633 = vmatmul.mubr.f32.vlgmr.msra.gmra.mrb[6].mxu0 %v4430_v33  ;;  %v4472_v33 = vcombine.high %v4464_v17, %v4464_v17 }
 0x49e   : > { %24703 = vmatmul.mubr.f32.vlgmr.msra.gmra.mrb[6].mxu1 %v4437_v38  ;;  %34288 = vmatpush1.bf16.xpose.msra.mxu0 %v34287_v5  ;;  %v1004_v38 = vld [vmem:[%s35442_s22 + $0x10c0] sm:$0xff]  ;;  %v1013_v5 = vld [vmem:[%s35442_s22 + $0x1108] sm:$0xff] }
 0x49f   : > { %34292 = vmatpush1.bf16.xpose.msra.mxu1 %v34291_v6  ;;  %24772 = vmatprep.mubr.f32.mxu0 %v4455_v8  ;;  %v34303_v54 = vpack.c.bf16 %v1772_v39, %v1004_v38  ;;  %v1781_v6 = vld [vmem:[%s35442_s22 + $0x2908] sm:$0x3] }
 0x4a0   : > { %34294 = vmatprep.subr.bf16.mxu0 %v34293_v9  ;;  %v20994_v18 = vpop.f32.mrb[210].mxu0  ;;  %24842 = vmatprep.mubr.f32.mxu1 %v4456_v10  ;;  %v413_v38 = vld [vmem:[%s35435_s12 + $0x448] sm:$0xff] }
 0x4a1   : > { %v21064_v19 = vpop.f32.mrb[210].mxu1  ;;  %34298 = vmatprep.subr.bf16.mxu1 %v34297_v11  ;;  %v20995_v23 = vadd.f32 %v20994_v18, %v20925_v7  ;;  %v20996_v24 = vpop.f32.mrb[211].mxu0  ;;  %v4505_v7 = vrot.slane %v4491_v61, %v35466_v25  ;;  %v1015_v11 = vld [vmem:[%s35442_s22 + $0x1118] sm:$0xff]  ;;  %v34317_v18 = vpack.c.bf16 %v1781_v6, %v1013_v5  ;;  %v4525_v46 = vcombine.high %v413_v38, %v413_v38 }
 0x4a2   : > { %v21066_v26 = vpop.f32.mrb[211].mxu1  ;;  %v34321_v20 = vpack.c.bf16 %v1783_v12, %v1015_v11  ;;  %v1014_v24 = vld [vmem:[%s35442_s22 + $0x1110] sm:$0xff]  ;;  %v4532_v51 = vrot.slane %v413_v38, %v35466_v25  ;;  %v1791_v61 = vld [vmem:[%s35442_s22 + $0x2958] sm:$0x3] }
 0x4a3   : > { %v21065_v32 = vadd.f32 %v21064_v19, %v20995_v23  ;;  %v4507_v19 = vcombine.high %v4505_v7, %v4505_v7  ;;  %v1780_v23 = vld [vmem:[%s35442_s22 + $0x2900] sm:$0x3]  ;;  %v1782_v26 = vld [vmem:[%s35442_s22 + $0x2910] sm:$0x3] }
 0x4a4   : > { %v34323_v40 = vpack.c.bf16 %v1782_v26, %v1014_v24 }
 0x4a5   : > { %24773 = vmatmul.mubr.f32.vlgmr.msra.gmra.mrb[8].mxu0 %v4447_v57  ;;  %v4489_v57 = vcombine.high %v4481_v42, %v4481_v42 }
 0x4a6   : > { %24843 = vmatmul.mubr.f32.vlgmr.msra.gmra.mrb[8].mxu1 %v4454_v62  ;;  %34296 = vmatpush1.bf16.xpose.msra.mxu0 %v34295_v30  ;;  %v1008_v62 = vld [vmem:[%s35442_s22 + $0x10e0] sm:$0xff]  ;;  %v1017_v30 = vld [vmem:[%s35442_s22 + $0x1128] sm:$0xff] }
 0x4a7   : > { %34300 = vmatpush1.bf16.xpose.msra.mxu1 %v34299_v31  ;;  %24912 = vmatprep.mubr.f32.mxu0 %v4472_v33  ;;  %v34311_v14 = vpack.c.bf16 %v1776_v63, %v1008_v62  ;;  %v1785_v31 = vld [vmem:[%s35442_s22 + $0x2928] sm:$0x3]  ;;  %v414_v62 = vld [vmem:[%s35435_s12 + $0x450] sm:$0xff] }
 0x4a8   : > { %34302 = vmatprep.subr.bf16.mxu0 %v34301_v34  ;;  %v21134_v43 = vpop.f32.mrb[212].mxu0  ;;  %24982 = vmatprep.mubr.f32.mxu1 %v4473_v35  ;;  %v4542_v6 = vcombine.high %v414_v62, %v414_v62  ;;  %v4549_v11 = vrot.slane %v414_v62, %v35466_v25 }
 0x4a9   : > { %v21204_v44 = vpop.f32.mrb[212].mxu1  ;;  %34306 = vmatprep.subr.bf16.mxu1 %v34305_v36  ;;  %v21135_v48 = vadd.f32 %v21134_v43, %v21065_v32  ;;  %v21136_v49 = vpop.f32.mrb[213].mxu0  ;;  %v4522_v32 = vrot.slane %v4508_v21, %v35466_v25  ;;  %v1019_v36 = vld [vmem:[%s35442_s22 + $0x1138] sm:$0xff]  ;;  %v34325_v43 = vpack.c.bf16 %v1785_v31, %v1017_v30 }
 0x4aa   : > { %v21206_v50 = vpop.f32.mrb[213].mxu1  ;;  %v34329_v45 = vpack.c.bf16 %v1787_v37, %v1019_v36  ;;  %v1018_v49 = vld [vmem:[%s35442_s22 + $0x1130] sm:$0xff]  ;;  %v1795_v21 = vld [vmem:[%s35442_s22 + $0x2978] sm:$0x3] }
 0x4ab   : > { %v21205_v56 = vadd.f32 %v21204_v44, %v21135_v48  ;;  %v4524_v44 = vcombine.high %v4522_v32, %v4522_v32  ;;  %v1784_v48 = vld [vmem:[%s35442_s22 + $0x2920] sm:$0x3]  ;;  %v1786_v50 = vld [vmem:[%s35442_s22 + $0x2930] sm:$0x3] }
 0x4ac   : > { %v34331_v0 = vpack.c.bf16 %v1786_v50, %v1018_v49 }
 0x4ad   : > { %24913 = vmatmul.mubr.f32.vlgmr.msra.gmra.mrb[10].mxu0 %v4464_v17  ;;  %v4506_v17 = vcombine.high %v4498_v2, %v4498_v2 }
 0x4ae   : > { %24983 = vmatmul.mubr.f32.vlgmr.msra.gmra.mrb[10].mxu1 %v4471_v22  ;;  %34304 = vmatpush1.bf16.xpose.msra.mxu0 %v34303_v54  ;;  %v1012_v22 = vld [vmem:[%s35442_s22 + $0x1100] sm:$0xff]  ;;  %v1021_v54 = vld [vmem:[%s35442_s22 + $0x1148] sm:$0xff] }
 0x4af   : > { %34308 = vmatpush1.bf16.xpose.msra.mxu1 %v34307_v55  ;;  %25052 = vmatprep.mubr.f32.mxu0 %v4489_v57  ;;  %v34319_v39 = vpack.c.bf16 %v1780_v23, %v1012_v22  ;;  %v1789_v55 = vld [vmem:[%s35442_s22 + $0x2948] sm:$0x3]  ;;  %v415_v22 = vld [vmem:[%s35435_s12 + $0x458] sm:$0xff] }
 0x4b0   : > { %34310 = vmatprep.subr.bf16.mxu0 %v34309_v58  ;;  %v21274_v3 = vpop.f32.mrb[214].mxu0  ;;  %25122 = vmatprep.mubr.f32.mxu1 %v4490_v59  ;;  %v4559_v31 = vcombine.high %v415_v22, %v415_v22  ;;  %v4566_v36 = vrot.slane %v415_v22, %v35466_v25 }
 0x4b1   : > { %v21344_v4 = vpop.f32.mrb[214].mxu1  ;;  %34314 = vmatprep.subr.bf16.mxu1 %v34313_v60  ;;  %v21275_v8 = vadd.f32 %v21274_v3, %v21205_v56  ;;  %v21276_v9 = vpop.f32.mrb[215].mxu0  ;;  %v4539_v56 = vrot.slane %v4525_v46, %v35466_v25  ;;  %v1023_v60 = vld [vmem:[%s35442_s22 + $0x1158] sm:$0xff]  ;;  %v34333_v3 = vpack.c.bf16 %v1789_v55, %v1021_v54 }
 0x4b2   : > { %v21346_v10 = vpop.f32.mrb[215].mxu1  ;;  %v34337_v5 = vpack.c.bf16 %v1791_v61, %v1023_v60  ;;  %v1022_v9 = vld [vmem:[%s35442_s22 + $0x1150] sm:$0xff]  ;;  %v1799_v46 = vld [vmem:[%s35442_s22 + $0x2998] sm:$0x3] }
 0x4b3   : > { %v21345_v16 = vadd.f32 %v21344_v4, %v21275_v8  ;;  %v4541_v4 = vcombine.high %v4539_v56, %v4539_v56  ;;  %v1788_v8 = vld [vmem:[%s35442_s22 + $0x2940] sm:$0x3]  ;;  %v1790_v10 = vld [vmem:[%s35442_s22 + $0x2950] sm:$0x3] }
 0x4b4   : > { %v34339_v24 = vpack.c.bf16 %v1790_v10, %v1022_v9 }
 0x4b5   : > { %25053 = vmatmul.mubr.f32.vlgmr.msra.gmra.mrb[12].mxu0 %v4481_v42  ;;  %v4523_v42 = vcombine.high %v4515_v27, %v4515_v27 }
 0x4b6   : > { %25123 = vmatmul.mubr.f32.vlgmr.msra.gmra.mrb[12].mxu1 %v4488_v47  ;;  %34312 = vmatpush1.bf16.xpose.msra.mxu0 %v34311_v14  ;;  %v1016_v47 = vld [vmem:[%s35442_s22 + $0x1120] sm:$0xff]  ;;  %v1025_v14 = vld [vmem:[%s35442_s22 + $0x1168] sm:$0xff] }
 0x4b7   : > { %34316 = vmatpush1.bf16.xpose.msra.mxu1 %v34315_v15  ;;  %25192 = vmatprep.mubr.f32.mxu0 %v4506_v17  ;;  %v34327_v63 = vpack.c.bf16 %v1784_v48, %v1016_v47  ;;  %v1793_v15 = vld [vmem:[%s35442_s22 + $0x2968] sm:$0x3]  ;;  %v416_v47 = vld [vmem:[%s35435_s12 + $0x460] sm:$0xff] }
 0x4b8   : > { %34318 = vmatprep.subr.bf16.mxu0 %v34317_v18  ;;  %v21414_v28 = vpop.f32.mrb[216].mxu0  ;;  %25262 = vmatprep.mubr.f32.mxu1 %v4507_v19  ;;  %v4576_v55 = vcombine.high %v416_v47, %v416_v47  ;;  %v4583_v60 = vrot.slane %v416_v47, %v35466_v25 }
 0x4b9   : > { %v21484_v29 = vpop.f32.mrb[216].mxu1  ;;  %34322 = vmatprep.subr.bf16.mxu1 %v34321_v20  ;;  %v21415_v33 = vadd.f32 %v21414_v28, %v21345_v16  ;;  %v21416_v34 = vpop.f32.mrb[217].mxu0  ;;  %v4556_v16 = vrot.slane %v4542_v6, %v35466_v25  ;;  %v1027_v20 = vld [vmem:[%s35442_s22 + $0x1178] sm:$0xff]  ;;  %v34341_v28 = vpack.c.bf16 %v1793_v15, %v1025_v14 }
 0x4ba   : > { %v21486_v35 = vpop.f32.mrb[217].mxu1  ;;  %v34345_v30 = vpack.c.bf16 %v1795_v21, %v1027_v20  ;;  %v1026_v34 = vld [vmem:[%s35442_s22 + $0x1170] sm:$0xff]  ;;  %v1803_v6 = vld [vmem:[%s35442_s22 + $0x29b8] sm:$0x3] }
 0x4bb   : > { %v21485_v41 = vadd.f32 %v21484_v29, %v21415_v33  ;;  %v4558_v29 = vcombine.high %v4556_v16, %v4556_v16  ;;  %v1792_v33 = vld [vmem:[%s35442_s22 + $0x2960] sm:$0x3]  ;;  %v1794_v35 = vld [vmem:[%s35442_s22 + $0x2970] sm:$0x3] }
 0x4bc   : > { %v34347_v49 = vpack.c.bf16 %v1794_v35, %v1026_v34 }
 0x4bd   : > { %25193 = vmatmul.mubr.f32.vlgmr.msra.gmra.mrb[14].mxu0 %v4498_v2  ;;  %v4540_v2 = vcombine.high %v4532_v51, %v4532_v51 }
 0x4be   : > { %25263 = vmatmul.mubr.f32.vlgmr.msra.gmra.mrb[14].mxu1 %v4505_v7  ;;  %34320 = vmatpush1.bf16.xpose.msra.mxu0 %v34319_v39  ;;  %v1020_v7 = vld [vmem:[%s35442_s22 + $0x1140] sm:$0xff]  ;;  %v1029_v39 = vld [vmem:[%s35442_s22 + $0x1188] sm:$0xff] }
 0x4bf   : > { %34324 = vmatpush1.bf16.xpose.msra.mxu1 %v34323_v40  ;;  %25332 = vmatprep.mubr.f32.mxu0 %v4523_v42  ;;  %v34335_v23 = vpack.c.bf16 %v1788_v8, %v1020_v7  ;;  %v1797_v40 = vld [vmem:[%s35442_s22 + $0x2988] sm:$0x3] }
 0x4c0   : > { %34326 = vmatprep.subr.bf16.mxu0 %v34325_v43  ;;  %v21554_v52 = vpop.f32.mrb[218].mxu0  ;;  %25402 = vmatprep.mubr.f32.mxu1 %v4524_v44  ;;  %v417_v7 = vld [vmem:[%s35435_s12 + $0x468] sm:$0xff] }
 0x4c1   : > { %v21624_v53 = vpop.f32.mrb[218].mxu1  ;;  %34330 = vmatprep.subr.bf16.mxu1 %v34329_v45  ;;  %v21555_v57 = vadd.f32 %v21554_v52, %v21485_v41  ;;  %v21556_v58 = vpop.f32.mrb[219].mxu0  ;;  %v4573_v41 = vrot.slane %v4559_v31, %v35466_v25  ;;  %v1031_v45 = vld [vmem:[%s35442_s22 + $0x1198] sm:$0xff]  ;;  %v34349_v52 = vpack.c.bf16 %v1797_v40, %v1029_v39  ;;  %v4593_v15 = vcombine.high %v417_v7, %v417_v7 }
 0x4c2   : > { %v21626_v59 = vpop.f32.mrb[219].mxu1  ;;  %v34353_v54 = vpack.c.bf16 %v1799_v46, %v1031_v45  ;;  %v1030_v58 = vld [vmem:[%s35442_s22 + $0x1190] sm:$0xff]  ;;  %v4600_v20 = vrot.slane %v417_v7, %v35466_v25  ;;  %v1807_v31 = vld [vmem:[%s35442_s22 + $0x29d8] sm:$0x3] }
 0x4c3   : > { %v21625_v1 = vadd.f32 %v21624_v53, %v21555_v57  ;;  %v4575_v53 = vcombine.high %v4573_v41, %v4573_v41  ;;  %v1796_v57 = vld [vmem:[%s35442_s22 + $0x2980] sm:$0x3]  ;;  %v1798_v59 = vld [vmem:[%s35442_s22 + $0x2990] sm:$0x3] }
 0x4c4   : > { %v34355_v9 = vpack.c.bf16 %v1798_v59, %v1030_v58 }
 0x4c5   : > { %25333 = vmatmul.mubr.f32.vlgmr.msra.gmra.mrb[16].mxu0 %v4515_v27  ;;  %v4557_v27 = vcombine.high %v4549_v11, %v4549_v11 }
 0x4c6   : > { %25403 = vmatmul.mubr.f32.vlgmr.msra.gmra.mrb[16].mxu1 %v4522_v32  ;;  %34328 = vmatpush1.bf16.xpose.msra.mxu0 %v34327_v63  ;;  %v1024_v32 = vld [vmem:[%s35442_s22 + $0x1160] sm:$0xff]  ;;  %v1033_v63 = vld [vmem:[%s35442_s22 + $0x11a8] sm:$0xff] }
 0x4c7   : > { %34332 = vmatpush1.bf16.xpose.msra.mxu1 %v34331_v0  ;;  %25472 = vmatprep.mubr.f32.mxu0 %v4540_v2  ;;  %v34343_v48 = vpack.c.bf16 %v1792_v33, %v1024_v32  ;;  %v1801_v0 = vld [vmem:[%s35442_s22 + $0x29a8] sm:$0x3]  ;;  %v418_v32 = vld [vmem:[%s35435_s12 + $0x470] sm:$0xff] }
 0x4c8   : > { %34334 = vmatprep.subr.bf16.mxu0 %v34333_v3  ;;  %v21694_v12 = vpop.f32.mrb[220].mxu0  ;;  %25542 = vmatprep.mubr.f32.mxu1 %v4541_v4  ;;  %v4610_v40 = vcombine.high %v418_v32, %v418_v32  ;;  %v4617_v45 = vrot.slane %v418_v32, %v35466_v25 }
 0x4c9   : > { %v21764_v13 = vpop.f32.mrb[220].mxu1  ;;  %34338 = vmatprep.subr.bf16.mxu1 %v34337_v5  ;;  %v21695_v17 = vadd.f32 %v21694_v12, %v21625_v1  ;;  %v21696_v18 = vpop.f32.mrb[221].mxu0  ;;  %v4590_v1 = vrot.slane %v4576_v55, %v35466_v25  ;;  %v1035_v5 = vld [vmem:[%s35442_s22 + $0x11b8] sm:$0xff]  ;;  %v34357_v12 = vpack.c.bf16 %v1801_v0, %v1033_v63 }
 0x4ca   : > { %v21766_v19 = vpop.f32.mrb[221].mxu1  ;;  %v34361_v14 = vpack.c.bf16 %v1803_v6, %v1035_v5  ;;  %v1034_v18 = vld [vmem:[%s35442_s22 + $0x11b0] sm:$0xff]  ;;  %v1811_v55 = vld [vmem:[%s35442_s22 + $0x29f8] sm:$0x3] }
 0x4cb   : > { %v21765_v26 = vadd.f32 %v21764_v13, %v21695_v17  ;;  %v4592_v13 = vcombine.high %v4590_v1, %v4590_v1  ;;  %v1800_v17 = vld [vmem:[%s35442_s22 + $0x29a0] sm:$0x3]  ;;  %v1802_v19 = vld [vmem:[%s35442_s22 + $0x29b0] sm:$0x3] }
 0x4cc   : > { %v34363_v34 = vpack.c.bf16 %v1802_v19, %v1034_v18 }
 0x4cd   : > { %25473 = vmatmul.mubr.f32.vlgmr.msra.gmra.mrb[18].mxu0 %v4532_v51  ;;  %v4574_v51 = vcombine.high %v4566_v36, %v4566_v36 }
 0x4ce   : > { %25543 = vmatmul.mubr.f32.vlgmr.msra.gmra.mrb[18].mxu1 %v4539_v56  ;;  %34336 = vmatpush1.bf16.xpose.msra.mxu0 %v34335_v23  ;;  %v1028_v56 = vld [vmem:[%s35442_s22 + $0x1180] sm:$0xff]  ;;  %v1037_v23 = vld [vmem:[%s35442_s22 + $0x11c8] sm:$0xff] }
 0x4cf   : > { %34340 = vmatpush1.bf16.xpose.msra.mxu1 %v34339_v24  ;;  %25612 = vmatprep.mubr.f32.mxu0 %v4557_v27  ;;  %v34351_v8 = vpack.c.bf16 %v1796_v57, %v1028_v56  ;;  %v1805_v24 = vld [vmem:[%s35442_s22 + $0x29c8] sm:$0x3]  ;;  %v419_v56 = vld [vmem:[%s35435_s12 + $0x478] sm:$0xff] }
 0x4d0   : > { %34342 = vmatprep.subr.bf16.mxu0 %v34341_v28  ;;  %v21834_v37 = vpop.f32.mrb[222].mxu0  ;;  %25682 = vmatprep.mubr.f32.mxu1 %v4558_v29  ;;  %v4627_v0 = vcombine.high %v419_v56, %v419_v56  ;;  %v4634_v5 = vrot.slane %v419_v56, %v35466_v25 }
 0x4d1   : > { %v21904_v38 = vpop.f32.mrb[222].mxu1  ;;  %34346 = vmatprep.subr.bf16.mxu1 %v34345_v30  ;;  %v21835_v42 = vadd.f32 %v21834_v37, %v21765_v26  ;;  %v21836_v43 = vpop.f32.mrb[223].mxu0  ;;  %v4607_v26 = vrot.slane %v4593_v15, %v35466_v25  ;;  %v1039_v30 = vld [vmem:[%s35442_s22 + $0x11d8] sm:$0xff]  ;;  %v34365_v37 = vpack.c.bf16 %v1805_v24, %v1037_v23 }
 0x4d2   : > { %v21906_v44 = vpop.f32.mrb[223].mxu1  ;;  %v34369_v39 = vpack.c.bf16 %v1807_v31, %v1039_v30  ;;  %v1038_v43 = vld [vmem:[%s35442_s22 + $0x11d0] sm:$0xff]  ;;  %v1815_v15 = vld [vmem:[%s35442_s22 + $0x2a18] sm:$0x3] }
 0x4d3   : > { %v21905_v50 = vadd.f32 %v21904_v38, %v21835_v42  ;;  %v4609_v38 = vcombine.high %v4607_v26, %v4607_v26  ;;  %v1804_v42 = vld [vmem:[%s35442_s22 + $0x29c0] sm:$0x3]  ;;  %v1806_v44 = vld [vmem:[%s35442_s22 + $0x29d0] sm:$0x3] }
 0x4d4   : > { %v34371_v58 = vpack.c.bf16 %v1806_v44, %v1038_v43 }
 0x4d5   : > { %25613 = vmatmul.mubr.f32.vlgmr.msra.gmra.mrb[20].mxu0 %v4549_v11  ;;  %v4591_v11 = vcombine.high %v4583_v60, %v4583_v60 }
 0x4d6   : > { %25683 = vmatmul.mubr.f32.vlgmr.msra.gmra.mrb[20].mxu1 %v4556_v16  ;;  %34344 = vmatpush1.bf16.xpose.msra.mxu0 %v34343_v48  ;;  %v1032_v16 = vld [vmem:[%s35442_s22 + $0x11a0] sm:$0xff]  ;;  %v1041_v48 = vld [vmem:[%s35442_s22 + $0x11e8] sm:$0xff] }
 0x4d7   : > { %34348 = vmatpush1.bf16.xpose.msra.mxu1 %v34347_v49  ;;  %25752 = vmatprep.mubr.f32.mxu0 %v4574_v51  ;;  %v34359_v33 = vpack.c.bf16 %v1800_v17, %v1032_v16  ;;  %v1809_v49 = vld [vmem:[%s35442_s22 + $0x29e8] sm:$0x3]  ;;  %v420_v16 = vld [vmem:[%s35435_s12 + $0x480] sm:$0xff] }
 0x4d8   : > { %34350 = vmatprep.subr.bf16.mxu0 %v34349_v52  ;;  %v21974_v61 = vpop.f32.mrb[224].mxu0  ;;  %25822 = vmatprep.mubr.f32.mxu1 %v4575_v53  ;;  %v4644_v24 = vcombine.high %v420_v16, %v420_v16  ;;  %v4651_v30 = vrot.slane %v420_v16, %v35466_v25 }
 0x4d9   : > { %v22044_v62 = vpop.f32.mrb[224].mxu1  ;;  %34354 = vmatprep.subr.bf16.mxu1 %v34353_v54  ;;  %v21975_v2 = vadd.f32 %v21974_v61, %v21905_v50  ;;  %v21976_v3 = vpop.f32.mrb[225].mxu0  ;;  %v4624_v50 = vrot.slane %v4610_v40, %v35466_v25  ;;  %v1043_v54 = vld [vmem:[%s35442_s22 + $0x11f8] sm:$0xff]  ;;  %v34373_v61 = vpack.c.bf16 %v1809_v49, %v1041_v48 }
 0x4da   : > { %v22046_v4 = vpop.f32.mrb[225].mxu1  ;;  %v34377_v63 = vpack.c.bf16 %v1811_v55, %v1043_v54  ;;  %v1042_v3 = vld [vmem:[%s35442_s22 + $0x11f0] sm:$0xff]  ;;  %v1819_v40 = vld [vmem:[%s35442_s22 + $0x2a38] sm:$0x3] }
 0x4db   : > { %v22045_v10 = vadd.f32 %v22044_v62, %v21975_v2  ;;  %v4626_v62 = vcombine.high %v4624_v50, %v4624_v50  ;;  %v1808_v2 = vld [vmem:[%s35442_s22 + $0x29e0] sm:$0x3]  ;;  %v1810_v4 = vld [vmem:[%s35442_s22 + $0x29f0] sm:$0x3] }
 0x4dc   : > { %v34379_v18 = vpack.c.bf16 %v1810_v4, %v1042_v3 }
 0x4dd   : > { %25753 = vmatmul.mubr.f32.vlgmr.msra.gmra.mrb[22].mxu0 %v4566_v36  ;;  %v4608_v36 = vcombine.high %v4600_v20, %v4600_v20 }
 0x4de   : > { %25823 = vmatmul.mubr.f32.vlgmr.msra.gmra.mrb[22].mxu1 %v4573_v41  ;;  %34352 = vmatpush1.bf16.xpose.msra.mxu0 %v34351_v8  ;;  %v1036_v41 = vld [vmem:[%s35442_s22 + $0x11c0] sm:$0xff]  ;;  %v1045_v8 = vld [vmem:[%s35442_s22 + $0x1208] sm:$0xff] }
 0x4df   : > { %34356 = vmatpush1.bf16.xpose.msra.mxu1 %v34355_v9  ;;  %25892 = vmatprep.mubr.f32.mxu0 %v4591_v11  ;;  %v34367_v57 = vpack.c.bf16 %v1804_v42, %v1036_v41  ;;  %v1813_v9 = vld [vmem:[%s35442_s22 + $0x2a08] sm:$0x3] }
 0x4e0   : > { %34358 = vmatprep.subr.bf16.mxu0 %v34357_v12  ;;  %v22114_v21 = vpop.f32.mrb[226].mxu0  ;;  %25962 = vmatprep.mubr.f32.mxu1 %v4592_v13  ;;  %v421_v41 = vld [vmem:[%s35435_s12 + $0x488] sm:$0xff] }
 0x4e1   : > { %v22184_v22 = vpop.f32.mrb[226].mxu1  ;;  %34362 = vmatprep.subr.bf16.mxu1 %v34361_v14  ;;  %v22115_v27 = vadd.f32 %v22114_v21, %v22045_v10  ;;  %v22116_v28 = vpop.f32.mrb[227].mxu0  ;;  %v4641_v10 = vrot.slane %v4627_v0, %v35466_v25  ;;  %v1047_v14 = vld [vmem:[%s35442_s22 + $0x1218] sm:$0xff]  ;;  %v34381_v21 = vpack.c.bf16 %v1813_v9, %v1045_v8  ;;  %v4661_v49 = vcombine.high %v421_v41, %v421_v41 }
 0x4e2   : > { %v22186_v29 = vpop.f32.mrb[227].mxu1  ;;  %v34385_v23 = vpack.c.bf16 %v1815_v15, %v1047_v14  ;;  %v1046_v28 = vld [vmem:[%s35442_s22 + $0x1210] sm:$0xff]  ;;  %v4668_v54 = vrot.slane %v421_v41, %v35466_v25  ;;  %v1823_v0 = vld [vmem:[%s35442_s22 + $0x2a58] sm:$0x3] }
 0x4e3   : > { %v22185_v35 = vadd.f32 %v22184_v22, %v22115_v27  ;;  %v4643_v22 = vcombine.high %v4641_v10, %v4641_v10  ;;  %v1812_v27 = vld [vmem:[%s35442_s22 + $0x2a00] sm:$0x3]  ;;  %v1814_v29 = vld [vmem:[%s35442_s22 + $0x2a10] sm:$0x3] }
 0x4e4   : > { %v34387_v43 = vpack.c.bf16 %v1814_v29, %v1046_v28 }
 0x4e5   : > { %25893 = vmatmul.mubr.f32.vlgmr.msra.gmra.mrb[24].mxu0 %v4583_v60  ;;  %v4625_v60 = vcombine.high %v4617_v45, %v4617_v45 }
 0x4e6   : > { %25963 = vmatmul.mubr.f32.vlgmr.msra.gmra.mrb[24].mxu1 %v4590_v1  ;;  %34360 = vmatpush1.bf16.xpose.msra.mxu0 %v34359_v33  ;;  %v1040_v1 = vld [vmem:[%s35442_s22 + $0x11e0] sm:$0xff]  ;;  %v1049_v33 = vld [vmem:[%s35442_s22 + $0x1228] sm:$0xff] }
 0x4e7   : > { %34364 = vmatpush1.bf16.xpose.msra.mxu1 %v34363_v34  ;;  %26032 = vmatprep.mubr.f32.mxu0 %v4608_v36  ;;  %v34375_v17 = vpack.c.bf16 %v1808_v2, %v1040_v1  ;;  %v1817_v34 = vld [vmem:[%s35442_s22 + $0x2a28] sm:$0x3]  ;;  %v422_v1 = vld [vmem:[%s35435_s12 + $0x490] sm:$0xff] }
 0x4e8   : > { %34366 = vmatprep.subr.bf16.mxu0 %v34365_v37  ;;  %v22254_v46 = vpop.f32.mrb[228].mxu0  ;;  %26102 = vmatprep.mubr.f32.mxu1 %v4609_v38  ;;  %v4678_v9 = vcombine.high %v422_v1, %v422_v1  ;;  %v4685_v14 = vrot.slane %v422_v1, %v35466_v25 }
 0x4e9   : > { %v22324_v47 = vpop.f32.mrb[228].mxu1  ;;  %34370 = vmatprep.subr.bf16.mxu1 %v34369_v39  ;;  %v22255_v51 = vadd.f32 %v22254_v46, %v22185_v35  ;;  %v22256_v52 = vpop.f32.mrb[229].mxu0  ;;  %v4658_v35 = vrot.slane %v4644_v24, %v35466_v25  ;;  %v1051_v39 = vld [vmem:[%s35442_s22 + $0x1238] sm:$0xff]  ;;  %v34389_v46 = vpack.c.bf16 %v1817_v34, %v1049_v33 }
 0x4ea   : > { %v22326_v53 = vpop.f32.mrb[229].mxu1  ;;  %v34393_v48 = vpack.c.bf16 %v1819_v40, %v1051_v39  ;;  %v1050_v52 = vld [vmem:[%s35442_s22 + $0x1230] sm:$0xff]  ;;  %v1827_v24 = vld [vmem:[%s35442_s22 + $0x2a78] sm:$0x3] }
 0x4eb   : > { %v22325_v59 = vadd.f32 %v22324_v47, %v22255_v51  ;;  %v4660_v47 = vcombine.high %v4658_v35, %v4658_v35  ;;  %v1816_v51 = vld [vmem:[%s35442_s22 + $0x2a20] sm:$0x3]  ;;  %v1818_v53 = vld [vmem:[%s35442_s22 + $0x2a30] sm:$0x3] }
 0x4ec   : > { %v34395_v3 = vpack.c.bf16 %v1818_v53, %v1050_v52 }
 0x4ed   : > { %26033 = vmatmul.mubr.f32.vlgmr.msra.gmra.mrb[26].mxu0 %v4600_v20  ;;  %v4642_v20 = vcombine.high %v4634_v5, %v4634_v5 }
 0x4ee   : > { %26103 = vmatmul.mubr.f32.vlgmr.msra.gmra.mrb[26].mxu1 %v4607_v26  ;;  %34368 = vmatpush1.bf16.xpose.msra.mxu0 %v34367_v57  ;;  %v1044_v26 = vld [vmem:[%s35442_s22 + $0x1200] sm:$0xff]  ;;  %v1053_v57 = vld [vmem:[%s35442_s22 + $0x1248] sm:$0xff] }
 0x4ef   : > { %34372 = vmatpush1.bf16.xpose.msra.mxu1 %v34371_v58  ;;  %26172 = vmatprep.mubr.f32.mxu0 %v4625_v60  ;;  %v34383_v42 = vpack.c.bf16 %v1812_v27, %v1044_v26  ;;  %v1821_v58 = vld [vmem:[%s35442_s22 + $0x2a48] sm:$0x3]  ;;  %v423_v26 = vld [vmem:[%s35435_s12 + $0x498] sm:$0xff] }
 0x4f0   : > { %34374 = vmatprep.subr.bf16.mxu0 %v34373_v61  ;;  %v22394_v6 = vpop.f32.mrb[230].mxu0  ;;  %26242 = vmatprep.mubr.f32.mxu1 %v4626_v62  ;;  %v4695_v34 = vcombine.high %v423_v26, %v423_v26  ;;  %v4702_v39 = vrot.slane %v423_v26, %v35466_v25 }
 0x4f1   : > { %v22464_v7 = vpop.f32.mrb[230].mxu1  ;;  %34378 = vmatprep.subr.bf16.mxu1 %v34377_v63  ;;  %v22395_v11 = vadd.f32 %v22394_v6, %v22325_v59  ;;  %v22396_v12 = vpop.f32.mrb[231].mxu0  ;;  %v4675_v59 = vrot.slane %v4661_v49, %v35466_v25  ;;  %v1055_v63 = vld [vmem:[%s35442_s22 + $0x1258] sm:$0xff]  ;;  %v34397_v6 = vpack.c.bf16 %v1821_v58, %v1053_v57 }
 0x4f2   : > { %v22466_v13 = vpop.f32.mrb[231].mxu1  ;;  %v34401_v8 = vpack.c.bf16 %v1823_v0, %v1055_v63  ;;  %v1054_v12 = vld [vmem:[%s35442_s22 + $0x1250] sm:$0xff]  ;;  %v1831_v49 = vld [vmem:[%s35442_s22 + $0x2a98] sm:$0x3] }
 0x4f3   : > { %v22465_v19 = vadd.f32 %v22464_v7, %v22395_v11  ;;  %v4677_v7 = vcombine.high %v4675_v59, %v4675_v59  ;;  %v1820_v11 = vld [vmem:[%s35442_s22 + $0x2a40] sm:$0x3]  ;;  %v1822_v13 = vld [vmem:[%s35442_s22 + $0x2a50] sm:$0x3] }
 0x4f4   : > { %v34403_v28 = vpack.c.bf16 %v1822_v13, %v1054_v12 }
 0x4f5   : > { %26173 = vmatmul.mubr.f32.vlgmr.msra.gmra.mrb[28].mxu0 %v4617_v45  ;;  %v4659_v45 = vcombine.high %v4651_v30, %v4651_v30 }
 0x4f6   : > { %26243 = vmatmul.mubr.f32.vlgmr.msra.gmra.mrb[28].mxu1 %v4624_v50  ;;  %34376 = vmatpush1.bf16.xpose.msra.mxu0 %v34375_v17  ;;  %v1048_v50 = vld [vmem:[%s35442_s22 + $0x1220] sm:$0xff]  ;;  %v1057_v17 = vld [vmem:[%s35442_s22 + $0x1268] sm:$0xff] }
 0x4f7   : > { %34380 = vmatpush1.bf16.xpose.msra.mxu1 %v34379_v18  ;;  %26312 = vmatprep.mubr.f32.mxu0 %v4642_v20  ;;  %v34391_v2 = vpack.c.bf16 %v1816_v51, %v1048_v50  ;;  %v1825_v18 = vld [vmem:[%s35442_s22 + $0x2a68] sm:$0x3]  ;;  %v424_v50 = vld [vmem:[%s35435_s12 + $0x4a0] sm:$0xff] }
 0x4f8   : > { %34382 = vmatprep.subr.bf16.mxu0 %v34381_v21  ;;  %v22534_v31 = vpop.f32.mrb[232].mxu0  ;;  %26382 = vmatprep.mubr.f32.mxu1 %v4643_v22  ;;  %v4712_v58 = vcombine.high %v424_v50, %v424_v50  ;;  %v4719_v63 = vrot.slane %v424_v50, %v35466_v25 }
 0x4f9   : > { %v22604_v32 = vpop.f32.mrb[232].mxu1  ;;  %34386 = vmatprep.subr.bf16.mxu1 %v34385_v23  ;;  %v22535_v36 = vadd.f32 %v22534_v31, %v22465_v19  ;;  %v22536_v37 = vpop.f32.mrb[233].mxu0  ;;  %v4692_v19 = vrot.slane %v4678_v9, %v35466_v25  ;;  %v1059_v23 = vld [vmem:[%s35442_s22 + $0x1278] sm:$0xff]  ;;  %v34405_v31 = vpack.c.bf16 %v1825_v18, %v1057_v17 }
 0x4fa   : > { %v22606_v38 = vpop.f32.mrb[233].mxu1  ;;  %v34409_v33 = vpack.c.bf16 %v1827_v24, %v1059_v23  ;;  %v1058_v37 = vld [vmem:[%s35442_s22 + $0x1270] sm:$0xff]  ;;  %v1835_v9 = vld [vmem:[%s35442_s22 + $0x2ab8] sm:$0x3] }
 0x4fb   : > { %v22605_v44 = vadd.f32 %v22604_v32, %v22535_v36  ;;  %v4694_v32 = vcombine.high %v4692_v19, %v4692_v19  ;;  %v1824_v36 = vld [vmem:[%s35442_s22 + $0x2a60] sm:$0x3]  ;;  %v1826_v38 = vld [vmem:[%s35442_s22 + $0x2a70] sm:$0x3] }
 0x4fc   : > { %v34411_v52 = vpack.c.bf16 %v1826_v38, %v1058_v37 }
 0x4fd   : > { %26313 = vmatmul.mubr.f32.vlgmr.msra.gmra.mrb[30].mxu0 %v4634_v5  ;;  %v4676_v5 = vcombine.high %v4668_v54, %v4668_v54 }
 0x4fe   : > { %26383 = vmatmul.mubr.f32.vlgmr.msra.gmra.mrb[30].mxu1 %v4641_v10  ;;  %34384 = vmatpush1.bf16.xpose.msra.mxu0 %v34383_v42  ;;  %v1052_v10 = vld [vmem:[%s35442_s22 + $0x1240] sm:$0xff]  ;;  %v1061_v42 = vld [vmem:[%s35442_s22 + $0x1288] sm:$0xff] }
 0x4ff   : > { %34388 = vmatpush1.bf16.xpose.msra.mxu1 %v34387_v43  ;;  %26452 = vmatprep.mubr.f32.mxu0 %v4659_v45  ;;  %v34399_v27 = vpack.c.bf16 %v1820_v11, %v1052_v10  ;;  %v1829_v43 = vld [vmem:[%s35442_s22 + $0x2a88] sm:$0x3] }
 0x500   : > { %34390 = vmatprep.subr.bf16.mxu0 %v34389_v46  ;;  %v22674_v55 = vpop.f32.mrb[234].mxu0  ;;  %26522 = vmatprep.mubr.f32.mxu1 %v4660_v47  ;;  %v425_v10 = vld [vmem:[%s35435_s12 + $0x4a8] sm:$0xff] }
 0x501   : > { %v22744_v56 = vpop.f32.mrb[234].mxu1  ;;  %34394 = vmatprep.subr.bf16.mxu1 %v34393_v48  ;;  %v22675_v60 = vadd.f32 %v22674_v55, %v22605_v44  ;;  %v22676_v61 = vpop.f32.mrb[235].mxu0  ;;  %v4709_v44 = vrot.slane %v4695_v34, %v35466_v25  ;;  %v1063_v48 = vld [vmem:[%s35442_s22 + $0x1298] sm:$0xff]  ;;  %v34413_v55 = vpack.c.bf16 %v1829_v43, %v1061_v42  ;;  %v4729_v18 = vcombine.high %v425_v10, %v425_v10 }
 0x502   : > { %v22746_v62 = vpop.f32.mrb[235].mxu1  ;;  %v34417_v57 = vpack.c.bf16 %v1831_v49, %v1063_v48  ;;  %v1062_v61 = vld [vmem:[%s35442_s22 + $0x1290] sm:$0xff]  ;;  %v4736_v23 = vrot.slane %v425_v10, %v35466_v25  ;;  %v1839_v34 = vld [vmem:[%s35442_s22 + $0x2ad8] sm:$0x3] }
 0x503   : > { %v22745_v4 = vadd.f32 %v22744_v56, %v22675_v60  ;;  %v4711_v56 = vcombine.high %v4709_v44, %v4709_v44  ;;  %v1828_v60 = vld [vmem:[%s35442_s22 + $0x2a80] sm:$0x3]  ;;  %v1830_v62 = vld [vmem:[%s35442_s22 + $0x2a90] sm:$0x3] }
 0x504   : > { %v34419_v12 = vpack.c.bf16 %v1830_v62, %v1062_v61 }
 0x505   : > { %26453 = vmatmul.mubr.f32.vlgmr.msra.gmra.mrb[32].mxu0 %v4651_v30  ;;  %v4693_v30 = vcombine.high %v4685_v14, %v4685_v14 }
 0x506   : > { %26523 = vmatmul.mubr.f32.vlgmr.msra.gmra.mrb[32].mxu1 %v4658_v35  ;;  %34392 = vmatpush1.bf16.xpose.msra.mxu0 %v34391_v2  ;;  %v1056_v35 = vld [vmem:[%s35442_s22 + $0x1260] sm:$0xff]  ;;  %v1065_v2 = vld [vmem:[%s35442_s22 + $0x12a8] sm:$0xff] }
 0x507   : > { %34396 = vmatpush1.bf16.xpose.msra.mxu1 %v34395_v3  ;;  %26592 = vmatprep.mubr.f32.mxu0 %v4676_v5  ;;  %v34407_v51 = vpack.c.bf16 %v1824_v36, %v1056_v35  ;;  %v1833_v3 = vld [vmem:[%s35442_s22 + $0x2aa8] sm:$0x3]  ;;  %v426_v35 = vld [vmem:[%s35435_s12 + $0x4b0] sm:$0xff] }
 0x508   : > { %34398 = vmatprep.subr.bf16.mxu0 %v34397_v6  ;;  %v22814_v15 = vpop.f32.mrb[236].mxu0  ;;  %26662 = vmatprep.mubr.f32.mxu1 %v4677_v7  ;;  %v4746_v43 = vcombine.high %v426_v35, %v426_v35  ;;  %v4753_v48 = vrot.slane %v426_v35, %v35466_v25 }
 0x509   : > { %v22884_v16 = vpop.f32.mrb[236].mxu1  ;;  %34402 = vmatprep.subr.bf16.mxu1 %v34401_v8  ;;  %v22815_v20 = vadd.f32 %v22814_v15, %v22745_v4  ;;  %v22816_v21 = vpop.f32.mrb[237].mxu0  ;;  %v4726_v4 = vrot.slane %v4712_v58, %v35466_v25  ;;  %v1067_v8 = vld [vmem:[%s35442_s22 + $0x12b8] sm:$0xff]  ;;  %v34421_v15 = vpack.c.bf16 %v1833_v3, %v1065_v2 }
 0x50a   : > { %v22886_v22 = vpop.f32.mrb[237].mxu1  ;;  %v34425_v17 = vpack.c.bf16 %v1835_v9, %v1067_v8  ;;  %v1066_v21 = vld [vmem:[%s35442_s22 + $0x12b0] sm:$0xff]  ;;  %v1843_v58 = vld [vmem:[%s35442_s22 + $0x2af8] sm:$0x3] }
 0x50b   : > { %v22885_v29 = vadd.f32 %v22884_v16, %v22815_v20  ;;  %v4728_v16 = vcombine.high %v4726_v4, %v4726_v4  ;;  %v1832_v20 = vld [vmem:[%s35442_s22 + $0x2aa0] sm:$0x3]  ;;  %v1834_v22 = vld [vmem:[%s35442_s22 + $0x2ab0] sm:$0x3] }
 0x50c   : > { %v34427_v37 = vpack.c.bf16 %v1834_v22, %v1066_v21 }
 0x50d   : > { %26593 = vmatmul.mubr.f32.vlgmr.msra.gmra.mrb[34].mxu0 %v4668_v54  ;;  %v4710_v54 = vcombine.high %v4702_v39, %v4702_v39 }
 0x50e   : > { %26663 = vmatmul.mubr.f32.vlgmr.msra.gmra.mrb[34].mxu1 %v4675_v59  ;;  %34400 = vmatpush1.bf16.xpose.msra.mxu0 %v34399_v27  ;;  %v1060_v59 = vld [vmem:[%s35442_s22 + $0x1280] sm:$0xff]  ;;  %v1069_v27 = vld [vmem:[%s35442_s22 + $0x12c8] sm:$0xff] }
 0x50f   : > { %34404 = vmatpush1.bf16.xpose.msra.mxu1 %v34403_v28  ;;  %26732 = vmatprep.mubr.f32.mxu0 %v4693_v30  ;;  %v34415_v11 = vpack.c.bf16 %v1828_v60, %v1060_v59  ;;  %v1837_v28 = vld [vmem:[%s35442_s22 + $0x2ac8] sm:$0x3]  ;;  %v427_v59 = vld [vmem:[%s35435_s12 + $0x4b8] sm:$0xff] }
 0x510   : > { %34406 = vmatprep.subr.bf16.mxu0 %v34405_v31  ;;  %v22954_v40 = vpop.f32.mrb[238].mxu0  ;;  %26802 = vmatprep.mubr.f32.mxu1 %v4694_v32  ;;  %v4763_v3 = vcombine.high %v427_v59, %v427_v59  ;;  %v4770_v8 = vrot.slane %v427_v59, %v35466_v25 }
 0x511   : > { %v23024_v41 = vpop.f32.mrb[238].mxu1  ;;  %34410 = vmatprep.subr.bf16.mxu1 %v34409_v33  ;;  %v22955_v45 = vadd.f32 %v22954_v40, %v22885_v29  ;;  %v22956_v46 = vpop.f32.mrb[239].mxu0  ;;  %v4743_v29 = vrot.slane %v4729_v18, %v35466_v25  ;;  %v1071_v33 = vld [vmem:[%s35442_s22 + $0x12d8] sm:$0xff]  ;;  %v34429_v40 = vpack.c.bf16 %v1837_v28, %v1069_v27 }
 0x512   : > { %v23026_v47 = vpop.f32.mrb[239].mxu1  ;;  %v34433_v42 = vpack.c.bf16 %v1839_v34, %v1071_v33  ;;  %v1070_v46 = vld [vmem:[%s35442_s22 + $0x12d0] sm:$0xff]  ;;  %v1847_v18 = vld [vmem:[%s35442_s22 + $0x2b18] sm:$0x3] }
 0x513   : > { %v23025_v53 = vadd.f32 %v23024_v41, %v22955_v45  ;;  %v4745_v41 = vcombine.high %v4743_v29, %v4743_v29  ;;  %v1836_v45 = vld [vmem:[%s35442_s22 + $0x2ac0] sm:$0x3]  ;;  %v1838_v47 = vld [vmem:[%s35442_s22 + $0x2ad0] sm:$0x3] }
 0x514   : > { %v34435_v61 = vpack.c.bf16 %v1838_v47, %v1070_v46 }
 0x515   : > { %26733 = vmatmul.mubr.f32.vlgmr.msra.gmra.mrb[36].mxu0 %v4685_v14  ;;  %v4727_v14 = vcombine.high %v4719_v63, %v4719_v63 }
 0x516   : > { %26803 = vmatmul.mubr.f32.vlgmr.msra.gmra.mrb[36].mxu1 %v4692_v19  ;;  %34408 = vmatpush1.bf16.xpose.msra.mxu0 %v34407_v51  ;;  %v1064_v19 = vld [vmem:[%s35442_s22 + $0x12a0] sm:$0xff]  ;;  %v1073_v51 = vld [vmem:[%s35442_s22 + $0x12e8] sm:$0xff] }
 0x517   : > { %34412 = vmatpush1.bf16.xpose.msra.mxu1 %v34411_v52  ;;  %26872 = vmatprep.mubr.f32.mxu0 %v4710_v54  ;;  %v34423_v36 = vpack.c.bf16 %v1832_v20, %v1064_v19  ;;  %v1841_v52 = vld [vmem:[%s35442_s22 + $0x2ae8] sm:$0x3]  ;;  %v428_v19 = vld [vmem:[%s35435_s12 + $0x4c0] sm:$0xff] }
 0x518   : > { %34414 = vmatprep.subr.bf16.mxu0 %v34413_v55  ;;  %v23094_v0 = vpop.f32.mrb[240].mxu0  ;;  %26942 = vmatprep.mubr.f32.mxu1 %v4711_v56  ;;  %v4780_v28 = vcombine.high %v428_v19, %v428_v19  ;;  %v4787_v33 = vrot.slane %v428_v19, %v35466_v25 }
 0x519   : > { %v23164_v1 = vpop.f32.mrb[240].mxu1  ;;  %34418 = vmatprep.subr.bf16.mxu1 %v34417_v57  ;;  %v23095_v5 = vadd.f32 %v23094_v0, %v23025_v53  ;;  %v23096_v6 = vpop.f32.mrb[241].mxu0  ;;  %v4760_v53 = vrot.slane %v4746_v43, %v35466_v25  ;;  %v1075_v57 = vld [vmem:[%s35442_s22 + $0x12f8] sm:$0xff]  ;;  %v34437_v0 = vpack.c.bf16 %v1841_v52, %v1073_v51 }
 0x51a   : > { %v23166_v7 = vpop.f32.mrb[241].mxu1  ;;  %v34441_v2 = vpack.c.bf16 %v1843_v58, %v1075_v57  ;;  %v1074_v6 = vld [vmem:[%s35442_s22 + $0x12f0] sm:$0xff]  ;;  %v1851_v43 = vld [vmem:[%s35442_s22 + $0x2b38] sm:$0x3] }
 0x51b   : > { %v23165_v13 = vadd.f32 %v23164_v1, %v23095_v5  ;;  %v4762_v1 = vcombine.high %v4760_v53, %v4760_v53  ;;  %v1840_v5 = vld [vmem:[%s35442_s22 + $0x2ae0] sm:$0x3]  ;;  %v1842_v7 = vld [vmem:[%s35442_s22 + $0x2af0] sm:$0x3] }
 0x51c   : > { %v34443_v21 = vpack.c.bf16 %v1842_v7, %v1074_v6 }
 0x51d   : > { %26873 = vmatmul.mubr.f32.vlgmr.msra.gmra.mrb[38].mxu0 %v4702_v39  ;;  %v4744_v39 = vcombine.high %v4736_v23, %v4736_v23 }
 0x51e   : > { %26943 = vmatmul.mubr.f32.vlgmr.msra.gmra.mrb[38].mxu1 %v4709_v44  ;;  %34416 = vmatpush1.bf16.xpose.msra.mxu0 %v34415_v11  ;;  %v1068_v44 = vld [vmem:[%s35442_s22 + $0x12c0] sm:$0xff]  ;;  %v1077_v11 = vld [vmem:[%s35442_s22 + $0x1308] sm:$0xff] }
 0x51f   : > { %34420 = vmatpush1.bf16.xpose.msra.mxu1 %v34419_v12  ;;  %27012 = vmatprep.mubr.f32.mxu0 %v4727_v14  ;;  %v34431_v60 = vpack.c.bf16 %v1836_v45, %v1068_v44  ;;  %v1845_v12 = vld [vmem:[%s35442_s22 + $0x2b08] sm:$0x3] }
 0x520   : > { %34422 = vmatprep.subr.bf16.mxu0 %v34421_v15  ;;  %v23234_v24 = vpop.f32.mrb[242].mxu0  ;;  %27082 = vmatprep.mubr.f32.mxu1 %v4728_v16  ;;  %v429_v44 = vld [vmem:[%s35435_s12 + $0x4c8] sm:$0xff] }
 0x521   : > { %v23304_v26 = vpop.f32.mrb[242].mxu1  ;;  %34426 = vmatprep.subr.bf16.mxu1 %v34425_v17  ;;  %v23235_v30 = vadd.f32 %v23234_v24, %v23165_v13  ;;  %v23236_v31 = vpop.f32.mrb[243].mxu0  ;;  %v4777_v13 = vrot.slane %v4763_v3, %v35466_v25  ;;  %v1079_v17 = vld [vmem:[%s35442_s22 + $0x1318] sm:$0xff]  ;;  %v34445_v24 = vpack.c.bf16 %v1845_v12, %v1077_v11  ;;  %v4797_v52 = vcombine.high %v429_v44, %v429_v44 }
 0x522   : > { %v23306_v32 = vpop.f32.mrb[243].mxu1  ;;  %v34449_v27 = vpack.c.bf16 %v1847_v18, %v1079_v17  ;;  %v1078_v31 = vld [vmem:[%s35442_s22 + $0x1310] sm:$0xff]  ;;  %v4804_v57 = vrot.slane %v429_v44, %v35466_v25  ;;  %v1855_v3 = vld [vmem:[%s35442_s22 + $0x2b58] sm:$0x3] }
 0x523   : > { %v23305_v38 = vadd.f32 %v23304_v26, %v23235_v30  ;;  %v4779_v26 = vcombine.high %v4777_v13, %v4777_v13  ;;  %v1844_v30 = vld [vmem:[%s35442_s22 + $0x2b00] sm:$0x3]  ;;  %v1846_v32 = vld [vmem:[%s35442_s22 + $0x2b10] sm:$0x3] }
 0x524   : > { %v34451_v46 = vpack.c.bf16 %v1846_v32, %v1078_v31 }
 0x525   : > { %27013 = vmatmul.mubr.f32.vlgmr.msra.gmra.mrb[40].mxu0 %v4719_v63  ;;  %v4761_v63 = vcombine.high %v4753_v48, %v4753_v48 }
 0x526   : > { %27083 = vmatmul.mubr.f32.vlgmr.msra.gmra.mrb[40].mxu1 %v4726_v4  ;;  %34424 = vmatpush1.bf16.xpose.msra.mxu0 %v34423_v36  ;;  %v1072_v4 = vld [vmem:[%s35442_s22 + $0x12e0] sm:$0xff]  ;;  %v1081_v36 = vld [vmem:[%s35442_s22 + $0x1328] sm:$0xff] }
 0x527   : > { %34428 = vmatpush1.bf16.xpose.msra.mxu1 %v34427_v37  ;;  %27152 = vmatprep.mubr.f32.mxu0 %v4744_v39  ;;  %v34439_v20 = vpack.c.bf16 %v1840_v5, %v1072_v4  ;;  %v1849_v37 = vld [vmem:[%s35442_s22 + $0x2b28] sm:$0x3]  ;;  %v430_v4 = vld [vmem:[%s35435_s12 + $0x4d0] sm:$0xff] }
 0x528   : > { %34430 = vmatprep.subr.bf16.mxu0 %v34429_v40  ;;  %v23374_v49 = vpop.f32.mrb[244].mxu0  ;;  %27222 = vmatprep.mubr.f32.mxu1 %v4745_v41  ;;  %v4814_v12 = vcombine.high %v430_v4, %v430_v4  ;;  %v4821_v17 = vrot.slane %v430_v4, %v35466_v25 }
 0x529   : > { %v23444_v50 = vpop.f32.mrb[244].mxu1  ;;  %34434 = vmatprep.subr.bf16.mxu1 %v34433_v42  ;;  %v23375_v54 = vadd.f32 %v23374_v49, %v23305_v38  ;;  %v23376_v55 = vpop.f32.mrb[245].mxu0  ;;  %v4794_v38 = vrot.slane %v4780_v28, %v35466_v25  ;;  %v1083_v42 = vld [vmem:[%s35442_s22 + $0x1338] sm:$0xff]  ;;  %v34453_v49 = vpack.c.bf16 %v1849_v37, %v1081_v36 }
 0x52a   : > { %v23446_v56 = vpop.f32.mrb[245].mxu1  ;;  %v34457_v51 = vpack.c.bf16 %v1851_v43, %v1083_v42  ;;  %v1082_v55 = vld [vmem:[%s35442_s22 + $0x1330] sm:$0xff]  ;;  %v1859_v28 = vld [vmem:[%s35442_s22 + $0x2b78] sm:$0x3] }
 0x52b   : > { %v23445_v62 = vadd.f32 %v23444_v50, %v23375_v54  ;;  %v4796_v50 = vcombine.high %v4794_v38, %v4794_v38  ;;  %v1848_v54 = vld [vmem:[%s35442_s22 + $0x2b20] sm:$0x3]  ;;  %v1850_v56 = vld [vmem:[%s35442_s22 + $0x2b30] sm:$0x3] }
 0x52c   : > { %v34459_v6 = vpack.c.bf16 %v1850_v56, %v1082_v55 }
 0x52d   : > { %27153 = vmatmul.mubr.f32.vlgmr.msra.gmra.mrb[42].mxu0 %v4736_v23  ;;  %v4778_v23 = vcombine.high %v4770_v8, %v4770_v8 }
 0x52e   : > { %27223 = vmatmul.mubr.f32.vlgmr.msra.gmra.mrb[42].mxu1 %v4743_v29  ;;  %34432 = vmatpush1.bf16.xpose.msra.mxu0 %v34431_v60  ;;  %v1076_v29 = vld [vmem:[%s35442_s22 + $0x1300] sm:$0xff]  ;;  %v1085_v60 = vld [vmem:[%s35442_s22 + $0x1348] sm:$0xff] }
 0x52f   : > { %34436 = vmatpush1.bf16.xpose.msra.mxu1 %v34435_v61  ;;  %27292 = vmatprep.mubr.f32.mxu0 %v4761_v63  ;;  %v34447_v45 = vpack.c.bf16 %v1844_v30, %v1076_v29  ;;  %v1853_v61 = vld [vmem:[%s35442_s22 + $0x2b48] sm:$0x3]  ;;  %v431_v29 = vld [vmem:[%s35435_s12 + $0x4d8] sm:$0xff] }
 0x530   : > { %34438 = vmatprep.subr.bf16.mxu0 %v34437_v0  ;;  %v23514_v9 = vpop.f32.mrb[246].mxu0  ;;  %27362 = vmatprep.mubr.f32.mxu1 %v4762_v1  ;;  %v4831_v37 = vcombine.high %v431_v29, %v431_v29  ;;  %v4838_v42 = vrot.slane %v431_v29, %v35466_v25 }
 0x531   : > { %v23584_v10 = vpop.f32.mrb[246].mxu1  ;;  %34442 = vmatprep.subr.bf16.mxu1 %v34441_v2  ;;  %v23515_v14 = vadd.f32 %v23514_v9, %v23445_v62  ;;  %v23516_v15 = vpop.f32.mrb[247].mxu0  ;;  %v4811_v62 = vrot.slane %v4797_v52, %v35466_v25  ;;  %v1087_v2 = vld [vmem:[%s35442_s22 + $0x1358] sm:$0xff]  ;;  %v34461_v9 = vpack.c.bf16 %v1853_v61, %v1085_v60 }
 0x532   : > { %v23586_v16 = vpop.f32.mrb[247].mxu1  ;;  %v34465_v11 = vpack.c.bf16 %v1855_v3, %v1087_v2  ;;  %v1086_v15 = vld [vmem:[%s35442_s22 + $0x1350] sm:$0xff]  ;;  %v1863_v52 = vld [vmem:[%s35442_s22 + $0x2b98] sm:$0x3] }
 0x533   : > { %v23585_v22 = vadd.f32 %v23584_v10, %v23515_v14  ;;  %v4813_v10 = vcombine.high %v4811_v62, %v4811_v62  ;;  %v1852_v14 = vld [vmem:[%s35442_s22 + $0x2b40] sm:$0x3]  ;;  %v1854_v16 = vld [vmem:[%s35442_s22 + $0x2b50] sm:$0x3] }
 0x534   : > { %v34467_v31 = vpack.c.bf16 %v1854_v16, %v1086_v15 }
 0x535   : > { %27293 = vmatmul.mubr.f32.vlgmr.msra.gmra.mrb[44].mxu0 %v4753_v48  ;;  %v4795_v48 = vcombine.high %v4787_v33, %v4787_v33 }
 0x536   : > { %27363 = vmatmul.mubr.f32.vlgmr.msra.gmra.mrb[44].mxu1 %v4760_v53  ;;  %34440 = vmatpush1.bf16.xpose.msra.mxu0 %v34439_v20  ;;  %v1080_v53 = vld [vmem:[%s35442_s22 + $0x1320] sm:$0xff]  ;;  %v1089_v20 = vld [vmem:[%s35442_s22 + $0x1368] sm:$0xff] }
 0x537   : > { %34444 = vmatpush1.bf16.xpose.msra.mxu1 %v34443_v21  ;;  %27432 = vmatprep.mubr.f32.mxu0 %v4778_v23  ;;  %v34455_v5 = vpack.c.bf16 %v1848_v54, %v1080_v53  ;;  %v1857_v21 = vld [vmem:[%s35442_s22 + $0x2b68] sm:$0x3]  ;;  %v432_v53 = vld [vmem:[%s35435_s12 + $0x4e0] sm:$0xff] }
 0x538   : > { %34446 = vmatprep.subr.bf16.mxu0 %v34445_v24  ;;  %v23654_v34 = vpop.f32.mrb[248].mxu0  ;;  %27502 = vmatprep.mubr.f32.mxu1 %v4779_v26  ;;  %v4848_v61 = vcombine.high %v432_v53, %v432_v53  ;;  %v4855_v2 = vrot.slane %v432_v53, %v35466_v25 }
 0x539   : > { %v23724_v35 = vpop.f32.mrb[248].mxu1  ;;  %34450 = vmatprep.subr.bf16.mxu1 %v34449_v27  ;;  %v23655_v39 = vadd.f32 %v23654_v34, %v23585_v22  ;;  %v23656_v40 = vpop.f32.mrb[249].mxu0  ;;  %v4828_v22 = vrot.slane %v4814_v12, %v35466_v25  ;;  %v1091_v27 = vld [vmem:[%s35442_s22 + $0x1378] sm:$0xff]  ;;  %v34469_v34 = vpack.c.bf16 %v1857_v21, %v1089_v20 }
 0x53a   : > { %v23726_v41 = vpop.f32.mrb[249].mxu1  ;;  %v34473_v36 = vpack.c.bf16 %v1859_v28, %v1091_v27  ;;  %v1090_v40 = vld [vmem:[%s35442_s22 + $0x1370] sm:$0xff]  ;;  %v1867_v12 = vld [vmem:[%s35442_s22 + $0x2bb8] sm:$0x3] }
 0x53b   : > { %v23725_v47 = vadd.f32 %v23724_v35, %v23655_v39  ;;  %v4830_v35 = vcombine.high %v4828_v22, %v4828_v22  ;;  %v1856_v39 = vld [vmem:[%s35442_s22 + $0x2b60] sm:$0x3]  ;;  %v1858_v41 = vld [vmem:[%s35442_s22 + $0x2b70] sm:$0x3] }
 0x53c   : > { %v34475_v55 = vpack.c.bf16 %v1858_v41, %v1090_v40 }
 0x53d   : > { %27433 = vmatmul.mubr.f32.vlgmr.msra.gmra.mrb[46].mxu0 %v4770_v8  ;;  %v4812_v8 = vcombine.high %v4804_v57, %v4804_v57 }
 0x53e   : > { %27503 = vmatmul.mubr.f32.vlgmr.msra.gmra.mrb[46].mxu1 %v4777_v13  ;;  %34448 = vmatpush1.bf16.xpose.msra.mxu0 %v34447_v45  ;;  %v1084_v13 = vld [vmem:[%s35442_s22 + $0x1340] sm:$0xff]  ;;  %v1093_v45 = vld [vmem:[%s35442_s22 + $0x1388] sm:$0xff] }
 0x53f   : > { %34452 = vmatpush1.bf16.xpose.msra.mxu1 %v34451_v46  ;;  %27572 = vmatprep.mubr.f32.mxu0 %v4795_v48  ;;  %v34463_v30 = vpack.c.bf16 %v1852_v14, %v1084_v13  ;;  %v1861_v46 = vld [vmem:[%s35442_s22 + $0x2b88] sm:$0x3] }
 0x540   : > { %34454 = vmatprep.subr.bf16.mxu0 %v34453_v49  ;;  %v23794_v58 = vpop.f32.mrb[250].mxu0  ;;  %27642 = vmatprep.mubr.f32.mxu1 %v4796_v50  ;;  %v433_v13 = vld [vmem:[%s35435_s12 + $0x4e8] sm:$0xff] }
 0x541   : > { %v23864_v59 = vpop.f32.mrb[250].mxu1  ;;  %34458 = vmatprep.subr.bf16.mxu1 %v34457_v51  ;;  %v23795_v63 = vadd.f32 %v23794_v58, %v23725_v47  ;;  %v23796_v0 = vpop.f32.mrb[251].mxu0  ;;  %v4845_v47 = vrot.slane %v4831_v37, %v35466_v25  ;;  %v1095_v51 = vld [vmem:[%s35442_s22 + $0x1398] sm:$0xff]  ;;  %v34477_v58 = vpack.c.bf16 %v1861_v46, %v1093_v45  ;;  %v4865_v21 = vcombine.high %v433_v13, %v433_v13 }
 0x542   : > { %v23866_v1 = vpop.f32.mrb[251].mxu1  ;;  %v34481_v60 = vpack.c.bf16 %v1863_v52, %v1095_v51  ;;  %v1094_v0 = vld [vmem:[%s35442_s22 + $0x1390] sm:$0xff]  ;;  %v4872_v27 = vrot.slane %v433_v13, %v35466_v25  ;;  %v1871_v37 = vld [vmem:[%s35442_s22 + $0x2bd8] sm:$0x3] }
 0x543   : > { %v23865_v7 = vadd.f32 %v23864_v59, %v23795_v63  ;;  %v4847_v59 = vcombine.high %v4845_v47, %v4845_v47  ;;  %v1860_v63 = vld [vmem:[%s35442_s22 + $0x2b80] sm:$0x3]  ;;  %v1862_v1 = vld [vmem:[%s35442_s22 + $0x2b90] sm:$0x3] }
 0x544   : > { %v34483_v15 = vpack.c.bf16 %v1862_v1, %v1094_v0 }
 0x545   : > { %27573 = vmatmul.mubr.f32.vlgmr.msra.gmra.mrb[48].mxu0 %v4787_v33  ;;  %v4829_v33 = vcombine.high %v4821_v17, %v4821_v17 }
 0x546   : > { %27643 = vmatmul.mubr.f32.vlgmr.msra.gmra.mrb[48].mxu1 %v4794_v38  ;;  %34456 = vmatpush1.bf16.xpose.msra.mxu0 %v34455_v5  ;;  %v1088_v38 = vld [vmem:[%s35442_s22 + $0x1360] sm:$0xff]  ;;  %v1097_v5 = vld [vmem:[%s35442_s22 + $0x13a8] sm:$0xff] }
 0x547   : > { %34460 = vmatpush1.bf16.xpose.msra.mxu1 %v34459_v6  ;;  %27712 = vmatprep.mubr.f32.mxu0 %v4812_v8  ;;  %v34471_v54 = vpack.c.bf16 %v1856_v39, %v1088_v38  ;;  %v1865_v6 = vld [vmem:[%s35442_s22 + $0x2ba8] sm:$0x3]  ;;  %v434_v38 = vld [vmem:[%s35435_s12 + $0x4f0] sm:$0xff] }
 0x548   : > { %34462 = vmatprep.subr.bf16.mxu0 %v34461_v9  ;;  %v23934_v18 = vpop.f32.mrb[252].mxu0  ;;  %27782 = vmatprep.mubr.f32.mxu1 %v4813_v10  ;;  %v4882_v46 = vcombine.high %v434_v38, %v434_v38  ;;  %v4889_v51 = vrot.slane %v434_v38, %v35466_v25 }
 0x549   : > { %v24004_v19 = vpop.f32.mrb[252].mxu1  ;;  %34466 = vmatprep.subr.bf16.mxu1 %v34465_v11  ;;  %v23935_v23 = vadd.f32 %v23934_v18, %v23865_v7  ;;  %v23936_v24 = vpop.f32.mrb[253].mxu0  ;;  %v4862_v7 = vrot.slane %v4848_v61, %v35466_v25  ;;  %v1099_v11 = vld [vmem:[%s35442_s22 + $0x13b8] sm:$0xff]  ;;  %v34485_v18 = vpack.c.bf16 %v1865_v6, %v1097_v5 }
 0x54a   : > { %v24006_v26 = vpop.f32.mrb[253].mxu1  ;;  %v34489_v20 = vpack.c.bf16 %v1867_v12, %v1099_v11  ;;  %v1098_v24 = vld [vmem:[%s35442_s22 + $0x13b0] sm:$0xff]  ;;  %v1875_v61 = vld [vmem:[%s35442_s22 + $0x2bf8] sm:$0x3] }
 0x54b   : > { %v24005_v32 = vadd.f32 %v24004_v19, %v23935_v23  ;;  %v4864_v19 = vcombine.high %v4862_v7, %v4862_v7  ;;  %v1864_v23 = vld [vmem:[%s35442_s22 + $0x2ba0] sm:$0x3]  ;;  %v1866_v26 = vld [vmem:[%s35442_s22 + $0x2bb0] sm:$0x3] }
 0x54c   : > { %v34491_v40 = vpack.c.bf16 %v1866_v26, %v1098_v24 }
 0x54d   : > { %27713 = vmatmul.mubr.f32.vlgmr.msra.gmra.mrb[50].mxu0 %v4804_v57  ;;  %v4846_v57 = vcombine.high %v4838_v42, %v4838_v42 }
 0x54e   : > { %27783 = vmatmul.mubr.f32.vlgmr.msra.gmra.mrb[50].mxu1 %v4811_v62  ;;  %34464 = vmatpush1.bf16.xpose.msra.mxu0 %v34463_v30  ;;  %v1092_v62 = vld [vmem:[%s35442_s22 + $0x1380] sm:$0xff]  ;;  %v1101_v30 = vld [vmem:[%s35442_s22 + $0x13c8] sm:$0xff] }
 0x54f   : > { %34468 = vmatpush1.bf16.xpose.msra.mxu1 %v34467_v31  ;;  %27852 = vmatprep.mubr.f32.mxu0 %v4829_v33  ;;  %v34479_v14 = vpack.c.bf16 %v1860_v63, %v1092_v62  ;;  %v1869_v31 = vld [vmem:[%s35442_s22 + $0x2bc8] sm:$0x3]  ;;  %v435_v62 = vld [vmem:[%s35435_s12 + $0x4f8] sm:$0xff] }
 0x550   : > { %34470 = vmatprep.subr.bf16.mxu0 %v34469_v34  ;;  %v24074_v43 = vpop.f32.mrb[254].mxu0  ;;  %27922 = vmatprep.mubr.f32.mxu1 %v4830_v35  ;;  %v4899_v6 = vcombine.high %v435_v62, %v435_v62  ;;  %v4906_v11 = vrot.slane %v435_v62, %v35466_v25 }
 0x551   : > { %v24144_v44 = vpop.f32.mrb[254].mxu1  ;;  %34474 = vmatprep.subr.bf16.mxu1 %v34473_v36  ;;  %v24075_v48 = vadd.f32 %v24074_v43, %v24005_v32  ;;  %v24076_v49 = vpop.f32.mrb[255].mxu0  ;;  %v4879_v32 = vrot.slane %v4865_v21, %v35466_v25  ;;  %v1103_v36 = vld [vmem:[%s35442_s22 + $0x13d8] sm:$0xff]  ;;  %v34493_v43 = vpack.c.bf16 %v1869_v31, %v1101_v30 }
 0x552   : > { %v24146_v50 = vpop.f32.mrb[255].mxu1  ;;  %v34497_v45 = vpack.c.bf16 %v1871_v37, %v1103_v36  ;;  %v1102_v49 = vld [vmem:[%s35442_s22 + $0x13d0] sm:$0xff]  ;;  %v1879_v21 = vld [vmem:[%s35442_s22 + $0x2c18] sm:$0x3] }
 0x553   : > { %v24145_v56 = vadd.f32 %v24144_v44, %v24075_v48  ;;  %v4881_v44 = vcombine.high %v4879_v32, %v4879_v32  ;;  %v1868_v48 = vld [vmem:[%s35442_s22 + $0x2bc0] sm:$0x3]  ;;  %v1870_v50 = vld [vmem:[%s35442_s22 + $0x2bd0] sm:$0x3] }
 0x554   : > { %v34499_v0 = vpack.c.bf16 %v1870_v50, %v1102_v49 }
 0x555   : > { %27853 = vmatmul.mubr.f32.vlgmr.msra.gmra.mrb[52].mxu0 %v4821_v17  ;;  %v4863_v17 = vcombine.high %v4855_v2, %v4855_v2 }
 0x556   : > { %27923 = vmatmul.mubr.f32.vlgmr.msra.gmra.mrb[52].mxu1 %v4828_v22  ;;  %34472 = vmatpush1.bf16.xpose.msra.mxu0 %v34471_v54  ;;  %v1096_v22 = vld [vmem:[%s35442_s22 + $0x13a0] sm:$0xff]  ;;  %v1105_v54 = vld [vmem:[%s35442_s22 + $0x13e8] sm:$0xff] }
 0x557   : > { %34476 = vmatpush1.bf16.xpose.msra.mxu1 %v34475_v55  ;;  %27992 = vmatprep.mubr.f32.mxu0 %v4846_v57  ;;  %v34487_v39 = vpack.c.bf16 %v1864_v23, %v1096_v22  ;;  %v1873_v55 = vld [vmem:[%s35442_s22 + $0x2be8] sm:$0x3]  ;;  %v436_v22 = vld [vmem:[%s35435_s12 + $0x500] sm:$0xff] }
 0x558   : > { %34478 = vmatprep.subr.bf16.mxu0 %v34477_v58  ;;  %v24214_v3 = vpop.f32.mrb[0].mxu0  ;;  %28062 = vmatprep.mubr.f32.mxu1 %v4847_v59  ;;  %v4916_v31 = vcombine.high %v436_v22, %v436_v22  ;;  %v4923_v36 = vrot.slane %v436_v22, %v35466_v25 }
 0x559   : > { %v24284_v4 = vpop.f32.mrb[0].mxu1  ;;  %34482 = vmatprep.subr.bf16.mxu1 %v34481_v60  ;;  %v24215_v8 = vadd.f32 %v24214_v3, %v24145_v56  ;;  %v24216_v9 = vpop.f32.mrb[1].mxu0  ;;  %v4896_v56 = vrot.slane %v4882_v46, %v35466_v25  ;;  %v1107_v60 = vld [vmem:[%s35442_s22 + $0x13f8] sm:$0xff]  ;;  %v34501_v3 = vpack.c.bf16 %v1873_v55, %v1105_v54 }
 0x55a   : > { %v24286_v10 = vpop.f32.mrb[1].mxu1  ;;  %v34505_v5 = vpack.c.bf16 %v1875_v61, %v1107_v60  ;;  %v1106_v9 = vld [vmem:[%s35442_s22 + $0x13f0] sm:$0xff]  ;;  %v1883_v46 = vld [vmem:[%s35442_s22 + $0x2c38] sm:$0x3] }
 0x55b   : > { %v24285_v16 = vadd.f32 %v24284_v4, %v24215_v8  ;;  %v4898_v4 = vcombine.high %v4896_v56, %v4896_v56  ;;  %v1872_v8 = vld [vmem:[%s35442_s22 + $0x2be0] sm:$0x3]  ;;  %v1874_v10 = vld [vmem:[%s35442_s22 + $0x2bf0] sm:$0x3] }
 0x55c   : > { %v34507_v24 = vpack.c.bf16 %v1874_v10, %v1106_v9 }
 0x55d   : > { %27993 = vmatmul.mubr.f32.vlgmr.msra.gmra.mrb[54].mxu0 %v4838_v42  ;;  %v4880_v42 = vcombine.high %v4872_v27, %v4872_v27 }
 0x55e   : > { %28063 = vmatmul.mubr.f32.vlgmr.msra.gmra.mrb[54].mxu1 %v4845_v47  ;;  %34480 = vmatpush1.bf16.xpose.msra.mxu0 %v34479_v14  ;;  %v1100_v47 = vld [vmem:[%s35442_s22 + $0x13c0] sm:$0xff]  ;;  %v1109_v14 = vld [vmem:[%s35442_s22 + $0x1408] sm:$0xff] }
 0x55f   : > { %34484 = vmatpush1.bf16.xpose.msra.mxu1 %v34483_v15  ;;  %28132 = vmatprep.mubr.f32.mxu0 %v4863_v17  ;;  %v34495_v63 = vpack.c.bf16 %v1868_v48, %v1100_v47  ;;  %v1877_v15 = vld [vmem:[%s35442_s22 + $0x2c08] sm:$0x3] }
 0x560   : > { %34486 = vmatprep.subr.bf16.mxu0 %v34485_v18  ;;  %v24354_v28 = vpop.f32.mrb[2].mxu0  ;;  %28202 = vmatprep.mubr.f32.mxu1 %v4864_v19  ;;  %v437_v47 = vld [vmem:[%s35435_s12 + $0x508] sm:$0xff] }
 0x561   : > { %v24424_v29 = vpop.f32.mrb[2].mxu1  ;;  %34490 = vmatprep.subr.bf16.mxu1 %v34489_v20  ;;  %v24355_v33 = vadd.f32 %v24354_v28, %v24285_v16  ;;  %v24356_v34 = vpop.f32.mrb[3].mxu0  ;;  %v4913_v16 = vrot.slane %v4899_v6, %v35466_v25  ;;  %v1111_v20 = vld [vmem:[%s35442_s22 + $0x1418] sm:$0xff]  ;;  %v34509_v28 = vpack.c.bf16 %v1877_v15, %v1109_v14  ;;  %v4933_v55 = vcombine.high %v437_v47, %v437_v47 }
 0x562   : > { %v24426_v35 = vpop.f32.mrb[3].mxu1  ;;  %v34513_v30 = vpack.c.bf16 %v1879_v21, %v1111_v20  ;;  %v1110_v34 = vld [vmem:[%s35442_s22 + $0x1410] sm:$0xff]  ;;  %v4940_v60 = vrot.slane %v437_v47, %v35466_v25  ;;  %v1887_v6 = vld [vmem:[%s35442_s22 + $0x2c58] sm:$0x3] }
 0x563   : > { %v24425_v41 = vadd.f32 %v24424_v29, %v24355_v33  ;;  %v4915_v29 = vcombine.high %v4913_v16, %v4913_v16  ;;  %v1876_v33 = vld [vmem:[%s35442_s22 + $0x2c00] sm:$0x3]  ;;  %v1878_v35 = vld [vmem:[%s35442_s22 + $0x2c10] sm:$0x3] }
 0x564   : > { %v34515_v49 = vpack.c.bf16 %v1878_v35, %v1110_v34 }
 0x565   : > { %28133 = vmatmul.mubr.f32.vlgmr.msra.gmra.mrb[56].mxu0 %v4855_v2  ;;  %v4897_v2 = vcombine.high %v4889_v51, %v4889_v51 }
 0x566   : > { %28203 = vmatmul.mubr.f32.vlgmr.msra.gmra.mrb[56].mxu1 %v4862_v7  ;;  %34488 = vmatpush1.bf16.xpose.msra.mxu0 %v34487_v39  ;;  %v1104_v7 = vld [vmem:[%s35442_s22 + $0x13e0] sm:$0xff]  ;;  %v1113_v39 = vld [vmem:[%s35442_s22 + $0x1428] sm:$0xff] }
 0x567   : > { %34492 = vmatpush1.bf16.xpose.msra.mxu1 %v34491_v40  ;;  %28272 = vmatprep.mubr.f32.mxu0 %v4880_v42  ;;  %v34503_v23 = vpack.c.bf16 %v1872_v8, %v1104_v7  ;;  %v1881_v40 = vld [vmem:[%s35442_s22 + $0x2c28] sm:$0x3]  ;;  %v438_v7 = vld [vmem:[%s35435_s12 + $0x510] sm:$0xff] }
 0x568   : > { %34494 = vmatprep.subr.bf16.mxu0 %v34493_v43  ;;  %v24494_v52 = vpop.f32.mrb[4].mxu0  ;;  %28342 = vmatprep.mubr.f32.mxu1 %v4881_v44  ;;  %v4950_v15 = vcombine.high %v438_v7, %v438_v7  ;;  %v4957_v20 = vrot.slane %v438_v7, %v35466_v25 }
 0x569   : > { %v24564_v53 = vpop.f32.mrb[4].mxu1  ;;  %34498 = vmatprep.subr.bf16.mxu1 %v34497_v45  ;;  %v24495_v57 = vadd.f32 %v24494_v52, %v24425_v41  ;;  %v24496_v58 = vpop.f32.mrb[5].mxu0  ;;  %v4930_v41 = vrot.slane %v4916_v31, %v35466_v25  ;;  %v1115_v45 = vld [vmem:[%s35442_s22 + $0x1438] sm:$0xff]  ;;  %v34517_v52 = vpack.c.bf16 %v1881_v40, %v1113_v39 }
 0x56a   : > { %v24566_v59 = vpop.f32.mrb[5].mxu1  ;;  %v34521_v54 = vpack.c.bf16 %v1883_v46, %v1115_v45  ;;  %v1114_v58 = vld [vmem:[%s35442_s22 + $0x1430] sm:$0xff]  ;;  %v1891_v31 = vld [vmem:[%s35442_s22 + $0x2c78] sm:$0x3] }
 0x56b   : > { %v24565_v1 = vadd.f32 %v24564_v53, %v24495_v57  ;;  %v4932_v53 = vcombine.high %v4930_v41, %v4930_v41  ;;  %v1880_v57 = vld [vmem:[%s35442_s22 + $0x2c20] sm:$0x3]  ;;  %v1882_v59 = vld [vmem:[%s35442_s22 + $0x2c30] sm:$0x3] }
 0x56c   : > { %v34523_v9 = vpack.c.bf16 %v1882_v59, %v1114_v58 }
 0x56d   : > { %28273 = vmatmul.mubr.f32.vlgmr.msra.gmra.mrb[58].mxu0 %v4872_v27  ;;  %v4914_v27 = vcombine.high %v4906_v11, %v4906_v11 }
 0x56e   : > { %28343 = vmatmul.mubr.f32.vlgmr.msra.gmra.mrb[58].mxu1 %v4879_v32  ;;  %34496 = vmatpush1.bf16.xpose.msra.mxu0 %v34495_v63  ;;  %v1108_v32 = vld [vmem:[%s35442_s22 + $0x1400] sm:$0xff]  ;;  %v1117_v63 = vld [vmem:[%s35442_s22 + $0x1448] sm:$0xff] }
 0x56f   : > { %34500 = vmatpush1.bf16.xpose.msra.mxu1 %v34499_v0  ;;  %28412 = vmatprep.mubr.f32.mxu0 %v4897_v2  ;;  %v34511_v48 = vpack.c.bf16 %v1876_v33, %v1108_v32  ;;  %v1885_v0 = vld [vmem:[%s35442_s22 + $0x2c48] sm:$0x3]  ;;  %v439_v32 = vld [vmem:[%s35435_s12 + $0x518] sm:$0xff] }
 0x570   : > { %34502 = vmatprep.subr.bf16.mxu0 %v34501_v3  ;;  %v24634_v12 = vpop.f32.mrb[6].mxu0  ;;  %28482 = vmatprep.mubr.f32.mxu1 %v4898_v4  ;;  %v4967_v40 = vcombine.high %v439_v32, %v439_v32  ;;  %v4974_v45 = vrot.slane %v439_v32, %v35466_v25 }
 0x571   : > { %v24704_v13 = vpop.f32.mrb[6].mxu1  ;;  %34506 = vmatprep.subr.bf16.mxu1 %v34505_v5  ;;  %v24635_v17 = vadd.f32 %v24634_v12, %v24565_v1  ;;  %v24636_v18 = vpop.f32.mrb[7].mxu0  ;;  %v4947_v1 = vrot.slane %v4933_v55, %v35466_v25  ;;  %v1119_v5 = vld [vmem:[%s35442_s22 + $0x1458] sm:$0xff]  ;;  %v34525_v12 = vpack.c.bf16 %v1885_v0, %v1117_v63 }
 0x572   : > { %v24706_v19 = vpop.f32.mrb[7].mxu1  ;;  %v34529_v14 = vpack.c.bf16 %v1887_v6, %v1119_v5  ;;  %v1118_v18 = vld [vmem:[%s35442_s22 + $0x1450] sm:$0xff]  ;;  %v1895_v55 = vld [vmem:[%s35442_s22 + $0x2c98] sm:$0x3] }
 0x573   : > { %v24705_v26 = vadd.f32 %v24704_v13, %v24635_v17  ;;  %v4949_v13 = vcombine.high %v4947_v1, %v4947_v1  ;;  %v1884_v17 = vld [vmem:[%s35442_s22 + $0x2c40] sm:$0x3]  ;;  %v1886_v19 = vld [vmem:[%s35442_s22 + $0x2c50] sm:$0x3] }
 0x574   : > { %v34531_v34 = vpack.c.bf16 %v1886_v19, %v1118_v18 }
 0x575   : > { %28413 = vmatmul.mubr.f32.vlgmr.msra.gmra.mrb[60].mxu0 %v4889_v51  ;;  %v4931_v51 = vcombine.high %v4923_v36, %v4923_v36 }
 0x576   : > { %28483 = vmatmul.mubr.f32.vlgmr.msra.gmra.mrb[60].mxu1 %v4896_v56  ;;  %34504 = vmatpush1.bf16.xpose.msra.mxu0 %v34503_v23  ;;  %v1112_v56 = vld [vmem:[%s35442_s22 + $0x1420] sm:$0xff]  ;;  %v1121_v23 = vld [vmem:[%s35442_s22 + $0x1468] sm:$0xff] }
 0x577   : > { %34508 = vmatpush1.bf16.xpose.msra.mxu1 %v34507_v24  ;;  %28552 = vmatprep.mubr.f32.mxu0 %v4914_v27  ;;  %v34519_v8 = vpack.c.bf16 %v1880_v57, %v1112_v56  ;;  %v1889_v24 = vld [vmem:[%s35442_s22 + $0x2c68] sm:$0x3]  ;;  %v440_v56 = vld [vmem:[%s35435_s12 + $0x520] sm:$0xff] }
 0x578   : > { %34510 = vmatprep.subr.bf16.mxu0 %v34509_v28  ;;  %v24774_v37 = vpop.f32.mrb[8].mxu0  ;;  %28622 = vmatprep.mubr.f32.mxu1 %v4915_v29  ;;  %v4984_v0 = vcombine.high %v440_v56, %v440_v56  ;;  %v4991_v5 = vrot.slane %v440_v56, %v35466_v25 }
 0x579   : > { %v24844_v38 = vpop.f32.mrb[8].mxu1  ;;  %34514 = vmatprep.subr.bf16.mxu1 %v34513_v30  ;;  %v24775_v42 = vadd.f32 %v24774_v37, %v24705_v26  ;;  %v24776_v43 = vpop.f32.mrb[9].mxu0  ;;  %v4964_v26 = vrot.slane %v4950_v15, %v35466_v25  ;;  %v1123_v30 = vld [vmem:[%s35442_s22 + $0x1478] sm:$0xff]  ;;  %v34533_v37 = vpack.c.bf16 %v1889_v24, %v1121_v23 }
 0x57a   : > { %v24846_v44 = vpop.f32.mrb[9].mxu1  ;;  %v34537_v39 = vpack.c.bf16 %v1891_v31, %v1123_v30  ;;  %v1122_v43 = vld [vmem:[%s35442_s22 + $0x1470] sm:$0xff]  ;;  %v1899_v15 = vld [vmem:[%s35442_s22 + $0x2cb8] sm:$0x3] }
 0x57b   : > { %v24845_v50 = vadd.f32 %v24844_v38, %v24775_v42  ;;  %v4966_v38 = vcombine.high %v4964_v26, %v4964_v26  ;;  %v1888_v42 = vld [vmem:[%s35442_s22 + $0x2c60] sm:$0x3]  ;;  %v1890_v44 = vld [vmem:[%s35442_s22 + $0x2c70] sm:$0x3] }
 0x57c   : > { %v34539_v58 = vpack.c.bf16 %v1890_v44, %v1122_v43 }
 0x57d   : > { %28553 = vmatmul.mubr.f32.vlgmr.msra.gmra.mrb[62].mxu0 %v4906_v11  ;;  %v4948_v11 = vcombine.high %v4940_v60, %v4940_v60 }
 0x57e   : > { %28623 = vmatmul.mubr.f32.vlgmr.msra.gmra.mrb[62].mxu1 %v4913_v16  ;;  %34512 = vmatpush1.bf16.xpose.msra.mxu0 %v34511_v48  ;;  %v1116_v16 = vld [vmem:[%s35442_s22 + $0x1440] sm:$0xff]  ;;  %v1125_v48 = vld [vmem:[%s35442_s22 + $0x1488] sm:$0xff] }
 0x57f   : > { %34516 = vmatpush1.bf16.xpose.msra.mxu1 %v34515_v49  ;;  %28692 = vmatprep.mubr.f32.mxu0 %v4931_v51  ;;  %v34527_v33 = vpack.c.bf16 %v1884_v17, %v1116_v16  ;;  %v1893_v49 = vld [vmem:[%s35442_s22 + $0x2c88] sm:$0x3] }
 0x580   : > { %34518 = vmatprep.subr.bf16.mxu0 %v34517_v52  ;;  %v24914_v61 = vpop.f32.mrb[10].mxu0  ;;  %28762 = vmatprep.mubr.f32.mxu1 %v4932_v53  ;;  %v441_v16 = vld [vmem:[%s35435_s12 + $0x528] sm:$0xff] }
 0x581   : > { %v24984_v62 = vpop.f32.mrb[10].mxu1  ;;  %34522 = vmatprep.subr.bf16.mxu1 %v34521_v54  ;;  %v24915_v2 = vadd.f32 %v24914_v61, %v24845_v50  ;;  %v24916_v3 = vpop.f32.mrb[11].mxu0  ;;  %v4981_v50 = vrot.slane %v4967_v40, %v35466_v25  ;;  %v1127_v54 = vld [vmem:[%s35442_s22 + $0x1498] sm:$0xff]  ;;  %v34541_v61 = vpack.c.bf16 %v1893_v49, %v1125_v48  ;;  %v5001_v24 = vcombine.high %v441_v16, %v441_v16 }
 0x582   : > { %v24986_v4 = vpop.f32.mrb[11].mxu1  ;;  %v34545_v63 = vpack.c.bf16 %v1895_v55, %v1127_v54  ;;  %v1126_v3 = vld [vmem:[%s35442_s22 + $0x1490] sm:$0xff]  ;;  %v5008_v30 = vrot.slane %v441_v16, %v35466_v25  ;;  %v1903_v40 = vld [vmem:[%s35442_s22 + $0x2cd8] sm:$0x3] }
 0x583   : > { %v24985_v10 = vadd.f32 %v24984_v62, %v24915_v2  ;;  %v4983_v62 = vcombine.high %v4981_v50, %v4981_v50  ;;  %v1892_v2 = vld [vmem:[%s35442_s22 + $0x2c80] sm:$0x3]  ;;  %v1894_v4 = vld [vmem:[%s35442_s22 + $0x2c90] sm:$0x3] }
 0x584   : > { %v34547_v18 = vpack.c.bf16 %v1894_v4, %v1126_v3 }
 0x585   : > { %28693 = vmatmul.mubr.f32.vlgmr.msra.gmra.mrb[64].mxu0 %v4923_v36  ;;  %v4965_v36 = vcombine.high %v4957_v20, %v4957_v20 }
 0x586   : > { %28763 = vmatmul.mubr.f32.vlgmr.msra.gmra.mrb[64].mxu1 %v4930_v41  ;;  %34520 = vmatpush1.bf16.xpose.msra.mxu0 %v34519_v8  ;;  %v1120_v41 = vld [vmem:[%s35442_s22 + $0x1460] sm:$0xff]  ;;  %v1129_v8 = vld [vmem:[%s35442_s22 + $0x14a8] sm:$0xff] }
 0x587   : > { %34524 = vmatpush1.bf16.xpose.msra.mxu1 %v34523_v9  ;;  %28832 = vmatprep.mubr.f32.mxu0 %v4948_v11  ;;  %v34535_v57 = vpack.c.bf16 %v1888_v42, %v1120_v41  ;;  %v1897_v9 = vld [vmem:[%s35442_s22 + $0x2ca8] sm:$0x3]  ;;  %v442_v41 = vld [vmem:[%s35435_s12 + $0x530] sm:$0xff] }
 0x588   : > { %34526 = vmatprep.subr.bf16.mxu0 %v34525_v12  ;;  %v25054_v21 = vpop.f32.mrb[12].mxu0  ;;  %28902 = vmatprep.mubr.f32.mxu1 %v4949_v13  ;;  %v5018_v49 = vcombine.high %v442_v41, %v442_v41  ;;  %v5025_v54 = vrot.slane %v442_v41, %v35466_v25 }
 0x589   : > { %v25124_v22 = vpop.f32.mrb[12].mxu1  ;;  %34530 = vmatprep.subr.bf16.mxu1 %v34529_v14  ;;  %v25055_v27 = vadd.f32 %v25054_v21, %v24985_v10  ;;  %v25056_v28 = vpop.f32.mrb[13].mxu0  ;;  %v4998_v10 = vrot.slane %v4984_v0, %v35466_v25  ;;  %v1131_v14 = vld [vmem:[%s35442_s22 + $0x14b8] sm:$0xff]  ;;  %v34549_v21 = vpack.c.bf16 %v1897_v9, %v1129_v8 }
 0x58a   : > { %v25126_v29 = vpop.f32.mrb[13].mxu1  ;;  %v34553_v23 = vpack.c.bf16 %v1899_v15, %v1131_v14  ;;  %v1130_v28 = vld [vmem:[%s35442_s22 + $0x14b0] sm:$0xff]  ;;  %v1907_v0 = vld [vmem:[%s35442_s22 + $0x2cf8] sm:$0x3] }
 0x58b   : > { %v25125_v35 = vadd.f32 %v25124_v22, %v25055_v27  ;;  %v5000_v22 = vcombine.high %v4998_v10, %v4998_v10  ;;  %v1896_v27 = vld [vmem:[%s35442_s22 + $0x2ca0] sm:$0x3]  ;;  %v1898_v29 = vld [vmem:[%s35442_s22 + $0x2cb0] sm:$0x3] }
 0x58c   : > { %v34555_v43 = vpack.c.bf16 %v1898_v29, %v1130_v28 }
 0x58d   : > { %28833 = vmatmul.mubr.f32.vlgmr.msra.gmra.mrb[66].mxu0 %v4940_v60  ;;  %v4982_v60 = vcombine.high %v4974_v45, %v4974_v45 }
 0x58e   : > { %28903 = vmatmul.mubr.f32.vlgmr.msra.gmra.mrb[66].mxu1 %v4947_v1  ;;  %34528 = vmatpush1.bf16.xpose.msra.mxu0 %v34527_v33  ;;  %v1124_v1 = vld [vmem:[%s35442_s22 + $0x1480] sm:$0xff]  ;;  %v1133_v33 = vld [vmem:[%s35442_s22 + $0x14c8] sm:$0xff] }
 0x58f   : > { %34532 = vmatpush1.bf16.xpose.msra.mxu1 %v34531_v34  ;;  %28972 = vmatprep.mubr.f32.mxu0 %v4965_v36  ;;  %v34543_v17 = vpack.c.bf16 %v1892_v2, %v1124_v1  ;;  %v1901_v34 = vld [vmem:[%s35442_s22 + $0x2cc8] sm:$0x3]  ;;  %v443_v1 = vld [vmem:[%s35435_s12 + $0x538] sm:$0xff] }
 0x590   : > { %34534 = vmatprep.subr.bf16.mxu0 %v34533_v37  ;;  %v25194_v46 = vpop.f32.mrb[14].mxu0  ;;  %29042 = vmatprep.mubr.f32.mxu1 %v4966_v38  ;;  %v5035_v9 = vcombine.high %v443_v1, %v443_v1  ;;  %v5042_v14 = vrot.slane %v443_v1, %v35466_v25 }
 0x591   : > { %v25264_v47 = vpop.f32.mrb[14].mxu1  ;;  %34538 = vmatprep.subr.bf16.mxu1 %v34537_v39  ;;  %v25195_v51 = vadd.f32 %v25194_v46, %v25125_v35  ;;  %v25196_v52 = vpop.f32.mrb[15].mxu0  ;;  %v5015_v35 = vrot.slane %v5001_v24, %v35466_v25  ;;  %v1135_v39 = vld [vmem:[%s35442_s22 + $0x14d8] sm:$0xff]  ;;  %v34557_v46 = vpack.c.bf16 %v1901_v34, %v1133_v33 }
 0x592   : > { %v25266_v53 = vpop.f32.mrb[15].mxu1  ;;  %v34561_v48 = vpack.c.bf16 %v1903_v40, %v1135_v39  ;;  %v1134_v52 = vld [vmem:[%s35442_s22 + $0x14d0] sm:$0xff]  ;;  %v1911_v24 = vld [vmem:[%s35442_s22 + $0x2d18] sm:$0x3] }
 0x593   : > { %v25265_v59 = vadd.f32 %v25264_v47, %v25195_v51  ;;  %v5017_v47 = vcombine.high %v5015_v35, %v5015_v35  ;;  %v1900_v51 = vld [vmem:[%s35442_s22 + $0x2cc0] sm:$0x3]  ;;  %v1902_v53 = vld [vmem:[%s35442_s22 + $0x2cd0] sm:$0x3] }
 0x594   : > { %v34563_v3 = vpack.c.bf16 %v1902_v53, %v1134_v52 }
 0x595   : > { %28973 = vmatmul.mubr.f32.vlgmr.msra.gmra.mrb[68].mxu0 %v4957_v20  ;;  %v4999_v20 = vcombine.high %v4991_v5, %v4991_v5 }
 0x596   : > { %29043 = vmatmul.mubr.f32.vlgmr.msra.gmra.mrb[68].mxu1 %v4964_v26  ;;  %34536 = vmatpush1.bf16.xpose.msra.mxu0 %v34535_v57  ;;  %v1128_v26 = vld [vmem:[%s35442_s22 + $0x14a0] sm:$0xff]  ;;  %v1137_v57 = vld [vmem:[%s35442_s22 + $0x14e8] sm:$0xff] }
 0x597   : > { %34540 = vmatpush1.bf16.xpose.msra.mxu1 %v34539_v58  ;;  %29112 = vmatprep.mubr.f32.mxu0 %v4982_v60  ;;  %v34551_v42 = vpack.c.bf16 %v1896_v27, %v1128_v26  ;;  %v1905_v58 = vld [vmem:[%s35442_s22 + $0x2ce8] sm:$0x3]  ;;  %v444_v26 = vld [vmem:[%s35435_s12 + $0x540] sm:$0xff] }
 0x598   : > { %34542 = vmatprep.subr.bf16.mxu0 %v34541_v61  ;;  %v25334_v6 = vpop.f32.mrb[16].mxu0  ;;  %29182 = vmatprep.mubr.f32.mxu1 %v4983_v62  ;;  %v5052_v34 = vcombine.high %v444_v26, %v444_v26  ;;  %v5059_v39 = vrot.slane %v444_v26, %v35466_v25 }
 0x599   : > { %v25404_v7 = vpop.f32.mrb[16].mxu1  ;;  %34546 = vmatprep.subr.bf16.mxu1 %v34545_v63  ;;  %v25335_v11 = vadd.f32 %v25334_v6, %v25265_v59  ;;  %v25336_v12 = vpop.f32.mrb[17].mxu0  ;;  %v5032_v59 = vrot.slane %v5018_v49, %v35466_v25  ;;  %v1139_v63 = vld [vmem:[%s35442_s22 + $0x14f8] sm:$0xff]  ;;  %v34565_v6 = vpack.c.bf16 %v1905_v58, %v1137_v57 }
 0x59a   : > { %v25406_v13 = vpop.f32.mrb[17].mxu1  ;;  %v34569_v8 = vpack.c.bf16 %v1907_v0, %v1139_v63  ;;  %v1138_v12 = vld [vmem:[%s35442_s22 + $0x14f0] sm:$0xff]  ;;  %v1915_v49 = vld [vmem:[%s35442_s22 + $0x2d38] sm:$0x3] }
 0x59b   : > { %v25405_v19 = vadd.f32 %v25404_v7, %v25335_v11  ;;  %v5034_v7 = vcombine.high %v5032_v59, %v5032_v59  ;;  %v1904_v11 = vld [vmem:[%s35442_s22 + $0x2ce0] sm:$0x3]  ;;  %v1906_v13 = vld [vmem:[%s35442_s22 + $0x2cf0] sm:$0x3] }
 0x59c   : > { %v34571_v28 = vpack.c.bf16 %v1906_v13, %v1138_v12 }
 0x59d   : > { %29113 = vmatmul.mubr.f32.vlgmr.msra.gmra.mrb[70].mxu0 %v4974_v45  ;;  %v5016_v45 = vcombine.high %v5008_v30, %v5008_v30 }
 0x59e   : > { %29183 = vmatmul.mubr.f32.vlgmr.msra.gmra.mrb[70].mxu1 %v4981_v50  ;;  %34544 = vmatpush1.bf16.xpose.msra.mxu0 %v34543_v17  ;;  %v1132_v50 = vld [vmem:[%s35442_s22 + $0x14c0] sm:$0xff]  ;;  %v1141_v17 = vld [vmem:[%s35442_s22 + $0x1508] sm:$0xff] }
 0x59f   : > { %34548 = vmatpush1.bf16.xpose.msra.mxu1 %v34547_v18  ;;  %29252 = vmatprep.mubr.f32.mxu0 %v4999_v20  ;;  %v34559_v2 = vpack.c.bf16 %v1900_v51, %v1132_v50  ;;  %v1909_v18 = vld [vmem:[%s35442_s22 + $0x2d08] sm:$0x3] }
 0x5a0   : > { %34550 = vmatprep.subr.bf16.mxu0 %v34549_v21  ;;  %v25474_v31 = vpop.f32.mrb[18].mxu0  ;;  %29322 = vmatprep.mubr.f32.mxu1 %v5000_v22  ;;  %v445_v50 = vld [vmem:[%s35435_s12 + $0x548] sm:$0xff] }
 0x5a1   : > { %v25544_v32 = vpop.f32.mrb[18].mxu1  ;;  %34554 = vmatprep.subr.bf16.mxu1 %v34553_v23  ;;  %v25475_v36 = vadd.f32 %v25474_v31, %v25405_v19  ;;  %v25476_v37 = vpop.f32.mrb[19].mxu0  ;;  %v5049_v19 = vrot.slane %v5035_v9, %v35466_v25  ;;  %v1143_v23 = vld [vmem:[%s35442_s22 + $0x1518] sm:$0xff]  ;;  %v34573_v31 = vpack.c.bf16 %v1909_v18, %v1141_v17  ;;  %v5069_v58 = vcombine.high %v445_v50, %v445_v50 }
 0x5a2   : > { %v25546_v38 = vpop.f32.mrb[19].mxu1  ;;  %v34577_v33 = vpack.c.bf16 %v1911_v24, %v1143_v23  ;;  %v1142_v37 = vld [vmem:[%s35442_s22 + $0x1510] sm:$0xff]  ;;  %v5076_v63 = vrot.slane %v445_v50, %v35466_v25  ;;  %v1919_v9 = vld [vmem:[%s35442_s22 + $0x2d58] sm:$0x3] }
 0x5a3   : > { %v25545_v44 = vadd.f32 %v25544_v32, %v25475_v36  ;;  %v5051_v32 = vcombine.high %v5049_v19, %v5049_v19  ;;  %v1908_v36 = vld [vmem:[%s35442_s22 + $0x2d00] sm:$0x3]  ;;  %v1910_v38 = vld [vmem:[%s35442_s22 + $0x2d10] sm:$0x3] }
 0x5a4   : > { %v34579_v52 = vpack.c.bf16 %v1910_v38, %v1142_v37 }
 0x5a5   : > { %29253 = vmatmul.mubr.f32.vlgmr.msra.gmra.mrb[72].mxu0 %v4991_v5  ;;  %v5033_v5 = vcombine.high %v5025_v54, %v5025_v54 }
 0x5a6   : > { %29323 = vmatmul.mubr.f32.vlgmr.msra.gmra.mrb[72].mxu1 %v4998_v10  ;;  %34552 = vmatpush1.bf16.xpose.msra.mxu0 %v34551_v42  ;;  %v1136_v10 = vld [vmem:[%s35442_s22 + $0x14e0] sm:$0xff]  ;;  %v1145_v42 = vld [vmem:[%s35442_s22 + $0x1528] sm:$0xff] }
 0x5a7   : > { %34556 = vmatpush1.bf16.xpose.msra.mxu1 %v34555_v43  ;;  %29392 = vmatprep.mubr.f32.mxu0 %v5016_v45  ;;  %v34567_v27 = vpack.c.bf16 %v1904_v11, %v1136_v10  ;;  %v1913_v43 = vld [vmem:[%s35442_s22 + $0x2d28] sm:$0x3]  ;;  %v446_v10 = vld [vmem:[%s35435_s12 + $0x550] sm:$0xff] }
 0x5a8   : > { %34558 = vmatprep.subr.bf16.mxu0 %v34557_v46  ;;  %v25614_v55 = vpop.f32.mrb[20].mxu0  ;;  %29462 = vmatprep.mubr.f32.mxu1 %v5017_v47  ;;  %v5086_v18 = vcombine.high %v446_v10, %v446_v10  ;;  %v5093_v23 = vrot.slane %v446_v10, %v35466_v25 }
 0x5a9   : > { %v25684_v56 = vpop.f32.mrb[20].mxu1  ;;  %34562 = vmatprep.subr.bf16.mxu1 %v34561_v48  ;;  %v25615_v60 = vadd.f32 %v25614_v55, %v25545_v44  ;;  %v25616_v61 = vpop.f32.mrb[21].mxu0  ;;  %v5066_v44 = vrot.slane %v5052_v34, %v35466_v25  ;;  %v1147_v48 = vld [vmem:[%s35442_s22 + $0x1538] sm:$0xff]  ;;  %v34581_v55 = vpack.c.bf16 %v1913_v43, %v1145_v42 }
 0x5aa   : > { %v25686_v62 = vpop.f32.mrb[21].mxu1  ;;  %v34585_v57 = vpack.c.bf16 %v1915_v49, %v1147_v48  ;;  %v1146_v61 = vld [vmem:[%s35442_s22 + $0x1530] sm:$0xff]  ;;  %v1923_v34 = vld [vmem:[%s35442_s22 + $0x2d78] sm:$0x3] }
 0x5ab   : > { %v25685_v4 = vadd.f32 %v25684_v56, %v25615_v60  ;;  %v5068_v56 = vcombine.high %v5066_v44, %v5066_v44  ;;  %v1912_v60 = vld [vmem:[%s35442_s22 + $0x2d20] sm:$0x3]  ;;  %v1914_v62 = vld [vmem:[%s35442_s22 + $0x2d30] sm:$0x3] }
 0x5ac   : > { %v34587_v12 = vpack.c.bf16 %v1914_v62, %v1146_v61 }
 0x5ad   : > { %29393 = vmatmul.mubr.f32.vlgmr.msra.gmra.mrb[74].mxu0 %v5008_v30  ;;  %v5050_v30 = vcombine.high %v5042_v14, %v5042_v14 }
 0x5ae   : > { %29463 = vmatmul.mubr.f32.vlgmr.msra.gmra.mrb[74].mxu1 %v5015_v35  ;;  %34560 = vmatpush1.bf16.xpose.msra.mxu0 %v34559_v2  ;;  %v1140_v35 = vld [vmem:[%s35442_s22 + $0x1500] sm:$0xff]  ;;  %v1149_v2 = vld [vmem:[%s35442_s22 + $0x1548] sm:$0xff] }
 0x5af   : > { %34564 = vmatpush1.bf16.xpose.msra.mxu1 %v34563_v3  ;;  %29532 = vmatprep.mubr.f32.mxu0 %v5033_v5  ;;  %v34575_v51 = vpack.c.bf16 %v1908_v36, %v1140_v35  ;;  %v1917_v3 = vld [vmem:[%s35442_s22 + $0x2d48] sm:$0x3]  ;;  %v447_v35 = vld [vmem:[%s35435_s12 + $0x558] sm:$0xff] }
 0x5b0   : > { %34566 = vmatprep.subr.bf16.mxu0 %v34565_v6  ;;  %v25754_v15 = vpop.f32.mrb[22].mxu0  ;;  %29602 = vmatprep.mubr.f32.mxu1 %v5034_v7  ;;  %v5103_v43 = vcombine.high %v447_v35, %v447_v35  ;;  %v5110_v48 = vrot.slane %v447_v35, %v35466_v25 }
 0x5b1   : > { %v25824_v16 = vpop.f32.mrb[22].mxu1  ;;  %34570 = vmatprep.subr.bf16.mxu1 %v34569_v8  ;;  %v25755_v20 = vadd.f32 %v25754_v15, %v25685_v4  ;;  %v25756_v21 = vpop.f32.mrb[23].mxu0  ;;  %v5083_v4 = vrot.slane %v5069_v58, %v35466_v25  ;;  %v1151_v8 = vld [vmem:[%s35442_s22 + $0x1558] sm:$0xff]  ;;  %v34589_v15 = vpack.c.bf16 %v1917_v3, %v1149_v2 }
 0x5b2   : > { %v25826_v22 = vpop.f32.mrb[23].mxu1  ;;  %v34593_v17 = vpack.c.bf16 %v1919_v9, %v1151_v8  ;;  %v1150_v21 = vld [vmem:[%s35442_s22 + $0x1550] sm:$0xff]  ;;  %v1927_v58 = vld [vmem:[%s35442_s22 + $0x2d98] sm:$0x3] }
 0x5b3   : > { %v25825_v29 = vadd.f32 %v25824_v16, %v25755_v20  ;;  %v5085_v16 = vcombine.high %v5083_v4, %v5083_v4  ;;  %v1916_v20 = vld [vmem:[%s35442_s22 + $0x2d40] sm:$0x3]  ;;  %v1918_v22 = vld [vmem:[%s35442_s22 + $0x2d50] sm:$0x3] }
 0x5b4   : > { %v34595_v37 = vpack.c.bf16 %v1918_v22, %v1150_v21 }
 0x5b5   : > { %29533 = vmatmul.mubr.f32.vlgmr.msra.gmra.mrb[76].mxu0 %v5025_v54  ;;  %v5067_v54 = vcombine.high %v5059_v39, %v5059_v39 }
 0x5b6   : > { %29603 = vmatmul.mubr.f32.vlgmr.msra.gmra.mrb[76].mxu1 %v5032_v59  ;;  %34568 = vmatpush1.bf16.xpose.msra.mxu0 %v34567_v27  ;;  %v1144_v59 = vld [vmem:[%s35442_s22 + $0x1520] sm:$0xff]  ;;  %v1153_v27 = vld [vmem:[%s35442_s22 + $0x1568] sm:$0xff] }
 0x5b7   : > { %34572 = vmatpush1.bf16.xpose.msra.mxu1 %v34571_v28  ;;  %29672 = vmatprep.mubr.f32.mxu0 %v5050_v30  ;;  %v34583_v11 = vpack.c.bf16 %v1912_v60, %v1144_v59  ;;  %v1921_v28 = vld [vmem:[%s35442_s22 + $0x2d68] sm:$0x3]  ;;  %v448_v59 = vld [vmem:[%s35435_s12 + $0x560] sm:$0xff] }
 0x5b8   : > { %34574 = vmatprep.subr.bf16.mxu0 %v34573_v31  ;;  %v25894_v40 = vpop.f32.mrb[24].mxu0  ;;  %29742 = vmatprep.mubr.f32.mxu1 %v5051_v32  ;;  %v5120_v3 = vcombine.high %v448_v59, %v448_v59  ;;  %v5127_v8 = vrot.slane %v448_v59, %v35466_v25 }
 0x5b9   : > { %v25964_v41 = vpop.f32.mrb[24].mxu1  ;;  %34578 = vmatprep.subr.bf16.mxu1 %v34577_v33  ;;  %v25895_v45 = vadd.f32 %v25894_v40, %v25825_v29  ;;  %v25896_v46 = vpop.f32.mrb[25].mxu0  ;;  %v5100_v29 = vrot.slane %v5086_v18, %v35466_v25  ;;  %v1155_v33 = vld [vmem:[%s35442_s22 + $0x1578] sm:$0xff]  ;;  %v34597_v40 = vpack.c.bf16 %v1921_v28, %v1153_v27 }
 0x5ba   : > { %v25966_v47 = vpop.f32.mrb[25].mxu1  ;;  %v34601_v42 = vpack.c.bf16 %v1923_v34, %v1155_v33  ;;  %v1154_v46 = vld [vmem:[%s35442_s22 + $0x1570] sm:$0xff]  ;;  %v1931_v18 = vld [vmem:[%s35442_s22 + $0x2db8] sm:$0x3] }
 0x5bb   : > { %v25965_v53 = vadd.f32 %v25964_v41, %v25895_v45  ;;  %v5102_v41 = vcombine.high %v5100_v29, %v5100_v29  ;;  %v1920_v45 = vld [vmem:[%s35442_s22 + $0x2d60] sm:$0x3]  ;;  %v1922_v47 = vld [vmem:[%s35442_s22 + $0x2d70] sm:$0x3] }
 0x5bc   : > { %v34603_v61 = vpack.c.bf16 %v1922_v47, %v1154_v46 }
 0x5bd   : > { %29673 = vmatmul.mubr.f32.vlgmr.msra.gmra.mrb[78].mxu0 %v5042_v14  ;;  %v5084_v14 = vcombine.high %v5076_v63, %v5076_v63 }
 0x5be   : > { %29743 = vmatmul.mubr.f32.vlgmr.msra.gmra.mrb[78].mxu1 %v5049_v19  ;;  %34576 = vmatpush1.bf16.xpose.msra.mxu0 %v34575_v51  ;;  %v1148_v19 = vld [vmem:[%s35442_s22 + $0x1540] sm:$0xff]  ;;  %v1157_v51 = vld [vmem:[%s35442_s22 + $0x1588] sm:$0xff] }
 0x5bf   : > { %34580 = vmatpush1.bf16.xpose.msra.mxu1 %v34579_v52  ;;  %29812 = vmatprep.mubr.f32.mxu0 %v5067_v54  ;;  %v34591_v36 = vpack.c.bf16 %v1916_v20, %v1148_v19  ;;  %v1925_v52 = vld [vmem:[%s35442_s22 + $0x2d88] sm:$0x3] }
 0x5c0   : > { %34582 = vmatprep.subr.bf16.mxu0 %v34581_v55  ;;  %v26034_v0 = vpop.f32.mrb[26].mxu0  ;;  %29882 = vmatprep.mubr.f32.mxu1 %v5068_v56  ;;  %v449_v19 = vld [vmem:[%s35435_s12 + $0x568] sm:$0xff] }
 0x5c1   : > { %v26104_v1 = vpop.f32.mrb[26].mxu1  ;;  %34586 = vmatprep.subr.bf16.mxu1 %v34585_v57  ;;  %v26035_v5 = vadd.f32 %v26034_v0, %v25965_v53  ;;  %v26036_v6 = vpop.f32.mrb[27].mxu0  ;;  %v5117_v53 = vrot.slane %v5103_v43, %v35466_v25  ;;  %v1159_v57 = vld [vmem:[%s35442_s22 + $0x1598] sm:$0xff]  ;;  %v34605_v0 = vpack.c.bf16 %v1925_v52, %v1157_v51  ;;  %v5137_v28 = vcombine.high %v449_v19, %v449_v19 }
 0x5c2   : > { %v26106_v7 = vpop.f32.mrb[27].mxu1  ;;  %v34609_v2 = vpack.c.bf16 %v1927_v58, %v1159_v57  ;;  %v1158_v6 = vld [vmem:[%s35442_s22 + $0x1590] sm:$0xff]  ;;  %v5144_v33 = vrot.slane %v449_v19, %v35466_v25  ;;  %v1935_v43 = vld [vmem:[%s35442_s22 + $0x2dd8] sm:$0x3] }
 0x5c3   : > { %v26105_v13 = vadd.f32 %v26104_v1, %v26035_v5  ;;  %v5119_v1 = vcombine.high %v5117_v53, %v5117_v53  ;;  %v1924_v5 = vld [vmem:[%s35442_s22 + $0x2d80] sm:$0x3]  ;;  %v1926_v7 = vld [vmem:[%s35442_s22 + $0x2d90] sm:$0x3] }
 0x5c4   : > { %v34611_v21 = vpack.c.bf16 %v1926_v7, %v1158_v6 }
 0x5c5   : > { %29813 = vmatmul.mubr.f32.vlgmr.msra.gmra.mrb[80].mxu0 %v5059_v39  ;;  %v5101_v39 = vcombine.high %v5093_v23, %v5093_v23 }
 0x5c6   : > { %29883 = vmatmul.mubr.f32.vlgmr.msra.gmra.mrb[80].mxu1 %v5066_v44  ;;  %34584 = vmatpush1.bf16.xpose.msra.mxu0 %v34583_v11  ;;  %v1152_v44 = vld [vmem:[%s35442_s22 + $0x1560] sm:$0xff]  ;;  %v1161_v11 = vld [vmem:[%s35442_s22 + $0x15a8] sm:$0xff] }
 0x5c7   : > { %34588 = vmatpush1.bf16.xpose.msra.mxu1 %v34587_v12  ;;  %29952 = vmatprep.mubr.f32.mxu0 %v5084_v14  ;;  %v34599_v60 = vpack.c.bf16 %v1920_v45, %v1152_v44  ;;  %v1929_v12 = vld [vmem:[%s35442_s22 + $0x2da8] sm:$0x3]  ;;  %v450_v44 = vld [vmem:[%s35435_s12 + $0x570] sm:$0xff] }
 0x5c8   : > { %34590 = vmatprep.subr.bf16.mxu0 %v34589_v15  ;;  %v26174_v24 = vpop.f32.mrb[28].mxu0  ;;  %30022 = vmatprep.mubr.f32.mxu1 %v5085_v16  ;;  %v5154_v52 = vcombine.high %v450_v44, %v450_v44  ;;  %v5161_v57 = vrot.slane %v450_v44, %v35466_v25 }
 0x5c9   : > { %v26244_v26 = vpop.f32.mrb[28].mxu1  ;;  %34594 = vmatprep.subr.bf16.mxu1 %v34593_v17  ;;  %v26175_v30 = vadd.f32 %v26174_v24, %v26105_v13  ;;  %v26176_v31 = vpop.f32.mrb[29].mxu0  ;;  %v5134_v13 = vrot.slane %v5120_v3, %v35466_v25  ;;  %v1163_v17 = vld [vmem:[%s35442_s22 + $0x15b8] sm:$0xff]  ;;  %v34613_v24 = vpack.c.bf16 %v1929_v12, %v1161_v11 }
 0x5ca   : > { %v26246_v32 = vpop.f32.mrb[29].mxu1  ;;  %v34617_v27 = vpack.c.bf16 %v1931_v18, %v1163_v17  ;;  %v1162_v31 = vld [vmem:[%s35442_s22 + $0x15b0] sm:$0xff]  ;;  %v1939_v3 = vld [vmem:[%s35442_s22 + $0x2df8] sm:$0x3] }
 0x5cb   : > { %v26245_v38 = vadd.f32 %v26244_v26, %v26175_v30  ;;  %v5136_v26 = vcombine.high %v5134_v13, %v5134_v13  ;;  %v1928_v30 = vld [vmem:[%s35442_s22 + $0x2da0] sm:$0x3]  ;;  %v1930_v32 = vld [vmem:[%s35442_s22 + $0x2db0] sm:$0x3] }
 0x5cc   : > { %v34619_v46 = vpack.c.bf16 %v1930_v32, %v1162_v31 }
 0x5cd   : > { %29953 = vmatmul.mubr.f32.vlgmr.msra.gmra.mrb[82].mxu0 %v5076_v63  ;;  %v5118_v63 = vcombine.high %v5110_v48, %v5110_v48 }
 0x5ce   : > { %30023 = vmatmul.mubr.f32.vlgmr.msra.gmra.mrb[82].mxu1 %v5083_v4  ;;  %34592 = vmatpush1.bf16.xpose.msra.mxu0 %v34591_v36  ;;  %v1156_v4 = vld [vmem:[%s35442_s22 + $0x1580] sm:$0xff]  ;;  %v1165_v36 = vld [vmem:[%s35442_s22 + $0x15c8] sm:$0xff] }
 0x5cf   : > { %34596 = vmatpush1.bf16.xpose.msra.mxu1 %v34595_v37  ;;  %30092 = vmatprep.mubr.f32.mxu0 %v5101_v39  ;;  %v34607_v20 = vpack.c.bf16 %v1924_v5, %v1156_v4  ;;  %v1933_v37 = vld [vmem:[%s35442_s22 + $0x2dc8] sm:$0x3]  ;;  %v451_v4 = vld [vmem:[%s35435_s12 + $0x578] sm:$0xff] }
 0x5d0   : > { %34598 = vmatprep.subr.bf16.mxu0 %v34597_v40  ;;  %v26314_v49 = vpop.f32.mrb[30].mxu0  ;;  %30162 = vmatprep.mubr.f32.mxu1 %v5102_v41  ;;  %v5171_v12 = vcombine.high %v451_v4, %v451_v4  ;;  %v5178_v17 = vrot.slane %v451_v4, %v35466_v25 }
 0x5d1   : > { %v26384_v50 = vpop.f32.mrb[30].mxu1  ;;  %34602 = vmatprep.subr.bf16.mxu1 %v34601_v42  ;;  %v26315_v54 = vadd.f32 %v26314_v49, %v26245_v38  ;;  %v26316_v55 = vpop.f32.mrb[31].mxu0  ;;  %v5151_v38 = vrot.slane %v5137_v28, %v35466_v25  ;;  %v1167_v42 = vld [vmem:[%s35442_s22 + $0x15d8] sm:$0xff]  ;;  %v34621_v49 = vpack.c.bf16 %v1933_v37, %v1165_v36 }
 0x5d2   : > { %v26386_v56 = vpop.f32.mrb[31].mxu1  ;;  %v34625_v51 = vpack.c.bf16 %v1935_v43, %v1167_v42  ;;  %v1166_v55 = vld [vmem:[%s35442_s22 + $0x15d0] sm:$0xff]  ;;  %v1943_v28 = vld [vmem:[%s35442_s22 + $0x2e18] sm:$0x3] }
 0x5d3   : > { %v26385_v62 = vadd.f32 %v26384_v50, %v26315_v54  ;;  %v5153_v50 = vcombine.high %v5151_v38, %v5151_v38  ;;  %v1932_v54 = vld [vmem:[%s35442_s22 + $0x2dc0] sm:$0x3]  ;;  %v1934_v56 = vld [vmem:[%s35442_s22 + $0x2dd0] sm:$0x3] }
 0x5d4   : > { %v34627_v6 = vpack.c.bf16 %v1934_v56, %v1166_v55 }
 0x5d5   : > { %30093 = vmatmul.mubr.f32.vlgmr.msra.gmra.mrb[84].mxu0 %v5093_v23  ;;  %v5135_v23 = vcombine.high %v5127_v8, %v5127_v8 }
 0x5d6   : > { %30163 = vmatmul.mubr.f32.vlgmr.msra.gmra.mrb[84].mxu1 %v5100_v29  ;;  %34600 = vmatpush1.bf16.xpose.msra.mxu0 %v34599_v60  ;;  %v1160_v29 = vld [vmem:[%s35442_s22 + $0x15a0] sm:$0xff]  ;;  %v1169_v60 = vld [vmem:[%s35442_s22 + $0x15e8] sm:$0xff] }
 0x5d7   : > { %34604 = vmatpush1.bf16.xpose.msra.mxu1 %v34603_v61  ;;  %30232 = vmatprep.mubr.f32.mxu0 %v5118_v63  ;;  %v34615_v45 = vpack.c.bf16 %v1928_v30, %v1160_v29  ;;  %v1937_v61 = vld [vmem:[%s35442_s22 + $0x2de8] sm:$0x3]  ;;  %v452_v29 = vld [vmem:[%s35435_s12 + $0x580] sm:$0xff] }
 0x5d8   : > { %34606 = vmatprep.subr.bf16.mxu0 %v34605_v0  ;;  %v26454_v9 = vpop.f32.mrb[32].mxu0  ;;  %30302 = vmatprep.mubr.f32.mxu1 %v5119_v1  ;;  %v5188_v37 = vcombine.high %v452_v29, %v452_v29  ;;  %v5195_v42 = vrot.slane %v452_v29, %v35466_v25 }
 0x5d9   : > { %v26524_v10 = vpop.f32.mrb[32].mxu1  ;;  %34610 = vmatprep.subr.bf16.mxu1 %v34609_v2  ;;  %v26455_v14 = vadd.f32 %v26454_v9, %v26385_v62  ;;  %v26456_v15 = vpop.f32.mrb[33].mxu0  ;;  %v5168_v62 = vrot.slane %v5154_v52, %v35466_v25  ;;  %v1171_v2 = vld [vmem:[%s35442_s22 + $0x15f8] sm:$0xff]  ;;  %v34629_v9 = vpack.c.bf16 %v1937_v61, %v1169_v60 }
 0x5da   : > { %v26526_v16 = vpop.f32.mrb[33].mxu1  ;;  %v34633_v11 = vpack.c.bf16 %v1939_v3, %v1171_v2  ;;  %v1170_v15 = vld [vmem:[%s35442_s22 + $0x15f0] sm:$0xff]  ;;  %v1947_v52 = vld [vmem:[%s35442_s22 + $0x2e38] sm:$0x3] }
 0x5db   : > { %v26525_v22 = vadd.f32 %v26524_v10, %v26455_v14  ;;  %v5170_v10 = vcombine.high %v5168_v62, %v5168_v62  ;;  %v1936_v14 = vld [vmem:[%s35442_s22 + $0x2de0] sm:$0x3]  ;;  %v1938_v16 = vld [vmem:[%s35442_s22 + $0x2df0] sm:$0x3] }
 0x5dc   : > { %v34635_v31 = vpack.c.bf16 %v1938_v16, %v1170_v15 }
 0x5dd   : > { %30233 = vmatmul.mubr.f32.vlgmr.msra.gmra.mrb[86].mxu0 %v5110_v48  ;;  %v5152_v48 = vcombine.high %v5144_v33, %v5144_v33 }
 0x5de   : > { %30303 = vmatmul.mubr.f32.vlgmr.msra.gmra.mrb[86].mxu1 %v5117_v53  ;;  %34608 = vmatpush1.bf16.xpose.msra.mxu0 %v34607_v20  ;;  %v1164_v53 = vld [vmem:[%s35442_s22 + $0x15c0] sm:$0xff]  ;;  %v1173_v20 = vld [vmem:[%s35442_s22 + $0x1608] sm:$0xff] }
 0x5df   : > { %34612 = vmatpush1.bf16.xpose.msra.mxu1 %v34611_v21  ;;  %30372 = vmatprep.mubr.f32.mxu0 %v5135_v23  ;;  %v34623_v5 = vpack.c.bf16 %v1932_v54, %v1164_v53  ;;  %v1941_v21 = vld [vmem:[%s35442_s22 + $0x2e08] sm:$0x3] }
 0x5e0   : > { %34614 = vmatprep.subr.bf16.mxu0 %v34613_v24  ;;  %v26594_v34 = vpop.f32.mrb[34].mxu0  ;;  %30442 = vmatprep.mubr.f32.mxu1 %v5136_v26  ;;  %v453_v53 = vld [vmem:[%s35435_s12 + $0x588] sm:$0xff] }
 0x5e1   : > { %v26664_v35 = vpop.f32.mrb[34].mxu1  ;;  %34618 = vmatprep.subr.bf16.mxu1 %v34617_v27  ;;  %v26595_v39 = vadd.f32 %v26594_v34, %v26525_v22  ;;  %v26596_v40 = vpop.f32.mrb[35].mxu0  ;;  %v5185_v22 = vrot.slane %v5171_v12, %v35466_v25  ;;  %v1175_v27 = vld [vmem:[%s35442_s22 + $0x1618] sm:$0xff]  ;;  %v34637_v34 = vpack.c.bf16 %v1941_v21, %v1173_v20  ;;  %v5205_v61 = vcombine.high %v453_v53, %v453_v53 }
 0x5e2   : > { %v26666_v41 = vpop.f32.mrb[35].mxu1  ;;  %v34641_v36 = vpack.c.bf16 %v1943_v28, %v1175_v27  ;;  %v1174_v40 = vld [vmem:[%s35442_s22 + $0x1610] sm:$0xff]  ;;  %v5212_v2 = vrot.slane %v453_v53, %v35466_v25  ;;  %v1951_v12 = vld [vmem:[%s35442_s22 + $0x2e58] sm:$0x3] }
 0x5e3   : > { %v26665_v47 = vadd.f32 %v26664_v35, %v26595_v39  ;;  %v5187_v35 = vcombine.high %v5185_v22, %v5185_v22  ;;  %v1940_v39 = vld [vmem:[%s35442_s22 + $0x2e00] sm:$0x3]  ;;  %v1942_v41 = vld [vmem:[%s35442_s22 + $0x2e10] sm:$0x3] }
 0x5e4   : > { %v34643_v55 = vpack.c.bf16 %v1942_v41, %v1174_v40 }
 0x5e5   : > { %30373 = vmatmul.mubr.f32.vlgmr.msra.gmra.mrb[88].mxu0 %v5127_v8  ;;  %v5169_v8 = vcombine.high %v5161_v57, %v5161_v57 }
 0x5e6   : > { %30443 = vmatmul.mubr.f32.vlgmr.msra.gmra.mrb[88].mxu1 %v5134_v13  ;;  %34616 = vmatpush1.bf16.xpose.msra.mxu0 %v34615_v45  ;;  %v1168_v13 = vld [vmem:[%s35442_s22 + $0x15e0] sm:$0xff]  ;;  %v1177_v45 = vld [vmem:[%s35442_s22 + $0x1628] sm:$0xff] }
 0x5e7   : > { %34620 = vmatpush1.bf16.xpose.msra.mxu1 %v34619_v46  ;;  %30512 = vmatprep.mubr.f32.mxu0 %v5152_v48  ;;  %v34631_v30 = vpack.c.bf16 %v1936_v14, %v1168_v13  ;;  %v1945_v46 = vld [vmem:[%s35442_s22 + $0x2e28] sm:$0x3]  ;;  %v454_v13 = vld [vmem:[%s35435_s12 + $0x590] sm:$0xff] }
 0x5e8   : > { %34622 = vmatprep.subr.bf16.mxu0 %v34621_v49  ;;  %v26734_v58 = vpop.f32.mrb[36].mxu0  ;;  %30582 = vmatprep.mubr.f32.mxu1 %v5153_v50  ;;  %v5222_v21 = vcombine.high %v454_v13, %v454_v13  ;;  %v5229_v27 = vrot.slane %v454_v13, %v35466_v25 }
 0x5e9   : > { %v26804_v59 = vpop.f32.mrb[36].mxu1  ;;  %34626 = vmatprep.subr.bf16.mxu1 %v34625_v51  ;;  %v26735_v63 = vadd.f32 %v26734_v58, %v26665_v47  ;;  %v26736_v0 = vpop.f32.mrb[37].mxu0  ;;  %v5202_v47 = vrot.slane %v5188_v37, %v35466_v25  ;;  %v1179_v51 = vld [vmem:[%s35442_s22 + $0x1638] sm:$0xff]  ;;  %v34645_v58 = vpack.c.bf16 %v1945_v46, %v1177_v45 }
 0x5ea   : > { %v26806_v1 = vpop.f32.mrb[37].mxu1  ;;  %v34649_v60 = vpack.c.bf16 %v1947_v52, %v1179_v51  ;;  %v1178_v0 = vld [vmem:[%s35442_s22 + $0x1630] sm:$0xff]  ;;  %v1955_v37 = vld [vmem:[%s35442_s22 + $0x2e78] sm:$0x3] }
 0x5eb   : > { %v26805_v7 = vadd.f32 %v26804_v59, %v26735_v63  ;;  %v5204_v59 = vcombine.high %v5202_v47, %v5202_v47  ;;  %v1944_v63 = vld [vmem:[%s35442_s22 + $0x2e20] sm:$0x3]  ;;  %v1946_v1 = vld [vmem:[%s35442_s22 + $0x2e30] sm:$0x3] }
 0x5ec   : > { %v34651_v15 = vpack.c.bf16 %v1946_v1, %v1178_v0 }
 0x5ed   : > { %30513 = vmatmul.mubr.f32.vlgmr.msra.gmra.mrb[90].mxu0 %v5144_v33  ;;  %v5186_v33 = vcombine.high %v5178_v17, %v5178_v17 }
 0x5ee   : > { %30583 = vmatmul.mubr.f32.vlgmr.msra.gmra.mrb[90].mxu1 %v5151_v38  ;;  %34624 = vmatpush1.bf16.xpose.msra.mxu0 %v34623_v5  ;;  %v1172_v38 = vld [vmem:[%s35442_s22 + $0x1600] sm:$0xff]  ;;  %v1181_v5 = vld [vmem:[%s35442_s22 + $0x1648] sm:$0xff] }
 0x5ef   : > { %34628 = vmatpush1.bf16.xpose.msra.mxu1 %v34627_v6  ;;  %30652 = vmatprep.mubr.f32.mxu0 %v5169_v8  ;;  %v34639_v54 = vpack.c.bf16 %v1940_v39, %v1172_v38  ;;  %v1949_v6 = vld [vmem:[%s35442_s22 + $0x2e48] sm:$0x3]  ;;  %v455_v38 = vld [vmem:[%s35435_s12 + $0x598] sm:$0xff] }
 0x5f0   : > { %34630 = vmatprep.subr.bf16.mxu0 %v34629_v9  ;;  %v26874_v18 = vpop.f32.mrb[38].mxu0  ;;  %30722 = vmatprep.mubr.f32.mxu1 %v5170_v10  ;;  %v5239_v46 = vcombine.high %v455_v38, %v455_v38  ;;  %v5246_v51 = vrot.slane %v455_v38, %v35466_v25 }
 0x5f1   : > { %v26944_v19 = vpop.f32.mrb[38].mxu1  ;;  %34634 = vmatprep.subr.bf16.mxu1 %v34633_v11  ;;  %v26875_v23 = vadd.f32 %v26874_v18, %v26805_v7  ;;  %v26876_v24 = vpop.f32.mrb[39].mxu0  ;;  %v5219_v7 = vrot.slane %v5205_v61, %v35466_v25  ;;  %v1183_v11 = vld [vmem:[%s35442_s22 + $0x1658] sm:$0xff]  ;;  %v34653_v18 = vpack.c.bf16 %v1949_v6, %v1181_v5 }
 0x5f2   : > { %v26946_v26 = vpop.f32.mrb[39].mxu1  ;;  %v34657_v20 = vpack.c.bf16 %v1951_v12, %v1183_v11  ;;  %v1182_v24 = vld [vmem:[%s35442_s22 + $0x1650] sm:$0xff]  ;;  %v1959_v61 = vld [vmem:[%s35442_s22 + $0x2e98] sm:$0x3] }
 0x5f3   : > { %v26945_v32 = vadd.f32 %v26944_v19, %v26875_v23  ;;  %v5221_v19 = vcombine.high %v5219_v7, %v5219_v7  ;;  %v1948_v23 = vld [vmem:[%s35442_s22 + $0x2e40] sm:$0x3]  ;;  %v1950_v26 = vld [vmem:[%s35442_s22 + $0x2e50] sm:$0x3] }
 0x5f4   : > { %v34659_v40 = vpack.c.bf16 %v1950_v26, %v1182_v24 }
 0x5f5   : > { %30653 = vmatmul.mubr.f32.vlgmr.msra.gmra.mrb[92].mxu0 %v5161_v57  ;;  %v5203_v57 = vcombine.high %v5195_v42, %v5195_v42 }
 0x5f6   : > { %30723 = vmatmul.mubr.f32.vlgmr.msra.gmra.mrb[92].mxu1 %v5168_v62  ;;  %34632 = vmatpush1.bf16.xpose.msra.mxu0 %v34631_v30  ;;  %v1176_v62 = vld [vmem:[%s35442_s22 + $0x1620] sm:$0xff]  ;;  %v1185_v30 = vld [vmem:[%s35442_s22 + $0x1668] sm:$0xff] }
 0x5f7   : > { %34636 = vmatpush1.bf16.xpose.msra.mxu1 %v34635_v31  ;;  %30792 = vmatprep.mubr.f32.mxu0 %v5186_v33  ;;  %v34647_v14 = vpack.c.bf16 %v1944_v63, %v1176_v62  ;;  %v1953_v31 = vld [vmem:[%s35442_s22 + $0x2e68] sm:$0x3]  ;;  %v456_v62 = vld [vmem:[%s35435_s12 + $0x5a0] sm:$0xff] }
 0x5f8   : > { %34638 = vmatprep.subr.bf16.mxu0 %v34637_v34  ;;  %v27014_v43 = vpop.f32.mrb[40].mxu0  ;;  %30862 = vmatprep.mubr.f32.mxu1 %v5187_v35  ;;  %v5256_v6 = vcombine.high %v456_v62, %v456_v62  ;;  %v5263_v11 = vrot.slane %v456_v62, %v35466_v25 }
 0x5f9   : > { %v27084_v44 = vpop.f32.mrb[40].mxu1  ;;  %34642 = vmatprep.subr.bf16.mxu1 %v34641_v36  ;;  %v27015_v48 = vadd.f32 %v27014_v43, %v26945_v32  ;;  %v27016_v49 = vpop.f32.mrb[41].mxu0  ;;  %v5236_v32 = vrot.slane %v5222_v21, %v35466_v25  ;;  %v1187_v36 = vld [vmem:[%s35442_s22 + $0x1678] sm:$0xff]  ;;  %v34661_v43 = vpack.c.bf16 %v1953_v31, %v1185_v30 }
 0x5fa   : > { %v27086_v50 = vpop.f32.mrb[41].mxu1  ;;  %v34665_v45 = vpack.c.bf16 %v1955_v37, %v1187_v36  ;;  %v1186_v49 = vld [vmem:[%s35442_s22 + $0x1670] sm:$0xff]  ;;  %v1963_v21 = vld [vmem:[%s35442_s22 + $0x2eb8] sm:$0x3] }
 0x5fb   : > { %v27085_v56 = vadd.f32 %v27084_v44, %v27015_v48  ;;  %v5238_v44 = vcombine.high %v5236_v32, %v5236_v32  ;;  %v1952_v48 = vld [vmem:[%s35442_s22 + $0x2e60] sm:$0x3]  ;;  %v1954_v50 = vld [vmem:[%s35442_s22 + $0x2e70] sm:$0x3] }
 0x5fc   : > { %v34667_v0 = vpack.c.bf16 %v1954_v50, %v1186_v49 }
 0x5fd   : > { %30793 = vmatmul.mubr.f32.vlgmr.msra.gmra.mrb[94].mxu0 %v5178_v17  ;;  %v5220_v17 = vcombine.high %v5212_v2, %v5212_v2 }
 0x5fe   : > { %30863 = vmatmul.mubr.f32.vlgmr.msra.gmra.mrb[94].mxu1 %v5185_v22  ;;  %34640 = vmatpush1.bf16.xpose.msra.mxu0 %v34639_v54  ;;  %v1180_v22 = vld [vmem:[%s35442_s22 + $0x1640] sm:$0xff]  ;;  %v1189_v54 = vld [vmem:[%s35442_s22 + $0x1688] sm:$0xff] }
 0x5ff   : > { %34644 = vmatpush1.bf16.xpose.msra.mxu1 %v34643_v55  ;;  %30932 = vmatprep.mubr.f32.mxu0 %v5203_v57  ;;  %v34655_v39 = vpack.c.bf16 %v1948_v23, %v1180_v22  ;;  %v1957_v55 = vld [vmem:[%s35442_s22 + $0x2e88] sm:$0x3] }
 0x600   : > { %34646 = vmatprep.subr.bf16.mxu0 %v34645_v58  ;;  %v27154_v3 = vpop.f32.mrb[42].mxu0  ;;  %31002 = vmatprep.mubr.f32.mxu1 %v5204_v59  ;;  %v457_v22 = vld [vmem:[%s35435_s12 + $0x5a8] sm:$0xff] }
 0x601   : > { %v27224_v4 = vpop.f32.mrb[42].mxu1  ;;  %34650 = vmatprep.subr.bf16.mxu1 %v34649_v60  ;;  %v27155_v8 = vadd.f32 %v27154_v3, %v27085_v56  ;;  %v27156_v9 = vpop.f32.mrb[43].mxu0  ;;  %v5253_v56 = vrot.slane %v5239_v46, %v35466_v25  ;;  %v1191_v60 = vld [vmem:[%s35442_s22 + $0x1698] sm:$0xff]  ;;  %v34669_v3 = vpack.c.bf16 %v1957_v55, %v1189_v54  ;;  %v5273_v31 = vcombine.high %v457_v22, %v457_v22 }
 0x602   : > { %v27226_v10 = vpop.f32.mrb[43].mxu1  ;;  %v34673_v5 = vpack.c.bf16 %v1959_v61, %v1191_v60  ;;  %v1190_v9 = vld [vmem:[%s35442_s22 + $0x1690] sm:$0xff]  ;;  %v5280_v36 = vrot.slane %v457_v22, %v35466_v25  ;;  %v1967_v46 = vld [vmem:[%s35442_s22 + $0x2ed8] sm:$0x3] }
 0x603   : > { %v27225_v16 = vadd.f32 %v27224_v4, %v27155_v8  ;;  %v5255_v4 = vcombine.high %v5253_v56, %v5253_v56  ;;  %v1956_v8 = vld [vmem:[%s35442_s22 + $0x2e80] sm:$0x3]  ;;  %v1958_v10 = vld [vmem:[%s35442_s22 + $0x2e90] sm:$0x3] }
 0x604   : > { %v34675_v24 = vpack.c.bf16 %v1958_v10, %v1190_v9 }
 0x605   : > { %30933 = vmatmul.mubr.f32.vlgmr.msra.gmra.mrb[96].mxu0 %v5195_v42  ;;  %v5237_v42 = vcombine.high %v5229_v27, %v5229_v27 }
 0x606   : > { %31003 = vmatmul.mubr.f32.vlgmr.msra.gmra.mrb[96].mxu1 %v5202_v47  ;;  %34648 = vmatpush1.bf16.xpose.msra.mxu0 %v34647_v14  ;;  %v1184_v47 = vld [vmem:[%s35442_s22 + $0x1660] sm:$0xff]  ;;  %v1193_v14 = vld [vmem:[%s35442_s22 + $0x16a8] sm:$0xff] }
 0x607   : > { %34652 = vmatpush1.bf16.xpose.msra.mxu1 %v34651_v15  ;;  %31072 = vmatprep.mubr.f32.mxu0 %v5220_v17  ;;  %v34663_v63 = vpack.c.bf16 %v1952_v48, %v1184_v47  ;;  %v1961_v15 = vld [vmem:[%s35442_s22 + $0x2ea8] sm:$0x3]  ;;  %v458_v47 = vld [vmem:[%s35435_s12 + $0x5b0] sm:$0xff] }
 0x608   : > { %34654 = vmatprep.subr.bf16.mxu0 %v34653_v18  ;;  %v27294_v28 = vpop.f32.mrb[44].mxu0  ;;  %31142 = vmatprep.mubr.f32.mxu1 %v5221_v19  ;;  %v5290_v55 = vcombine.high %v458_v47, %v458_v47  ;;  %v5297_v60 = vrot.slane %v458_v47, %v35466_v25 }
 0x609   : > { %v27364_v29 = vpop.f32.mrb[44].mxu1  ;;  %34658 = vmatprep.subr.bf16.mxu1 %v34657_v20  ;;  %v27295_v33 = vadd.f32 %v27294_v28, %v27225_v16  ;;  %v27296_v34 = vpop.f32.mrb[45].mxu0  ;;  %v5270_v16 = vrot.slane %v5256_v6, %v35466_v25  ;;  %v1195_v20 = vld [vmem:[%s35442_s22 + $0x16b8] sm:$0xff]  ;;  %v34677_v28 = vpack.c.bf16 %v1961_v15, %v1193_v14 }
 0x60a   : > { %v27366_v35 = vpop.f32.mrb[45].mxu1  ;;  %v34681_v30 = vpack.c.bf16 %v1963_v21, %v1195_v20  ;;  %v1194_v34 = vld [vmem:[%s35442_s22 + $0x16b0] sm:$0xff]  ;;  %v1971_v6 = vld [vmem:[%s35442_s22 + $0x2ef8] sm:$0x3] }
 0x60b   : > { %v27365_v41 = vadd.f32 %v27364_v29, %v27295_v33  ;;  %v5272_v29 = vcombine.high %v5270_v16, %v5270_v16  ;;  %v1960_v33 = vld [vmem:[%s35442_s22 + $0x2ea0] sm:$0x3]  ;;  %v1962_v35 = vld [vmem:[%s35442_s22 + $0x2eb0] sm:$0x3] }
 0x60c   : > { %v34683_v49 = vpack.c.bf16 %v1962_v35, %v1194_v34 }
 0x60d   : > { %31073 = vmatmul.mubr.f32.vlgmr.msra.gmra.mrb[98].mxu0 %v5212_v2  ;;  %v5254_v2 = vcombine.high %v5246_v51, %v5246_v51 }
 0x60e   : > { %31143 = vmatmul.mubr.f32.vlgmr.msra.gmra.mrb[98].mxu1 %v5219_v7  ;;  %34656 = vmatpush1.bf16.xpose.msra.mxu0 %v34655_v39  ;;  %v1188_v7 = vld [vmem:[%s35442_s22 + $0x1680] sm:$0xff]  ;;  %v1197_v39 = vld [vmem:[%s35442_s22 + $0x16c8] sm:$0xff] }
 0x60f   : > { %34660 = vmatpush1.bf16.xpose.msra.mxu1 %v34659_v40  ;;  %31212 = vmatprep.mubr.f32.mxu0 %v5237_v42  ;;  %v34671_v23 = vpack.c.bf16 %v1956_v8, %v1188_v7  ;;  %v1965_v40 = vld [vmem:[%s35442_s22 + $0x2ec8] sm:$0x3]  ;;  %v459_v7 = vld [vmem:[%s35435_s12 + $0x5b8] sm:$0xff] }
 0x610   : > { %34662 = vmatprep.subr.bf16.mxu0 %v34661_v43  ;;  %v27434_v52 = vpop.f32.mrb[46].mxu0  ;;  %31282 = vmatprep.mubr.f32.mxu1 %v5238_v44  ;;  %v5307_v15 = vcombine.high %v459_v7, %v459_v7  ;;  %v5314_v20 = vrot.slane %v459_v7, %v35466_v25 }
 0x611   : > { %v27504_v53 = vpop.f32.mrb[46].mxu1  ;;  %34666 = vmatprep.subr.bf16.mxu1 %v34665_v45  ;;  %v27435_v57 = vadd.f32 %v27434_v52, %v27365_v41  ;;  %v27436_v58 = vpop.f32.mrb[47].mxu0  ;;  %v5287_v41 = vrot.slane %v5273_v31, %v35466_v25  ;;  %v1199_v45 = vld [vmem:[%s35442_s22 + $0x16d8] sm:$0xff]  ;;  %v34685_v52 = vpack.c.bf16 %v1965_v40, %v1197_v39 }
 0x612   : > { %v27506_v59 = vpop.f32.mrb[47].mxu1  ;;  %v34689_v54 = vpack.c.bf16 %v1967_v46, %v1199_v45  ;;  %v1198_v58 = vld [vmem:[%s35442_s22 + $0x16d0] sm:$0xff]  ;;  %v1975_v31 = vld [vmem:[%s35442_s22 + $0x2f18] sm:$0x3] }
 0x613   : > { %v27505_v1 = vadd.f32 %v27504_v53, %v27435_v57  ;;  %v5289_v53 = vcombine.high %v5287_v41, %v5287_v41  ;;  %v1964_v57 = vld [vmem:[%s35442_s22 + $0x2ec0] sm:$0x3]  ;;  %v1966_v59 = vld [vmem:[%s35442_s22 + $0x2ed0] sm:$0x3] }
 0x614   : > { %v34691_v9 = vpack.c.bf16 %v1966_v59, %v1198_v58 }
 0x615   : > { %31213 = vmatmul.mubr.f32.vlgmr.msra.gmra.mrb[100].mxu0 %v5229_v27  ;;  %v5271_v27 = vcombine.high %v5263_v11, %v5263_v11 }
 0x616   : > { %31283 = vmatmul.mubr.f32.vlgmr.msra.gmra.mrb[100].mxu1 %v5236_v32  ;;  %34664 = vmatpush1.bf16.xpose.msra.mxu0 %v34663_v63  ;;  %v1192_v32 = vld [vmem:[%s35442_s22 + $0x16a0] sm:$0xff]  ;;  %v1201_v63 = vld [vmem:[%s35442_s22 + $0x16e8] sm:$0xff] }
 0x617   : > { %34668 = vmatpush1.bf16.xpose.msra.mxu1 %v34667_v0  ;;  %31352 = vmatprep.mubr.f32.mxu0 %v5254_v2  ;;  %v34679_v48 = vpack.c.bf16 %v1960_v33, %v1192_v32  ;;  %v1969_v0 = vld [vmem:[%s35442_s22 + $0x2ee8] sm:$0x3]  ;;  %v460_v32 = vld [vmem:[%s35435_s12 + $0x5c0] sm:$0xff] }
 0x618   : > { %34670 = vmatprep.subr.bf16.mxu0 %v34669_v3  ;;  %v27574_v12 = vpop.f32.mrb[48].mxu0  ;;  %31422 = vmatprep.mubr.f32.mxu1 %v5255_v4  ;;  %v5324_v40 = vcombine.high %v460_v32, %v460_v32  ;;  %v5331_v45 = vrot.slane %v460_v32, %v35466_v25 }
 0x619   : > { %v27644_v13 = vpop.f32.mrb[48].mxu1  ;;  %34674 = vmatprep.subr.bf16.mxu1 %v34673_v5  ;;  %v27575_v17 = vadd.f32 %v27574_v12, %v27505_v1  ;;  %v27576_v18 = vpop.f32.mrb[49].mxu0  ;;  %v5304_v1 = vrot.slane %v5290_v55, %v35466_v25  ;;  %v1203_v5 = vld [vmem:[%s35442_s22 + $0x16f8] sm:$0xff]  ;;  %v34693_v12 = vpack.c.bf16 %v1969_v0, %v1201_v63 }
 0x61a   : > { %v27646_v19 = vpop.f32.mrb[49].mxu1  ;;  %v34697_v14 = vpack.c.bf16 %v1971_v6, %v1203_v5  ;;  %v1202_v18 = vld [vmem:[%s35442_s22 + $0x16f0] sm:$0xff]  ;;  %v1979_v55 = vld [vmem:[%s35442_s22 + $0x2f38] sm:$0x3] }
 0x61b   : > { %v27645_v26 = vadd.f32 %v27644_v13, %v27575_v17  ;;  %v5306_v13 = vcombine.high %v5304_v1, %v5304_v1  ;;  %v1968_v17 = vld [vmem:[%s35442_s22 + $0x2ee0] sm:$0x3]  ;;  %v1970_v19 = vld [vmem:[%s35442_s22 + $0x2ef0] sm:$0x3] }
 0x61c   : > { %v34699_v34 = vpack.c.bf16 %v1970_v19, %v1202_v18 }
 0x61d   : > { %31353 = vmatmul.mubr.f32.vlgmr.msra.gmra.mrb[102].mxu0 %v5246_v51  ;;  %v5288_v51 = vcombine.high %v5280_v36, %v5280_v36 }
 0x61e   : > { %31423 = vmatmul.mubr.f32.vlgmr.msra.gmra.mrb[102].mxu1 %v5253_v56  ;;  %34672 = vmatpush1.bf16.xpose.msra.mxu0 %v34671_v23  ;;  %v1196_v56 = vld [vmem:[%s35442_s22 + $0x16c0] sm:$0xff]  ;;  %v1205_v23 = vld [vmem:[%s35442_s22 + $0x1708] sm:$0xff] }
 0x61f   : > { %34676 = vmatpush1.bf16.xpose.msra.mxu1 %v34675_v24  ;;  %31492 = vmatprep.mubr.f32.mxu0 %v5271_v27  ;;  %v34687_v8 = vpack.c.bf16 %v1964_v57, %v1196_v56  ;;  %v1973_v24 = vld [vmem:[%s35442_s22 + $0x2f08] sm:$0x3] }
 0x620   : > { %34678 = vmatprep.subr.bf16.mxu0 %v34677_v28  ;;  %v27714_v37 = vpop.f32.mrb[50].mxu0  ;;  %31562 = vmatprep.mubr.f32.mxu1 %v5272_v29  ;;  %v461_v56 = vld [vmem:[%s35435_s12 + $0x5c8] sm:$0xff] }
 0x621   : > { %v27784_v38 = vpop.f32.mrb[50].mxu1  ;;  %34682 = vmatprep.subr.bf16.mxu1 %v34681_v30  ;;  %v27715_v42 = vadd.f32 %v27714_v37, %v27645_v26  ;;  %v27716_v43 = vpop.f32.mrb[51].mxu0  ;;  %v5321_v26 = vrot.slane %v5307_v15, %v35466_v25  ;;  %v1207_v30 = vld [vmem:[%s35442_s22 + $0x1718] sm:$0xff]  ;;  %v34701_v37 = vpack.c.bf16 %v1973_v24, %v1205_v23  ;;  %v5341_v0 = vcombine.high %v461_v56, %v461_v56 }
 0x622   : > { %v27786_v44 = vpop.f32.mrb[51].mxu1  ;;  %v34705_v39 = vpack.c.bf16 %v1975_v31, %v1207_v30  ;;  %v1206_v43 = vld [vmem:[%s35442_s22 + $0x1710] sm:$0xff]  ;;  %v5348_v5 = vrot.slane %v461_v56, %v35466_v25  ;;  %v1983_v15 = vld [vmem:[%s35442_s22 + $0x2f58] sm:$0x3] }
 0x623   : > { %v27785_v50 = vadd.f32 %v27784_v38, %v27715_v42  ;;  %v5323_v38 = vcombine.high %v5321_v26, %v5321_v26  ;;  %v1972_v42 = vld [vmem:[%s35442_s22 + $0x2f00] sm:$0x3]  ;;  %v1974_v44 = vld [vmem:[%s35442_s22 + $0x2f10] sm:$0x3] }
 0x624   : > { %v34707_v58 = vpack.c.bf16 %v1974_v44, %v1206_v43 }
 0x625   : > { %31493 = vmatmul.mubr.f32.vlgmr.msra.gmra.mrb[104].mxu0 %v5263_v11  ;;  %v5305_v11 = vcombine.high %v5297_v60, %v5297_v60 }
 0x626   : > { %31563 = vmatmul.mubr.f32.vlgmr.msra.gmra.mrb[104].mxu1 %v5270_v16  ;;  %34680 = vmatpush1.bf16.xpose.msra.mxu0 %v34679_v48  ;;  %v1200_v16 = vld [vmem:[%s35442_s22 + $0x16e0] sm:$0xff]  ;;  %v1209_v48 = vld [vmem:[%s35442_s22 + $0x1728] sm:$0xff] }
 0x627   : > { %34684 = vmatpush1.bf16.xpose.msra.mxu1 %v34683_v49  ;;  %31632 = vmatprep.mubr.f32.mxu0 %v5288_v51  ;;  %v34695_v33 = vpack.c.bf16 %v1968_v17, %v1200_v16  ;;  %v1977_v49 = vld [vmem:[%s35442_s22 + $0x2f28] sm:$0x3]  ;;  %v462_v16 = vld [vmem:[%s35435_s12 + $0x5d0] sm:$0xff] }
 0x628   : > { %34686 = vmatprep.subr.bf16.mxu0 %v34685_v52  ;;  %v27854_v61 = vpop.f32.mrb[52].mxu0  ;;  %31702 = vmatprep.mubr.f32.mxu1 %v5289_v53  ;;  %v5358_v24 = vcombine.high %v462_v16, %v462_v16  ;;  %v5365_v30 = vrot.slane %v462_v16, %v35466_v25 }
 0x629   : > { %v27924_v62 = vpop.f32.mrb[52].mxu1  ;;  %34690 = vmatprep.subr.bf16.mxu1 %v34689_v54  ;;  %v27855_v2 = vadd.f32 %v27854_v61, %v27785_v50  ;;  %v27856_v3 = vpop.f32.mrb[53].mxu0  ;;  %v5338_v50 = vrot.slane %v5324_v40, %v35466_v25  ;;  %v1211_v54 = vld [vmem:[%s35442_s22 + $0x1738] sm:$0xff]  ;;  %v34709_v61 = vpack.c.bf16 %v1977_v49, %v1209_v48 }
 0x62a   : > { %v27926_v4 = vpop.f32.mrb[53].mxu1  ;;  %v34713_v63 = vpack.c.bf16 %v1979_v55, %v1211_v54  ;;  %v1210_v3 = vld [vmem:[%s35442_s22 + $0x1730] sm:$0xff]  ;;  %v1987_v40 = vld [vmem:[%s35442_s22 + $0x2f78] sm:$0x3] }
 0x62b   : > { %v27925_v10 = vadd.f32 %v27924_v62, %v27855_v2  ;;  %v5340_v62 = vcombine.high %v5338_v50, %v5338_v50  ;;  %v1976_v2 = vld [vmem:[%s35442_s22 + $0x2f20] sm:$0x3]  ;;  %v1978_v4 = vld [vmem:[%s35442_s22 + $0x2f30] sm:$0x3] }
 0x62c   : > { %v34715_v18 = vpack.c.bf16 %v1978_v4, %v1210_v3 }
 0x62d   : > { %31633 = vmatmul.mubr.f32.vlgmr.msra.gmra.mrb[106].mxu0 %v5280_v36  ;;  %v5322_v36 = vcombine.high %v5314_v20, %v5314_v20 }
 0x62e   : > { %31703 = vmatmul.mubr.f32.vlgmr.msra.gmra.mrb[106].mxu1 %v5287_v41  ;;  %34688 = vmatpush1.bf16.xpose.msra.mxu0 %v34687_v8  ;;  %v1204_v41 = vld [vmem:[%s35442_s22 + $0x1700] sm:$0xff]  ;;  %v1213_v8 = vld [vmem:[%s35442_s22 + $0x1748] sm:$0xff] }
 0x62f   : > { %34692 = vmatpush1.bf16.xpose.msra.mxu1 %v34691_v9  ;;  %31772 = vmatprep.mubr.f32.mxu0 %v5305_v11  ;;  %v34703_v57 = vpack.c.bf16 %v1972_v42, %v1204_v41  ;;  %v1981_v9 = vld [vmem:[%s35442_s22 + $0x2f48] sm:$0x3]  ;;  %v463_v41 = vld [vmem:[%s35435_s12 + $0x5d8] sm:$0xff] }
 0x630   : > { %34694 = vmatprep.subr.bf16.mxu0 %v34693_v12  ;;  %v27994_v21 = vpop.f32.mrb[54].mxu0  ;;  %31842 = vmatprep.mubr.f32.mxu1 %v5306_v13  ;;  %v5375_v49 = vcombine.high %v463_v41, %v463_v41  ;;  %v5382_v54 = vrot.slane %v463_v41, %v35466_v25 }
 0x631   : > { %v28064_v22 = vpop.f32.mrb[54].mxu1  ;;  %34698 = vmatprep.subr.bf16.mxu1 %v34697_v14  ;;  %v27995_v27 = vadd.f32 %v27994_v21, %v27925_v10  ;;  %v27996_v28 = vpop.f32.mrb[55].mxu0  ;;  %v5355_v10 = vrot.slane %v5341_v0, %v35466_v25  ;;  %v1215_v14 = vld [vmem:[%s35442_s22 + $0x1758] sm:$0xff]  ;;  %v34717_v21 = vpack.c.bf16 %v1981_v9, %v1213_v8 }
 0x632   : > { %v28066_v29 = vpop.f32.mrb[55].mxu1  ;;  %v34721_v23 = vpack.c.bf16 %v1983_v15, %v1215_v14  ;;  %v1214_v28 = vld [vmem:[%s35442_s22 + $0x1750] sm:$0xff]  ;;  %v1991_v0 = vld [vmem:[%s35442_s22 + $0x2f98] sm:$0x3] }
 0x633   : > { %v28065_v35 = vadd.f32 %v28064_v22, %v27995_v27  ;;  %v5357_v22 = vcombine.high %v5355_v10, %v5355_v10  ;;  %v1980_v27 = vld [vmem:[%s35442_s22 + $0x2f40] sm:$0x3]  ;;  %v1982_v29 = vld [vmem:[%s35442_s22 + $0x2f50] sm:$0x3] }
 0x634   : > { %v34723_v43 = vpack.c.bf16 %v1982_v29, %v1214_v28 }
 0x635   : > { %31773 = vmatmul.mubr.f32.vlgmr.msra.gmra.mrb[108].mxu0 %v5297_v60  ;;  %v5339_v60 = vcombine.high %v5331_v45, %v5331_v45 }
 0x636   : > { %31843 = vmatmul.mubr.f32.vlgmr.msra.gmra.mrb[108].mxu1 %v5304_v1  ;;  %34696 = vmatpush1.bf16.xpose.msra.mxu0 %v34695_v33  ;;  %v1208_v1 = vld [vmem:[%s35442_s22 + $0x1720] sm:$0xff]  ;;  %v1217_v33 = vld [vmem:[%s35442_s22 + $0x1768] sm:$0xff] }
 0x637   : > { %34700 = vmatpush1.bf16.xpose.msra.mxu1 %v34699_v34  ;;  %31912 = vmatprep.mubr.f32.mxu0 %v5322_v36  ;;  %v34711_v17 = vpack.c.bf16 %v1976_v2, %v1208_v1  ;;  %v1985_v34 = vld [vmem:[%s35442_s22 + $0x2f68] sm:$0x3]  ;;  %v464_v1 = vld [vmem:[%s35435_s12 + $0x5e0] sm:$0xff] }
 0x638   : > { %34702 = vmatprep.subr.bf16.mxu0 %v34701_v37  ;;  %v28134_v46 = vpop.f32.mrb[56].mxu0  ;;  %31982 = vmatprep.mubr.f32.mxu1 %v5323_v38  ;;  %v5392_v9 = vcombine.high %v464_v1, %v464_v1  ;;  %v5399_v14 = vrot.slane %v464_v1, %v35466_v25 }
 0x639   : > { %v28204_v47 = vpop.f32.mrb[56].mxu1  ;;  %34706 = vmatprep.subr.bf16.mxu1 %v34705_v39  ;;  %v28135_v51 = vadd.f32 %v28134_v46, %v28065_v35  ;;  %v28136_v52 = vpop.f32.mrb[57].mxu0  ;;  %v5372_v35 = vrot.slane %v5358_v24, %v35466_v25  ;;  %v1219_v39 = vld [vmem:[%s35442_s22 + $0x1778] sm:$0xff]  ;;  %v34725_v46 = vpack.c.bf16 %v1985_v34, %v1217_v33 }
 0x63a   : > { %v28206_v53 = vpop.f32.mrb[57].mxu1  ;;  %v34729_v48 = vpack.c.bf16 %v1987_v40, %v1219_v39  ;;  %v1218_v52 = vld [vmem:[%s35442_s22 + $0x1770] sm:$0xff]  ;;  %v1995_v24 = vld [vmem:[%s35442_s22 + $0x2fb8] sm:$0x3] }
 0x63b   : > { %v28205_v59 = vadd.f32 %v28204_v47, %v28135_v51  ;;  %v5374_v47 = vcombine.high %v5372_v35, %v5372_v35  ;;  %v1984_v51 = vld [vmem:[%s35442_s22 + $0x2f60] sm:$0x3]  ;;  %v1986_v53 = vld [vmem:[%s35442_s22 + $0x2f70] sm:$0x3] }
 0x63c   : > { %v34731_v3 = vpack.c.bf16 %v1986_v53, %v1218_v52 }
 0x63d   : > { %31913 = vmatmul.mubr.f32.vlgmr.msra.gmra.mrb[110].mxu0 %v5314_v20  ;;  %v5356_v20 = vcombine.high %v5348_v5, %v5348_v5 }
 0x63e   : > { %31983 = vmatmul.mubr.f32.vlgmr.msra.gmra.mrb[110].mxu1 %v5321_v26  ;;  %34704 = vmatpush1.bf16.xpose.msra.mxu0 %v34703_v57  ;;  %v1212_v26 = vld [vmem:[%s35442_s22 + $0x1740] sm:$0xff]  ;;  %v1221_v57 = vld [vmem:[%s35442_s22 + $0x1788] sm:$0xff] }
 0x63f   : > { %34708 = vmatpush1.bf16.xpose.msra.mxu1 %v34707_v58  ;;  %32052 = vmatprep.mubr.f32.mxu0 %v5339_v60  ;;  %v34719_v42 = vpack.c.bf16 %v1980_v27, %v1212_v26  ;;  %v1989_v58 = vld [vmem:[%s35442_s22 + $0x2f88] sm:$0x3] }
 0x640   : > { %34710 = vmatprep.subr.bf16.mxu0 %v34709_v61  ;;  %v28274_v6 = vpop.f32.mrb[58].mxu0  ;;  %32122 = vmatprep.mubr.f32.mxu1 %v5340_v62  ;;  %v465_v26 = vld [vmem:[%s35435_s12 + $0x5e8] sm:$0xff] }
 0x641   : > { %v28344_v7 = vpop.f32.mrb[58].mxu1  ;;  %34714 = vmatprep.subr.bf16.mxu1 %v34713_v63  ;;  %v28275_v11 = vadd.f32 %v28274_v6, %v28205_v59  ;;  %v28276_v12 = vpop.f32.mrb[59].mxu0  ;;  %v5389_v59 = vrot.slane %v5375_v49, %v35466_v25  ;;  %v1223_v63 = vld [vmem:[%s35442_s22 + $0x1798] sm:$0xff]  ;;  %v34733_v6 = vpack.c.bf16 %v1989_v58, %v1221_v57  ;;  %v5409_v34 = vcombine.high %v465_v26, %v465_v26 }
 0x642   : > { %v28346_v13 = vpop.f32.mrb[59].mxu1  ;;  %v34737_v8 = vpack.c.bf16 %v1991_v0, %v1223_v63  ;;  %v1222_v12 = vld [vmem:[%s35442_s22 + $0x1790] sm:$0xff]  ;;  %v5416_v39 = vrot.slane %v465_v26, %v35466_v25  ;;  %v1999_v49 = vld [vmem:[%s35442_s22 + $0x2fd8] sm:$0x3] }
 0x643   : > { %v28345_v19 = vadd.f32 %v28344_v7, %v28275_v11  ;;  %v5391_v7 = vcombine.high %v5389_v59, %v5389_v59  ;;  %v1988_v11 = vld [vmem:[%s35442_s22 + $0x2f80] sm:$0x3]  ;;  %v1990_v13 = vld [vmem:[%s35442_s22 + $0x2f90] sm:$0x3] }
 0x644   : > { %v34739_v28 = vpack.c.bf16 %v1990_v13, %v1222_v12 }
 0x645   : > { %32053 = vmatmul.mubr.f32.vlgmr.msra.gmra.mrb[112].mxu0 %v5331_v45  ;;  %v5373_v45 = vcombine.high %v5365_v30, %v5365_v30 }
 0x646   : > { %32123 = vmatmul.mubr.f32.vlgmr.msra.gmra.mrb[112].mxu1 %v5338_v50  ;;  %34712 = vmatpush1.bf16.xpose.msra.mxu0 %v34711_v17  ;;  %v1216_v50 = vld [vmem:[%s35442_s22 + $0x1760] sm:$0xff]  ;;  %v1225_v17 = vld [vmem:[%s35442_s22 + $0x17a8] sm:$0xff] }
 0x647   : > { %34716 = vmatpush1.bf16.xpose.msra.mxu1 %v34715_v18  ;;  %32192 = vmatprep.mubr.f32.mxu0 %v5356_v20  ;;  %v34727_v2 = vpack.c.bf16 %v1984_v51, %v1216_v50  ;;  %v1993_v18 = vld [vmem:[%s35442_s22 + $0x2fa8] sm:$0x3]  ;;  %v466_v50 = vld [vmem:[%s35435_s12 + $0x5f0] sm:$0xff] }
 0x648   : > { %34718 = vmatprep.subr.bf16.mxu0 %v34717_v21  ;;  %v28414_v31 = vpop.f32.mrb[60].mxu0  ;;  %32262 = vmatprep.mubr.f32.mxu1 %v5357_v22  ;;  %v5426_v58 = vcombine.high %v466_v50, %v466_v50  ;;  %v5433_v63 = vrot.slane %v466_v50, %v35466_v25 }
 0x649   : > { %v28484_v32 = vpop.f32.mrb[60].mxu1  ;;  %34722 = vmatprep.subr.bf16.mxu1 %v34721_v23  ;;  %v28415_v36 = vadd.f32 %v28414_v31, %v28345_v19  ;;  %v28416_v37 = vpop.f32.mrb[61].mxu0  ;;  %v5406_v19 = vrot.slane %v5392_v9, %v35466_v25  ;;  %v1227_v23 = vld [vmem:[%s35442_s22 + $0x17b8] sm:$0xff]  ;;  %v34741_v31 = vpack.c.bf16 %v1993_v18, %v1225_v17 }
 0x64a   : > { %v28486_v38 = vpop.f32.mrb[61].mxu1  ;;  %v34745_v33 = vpack.c.bf16 %v1995_v24, %v1227_v23  ;;  %v1226_v37 = vld [vmem:[%s35442_s22 + $0x17b0] sm:$0xff]  ;;  %v1235_v9 = vld [vmem:[%s35442_s22 + $0x17f8] sm:$0xff] }
 0x64b   : > { %v28485_v44 = vadd.f32 %v28484_v32, %v28415_v36  ;;  %v5408_v32 = vcombine.high %v5406_v19, %v5406_v19  ;;  %v1992_v36 = vld [vmem:[%s35442_s22 + $0x2fa0] sm:$0x3]  ;;  %v1994_v38 = vld [vmem:[%s35442_s22 + $0x2fb0] sm:$0x3] }
 0x64c   : > { %v34747_v52 = vpack.c.bf16 %v1994_v38, %v1226_v37 }
 0x64d   : > { %32193 = vmatmul.mubr.f32.vlgmr.msra.gmra.mrb[114].mxu0 %v5348_v5  ;;  %v5390_v5 = vcombine.high %v5382_v54, %v5382_v54 }
 0x64e   : > { %32263 = vmatmul.mubr.f32.vlgmr.msra.gmra.mrb[114].mxu1 %v5355_v10  ;;  %34720 = vmatpush1.bf16.xpose.msra.mxu0 %v34719_v42  ;;  %v1220_v10 = vld [vmem:[%s35442_s22 + $0x1780] sm:$0xff]  ;;  %v1229_v42 = vld [vmem:[%s35442_s22 + $0x17c8] sm:$0xff] }
 0x64f   : > { %34724 = vmatpush1.bf16.xpose.msra.mxu1 %v34723_v43  ;;  %32332 = vmatprep.mubr.f32.mxu0 %v5373_v45  ;;  %v34735_v27 = vpack.c.bf16 %v1988_v11, %v1220_v10  ;;  %v1997_v43 = vld [vmem:[%s35442_s22 + $0x2fc8] sm:$0x3]  ;;  %v2003_v10 = vld [vmem:[%s35442_s22 + $0x2ff8] sm:$0x3] }
 0x650   : > { %34726 = vmatprep.subr.bf16.mxu0 %v34725_v46  ;;  %v28554_v55 = vpop.f32.mrb[62].mxu0  ;;  %32402 = vmatprep.mubr.f32.mxu1 %v5374_v47  ;;  %v34761_v18 = vpack.c.bf16 %v2003_v10, %v1235_v9 }
 0x651   : > { %v28624_v56 = vpop.f32.mrb[62].mxu1  ;;  %34730 = vmatprep.subr.bf16.mxu1 %v34729_v48  ;;  %v28555_v60 = vadd.f32 %v28554_v55, %v28485_v44  ;;  %v28556_v61 = vpop.f32.mrb[63].mxu0  ;;  %v5423_v44 = vrot.slane %v5409_v34, %v35466_v25  ;;  %v1231_v48 = vld [vmem:[%s35442_s22 + $0x17d8] sm:$0xff]  ;;  %v34749_v55 = vpack.c.bf16 %v1997_v43, %v1229_v42 }
 0x652   : > { %v28626_v62 = vpop.f32.mrb[63].mxu1  ;;  %v34753_v57 = vpack.c.bf16 %v1999_v49, %v1231_v48  ;;  %v1230_v61 = vld [vmem:[%s35442_s22 + $0x17d0] sm:$0xff] }
 0x653   : > { %v28625_v4 = vadd.f32 %v28624_v56, %v28555_v60  ;;  %v5425_v56 = vcombine.high %v5423_v44, %v5423_v44  ;;  %v1996_v60 = vld [vmem:[%s35442_s22 + $0x2fc0] sm:$0x3]  ;;  %v1998_v62 = vld [vmem:[%s35442_s22 + $0x2fd0] sm:$0x3] }
 0x654   : > { %v34755_v12 = vpack.c.bf16 %v1998_v62, %v1230_v61 }
 0x655   : > { %32333 = vmatmul.mubr.f32.vlgmr.msra.gmra.mrb[116].mxu0 %v5365_v30  ;;  %v5407_v30 = vcombine.high %v5399_v14, %v5399_v14 }
 0x656   : > { %32403 = vmatmul.mubr.f32.vlgmr.msra.gmra.mrb[116].mxu1 %v5372_v35  ;;  %34728 = vmatpush1.bf16.xpose.msra.mxu0 %v34727_v2  ;;  %v1224_v35 = vld [vmem:[%s35442_s22 + $0x17a0] sm:$0xff]  ;;  %v1233_v2 = vld [vmem:[%s35442_s22 + $0x17e8] sm:$0xff] }
 0x657   : > { %34732 = vmatpush1.bf16.xpose.msra.mxu1 %v34731_v3  ;;  %32472 = vmatprep.mubr.f32.mxu0 %v5390_v5  ;;  %v34743_v51 = vpack.c.bf16 %v1992_v36, %v1224_v35  ;;  %v2001_v3 = vld [vmem:[%s35442_s22 + $0x2fe8] sm:$0x3]  ;;  %v467_v5 = vld [vmem:[%s35435_s12 + $0x5f8] sm:$0xff] }
 0x658   : > { %34734 = vmatprep.subr.bf16.mxu0 %v34733_v6  ;;  %v28694_v15 = vpop.f32.mrb[64].mxu0  ;;  %32542 = vmatprep.mubr.f32.mxu1 %v5391_v7  ;;  %v5450_v23 = vrot.slane %v467_v5, %v35466_v25 }
 0x659   : > { %v28764_v16 = vpop.f32.mrb[64].mxu1  ;;  %34738 = vmatprep.subr.bf16.mxu1 %v34737_v8  ;;  %v28695_v20 = vadd.f32 %v28694_v15, %v28625_v4  ;;  %v28696_v21 = vpop.f32.mrb[65].mxu0  ;;  %v5440_v4 = vrot.slane %v5426_v58, %v35466_v25  ;;  %v34757_v15 = vpack.c.bf16 %v2001_v3, %v1233_v2 }
 0x65a   : > { %v28766_v22 = vpop.f32.mrb[65].mxu1  ;;  %v1234_v21 = vld [vmem:[%s35442_s22 + $0x17f0] sm:$0xff]  ;;  %v5458_v34 = vcombine.high %v5450_v23, %v5450_v23 }
 0x65b   : > { %v28765_v29 = vadd.f32 %v28764_v16, %v28695_v20  ;;  %v5443_v16 = vcombine.high %v467_v5, %v467_v5  ;;  %v5442_v17 = vcombine.high %v5440_v4, %v5440_v4  ;;  %v2000_v20 = vld [vmem:[%s35442_s22 + $0x2fe0] sm:$0x3]  ;;  %v2002_v22 = vld [vmem:[%s35442_s22 + $0x2ff0] sm:$0x3] }
 0x65d   : > { %32473 = vmatmul.mubr.f32.vlgmr.msra.gmra.mrb[118].mxu0 %v5382_v54  ;;  %v5424_v54 = vcombine.high %v5416_v39, %v5416_v39  ;;  %v5457_v24 = vrot.slane %v5443_v16, %v35466_v25 }
 0x65e   : > { %32543 = vmatmul.mubr.f32.vlgmr.msra.gmra.mrb[118].mxu1 %v5389_v59  ;;  %34736 = vmatpush1.bf16.xpose.msra.mxu0 %v34735_v27  ;;  %v1228_v59 = vld [vmem:[%s35442_s22 + $0x17c0] sm:$0xff] }
 0x65f   : > { %34740 = vmatpush1.bf16.xpose.msra.mxu1 %v34739_v28  ;;  %32612 = vmatprep.mubr.f32.mxu0 %v5407_v30  ;;  %v34751_v11 = vpack.c.bf16 %v1996_v60, %v1228_v59  ;;  %v5459_v35 = vcombine.high %v5457_v24, %v5457_v24 }
 0x660   : > { %34742 = vmatprep.subr.bf16.mxu0 %v34741_v31  ;;  %v28834_v40 = vpop.f32.mrb[66].mxu0  ;;  %32682 = vmatprep.mubr.f32.mxu1 %v5408_v32  ;;  %v34763_v32 = vpack.c.bf16 %v2002_v22, %v1234_v21 }
 0x661   : > { %v28904_v41 = vpop.f32.mrb[66].mxu1  ;;  %34746 = vmatprep.subr.bf16.mxu1 %v34745_v33  ;;  %v28835_v45 = vadd.f32 %v28834_v40, %v28765_v29  ;;  %v28836_v46 = vpop.f32.mrb[67].mxu0 }
 0x662   : > { %v28906_v47 = vpop.f32.mrb[67].mxu1 }
 0x663   : > { %v28905_v53 = vadd.f32 %v28904_v41, %v28835_v45 }
 0x665   : > { %32613 = vmatmul.mubr.f32.vlgmr.msra.gmra.mrb[120].mxu0 %v5399_v14  ;;  %v5441_v14 = vcombine.high %v5433_v63, %v5433_v63 }
 0x666   : > { %32683 = vmatmul.mubr.f32.vlgmr.msra.gmra.mrb[120].mxu1 %v5406_v19  ;;  %34744 = vmatpush1.bf16.xpose.msra.mxu0 %v34743_v51  ;;  %v1232_v19 = vld [vmem:[%s35442_s22 + $0x17e0] sm:$0xff] }
 0x667   : > { %34748 = vmatpush1.bf16.xpose.msra.mxu1 %v34747_v52  ;;  %32752 = vmatprep.mubr.f32.mxu0 %v5424_v54  ;;  %v34759_v31 = vpack.c.bf16 %v2000_v20, %v1232_v19 }
 0x668   : > { %34750 = vmatprep.subr.bf16.mxu0 %v34749_v55  ;;  %v28974_v0 = vpop.f32.mrb[68].mxu0  ;;  %32822 = vmatprep.mubr.f32.mxu1 %v5425_v56 }
 0x669   : > { %v29044_v1 = vpop.f32.mrb[68].mxu1  ;;  %34754 = vmatprep.subr.bf16.mxu1 %v34753_v57  ;;  %v28975_v6 = vadd.f32 %v28974_v0, %v28905_v53  ;;  %v28976_v7 = vpop.f32.mrb[69].mxu0 }
 0x66a   : > { %v29046_v8 = vpop.f32.mrb[69].mxu1 }
 0x66b   : > { %v29045_v13 = vadd.f32 %v29044_v1, %v28975_v6 }
 0x66d   : > { %32753 = vmatmul.mubr.f32.vlgmr.msra.gmra.mrb[122].mxu0 %v5416_v39 }
 0x66e   : > { %32823 = vmatmul.mubr.f32.vlgmr.msra.gmra.mrb[122].mxu1 %v5423_v44  ;;  %34752 = vmatpush1.bf16.xpose.msra.mxu0 %v34751_v11 }
 0x66f   : > { %34756 = vmatpush1.bf16.xpose.msra.mxu1 %v34755_v12  ;;  %32892 = vmatprep.mubr.f32.mxu0 %v5441_v14 }
 0x670   : > { %34758 = vmatprep.subr.bf16.mxu0 %v34757_v15  ;;  %v29114_v26 = vpop.f32.mrb[70].mxu0  ;;  %32962 = vmatprep.mubr.f32.mxu1 %v5442_v17 }
 0x671   : > { %v29184_v27 = vpop.f32.mrb[70].mxu1  ;;  %34762 = vmatprep.subr.bf16.mxu1 %v34761_v18  ;;  %v29115_v28 = vadd.f32 %v29114_v26, %v29045_v13  ;;  %v29116_v29 = vpop.f32.mrb[71].mxu0 }
 0x672   : > { %v29186_v30 = vpop.f32.mrb[71].mxu1 }
 0x673   : > { %v29185_v33 = vadd.f32 %v29184_v27, %v29115_v28 }
 0x675   : > { %32893 = vmatmul.mubr.f32.vlgmr.msra.gmra.mrb[124].mxu0 %v5433_v63 }
 0x676   : > { %32963 = vmatmul.mubr.f32.vlgmr.msra.gmra.mrb[124].mxu1 %v5440_v4  ;;  %34760 = vmatpush1.bf16.xpose.msra.mxu0 %v34759_v31 }
 0x677   : > { %34764 = vmatpush1.bf16.xpose.msra.mxu1 %v34763_v32  ;;  %33032 = vmatprep.mubr.f32.mxu0 %v5458_v34 }
 0x678   : > { %33102 = vmatprep.mubr.f32.mxu1 %v5459_v35  ;;  %v29254_v36 = vpop.f32.mrb[72].mxu0 }
 0x679   : > { %v29324_v25 = vpop.f32.mrb[72].mxu1  ;;  %v29255_v37 = vadd.f32 %v29254_v36, %v29185_v33  ;;  %v29256_v38 = vpop.f32.mrb[73].mxu0 }
 0x67a   : > { %v29326_v39 = vpop.f32.mrb[73].mxu1 }
 0x67b   : > { %v29325_v40 = vadd.f32 %v29324_v25, %v29255_v37 }
 0x67d   : > { %33033 = vmatmul.mubr.f32.vlgmr.msra.gmra.mrb[126].mxu0 %v5450_v23 }
 0x67e   : > { %33103 = vmatmul.mubr.f32.vlgmr.msra.gmra.mrb[126].mxu1 %v5457_v24 }
 0x680   : > { %v29394_v41 = vpop.f32.mrb[74].mxu0 }
 0x681   : > { %v29464_v42 = vpop.f32.mrb[74].mxu1  ;;  %v29395_v43 = vadd.f32 %v29394_v41, %v29325_v40  ;;  %v29396_v44 = vpop.f32.mrb[75].mxu0 }
 0x682   : > { %v29466_v45 = vpop.f32.mrb[75].mxu1 }
 0x683   : > { %v29465_v46 = vadd.f32 %v29464_v42, %v29395_v43 }
 0x688   : > { %v29534_v47 = vpop.f32.mrb[76].mxu0 }
 0x689   : > { %v29604_v48 = vpop.f32.mrb[76].mxu1  ;;  %v29535_v49 = vadd.f32 %v29534_v47, %v29465_v46  ;;  %v29536_v50 = vpop.f32.mrb[77].mxu0 }
 0x68a   : > { %v29606_v51 = vpop.f32.mrb[77].mxu1 }
 0x68b   : > { %v29605_v52 = vadd.f32 %v29604_v48, %v29535_v49 }
 0x690   : > { %v29674_v53 = vpop.f32.mrb[78].mxu0 }
 0x691   : > { %v29744_v54 = vpop.f32.mrb[78].mxu1  ;;  %v29675_v55 = vadd.f32 %v29674_v53, %v29605_v52  ;;  %v29676_v56 = vpop.f32.mrb[79].mxu0 }
 0x692   : > { %v29746_v57 = vpop.f32.mrb[79].mxu1 }
 0x693   : > { %v29745_v58 = vadd.f32 %v29744_v54, %v29675_v55 }
 0x698   : > { %v29814_v59 = vpop.f32.mrb[80].mxu0 }
 0x699   : > { %v29884_v60 = vpop.f32.mrb[80].mxu1  ;;  %v29815_v61 = vadd.f32 %v29814_v59, %v29745_v58  ;;  %v29816_v62 = vpop.f32.mrb[81].mxu0 }
 0x69a   : > { %v29886_v63 = vpop.f32.mrb[81].mxu1 }
 0x69b   : > { %v29885_v0 = vadd.f32 %v29884_v60, %v29815_v61 }
 0x6a0   : > { %v29954_v1 = vpop.f32.mrb[82].mxu0 }
 0x6a1   : > { %v30024_v2 = vpop.f32.mrb[82].mxu1  ;;  %v29955_v3 = vadd.f32 %v29954_v1, %v29885_v0  ;;  %v29956_v4 = vpop.f32.mrb[83].mxu0 }
 0x6a2   : > { %v30026_v5 = vpop.f32.mrb[83].mxu1 }
 0x6a3   : > { %v30025_v6 = vadd.f32 %v30024_v2, %v29955_v3 }
 0x6a8   : > { %v30094_v7 = vpop.f32.mrb[84].mxu0 }
 0x6a9   : > { %v30164_v8 = vpop.f32.mrb[84].mxu1  ;;  %v30095_v9 = vadd.f32 %v30094_v7, %v30025_v6  ;;  %v30096_v10 = vpop.f32.mrb[85].mxu0 }
 0x6aa   : > { %v30166_v11 = vpop.f32.mrb[85].mxu1 }
 0x6ab   : > { %v30165_v12 = vadd.f32 %v30164_v8, %v30095_v9 }
 0x6b0   : > { %v30234_v13 = vpop.f32.mrb[86].mxu0 }
 0x6b1   : > { %v30304_v14 = vpop.f32.mrb[86].mxu1  ;;  %v30235_v15 = vadd.f32 %v30234_v13, %v30165_v12  ;;  %v30236_v16 = vpop.f32.mrb[87].mxu0 }
 0x6b2   : > { %v30306_v17 = vpop.f32.mrb[87].mxu1 }
 0x6b3   : > { %v30305_v18 = vadd.f32 %v30304_v14, %v30235_v15 }
 0x6b8   : > { %v30374_v19 = vpop.f32.mrb[88].mxu0 }
 0x6b9   : > { %v30444_v20 = vpop.f32.mrb[88].mxu1  ;;  %v30375_v21 = vadd.f32 %v30374_v19, %v30305_v18  ;;  %v30376_v22 = vpop.f32.mrb[89].mxu0 }
 0x6ba   : > { %v30446_v23 = vpop.f32.mrb[89].mxu1 }
 0x6bb   : > { %v30445_v24 = vadd.f32 %v30444_v20, %v30375_v21 }
 0x6c0   : > { %v30514_v26 = vpop.f32.mrb[90].mxu0 }
 0x6c1   : > { %v30584_v27 = vpop.f32.mrb[90].mxu1  ;;  %v30515_v28 = vadd.f32 %v30514_v26, %v30445_v24  ;;  %v30516_v29 = vpop.f32.mrb[91].mxu0 }
 0x6c2   : > { %v30586_v30 = vpop.f32.mrb[91].mxu1 }
 0x6c3   : > { %v30585_v31 = vadd.f32 %v30584_v27, %v30515_v28 }
 0x6c8   : > { %v30654_v32 = vpop.f32.mrb[92].mxu0 }
 0x6c9   : > { %v30724_v33 = vpop.f32.mrb[92].mxu1  ;;  %v30655_v34 = vadd.f32 %v30654_v32, %v30585_v31  ;;  %v30656_v35 = vpop.f32.mrb[93].mxu0 }
 0x6ca   : > { %v30726_v36 = vpop.f32.mrb[93].mxu1 }
 0x6cb   : > { %v30725_v25 = vadd.f32 %v30724_v33, %v30655_v34 }
 0x6d0   : > { %v30794_v37 = vpop.f32.mrb[94].mxu0 }
 0x6d1   : > { %v30864_v38 = vpop.f32.mrb[94].mxu1  ;;  %v30795_v39 = vadd.f32 %v30794_v37, %v30725_v25  ;;  %v30796_v40 = vpop.f32.mrb[95].mxu0 }
 0x6d2   : > { %v30866_v41 = vpop.f32.mrb[95].mxu1 }
 0x6d3   : > { %v30865_v42 = vadd.f32 %v30864_v38, %v30795_v39 }
 0x6d8   : > { %v30934_v43 = vpop.f32.mrb[96].mxu0 }
 0x6d9   : > { %v31004_v44 = vpop.f32.mrb[96].mxu1  ;;  %v30935_v45 = vadd.f32 %v30934_v43, %v30865_v42  ;;  %v30936_v46 = vpop.f32.mrb[97].mxu0 }
 0x6da   : > { %v31006_v47 = vpop.f32.mrb[97].mxu1 }
 0x6db   : > { %v31005_v48 = vadd.f32 %v31004_v44, %v30935_v45 }
 0x6e0   : > { %v31074_v49 = vpop.f32.mrb[98].mxu0 }
 0x6e1   : > { %v31144_v50 = vpop.f32.mrb[98].mxu1  ;;  %v31075_v51 = vadd.f32 %v31074_v49, %v31005_v48  ;;  %v31076_v52 = vpop.f32.mrb[99].mxu0 }
 0x6e2   : > { %v31146_v53 = vpop.f32.mrb[99].mxu1 }
 0x6e3   : > { %v31145_v54 = vadd.f32 %v31144_v50, %v31075_v51 }
 0x6e8   : > { %v31214_v55 = vpop.f32.mrb[100].mxu0 }
 0x6e9   : > { %v31284_v56 = vpop.f32.mrb[100].mxu1  ;;  %v31215_v57 = vadd.f32 %v31214_v55, %v31145_v54  ;;  %v31216_v58 = vpop.f32.mrb[101].mxu0 }
 0x6ea   : > { %v31286_v59 = vpop.f32.mrb[101].mxu1 }
 0x6eb   : > { %v31285_v60 = vadd.f32 %v31284_v56, %v31215_v57 }
 0x6f0   : > { %v31354_v61 = vpop.f32.mrb[102].mxu0 }
 0x6f1   : > { %v31424_v62 = vpop.f32.mrb[102].mxu1  ;;  %v31355_v63 = vadd.f32 %v31354_v61, %v31285_v60  ;;  %v31356_v0 = vpop.f32.mrb[103].mxu0 }
 0x6f2   : > { %v31426_v1 = vpop.f32.mrb[103].mxu1 }
 0x6f3   : > { %v31425_v2 = vadd.f32 %v31424_v62, %v31355_v63 }
 0x6f8   : > { %v31494_v3 = vpop.f32.mrb[104].mxu0 }
 0x6f9   : > { %v31564_v4 = vpop.f32.mrb[104].mxu1  ;;  %v31495_v5 = vadd.f32 %v31494_v3, %v31425_v2  ;;  %v31496_v6 = vpop.f32.mrb[105].mxu0 }
 0x6fa   : > { %v31566_v7 = vpop.f32.mrb[105].mxu1 }
 0x6fb   : > { %v31565_v8 = vadd.f32 %v31564_v4, %v31495_v5 }
 0x700   : > { %v31634_v9 = vpop.f32.mrb[106].mxu0 }
 0x701   : > { %v31704_v10 = vpop.f32.mrb[106].mxu1  ;;  %v31635_v11 = vadd.f32 %v31634_v9, %v31565_v8  ;;  %v31636_v12 = vpop.f32.mrb[107].mxu0 }
 0x702   : > { %v31706_v13 = vpop.f32.mrb[107].mxu1 }
 0x703   : > { %v31705_v14 = vadd.f32 %v31704_v10, %v31635_v11  ;;  %v275_v10 = vld [vmem:[#allocation8] sm:$0x3] }
 0x708   : > { %v31774_v15 = vpop.f32.mrb[108].mxu0 }
 0x709   : > { %v31844_v16 = vpop.f32.mrb[108].mxu1  ;;  %v31775_v17 = vadd.f32 %v31774_v15, %v31705_v14  ;;  %v31776_v18 = vpop.f32.mrb[109].mxu0 }
 0x70a   : > { %v31846_v19 = vpop.f32.mrb[109].mxu1 }
 0x70b   : > { %v31845_v20 = vadd.f32 %v31844_v16, %v31775_v17 }
 0x710   : > { %v31914_v21 = vpop.f32.mrb[110].mxu0 }
 0x711   : > { %v31984_v22 = vpop.f32.mrb[110].mxu1  ;;  %v31915_v23 = vadd.f32 %v31914_v21, %v31845_v20  ;;  %v31916_v24 = vpop.f32.mrb[111].mxu0 }
 0x712   : > { %v31986_v26 = vpop.f32.mrb[111].mxu1 }
 0x713   : > { %v31985_v27 = vadd.f32 %v31984_v22, %v31915_v23 }
 0x718   : > { %v32054_v28 = vpop.f32.mrb[112].mxu0 }
 0x719   : > { %v32124_v29 = vpop.f32.mrb[112].mxu1  ;;  %v32055_v30 = vadd.f32 %v32054_v28, %v31985_v27  ;;  %v32056_v31 = vpop.f32.mrb[113].mxu0 }
 0x71a   : > { %v32126_v32 = vpop.f32.mrb[113].mxu1 }
 0x71b   : > { %v32125_v33 = vadd.f32 %v32124_v29, %v32055_v30 }
 0x720   : > { %v32194_v34 = vpop.f32.mrb[114].mxu0 }
 0x721   : > { %v32264_v35 = vpop.f32.mrb[114].mxu1  ;;  %v32195_v36 = vadd.f32 %v32194_v34, %v32125_v33  ;;  %v32196_v25 = vpop.f32.mrb[115].mxu0 }
 0x722   : > { %v32266_v37 = vpop.f32.mrb[115].mxu1 }
 0x723   : > { %v32265_v38 = vadd.f32 %v32264_v35, %v32195_v36 }
 0x728   : > { %v32334_v39 = vpop.f32.mrb[116].mxu0 }
 0x729   : > { %v32404_v40 = vpop.f32.mrb[116].mxu1  ;;  %v32335_v41 = vadd.f32 %v32334_v39, %v32265_v38  ;;  %v32336_v42 = vpop.f32.mrb[117].mxu0 }
 0x72a   : > { %v32406_v43 = vpop.f32.mrb[117].mxu1 }
 0x72b   : > { %v32405_v44 = vadd.f32 %v32404_v40, %v32335_v41 }
 0x730   : > { %v32474_v45 = vpop.f32.mrb[118].mxu0 }
 0x731   : > { %v32544_v46 = vpop.f32.mrb[118].mxu1  ;;  %v32475_v47 = vadd.f32 %v32474_v45, %v32405_v44  ;;  %v32476_v48 = vpop.f32.mrb[119].mxu0 }
 0x732   : > { %v32546_v49 = vpop.f32.mrb[119].mxu1 }
 0x733   : > { %v32545_v50 = vadd.f32 %v32544_v46, %v32475_v47 }
 0x738   : > { %v32614_v51 = vpop.f32.mrb[120].mxu0 }
 0x739   : > { %v32684_v52 = vpop.f32.mrb[120].mxu1  ;;  %v32615_v53 = vadd.f32 %v32614_v51, %v32545_v50  ;;  %v32616_v54 = vpop.f32.mrb[121].mxu0 }
 0x73a   : > { %v32686_v55 = vpop.f32.mrb[121].mxu1 }
 0x73b   : > { %v32685_v56 = vadd.f32 %v32684_v52, %v32615_v53 }
 0x740   : > { %v32754_v57 = vpop.f32.mrb[122].mxu0 }
 0x741   : > { %v32824_v58 = vpop.f32.mrb[122].mxu1  ;;  %v32755_v59 = vadd.f32 %v32754_v57, %v32685_v56  ;;  %v32756_v60 = vpop.f32.mrb[123].mxu0 }
 0x742   : > { %v32826_v61 = vpop.f32.mrb[123].mxu1 }
 0x743   : > { %v32825_v62 = vadd.f32 %v32824_v58, %v32755_v59 }
 0x748   : > { %v32894_v63 = vpop.f32.mrb[124].mxu0 }
 0x749   : > { %v32964_v0 = vpop.f32.mrb[124].mxu1  ;;  %v32895_v1 = vadd.f32 %v32894_v63, %v32825_v62  ;;  %v32896_v2 = vpop.f32.mrb[125].mxu0 }
 0x74a   : > { %v32966_v3 = vpop.f32.mrb[125].mxu1 }
 0x74b   : > { %v32965_v4 = vadd.f32 %v32964_v0, %v32895_v1 }
 0x750   : > { %v33034_v5 = vpop.f32.mrb[126].mxu0 }
 0x751   : > { %v33104_v6 = vpop.f32.mrb[126].mxu1  ;;  %v33035_v7 = vadd.f32 %v33034_v5, %v32965_v4  ;;  %v33036_v8 = vpop.f32.mrb[127].mxu0 }
 0x752   : > { %v33106_v9 = vpop.f32.mrb[127].mxu1 }
 0x753   : > { %v33105_v11 = vadd.f32 %v33104_v6, %v33035_v7 }
 0x755   : > { %v33108_v12 = vadd.f32 %v33105_v11, %v275_v10 }
 0x757   : > { %33110 = vst.msk [vmem:[#allocation8] sm:$0x3] %vm33109_vm1, %v33108_v12 }
 0x758   : > { %35144 = shalt.err (!%p35141_p8)
}
 0x759   : > { %s35145_s7 = scalar_lea.hbm %s37611_s3, 32 }
 0x75a   : > { %p35146_p2 = scmp.ne.s32.totalorder %s37611_s3, %s35145_s7  ;;  %p35151_p10 = scmp.lt.u32.totalorder %s35145_s7, %s37611_s3 }
 0x75c   : > { %p35147_p12 = pnand %p35146_p2, %p34795_p9 }
 0x75e   : > { %p35148_p7 = pneg %p35147_p12 }
 0x760   : > { %p35153_p5 = pnand %p35151_p10, %p35148_p7 }
 0x762   : > { %35156 = shalt.err (!%p35153_p5)
}
 0x763   : > { %34778 = dma.vmem_to_hbm [thread:$0]  (%p34795_p9), %s33119_s20, 32, %s37611_s3, [#allocation4]  }
 0x764   : > { %35194 = dma.done.wait (%p34795_p9), [#allocation4], 32  }
 0x765   : > { %35196 = vsyncadd (%p34795_p9), [#allocation4], 4294967264 }
 0x766 PF: > { %s20_s17 = sadd.s32 1, %s35219_s17   ;;  %s37628_s12 = smov %s35203_s13 }
 0x767   : > { %p17_p6 = scmp.ge.s32.totalorder %s20_s17, 4   ;;  %s37629_s13 = smov %s35207_s14 }
 0x768   : > { %s37630_s14 = smov %s35362_s26  ;;  %s37631_s15 = smov %s35215_s16 }
 0x769   : > { %s37632_s16 = smov %s37634_s25  ;;  %19 = sbr.rel (!%p17_p6) target bundleno = 7 (0x7), region = 90 }
 0x770   :  { %33131 = vsyncpa [#allocation3], 1 }
 0x771   :  { %33133 = vsyncpa [#allocation3 + $0x1], 1 }
 0x772   :  { %33134 = vsyncpa [#allocation6], 1 }
 0x773   :  { %33136 = vsyncpa [#allocation6 + $0x1], 1 }
 0x774   :  { %33137 = vsyncpa [#allocation4], 1 }
 0x775   :  { %33139 = vsyncpa [#allocation4 + $0x1], 1 }

</bundles_post_ra>
